<compile_context>
chip_gen: v6e
topology: v6e:2x2x1
jax: 0.10.0
libtpu: 0.0.40
codegen_flags: <defaults>
</compile_context>

<pallas_src>
import math

import jax
import jax.numpy as jnp
import numpy as np
from jax.experimental import pallas as pl
from jax.experimental.pallas import tpu as pltpu

BERT_H = 768      # BertModel hidden size
WAV_C = 512       # wav2vec feature channels
LABEL_SIZE = 16   # label_size (small, synthetic)

LANE = 128
SUBLANE = 8
NEG_BIG = -1e30            # f32 fill for lane-padded logit columns (exp -> 0)
VMEM_LIMIT = 48 << 20      # > v5e's 16 MiB scoped default, < v7x's 64 MiB physical


def _round_up(x, m):
    return (x + m - 1) // m * m


# ----------------------------------------------------------------------------
# Kernel 1: fused [per-segment unbiased variance over time -> padded output].
# One pallas_call covers every sentence:
#   grid = (B, n_tiles); each step reads a (seg_tile, T, C) block of segments
#   (sentence start offsets are scalar-prefetched, block-aligned) and writes a
#   sublane-dense (seg_tile, C) slab of the padded (B, S_pad, C) output.
#   Rows >= the sentence's true segment count are masked to zero (the padding
#   torch writes with torch.zeros).
# ----------------------------------------------------------------------------
def _var_pad_kernel(tab_ref, len_ref, feat_ref, out_ref):
    bi = pl.program_id(0)
    jt = pl.program_id(1)
    x = feat_ref[...].astype(jnp.float32)                 # (ST, T, C)
    st, t, _ = x.shape
    # single-pass unbiased variance over time (f32 accumulation):
    #   var = (sum(x^2) - sum(x)^2 / T) / (T - 1)
    s1 = jnp.sum(x, axis=1)                               # (ST, C)
    s2 = jnp.sum(x * x, axis=1)                           # (ST, C)
    var = (s2 - s1 * s1 * (1.0 / t)) * (1.0 / (t - 1))
    row = jt * st + jax.lax.broadcasted_iota(jnp.int32, (st, 1), 0)
    mask = (row < len_ref[bi]).astype(var.dtype)          # zero the padding rows
    out_ref[0] = (var * mask).astype(out_ref.dtype)


def audio_variance_padded(audio_feature_list, *, min_out_len=0, seg_tile=32,
                          stream_dtype=jnp.float32, out_dtype=jnp.float32,
                          vmem_block_budget=8 << 20):
    """[(n_b, T, C)] -> (B, S_pad, C) in out_dtype, S_pad = round_up(max_len).

    Row j of sentence b equals torch.var(feats_b[j], dim=0, unbiased=True) for
    j < n_b and 0 otherwise (the zero padding of the original module)."""
    b = len(audio_feature_list)
    assert b >= 1
    t = int(audio_feature_list[0].shape[1])
    c = int(audio_feature_list[0].shape[2])
    assert t > 1, "unbiased variance (ddof=1) needs at least 2 time frames"
    lengths = [int(f.shape[0]) for f in audio_feature_list]
    assert min(lengths) >= 1
    max_len = max(max(lengths), int(min_out_len))

    # Segment tile: big enough to amortize the ~0.35us/step pipeline overhead,
    # clamped by a per-block VMEM budget (double-buffered) and the input size.
    itemsize = jnp.dtype(stream_dtype).itemsize
    fit = max(SUBLANE, vmem_block_budget // (2 * t * c * itemsize))
    seg_tile = int(min(seg_tile, fit, _round_up(max_len, SUBLANE)))
    seg_tile = max(SUBLANE, seg_tile // SUBLANE * SUBLANE)

    n_tiles = pl.cdiv(max_len, seg_tile)
    s_pad = n_tiles * seg_tile

    # Concatenate all segments; each sentence is zero-padded up to a multiple
    # of seg_tile so its start offset is block-aligned.  The cast to the
    # streaming dtype (bf16) fuses into the concat copy — no extra HBM pass.
    parts, off_blk, cur = [], [], 0
    for f, n in zip(audio_feature_list, lengths):
        pad_n = _round_up(n, seg_tile)
        off_blk.append(cur // seg_tile)
        parts.append(f.astype(stream_dtype))
        if pad_n > n:
            parts.append(jnp.zeros((pad_n - n, t, c), stream_dtype))
        cur += pad_n
    feats_cat = jnp.concatenate(parts, axis=0)            # (sum pad_n, T, C)

    # Per-(sentence, tile) source block table, clamped PER SENTENCE: tiles past
    # a short sentence keep its own last block index, so consecutive grid steps
    # see an unchanged block index and Pallas skips the re-DMA; the in-kernel
    # mask zeroes those rows anyway.
    tab = np.empty((b, n_tiles), np.int32)
    for bi, (off, n) in enumerate(zip(off_blk, lengths)):
        nblk = -(-n // seg_tile)
        for jt in range(n_tiles):
            tab[bi, jt] = off + min(jt, nblk - 1)
    tab = jnp.asarray(tab.reshape(-1))                    # 1-D -> cheap in SMEM
    lens = jnp.asarray(np.asarray(lengths, np.int32))

    def feat_map(bi, jt, tab_ref, len_ref):
        return (tab_ref[bi * n_tiles + jt], 0, 0)

    def out_map(bi, jt, tab_ref, len_ref):
        return (bi, jt, 0)

    out = pl.pallas_call(
        _var_pad_kernel,
        out_shape=jax.ShapeDtypeStruct((b, s_pad, c), out_dtype),
        grid_spec=pltpu.PrefetchScalarGridSpec(
            num_scalar_prefetch=2,
            grid=(b, n_tiles),
            in_specs=[pl.BlockSpec((seg_tile, t, c), feat_map)],
            out_specs=pl.BlockSpec((1, seg_tile, c), out_map),
        ),
        compiler_params=pltpu.CompilerParams(
            dimension_semantics=("parallel", "parallel"),
            vmem_limit_bytes=VMEM_LIMIT),
    )(tab, lens, feats_cat)
    return out


# ----------------------------------------------------------------------------
# Kernel 2: fused [concat -> Linear(1280, L) -> log_softmax].
# concat([x, y], -1) @ W == x @ W[:768] + y @ W[768:], so the weight is split
# and both matmuls + bias + log_softmax are fused in one kernel.  The label
# dim is lane-padded to 128 (zero weight columns, NEG_BIG f32 bias) so the
# output store is lane-dense; padded columns vanish under exp() and are sliced
# away.  All math is f32 in-kernel; operands/output stream in bf16 by default.
# ----------------------------------------------------------------------------
def _head_kernel(xb_ref, ya_ref, wb_ref, wa_ref, b_ref, out_ref):
    logits = (
        jnp.dot(xb_ref[...], wb_ref[...], preferred_element_type=jnp.float32)
        + jnp.dot(ya_ref[...], wa_ref[...], preferred_element_type=jnp.float32)
        + b_ref[...]                                      # (1, Lp) f32 broadcast
    )
    m = jnp.max(logits, axis=-1, keepdims=True)
    lse = jnp.log(jnp.sum(jnp.exp(logits - m), axis=-1, keepdims=True)) + m
    out_ref[...] = (logits - lse).astype(out_ref.dtype)


def punc_head(x_bert, y_audio, weight, bias, *, tm=2048, out_dtype=None):
    """x_bert: (B,S,768), y_audio: (B,S,512), weight: (1280,L), bias: (L,)."""
    b, s, hb = x_bert.shape
    hw = y_audio.shape[-1]
    l = weight.shape[1]
    rows = b * s
    assert rows % SUBLANE == 0, "pad the sequence dim to a multiple of 8 upstream"
    out_dtype = out_dtype or x_bert.dtype

    xb = x_bert.reshape(rows, hb)            # free reshapes; no pad/astype copies
    ya = y_audio.reshape(rows, hw)
    wb = weight[:hb].astype(xb.dtype)        # tiny (768, L)
    wa = weight[hb:].astype(ya.dtype)        # tiny (512, L)

    l_pad = _round_up(max(l, LANE), LANE)    # lane-dense output store
    if l_pad > l:
        wb = jnp.pad(wb, ((0, 0), (0, l_pad - l)))
        wa = jnp.pad(wa, ((0, 0), (0, l_pad - l)))
        b2 = jnp.pad(bias, (0, l_pad - l), constant_values=NEG_BIG)
    else:
        b2 = bias
    b2 = b2.reshape(1, l_pad).astype(jnp.float32)   # bias stays f32 (NEG_BIG!)

    tm_eff = min(_round_up(tm, SUBLANE), rows)
    if rows > SUBLANE and pl.cdiv(rows, tm_eff) < 2:
        # keep >= 2 grid steps so v7x can shard the row axis across its 2 TCs
        tm_eff = _round_up(pl.cdiv(rows, 2), SUBLANE)

    out = pl.pallas_call(
        _head_kernel,
        out_shape=jax.ShapeDtypeStruct((rows, l_pad), out_dtype),
        grid=(pl.cdiv(rows, tm_eff),),
        in_specs=[
            pl.BlockSpec((tm_eff, hb), lambda i: (i, 0)),
            pl.BlockSpec((tm_eff, hw), lambda i: (i, 0)),
            pl.BlockSpec((hb, l_pad), lambda i: (0, 0)),
            pl.BlockSpec((hw, l_pad), lambda i: (0, 0)),
            pl.BlockSpec((1, l_pad), lambda i: (0, 0)),
        ],
        out_specs=pl.BlockSpec((tm_eff, l_pad), lambda i: (i, 0)),
        compiler_params=pltpu.CompilerParams(
            dimension_semantics=("parallel",),
            vmem_limit_bytes=VMEM_LIMIT),
    )(xb, ya, wb, wa, b2)
    return out[:, :l].reshape(b, s, l)


# ----------------------------------------------------------------------------
# Full forward (glue in plain JAX, hot paths in the kernels above).
# ----------------------------------------------------------------------------
def punc_forward(audio_feature_list, sentences, embed_table, weight, bias,
                 *, use_bf16=True):
    b, s = sentences.shape
    # bf16 operand streaming halves HBM traffic on every generation (v5e has
    # the lowest bandwidth so it benefits most); matmul / variance accumulation
    # and the log-softmax stay f32 inside the kernels.
    act_dtype = jnp.bfloat16 if use_bf16 else jnp.float32

    # TODO(synk): wav2vec.feature_extractor / feature_aggregator (pretrained
    # checkpoint) — their outputs are the synthetic `audio_feature_list`.
    # Variance pooling + zero-padding fused into one Pallas call; the padded
    # (B, S_pad, 512) tensor is emitted directly in the head's streaming dtype.
    y = audio_variance_padded(audio_feature_list, min_out_len=s,
                              stream_dtype=act_dtype, out_dtype=act_dtype)
    s_pad = y.shape[1]

    # Pad the tiny int32 token ids (not the big activation tensor) so the
    # embedding gather below emits the padded activation directly in act_dtype.
    sent_pad = sentences if s_pad == s else jnp.pad(
        sentences, ((0, 0), (0, s_pad - s)))

    # attention_mask = torch.sign(sentences)
    attention_mask = jnp.sign(sent_pad).astype(act_dtype)

    # TODO(synk): real BertModel forward (pretrained checkpoint) — replaced by a
    # deterministic embedding-lookup stand-in; XLA fuses the gather with the
    # mask multiply so x_bert is materialized only once, already in act_dtype.
    x_bert = embed_table.astype(act_dtype)[sent_pad] * attention_mask[..., None]

    # concat + linear + log_softmax (fused Pallas kernel)
    out = punc_head(x_bert, y, weight, bias, out_dtype=act_dtype)
    return out[:, :s, :]


# ----------------------------------------------------------------------------
# Pure-JAX reference for a correctness check.
# ----------------------------------------------------------------------------
def punc_forward_ref(audio_feature_list, sentences, embed_table, weight, bias):
    attention_mask = jnp.sign(sentences).astype(jnp.float32)
    x_bert = embed_table[sentences] * attention_mask[..., None]
    pooled = [jnp.var(f, axis=1, ddof=1) for f in audio_feature_list]
    max_audio_length = max(p.shape[0] for p in pooled)
    y = jnp.zeros((len(pooled), max_audio_length, WAV_C), dtype=jnp.float32)
    for index, audio in enumerate(pooled):
        y = y.at[index, : audio.shape[0]].set(audio)
    x = jnp.concatenate([x_bert, y], axis=2)
    logits = x @ weight + bias
    return jax.nn.log_softmax(logits, axis=-1)


if __name__ == "__main__":
    B, S, T = 2, 64, 16          # batch, seq_len (== max #segments), frames/segment
    VOCAB = 100

    key = jax.random.PRNGKey(0)
    k_sent, k_emb, k_a0, k_a1, k_w, k_b = jax.random.split(key, 6)

    # token ids; last tokens of each sentence are padding (id 0)
    sentences = jax.random.randint(k_sent, (B, S), 1, VOCAB, dtype=jnp.int32)
    sentences = sentences.at[:, -5:].set(0)

    # synthetic "pretrained" parameters
    embed_table = jax.random.normal(k_emb, (VOCAB, BERT_H), jnp.float32) * 0.02
    weight = jax.random.normal(k_w, (BERT_H + WAV_C, LABEL_SIZE), jnp.float32)
    weight = weight * (1.0 / math.sqrt(BERT_H + WAV_C))
    bias = jax.random.normal(k_b, (LABEL_SIZE,), jnp.float32) * 0.01

    # synthetic wav2vec features: per-sentence list, variable #segments
    # (the original torch.cat requires max #segments == seq_len)
    audio_feats = [
        jax.random.normal(k_a0, (S, T, WAV_C), jnp.float32),    # full length
        jax.random.normal(k_a1, (20, T, WAV_C), jnp.float32),   # short -> padded
    ]

    ref = punc_forward_ref(audio_feats, sentences, embed_table, weight, bias)

    # f32 path: tight semantics check.
    out_f32 = jax.block_until_ready(
        punc_forward(audio_feats, sentences, embed_table, weight, bias,
                     use_bf16=False))
    np.testing.assert_allclose(np.asarray(out_f32), np.asarray(ref),
                               rtol=1e-4, atol=1e-3)

    # bf16 streaming path (default): bf16 operands + bf16 output, f32 math
    # in-kernel -> small rounding only.
    out_bf16 = jax.block_until_ready(
        punc_forward(audio_feats, sentences, embed_table, weight, bias,
                     use_bf16=True))
    np.testing.assert_allclose(np.asarray(out_bf16.astype(jnp.float32)),
                               np.asarray(ref), rtol=0.0, atol=1e-1)

    assert out_f32.shape == (B, S, LABEL_SIZE) and out_f32.dtype == jnp.float32
    assert out_bf16.shape == (B, S, LABEL_SIZE) and out_bf16.dtype == jnp.bfloat16
    print("KERNEL_OK")
</pallas_src>

<mosaic_0001>
module attributes {stable_mosaic.version = 11 : i64} {
  func.func @_var_pad_kernel(%arg0: i32, %arg1: i32, %arg2: memref<4xi32, #tpu.memory_space<smem>>, %arg3: memref<2xi32, #tpu.memory_space<smem>>, %arg4: memref<32x16x512xf32, #tpu.memory_space<vmem>>, %arg5: memref<1x32x512xf32, #tpu.memory_space<vmem>>) attributes {dimension_semantics = [#tpu.dimension_semantics<parallel>, #tpu.dimension_semantics<parallel>], iteration_bounds = array<i64: 2, 2>, scalar_prefetch = 2 : i64, scratch_operands = 0 : i64, tpu.core_type = #tpu.core_type<tc>, window_params = [{transform_indices = @transform_0, window_bounds = array<i64: 32, 16, 512>}, {transform_indices = @transform_1, window_bounds = array<i64: 1, 32, 512>}]} {
    %c0 = arith.constant 0 : index
    %c0_0 = arith.constant 0 : index
    %c0_1 = arith.constant 0 : index
    %0 = vector.load %arg4[%c0, %c0_0, %c0_1] : memref<32x16x512xf32, #tpu.memory_space<vmem>>, vector<32x16x512xf32>
    %cst = arith.constant dense<0.000000e+00> : vector<32x512xf32>
    %1 = vector.multi_reduction <add>, %0, %cst [1] : vector<32x16x512xf32> to vector<32x512xf32>
    %2 = arith.mulf %0, %0 : vector<32x16x512xf32>
    %cst_2 = arith.constant dense<0.000000e+00> : vector<32x512xf32>
    %3 = vector.multi_reduction <add>, %2, %cst_2 [1] : vector<32x16x512xf32> to vector<32x512xf32>
    %4 = arith.mulf %1, %1 : vector<32x512xf32>
    %cst_3 = arith.constant 6.250000e-02 : f32
    %5 = vector.broadcast %cst_3 : f32 to vector<32x512xf32>
    %6 = arith.mulf %4, %5 : vector<32x512xf32>
    %7 = arith.subf %3, %6 : vector<32x512xf32>
    %cst_4 = arith.constant 0.0666666701 : f32
    %8 = vector.broadcast %cst_4 : f32 to vector<32x512xf32>
    %9 = arith.mulf %7, %8 : vector<32x512xf32>
    %c32_i32 = arith.constant 32 : i32
    %10 = arith.muli %arg1, %c32_i32 : i32
    %11 = tpu.iota {dimensions = array<i32: 0>} : vector<32x1xi32>
    %12 = vector.broadcast %10 : i32 to vector<32x1xi32>
    %13 = arith.addi %12, %11 : vector<32x1xi32>
    %14 = arith.index_cast %arg0 : i32 to index
    %15 = memref.load %arg3[%14] : memref<2xi32, #tpu.memory_space<smem>>
    %16 = vector.broadcast %15 : i32 to vector<32x1xi32>
    %17 = arith.cmpi slt, %13, %16 : vector<32x1xi32>
    %18 = arith.extui %17 : vector<32x1xi1> to vector<32x1xi32>
    %19 = arith.sitofp %18 : vector<32x1xi32> to vector<32x1xf32>
    %20 = vector.broadcast %19 : vector<32x1xf32> to vector<32x512xf32>
    %21 = arith.mulf %9, %20 : vector<32x512xf32>
    %c0_5 = arith.constant 0 : index
    %c0_6 = arith.constant 0 : index
    %c0_7 = arith.constant 0 : index
    %22 = vector.load %arg5[%c0_5, %c0_6, %c0_7] : memref<1x32x512xf32, #tpu.memory_space<vmem>>, vector<1x32x512xf32>
    %23 = vector.shape_cast %22 : vector<1x32x512xf32> to vector<32x512xf32>
    %24 = vector.shape_cast %21 : vector<32x512xf32> to vector<1x32x512xf32>
    tpu.vector_store %arg5[%c0_5, %c0_6, %c0_7], %24 {strides = array<i32>} : memref<1x32x512xf32, #tpu.memory_space<vmem>>, vector<1x32x512xf32>,
    return
  }
  func.func @transform_0(%arg0: i32, %arg1: i32, %arg2: memref<4xi32, #tpu.memory_space<smem>>, %arg3: memref<2xi32, #tpu.memory_space<smem>>) -> (i32, i32, i32) {
    %c2_i32 = arith.constant 2 : i32
    %0 = arith.muli %arg0, %c2_i32 : i32
    %1 = arith.addi %0, %arg1 : i32
    %2 = arith.index_cast %1 : i32 to index
    %3 = memref.load %arg2[%2] : memref<4xi32, #tpu.memory_space<smem>>
    %c0_i32 = arith.constant 0 : i32
    %c0_i32_0 = arith.constant 0 : i32
    %c0_i32_1 = arith.constant 0 : i32
    return %3, %c0_i32, %c0_i32_0 : i32, i32, i32
  }
  func.func @transform_1(%arg0: i32, %arg1: i32, %arg2: memref<4xi32, #tpu.memory_space<smem>>, %arg3: memref<2xi32, #tpu.memory_space<smem>>) -> (i32, i32, i32) {
    %c0_i32 = arith.constant 0 : i32
    %c0_i32_0 = arith.constant 0 : i32
    return %arg0, %arg1, %c0_i32 : i32, i32, i32
  }
}

</mosaic_0001>

<bundles_post_ra>
// kernel: tpu_custom_call.1
= control target key start
LH: loop header
LB: loop body
LE: loop exit
PB: predicated region body
PF: predicated region fallthrough
CT: control target
= control target key end

     0   :  { %s4204_s12 = smov [#allocation3]   ;;  %s4205_s15 = smov [#allocation4]   ;;  %s9068_s0 = inlined_call_operand.hbm [shape: s32[4], index: 0, kind: input, shape index: {}]   ;;  %s9069_s2 = inlined_call_operand.hbm [shape: f32[96,16,512], index: 2, kind: input, shape index: {}]   ;;  %s9070_s3 = inlined_call_operand.hbm [shape: f32[2,64,512], index: 3, kind: output, shape index: {}]   ;;  %s9071_s1 = inlined_call_operand.hbm [shape: s32[2], index: 1, kind: input, shape index: {}]  }
   0x1   :  { %9 = dma.hbm_to_smem %s9068_s0, 16, %s4204_s12, [#allocation2] }
   0x2   :  { %11 = dma.hbm_to_smem %s9071_s1, 16, %s4205_s15, [#allocation2] }
   0x3   :  { %4150 = dma.done.wait [#allocation2], 32 }
   0x4   :  { %4151 = vsyncadd [#allocation2], 4294967264 }
   0x5   :  { %13 = sfence }
   0x6   :  { %14 = vsyncpa [#allocation6], 0 }
   0x7   :  { %16 = vsyncpa [#allocation6 + $0x1], 0 }
   0x8   :  { %17 = vsyncpa [#allocation7], 0 }
   0x9   :  { %19 = vsyncpa [#allocation7 + $0x1], 0  ;;  %s4239_s18 = smov 0   ;;  %s4241_s19 = smov 0  }
   0xa   :  { %s4243_s20 = smov 0   ;;  %s4245_s21 = smov 0  }
   0xb   :  { %s4247_s0 = smov 0   ;;  %s4249_s22 = smov 0  }
   0xc   :  { %s4251_s1 = smov 0   ;;  %s4253_s23 = smov 0  }
   0xd   :  { %s4255_s24 = smov 0   ;;  %s4257_s25 = smov 0  }
   0xe   :  { %s4259_s26 = smov 0  }
   0xf LB: > { %9346 = sst [smem:[#allocation14_spill]] %s4198_s25  ;;  %s3700_s27 = sadd.s32 4294967295, %s4202_s26   ;;  %s4202_s26 = sphi %s4259_s26, %s25_s26   ;;  %s4198_s25 = sphi %s4257_s25, %s11372_s25   ;;  %s4194_s24 = sphi %s4255_s24, %s11380_s24   ;;  %s4190_s23 = sphi %s4253_s23, %s11370_s23   ;;  %s4186_s1 = sphi %s4251_s1, %s11379_s1   ;;  %s4182_s22 = sphi %s4249_s22, %s11378_s22   ;;  %s4178_s0 = sphi %s4247_s0, %s11377_s0   ;;  %s4174_s21 = sphi %s4245_s21, %s11376_s21   ;;  %s4170_s20 = sphi %s4243_s20, %s11375_s20   ;;  %s4166_s19 = sphi %s4241_s19, %s11374_s19   ;;  %s4162_s18 = sphi %s4239_s18, %s11373_s18  }
  0x10   : > { %s3701_s28 = sadd.s32 4294967294, %s4202_s26   ;;  %s34_s29 = sadd.s32 1, %s4194_s24 }
  0x11   : > { %s37_s30 = sadd.s32 1, %s4198_s25  ;;  %p35_p0 = scmp.ge.s32.totalorder %s34_s29, 2 }
  0x12   : > { %s3702_s4 = sshll.u32 %s4198_s25, 1  ;;  %s50_s6 = sadd.s32 1, %s4182_s22 }
  0x13   : > { %s4298_s5 = sadd.s32 %s4194_s24, %s3702_s4  ;;  %s11382_s29 = smov (%p35_p0, %s34_s29), 0 }
  0x14   : > { %9347 = sst [smem:[#allocation15_spill]] %s11382_s29  ;;  %s11384_s30 = smov (!%p35_p0, %s37_s30), %s4198_s25 }
  0x15   : > { %s43_s7 = sld [smem:[#allocation3 + %s4298_s5]]  ;;  %p57_p1 = scmp.ne.s32.totalorder %s4182_s22, %s4178_s0 }
  0x16   : > { %p39_p2 = scmp.ge.s32.totalorder %s11384_s30, 2  ;;  %p58_p3 = scmp.eq.s32.totalorder %s4202_s26, 0 }
  0x17   : > { %p63_p4 = scmp.ne.s32.totalorder %s4178_s0, %s4174_s21  ;;  %p64_p5 = scmp.eq.s32.totalorder %s3700_s27, 0 }
  0x18   : > { %s11386_s30 = smov (%p39_p2, %s11384_s30), 0  ;;  %p4311_p6 = por %p58_p3, %p57_p1 }
  0x19   : > { %9348 = sst [smem:[#allocation16_spill]] %s11386_s30  ;;  %p4315_p7 = por %p64_p5, %p63_p4 }
  0x1a   : > { %s3703_s10 = sshll.u32 %s11386_s30, 1  ;;  %s73_s11 = ssub.s32 %s4198_s25, %s11386_s30 }
  0x1b   : > { %s9350_s9 = scalar_select %p4315_p7, 1, 0 }
  0x1c   : > { %s45_s12 = sadd.s32 %s3703_s10, %s11382_s29  ;;  %s74_s13 = ssub.s32 %s4194_s24, %s11382_s29 }
  0x1d   : > { %s46_s14 = sld [smem:[#allocation3 + %s45_s12]]  ;;  %s75_s15 = sor.u32 %s74_s13, %s73_s11 }
  0x1e   : > { %p76_p8 = scmp.eq.s32.totalorder %s75_s15, 0  ;;  %s78_s16 = sadd.s32 1, %s4170_s20 }
  0x1f   : > { %p88_p9 = scmp.ne.s32.totalorder %s4170_s20, %s4166_s19  ;;  %p89_p10 = scmp.eq.s32.totalorder %s3700_s27, 3 }
  0x20   : > { %s4329_s17 = scalar_select %p76_p8, %s4170_s20, %s78_s16  }
  0x21   : > { %p4331_p11 = por %p89_p10, %p88_p9  ;;  %p94_p12 = scmp.ne.s32.totalorder %s4166_s19, %s4162_s18 }
  0x22   : > { %p95_p13 = scmp.eq.s32.totalorder %s3701_s28, 3  ;;  %p3745_p0 = scmp.lt.s32.totalorder %s4202_s26, 4 }
  0x23   : > { %s9351_s21 = scalar_select %p4331_p11, 1, 0 }
  0x24   : > { %s47_s4 = ssub.s32 %s43_s7, %s46_s14  ;;  %p4340_p2 = por %p95_p13, %p94_p12 }
  0x25   : > { %p48_p1 = scmp.eq.s32.totalorder %s47_s4, 0  ;;  %s115_s11 = sand.u32 1, %s4182_s22  }
  0x26   : > { %s9352_s10 = scalar_select %p4340_p2, 1, 0 }
  0x27   : > { %p4347_p3 = pnand %p3745_p0, %p4311_p6  ;;  %s3706_s13 = sshll.u32 %s115_s11, 11 }
  0x28   : > { %s4354_s12 = scalar_select %p48_p1, %s4182_s22, %s50_s6  }
  0x29   : > { %s3729_s28 = scalar_select %p4311_p6, [#allocation3], [#allocation9] }
  0x2a   : > { %s11388_s5 = smov (!%p4311_p6, %s4298_s5), 0  ;;  %p3711_p4 = scmp.ge.s32.totalorder %s4202_s26, 1 }
  0x2b   : > { %s11390_s28 = smov (!%p3745_p0, %s3729_s28), [#allocation10]  ;;  %s11392_s5 = smov (!%p3745_p0, %s11388_s5), 0 }
  0x2c   : > { %s122_s7 = sld [smem:[%s11390_s28 + %s11392_s5]]  ;;  %s119_s14 = scalar_lea.vmem [#allocation5], %s3706_s13 }
  0x2d   : > { %s130_s15 = sshll.u32 %s119_s14, 4  ;;  %p138_p5 = scmp.lt.s32.totalorder %s4202_s26, 5  ;;  %s4367_s15 = int_to_ptr.vmem [resolvable:$true] %s130_s15 }
  0x2e   : > { %s4374_s5 = scalar_lea.sflag [#allocation6], %s115_s11  ;;  %p4054_p9 = pneg %p4347_p3 }
  0x2f   : > { %p4363_p8 = pnand %p3711_p4, %p138_p5 }
  0x31   : > { %s9354_s16 = scalar_select %p4363_p8, 1, 0 }
  0x32   : > { %s3727_s6 = sshll.u32 %s122_s7, 15  ;;  %s4057_s7 = scalar_lea.hbm %s9069_s2, 98304 }
  0x33   : > { %s4372_s8 = scalar_lea.hbm %s9069_s2, %s3727_s6 }
  0x34   : > { %s4052_s13 = scalar_lea.hbm %s4372_s8, 32768  ;;  %p4058_p13 = scmp.lt.s32.totalorder %s4372_s8, %s9069_s2 }
  0x35   : > { %p4053_p6 = scmp.ne.s32.totalorder %s4372_s8, %s4052_s13  ;;  %p4059_p0 = scmp.lt.s32.totalorder %s4057_s7, %s4052_s13 }
  0x37   : > { %p4055_p10 = pnand %p4054_p9, %p4053_p6  ;;  %p4060_p1 = por %p4059_p0, %p4058_p13 }
  0x39   : > { %p4056_p12 = pneg %p4055_p10 }
  0x3b   : > { %p4061_p4 = pnand %p4060_p1, %p4056_p12 }
  0x3d   : > { %4064 = shalt.err (!%p4061_p4)
}
  0x3e   : > { %s4065_s30 = scalar_lea.vmem %s4367_s15, 32768  ;;  %s4206_s11 = smov [#allocation5]  }
  0x3f   : > { %p4066_p5 = scmp.ne.s32.totalorder %s4367_s15, %s4065_s30  ;;  %s4070_s6 = sshll.u32 %s4206_s11, 4  ;;  %s4071_s6 = int_to_ptr.vmem [resolvable:$false] %s4070_s6 }
  0x40   : > { %s4072_s4 = scalar_lea.vmem %s4071_s6, 65536  ;;  %p4073_p10 = scmp.lt.s32.totalorder %s4367_s15, %s4071_s6 }
  0x41   : > { %p4068_p2 = pnand %p4066_p5, %p4054_p9  ;;  %p4074_p11 = scmp.lt.s32.totalorder %s4072_s4, %s4065_s30 }
  0x43   : > { %p4069_p6 = pneg %p4068_p2  ;;  %p4075_p7 = por %p4074_p11, %p4073_p10 }
  0x45   : > { %p4076_p8 = pnand %p4075_p7, %p4069_p6 }
  0x47   : > { %4079 = shalt.err (!%p4076_p8)
}
  0x48   : > { %s4207_s25 = smov 512   ;;  %s4208_s29 = smov 32  }
  0x49   : > { %3740 = dma.hbm_to_vmem [thread:$0]  (!%p4347_p3), %s4372_s8, 32768, %s4367_s15, %s4374_s5, %s4207_s25, %s4207_s25, %s4208_s29  }
  0x4a   : > { %p9355_p9 = scmp.ne.s32.totalorder %s9354_s16, 0 }
  0x4c   : > { %142 = sbr.rel (%p9355_p9) target bundleno = 1028 (0x404), region = 24 }
  0x51   : > { %s144_s13 = sand.u32 1, %s4178_s0   ;;  %p9356_p7 = scmp.ne.s32.totalorder %s9350_s9, 0 }
  0x52   : > { %s3712_s28 = sshll.u32 %s144_s13, 11  ;;  %s145_s14 = scalar_lea.sflag [#allocation6], %s144_s13 }
  0x53   : > { %s4398_s7 = scalar_lea.vmem [#allocation5], %s3712_s28 }
  0x54   : > { %4153 = dma.done.wait (%p9356_p7), %s145_s14, 32768  }
  0x55   : > { %4155 = vsyncadd (%p9356_p7), %s145_s14, 4294934528  ;;  %v172_v0 = vld [vmem:[%s4398_s7] sm:$0xff]  ;;  %v173_v1 = vld [vmem:[%s4398_s7 + $0x8] sm:$0xff]  ;;  %s3714_s9 = sshll.u32 %s4186_s1, 5  ;;  %s7532_s27 = sld [smem:[#allocation4 + %s4190_s23]]  ;;  %vm3334_vm4 = vcmask 1041409  }
  0x56   : > { %v176_v2 = vld [vmem:[%s4398_s7 + $0x20] sm:$0xff]  ;;  %v174_v3 = vld [vmem:[%s4398_s7 + $0x10] sm:$0xff]  ;;  %v175_v4 = vld [vmem:[%s4398_s7 + $0x18] sm:$0xff]  ;;  %vm3337_vm5 = vcmask 1042434   ;;  %vm3340_vm6 = vcmask 1043459   ;;  %vm3343_vm7 = vcmask 1044484  }
  0x57   : > { %v177_v5 = vld [vmem:[%s4398_s7 + $0x28] sm:$0xff]  ;;  %v178_v6 = vld [vmem:[%s4398_s7 + $0x30] sm:$0xff]  ;;  %v179_v7 = vld [vmem:[%s4398_s7 + $0x38] sm:$0xff]  ;;  %v428_v15 = vadd.f32 %v176_v2, %v172_v0  ;;  %vm3346_vm8 = vcmask 1045509   ;;  %vm3349_vm9 = vcmask 1046534   ;;  %vm3352_vm10 = vcmask 1047559  }
  0x58   : > { %v180_v8 = vld [vmem:[%s4398_s7 + $0x40] sm:$0xff]  ;;  %v181_v9 = vld [vmem:[%s4398_s7 + $0x48] sm:$0xff]  ;;  %v182_v10 = vld [vmem:[%s4398_s7 + $0x50] sm:$0xff]  ;;  %v435_v22 = vadd.f32 %v177_v5, %v173_v1  ;;  %v442_v26 = vadd.f32 %v178_v6, %v174_v3  ;;  %v449_v27 = vadd.f32 %v179_v7, %v175_v4  ;;  %s164_s15 = sand.u32 1, %s4166_s19   ;;  %s3728_s5 = sshll.u32 %s4186_s1, 4 }
  0x59   : > { %v183_v11 = vld [vmem:[%s4398_s7 + $0x58] sm:$0xff]  ;;  %v184_v12 = vld [vmem:[%s4398_s7 + $0x60] sm:$0xff]  ;;  %v185_v13 = vld [vmem:[%s4398_s7 + $0x68] sm:$0xff]  ;;  %v429_v31 = vrot.slane %v428_v15, 4  ;;  %s3713_s16 = sshll.u32 %s164_s15, 7  ;;  %s3722_s30 = sshll.u32 %s4190_s23, 5 }
  0x5a   : > { %v186_v14 = vld [vmem:[%s4398_s7 + $0x70] sm:$0xff]  ;;  %v187_v16 = vld [vmem:[%s4398_s7 + $0x78] sm:$0xff]  ;;  %v188_v17 = vld [vmem:[%s4398_s7 + $0x80] sm:$0xff]  ;;  %v456_v32 = vadd.f32 %v184_v12, %v180_v8  ;;  %v463_v36 = vadd.f32 %v185_v13, %v181_v9  ;;  %v436_v40 = vrot.slane %v435_v22, 4  ;;  %v443_v43 = vrot.slane %v442_v26, 4  ;;  %s8779_s8 = scalar_lea.vmem [#allocation8], %s3713_s16  ;;  %s3610_s1 = sadd.s32 %s3728_s5, %s3722_s30 }
  0x5b   : > { %v189_v18 = vld [vmem:[%s4398_s7 + $0x88] sm:$0xff]  ;;  %v190_v19 = vld [vmem:[%s4398_s7 + $0x90] sm:$0xff]  ;;  %v191_v20 = vld [vmem:[%s4398_s7 + $0x98] sm:$0xff]  ;;  %v470_v37 = vadd.f32 %v186_v14, %v182_v10  ;;  %v477_v38 = vadd.f32 %v187_v16, %v183_v11  ;;  %v450_v44 = vrot.slane %v449_v27, 4  ;;  %v430_v47 = vadd.f32 %v429_v31, %v428_v15  ;;  %s3613_s23 = sshll.u32 %s8779_s8, 4  ;;  %s3723_s11 = sshll.u32 %s3610_s1, 7  ;;  %s8996_s23 = int_to_ptr.vmem [resolvable:$true] %s3613_s23 }
  0x5c   : > { %v192_v21 = vld [vmem:[%s4398_s7 + $0xa0] sm:$0xff]  ;;  %v193_v23 = vld [vmem:[%s4398_s7 + $0xa8] sm:$0xff]  ;;  %v194_v24 = vld [vmem:[%s4398_s7 + $0xb0] sm:$0xff]  ;;  %v457_v48 = vrot.slane %v456_v32, 4  ;;  %v464_v51 = vrot.slane %v463_v36, 4  ;;  %v437_v55 = vadd.f32 %v436_v40, %v435_v22  ;;  %v444_v60 = vadd.f32 %v443_v43, %v442_v26  ;;  %s9002_s25 = scalar_lea.hbm %s9070_s3, %s3723_s11  ;;  %s9008_s29 = scalar_lea.sflag [#allocation7], %s164_s15 }
  0x5d   : > { %v195_v25 = vld [vmem:[%s4398_s7 + $0xb8] sm:$0xff]  ;;  %v196_v28 = vld [vmem:[%s4398_s7 + $0xc0] sm:$0xff]  ;;  %v197_v29 = vld [vmem:[%s4398_s7 + $0xc8] sm:$0xff]  ;;  %v484_v39 = vadd.f32 %v192_v21, %v188_v17  ;;  %v491_v41 = vadd.f32 %v193_v23, %v189_v18  ;;  %v498_v42 = vadd.f32 %v194_v24, %v190_v19  ;;  %v471_v52 = vrot.slane %v470_v37, 4  ;;  %s4080_s13 = scalar_lea.vmem %s8996_s23, 2048  ;;  %p11368_p2 = scmp.ne.s32.totalorder %s9351_s21, 0 }
  0x5e   : > { %v200_v30 = vld [vmem:[%s4398_s7 + $0xe0] sm:$0xff]  ;;  %v198_v33 = vld [vmem:[%s4398_s7 + $0xd0] sm:$0xff]  ;;  %v201_v34 = vld [vmem:[%s4398_s7 + $0xe8] sm:$0xff]  ;;  %v505_v45 = vadd.f32 %v195_v25, %v191_v20  ;;  %v478_v53 = vrot.slane %v477_v38, 4  ;;  %v451_v61 = vadd.f32 %v450_v44, %v449_v27  ;;  %v431_v0 = vrot.slane %v430_v47, 2  ;;  %p4081_p11 = scmp.ne.s32.totalorder %s8996_s23, %s4080_s13  ;;  %s4210_s28 = smov [#allocation8]  }
  0x5f   : > { %v202_v35 = vld [vmem:[%s4398_s7 + $0xf0] sm:$0xff]  ;;  %v512_v46 = vadd.f32 %v200_v30, %v196_v28  ;;  %v519_v49 = vadd.f32 %v201_v34, %v197_v29  ;;  %v485_v54 = vrot.slane %v484_v39, 4  ;;  %v492_v56 = vrot.slane %v491_v41, 4  ;;  %v199_v58 = vld [vmem:[%s4398_s7 + $0xd8] sm:$0xff]  ;;  %v204_v44 = vld [vmem:[%s4398_s7 + $0x100] sm:$0xff]  ;;  %s4084_s14 = sshll.u32 %s4210_s28, 4  ;;  %s4085_s14 = int_to_ptr.vmem [resolvable:$false] %s4084_s14 }
  0x60   : > { %v526_v50 = vadd.f32 %v202_v35, %v198_v33  ;;  %v499_v57 = vrot.slane %v498_v42, 4  ;;  %v203_v59 = vld [vmem:[%s4398_s7 + $0xf8] sm:$0xff]  ;;  %v506_v62 = vrot.slane %v505_v45, 4  ;;  %v458_v1 = vadd.f32 %v457_v48, %v456_v32  ;;  %p4082_p3 = pnand %p4081_p11, %p11368_p2  ;;  %p4087_p12 = scmp.lt.s32.totalorder %s8996_s23, %s4085_s14 }
  0x61   : > { %v513_v63 = vrot.slane %v512_v46, 4  ;;  %v520_v2 = vrot.slane %v519_v49, 4  ;;  %v465_v4 = vadd.f32 %v464_v51, %v463_v36  ;;  %v472_v5 = vadd.f32 %v471_v52, %v470_v37 }
  0x62   : > { %v527_v3 = vrot.slane %v526_v50, 4  ;;  %v479_v6 = vadd.f32 %v478_v53, %v477_v38  ;;  %v486_v7 = vadd.f32 %v485_v54, %v484_v39  ;;  %v438_v8 = vrot.slane %v437_v55, 2  ;;  %p4083_p8 = pneg %p4082_p3 }
  0x63   : > { %v493_v9 = vadd.f32 %v492_v56, %v491_v41  ;;  %v500_v10 = vadd.f32 %v499_v57, %v498_v42  ;;  %v533_v11 = vadd.f32 %v203_v59, %v199_v58  ;;  %v445_v12 = vrot.slane %v444_v60, 2  ;;  %v205_v58 = vld [vmem:[%s4398_s7 + $0x108] sm:$0xff]  ;;  %v206_v59 = vld [vmem:[%s4398_s7 + $0x110] sm:$0xff] }
  0x64   : > { %v452_v13 = vrot.slane %v451_v61, 2  ;;  %v507_v14 = vadd.f32 %v506_v62, %v505_v45  ;;  %v514_v15 = vadd.f32 %v513_v63, %v512_v46  ;;  %v432_v16 = vadd.f32 %v431_v0, %v430_v47  ;;  %v208_v45 = vld [vmem:[%s4398_s7 + $0x120] sm:$0xff] }
  0x65   : > { %v459_v17 = vrot.slane %v458_v1, 2  ;;  %v521_v18 = vadd.f32 %v520_v2, %v519_v49  ;;  %v528_v19 = vadd.f32 %v527_v3, %v526_v50  ;;  %v466_v20 = vrot.slane %v465_v4, 2  ;;  %v210_v2 = vld [vmem:[%s4398_s7 + $0x130] sm:$0xff]  ;;  %v211_v3 = vld [vmem:[%s4398_s7 + $0x138] sm:$0xff] }
  0x66   : > { %v473_v21 = vrot.slane %v472_v5, 2  ;;  %v480_v22 = vrot.slane %v479_v6, 2  ;;  %v487_v23 = vrot.slane %v486_v7, 2  ;;  %v439_v24 = vadd.f32 %v438_v8, %v437_v55 }
  0x67   : > { %v494_v25 = vrot.slane %v493_v9, 2  ;;  %v501_v26 = vrot.slane %v500_v10, 2  ;;  %v534_v27 = vrot.slane %v533_v11, 4  ;;  %v446_v28 = vadd.f32 %v445_v12, %v444_v60  ;;  %v209_v60 = vld [vmem:[%s4398_s7 + $0x128] sm:$0xff]  ;;  %v216_v12 = vld [vmem:[%s4398_s7 + $0x160] sm:$0xff] }
  0x68   : > { %v453_v29 = vadd.f32 %v452_v13, %v451_v61  ;;  %v508_v30 = vrot.slane %v507_v14, 2  ;;  %v515_v31 = vrot.slane %v514_v15, 2  ;;  %v433_v32 = vrot.slane %v432_v16, 1  ;;  %v217_v13 = vld [vmem:[%s4398_s7 + $0x168] sm:$0xff] }
  0x69   : > { %v460_v33 = vadd.f32 %v459_v17, %v458_v1  ;;  %v522_v34 = vrot.slane %v521_v18, 2  ;;  %v529_v35 = vrot.slane %v528_v19, 2  ;;  %v467_v36 = vadd.f32 %v466_v20, %v465_v4  ;;  %v207_v1 = vld [vmem:[%s4398_s7 + $0x118] sm:$0xff]  ;;  %v212_v4 = vld [vmem:[%s4398_s7 + $0x140] sm:$0xff] }
  0x6a   : > { %v474_v37 = vadd.f32 %v473_v21, %v472_v5  ;;  %v481_v38 = vadd.f32 %v480_v22, %v479_v6  ;;  %v488_v39 = vadd.f32 %v487_v23, %v486_v7  ;;  %v440_v40 = vrot.slane %v439_v24, 1  ;;  %v220_v20 = vld [vmem:[%s4398_s7 + $0x180] sm:$0xff]  ;;  %v221_v21 = vld [vmem:[%s4398_s7 + $0x188] sm:$0xff] }
  0x6b   : > { %v495_v41 = vadd.f32 %v494_v25, %v493_v9  ;;  %v502_v42 = vadd.f32 %v501_v26, %v500_v10  ;;  %v535_v43 = vadd.f32 %v534_v27, %v533_v11  ;;  %v447_v46 = vrot.slane %v446_v28, 1  ;;  %v213_v9 = vld [vmem:[%s4398_s7 + $0x148] sm:$0xff]  ;;  %v214_v10 = vld [vmem:[%s4398_s7 + $0x150] sm:$0xff]  ;;  %v215_v11 = vld [vmem:[%s4398_s7 + $0x158] sm:$0xff] }
  0x6c   : > { %v454_v47 = vrot.slane %v453_v29, 1  ;;  %v509_v48 = vadd.f32 %v508_v30, %v507_v14  ;;  %v516_v49 = vadd.f32 %v515_v31, %v514_v15  ;;  %v4438_v50 = vadd.f32 %v433_v32, %v432_v16  ;;  %v218_v14 = vld [vmem:[%s4398_s7 + $0x170] sm:$0xff]  ;;  %v223_v27 = vld [vmem:[%s4398_s7 + $0x198] sm:$0xff] }
  0x6d   : > { %v461_v51 = vrot.slane %v460_v33, 1  ;;  %v523_v52 = vadd.f32 %v522_v34, %v521_v18  ;;  %v530_v53 = vadd.f32 %v529_v35, %v528_v19  ;;  %v468_v54 = vrot.slane %v467_v36, 1  ;;  %v219_v19 = vld [vmem:[%s4398_s7 + $0x178] sm:$0xff]  ;;  %v222_v26 = vld [vmem:[%s4398_s7 + $0x190] sm:$0xff] }
  0x6e   : > { %9357 = vst [vmem:[#allocation17_spill] sm:$0xff] %v4438_v50  ;;  %v475_v55 = vrot.slane %v474_v37, 1  ;;  %v482_v56 = vrot.slane %v481_v38, 1  ;;  %v489_v57 = vrot.slane %v488_v39, 1  ;;  %v496_v61 = vrot.slane %v495_v41, 1  ;;  %v226_v34 = vld [vmem:[%s4398_s7 + $0x1b0] sm:$0xff] }
  0x6f   : > { %v503_v62 = vrot.slane %v502_v42, 1  ;;  %v536_v63 = vrot.slane %v535_v43, 2  ;;  %v540_v0 = vadd.f32 %v208_v45, %v204_v44  ;;  %v4447_v5 = vadd.f32 %v440_v40, %v439_v24  ;;  %v227_v35 = vld [vmem:[%s4398_s7 + $0x1b8] sm:$0xff]  ;;  %v228_v40 = vld [vmem:[%s4398_s7 + $0x1c0] sm:$0xff]  ;;  %v229_v44 = vld [vmem:[%s4398_s7 + $0x1c8] sm:$0xff] }
  0x70   : > { %v4449_v6 = vadd.f32 %v447_v46, %v446_v28  ;;  %v510_v7 = vrot.slane %v509_v48, 1  ;;  %v517_v8 = vrot.slane %v516_v49, 1  ;;  %v4457_v15 = vadd.f32 %v454_v47, %v453_v29  ;;  %v224_v28 = vld [vmem:[%s4398_s7 + $0x1a0] sm:$0xff]  ;;  %v230_v47 = vld [vmem:[%s4398_s7 + $0x1d0] sm:$0xff] }
  0x71   : > { %9358 = vst [vmem:[#allocation18_spill] sm:$0xff] %v4447_v5  ;;  %v4459_v16 = vadd.f32 %v461_v51, %v460_v33  ;;  %v524_v17 = vrot.slane %v523_v52, 1  ;;  %v531_v18 = vrot.slane %v530_v53, 1  ;;  %v4464_v22 = vadd.f32 %v468_v54, %v467_v36  ;;  %v225_v33 = vld [vmem:[%s4398_s7 + $0x1a8] sm:$0xff]  ;;  %v234_v54 = vld [vmem:[%s4398_s7 + $0x1f0] sm:$0xff] }
  0x72   : > { %9359 = vst [vmem:[#allocation19_spill] sm:$0xff] %v4449_v6  ;;  %9360 = vst [vmem:[#allocation20_spill] sm:$0xff] %v4457_v15  ;;  %v4466_v23 = vadd.f32 %v475_v55, %v474_v37  ;;  %v4468_v24 = vadd.f32 %v482_v56, %v481_v38  ;;  %v4470_v25 = vadd.f32 %v489_v57, %v488_v39  ;;  %v541_v32 = vrot.slane %v540_v0, 4  ;;  %v233_v51 = vld [vmem:[%s4398_s7 + $0x1e8] sm:$0xff] }
  0x73   : > { %9361 = vst [vmem:[#allocation21_spill] sm:$0xff] %v4459_v16  ;;  %9362 = vst [vmem:[#allocation22_spill] sm:$0xff] %v4464_v22  ;;  %v4475_v29 = vadd.f32 %v496_v61, %v495_v41  ;;  %v4477_v30 = vadd.f32 %v503_v62, %v502_v42  ;;  %v537_v31 = vadd.f32 %v536_v63, %v535_v43  ;;  %v232_v41 = vld [vmem:[%s4398_s7 + $0x1e0] sm:$0xff]  ;;  %v4906_v22 = vld [vmem:[%s4398_s7 + $0x6f8] sm:$0xff] }
  0x74   : > { %9363 = vst [vmem:[#allocation23_spill] sm:$0xff] %v4466_v23  ;;  %9364 = vst [vmem:[#allocation24_spill] sm:$0xff] %v4468_v24  ;;  %v4482_v36 = vadd.f32 %v510_v7, %v509_v48  ;;  %v4484_v37 = vadd.f32 %v517_v8, %v516_v49  ;;  %v547_v38 = vadd.f32 %v209_v60, %v205_v58  ;;  %v4903_v23 = vld [vmem:[%s4398_s7 + $0x6d8] sm:$0xff] }
  0x75   : > { %9365 = vst [vmem:[#allocation25_spill] sm:$0xff] %v4470_v25  ;;  %9366 = vst [vmem:[#allocation26_spill] sm:$0xff] %v4475_v29  ;;  %v554_v39 = vadd.f32 %v210_v2, %v206_v59  ;;  %v4489_v45 = vadd.f32 %v524_v17, %v523_v52  ;;  %v4491_v42 = vadd.f32 %v531_v18, %v530_v53  ;;  %v538_v49 = vrot.slane %v537_v31, 1 }
  0x76   : > { %9367 = vst [vmem:[#allocation27_spill] sm:$0xff] %v4477_v30  ;;  %9368 = vst [vmem:[#allocation28_spill] sm:$0xff] %v4482_v36  ;;  %v561_v43 = vadd.f32 %v211_v3, %v207_v1  ;;  %v568_v46 = vadd.f32 %v216_v12, %v212_v4  ;;  %v575_v55 = vadd.f32 %v217_v13, %v213_v9  ;;  %v548_v60 = vrot.slane %v547_v38, 4  ;;  %v231_v13 = vld [vmem:[%s4398_s7 + $0x1d8] sm:$0xff] }
  0x77   : > { %9369 = vst [vmem:[#allocation29_spill] sm:$0xff] %v4484_v37  ;;  %9370 = vst [vmem:[#allocation30_spill] sm:$0xff] %v4489_v45  ;;  %v582_v56 = vadd.f32 %v218_v14, %v214_v10  ;;  %v589_v48 = vadd.f32 %v219_v19, %v215_v11  ;;  %v596_v57 = vadd.f32 %v224_v28, %v220_v20  ;;  %v555_v62 = vrot.slane %v554_v39, 4  ;;  %v235_v14 = vld [vmem:[%s4398_s7 + $0x1f8] sm:$0xff] }
  0x78   : > { %9371 = vst [vmem:[#allocation31_spill] sm:$0xff] %v4491_v42  ;;  %v542_v61 = vadd.f32 %v541_v32, %v540_v0  ;;  %v603_v58 = vadd.f32 %v225_v33, %v221_v21  ;;  %v610_v59 = vadd.f32 %v226_v34, %v222_v26  ;;  %v617_v52 = vadd.f32 %v227_v35, %v223_v27 }
  0x79   : > { %v624_v53 = vadd.f32 %v232_v41, %v228_v40  ;;  %v562_v63 = vrot.slane %v561_v43, 4  ;;  %v569_v1 = vrot.slane %v568_v46, 4  ;;  %v631_v2 = vadd.f32 %v233_v51, %v229_v44  ;;  %9465 = vst [vmem:[#allocation125_spill] sm:$0xff] %v4903_v23  ;;  %9466 = vst [vmem:[#allocation126_spill] sm:$0xff] %v4906_v22 }
  0x7a   : > { %v638_v3 = vadd.f32 %v234_v54, %v230_v47  ;;  %v576_v4 = vrot.slane %v575_v55, 4  ;;  %v583_v7 = vrot.slane %v582_v56, 4  ;;  %v590_v8 = vrot.slane %v589_v48, 4 }
  0x7b   : > { %v597_v9 = vrot.slane %v596_v57, 4  ;;  %v4496_v10 = vadd.f32 %v538_v49, %v537_v31  ;;  %v543_v11 = vrot.slane %v542_v61, 2  ;;  %v604_v0 = vrot.slane %v603_v58, 4 }
  0x7c   : > { %v611_v12 = vrot.slane %v610_v59, 4  ;;  %v549_v17 = vadd.f32 %v548_v60, %v547_v38  ;;  %v556_v18 = vadd.f32 %v555_v62, %v554_v39  ;;  %v618_v19 = vrot.slane %v617_v52, 4 }
  0x7d   : > { %9372 = vst [vmem:[#allocation32_spill] sm:$0xff] %v4496_v10  ;;  %v625_v20 = vrot.slane %v624_v53, 4  ;;  %v563_v21 = vadd.f32 %v562_v63, %v561_v43  ;;  %v570_v26 = vadd.f32 %v569_v1, %v568_v46  ;;  %v632_v27 = vrot.slane %v631_v2, 4 }
  0x7e   : > { %v639_v28 = vrot.slane %v638_v3, 4  ;;  %v577_v32 = vadd.f32 %v576_v4, %v575_v55  ;;  %v584_v33 = vadd.f32 %v583_v7, %v582_v56  ;;  %v591_v34 = vadd.f32 %v590_v8, %v589_v48 }
  0x7f   : > { %v598_v35 = vadd.f32 %v597_v9, %v596_v57  ;;  %v544_v40 = vadd.f32 %v543_v11, %v542_v61  ;;  %v605_v31 = vadd.f32 %v604_v0, %v603_v58  ;;  %v612_v44 = vadd.f32 %v611_v12, %v610_v59 }
  0x80   : > { %v645_v41 = vadd.f32 %v235_v14, %v231_v13  ;;  %v550_v47 = vrot.slane %v549_v17, 2  ;;  %v557_v51 = vrot.slane %v556_v18, 2  ;;  %v619_v54 = vadd.f32 %v618_v19, %v617_v52 }
  0x81   : > { %v626_v49 = vadd.f32 %v625_v20, %v624_v53  ;;  %v564_v38 = vrot.slane %v563_v21, 2  ;;  %v571_v39 = vrot.slane %v570_v26, 2  ;;  %v633_v60 = vadd.f32 %v632_v27, %v631_v2 }
  0x82   : > { %v640_v62 = vadd.f32 %v639_v28, %v638_v3  ;;  %v578_v43 = vrot.slane %v577_v32, 2  ;;  %v585_v46 = vrot.slane %v584_v33, 2  ;;  %v592_v63 = vrot.slane %v591_v34, 2 }
  0x83   : > { %v599_v1 = vrot.slane %v598_v35, 2  ;;  %v545_v55 = vrot.slane %v544_v40, 1  ;;  %v606_v56 = vrot.slane %v605_v31, 2  ;;  %v613_v48 = vrot.slane %v612_v44, 2 }
  0x84   : > { %v646_v57 = vrot.slane %v645_v41, 4  ;;  %v551_v61 = vadd.f32 %v550_v47, %v549_v17  ;;  %v558_v58 = vadd.f32 %v557_v51, %v556_v18  ;;  %v620_v59 = vrot.slane %v619_v54, 2  ;;  %v236_v17 = vld [vmem:[%s4398_s7 + $0x200] sm:$0xff]  ;;  %v241_v47 = vld [vmem:[%s4398_s7 + $0x228] sm:$0xff] }
  0x85   : > { %v627_v4 = vrot.slane %v626_v49, 2  ;;  %v565_v52 = vadd.f32 %v564_v38, %v563_v21  ;;  %v572_v53 = vadd.f32 %v571_v39, %v570_v26  ;;  %v634_v7 = vrot.slane %v633_v60, 2  ;;  %v240_v18 = vld [vmem:[%s4398_s7 + $0x220] sm:$0xff]  ;;  %v239_v39 = vld [vmem:[%s4398_s7 + $0x218] sm:$0xff] }
  0x86   : > { %v641_v8 = vrot.slane %v640_v62, 2  ;;  %v579_v2 = vadd.f32 %v578_v43, %v577_v32  ;;  %v586_v3 = vadd.f32 %v585_v46, %v584_v33  ;;  %v593_v9 = vadd.f32 %v592_v63, %v591_v34  ;;  %v244_v43 = vld [vmem:[%s4398_s7 + $0x240] sm:$0xff] }
  0x87   : > { %v600_v11 = vadd.f32 %v599_v1, %v598_v35  ;;  %v4500_v0 = vadd.f32 %v545_v55, %v544_v40  ;;  %v607_v12 = vadd.f32 %v606_v56, %v605_v31  ;;  %v614_v13 = vadd.f32 %v613_v48, %v612_v44  ;;  %v237_v44 = vld [vmem:[%s4398_s7 + $0x208] sm:$0xff]  ;;  %v246_v48 = vld [vmem:[%s4398_s7 + $0x250] sm:$0xff] }
  0x88   : > { %v647_v14 = vadd.f32 %v646_v57, %v645_v41  ;;  %v552_v19 = vrot.slane %v551_v61, 1  ;;  %v559_v20 = vrot.slane %v558_v58, 1  ;;  %v621_v21 = vadd.f32 %v620_v59, %v619_v54  ;;  %v238_v41 = vld [vmem:[%s4398_s7 + $0x210] sm:$0xff]  ;;  %v245_v56 = vld [vmem:[%s4398_s7 + $0x248] sm:$0xff]  ;;  %v247_v57 = vld [vmem:[%s4398_s7 + $0x258] sm:$0xff] }
  0x89   : > { %9373 = vst [vmem:[#allocation33_spill] sm:$0xff] %v4500_v0  ;;  %v628_v26 = vadd.f32 %v627_v4, %v626_v49  ;;  %v566_v27 = vrot.slane %v565_v52, 1  ;;  %v573_v28 = vrot.slane %v572_v53, 1  ;;  %v635_v32 = vadd.f32 %v634_v7, %v633_v60  ;;  %v242_v60 = vld [vmem:[%s4398_s7 + $0x230] sm:$0xff]  ;;  %v248_v59 = vld [vmem:[%s4398_s7 + $0x260] sm:$0xff]  ;;  %v249_v4 = vld [vmem:[%s4398_s7 + $0x268] sm:$0xff] }
  0x8a   : > { %v642_v33 = vadd.f32 %v641_v8, %v640_v62  ;;  %v580_v34 = vrot.slane %v579_v2, 1  ;;  %v587_v35 = vrot.slane %v586_v3, 1  ;;  %v594_v40 = vrot.slane %v593_v9, 1  ;;  %v243_v62 = vld [vmem:[%s4398_s7 + $0x238] sm:$0xff]  ;;  %v250_v7 = vld [vmem:[%s4398_s7 + $0x270] sm:$0xff] }
  0x8b   : > { %v601_v31 = vrot.slane %v600_v11, 1  ;;  %v608_v51 = vrot.slane %v607_v12, 1  ;;  %v615_v54 = vrot.slane %v614_v13, 1  ;;  %v648_v49 = vrot.slane %v647_v14, 2 }
  0x8c   : > { %v652_v38 = vadd.f32 %v240_v18, %v236_v17  ;;  %v4511_v46 = vadd.f32 %v552_v19, %v551_v61  ;;  %v4513_v63 = vadd.f32 %v559_v20, %v558_v58  ;;  %v622_v1 = vrot.slane %v621_v21, 1  ;;  %v251_v58 = vld [vmem:[%s4398_s7 + $0x278] sm:$0xff]  ;;  %v252_v19 = vld [vmem:[%s4398_s7 + $0x280] sm:$0xff]  ;;  %v253_v20 = vld [vmem:[%s4398_s7 + $0x288] sm:$0xff] }
  0x8d   : > { %v629_v55 = vrot.slane %v628_v26, 1  ;;  %v4521_v8 = vadd.f32 %v566_v27, %v565_v52  ;;  %v4523_v17 = vadd.f32 %v573_v28, %v572_v53  ;;  %v636_v61 = vrot.slane %v635_v32, 1  ;;  %v254_v52 = vld [vmem:[%s4398_s7 + $0x290] sm:$0xff]  ;;  %v255_v53 = vld [vmem:[%s4398_s7 + $0x298] sm:$0xff]  ;;  %v256_v27 = vld [vmem:[%s4398_s7 + $0x2a0] sm:$0xff] }
  0x8e   : > { %9374 = vst [vmem:[#allocation34_spill] sm:$0xff] %v4511_v46  ;;  %9375 = vst [vmem:[#allocation35_spill] sm:$0xff] %v4513_v63  ;;  %v643_v18 = vrot.slane %v642_v33, 1  ;;  %v4528_v63 = vadd.f32 %v580_v34, %v579_v2  ;;  %v4530_v46 = vadd.f32 %v587_v35, %v586_v3  ;;  %v4532_v0 = vadd.f32 %v594_v40, %v593_v9  ;;  %v257_v3 = vld [vmem:[%s4398_s7 + $0x2a8] sm:$0xff]  ;;  %v258_v9 = vld [vmem:[%s4398_s7 + $0x2b0] sm:$0xff] }
  0x8f   : > { %9376 = vst [vmem:[#allocation36_spill] sm:$0xff] %v4521_v8  ;;  %9377 = vst [vmem:[#allocation37_spill] sm:$0xff] %v4523_v17  ;;  %v4534_v10 = vadd.f32 %v601_v31, %v600_v11  ;;  %v4539_v28 = vadd.f32 %v608_v51, %v607_v12  ;;  %v4541_v17 = vadd.f32 %v615_v54, %v614_v13  ;;  %v653_v2 = vrot.slane %v652_v38, 4  ;;  %v259_v34 = vld [vmem:[%s4398_s7 + $0x2b8] sm:$0xff]  ;;  %v264_v12 = vld [vmem:[%s4398_s7 + $0x2e0] sm:$0xff] }
  0x90   : > { %9378 = vst [vmem:[#allocation38_spill] sm:$0xff] %v4528_v63  ;;  %9379 = vst [vmem:[#allocation39_spill] sm:$0xff] %v4530_v46  ;;  %v649_v8 = vadd.f32 %v648_v49, %v647_v14  ;;  %v4546_v35 = vadd.f32 %v622_v1, %v621_v21  ;;  %v4548_v11 = vadd.f32 %v629_v55, %v628_v26  ;;  %v262_v49 = vld [vmem:[%s4398_s7 + $0x2d0] sm:$0xff] }
  0x91   : > { %9380 = vst [vmem:[#allocation40_spill] sm:$0xff] %v4532_v0  ;;  %9381 = vst [vmem:[#allocation41_spill] sm:$0xff] %v4534_v10  ;;  %v659_v40 = vadd.f32 %v241_v47, %v237_v44  ;;  %v666_v31 = vadd.f32 %v242_v60, %v238_v41  ;;  %v260_v10 = vld [vmem:[%s4398_s7 + $0x2c0] sm:$0xff]  ;;  %v261_v0 = vld [vmem:[%s4398_s7 + $0x2c8] sm:$0xff]  ;;  %v4553_v51 = vadd.f32 %v636_v61, %v635_v32 }
  0x92   : > { %9382 = vst [vmem:[#allocation42_spill] sm:$0xff] %v4539_v28  ;;  %9383 = vst [vmem:[#allocation43_spill] sm:$0xff] %v4541_v17  ;;  %v4555_v13 = vadd.f32 %v643_v18, %v642_v33  ;;  %v673_v14 = vadd.f32 %v243_v62, %v239_v39  ;;  %v680_v54 = vadd.f32 %v248_v59, %v244_v43  ;;  %v265_v17 = vld [vmem:[%s4398_s7 + $0x2e8] sm:$0xff]  ;;  %v266_v28 = vld [vmem:[%s4398_s7 + $0x2f0] sm:$0xff]  ;;  %v650_v26 = vrot.slane %v649_v8, 1 }
  0x93   : > { %9384 = vst [vmem:[#allocation44_spill] sm:$0xff] %v4546_v35  ;;  %9385 = vst [vmem:[#allocation45_spill] sm:$0xff] %v4548_v11  ;;  %v687_v46 = vadd.f32 %v249_v4, %v245_v56  ;;  %v694_v63 = vadd.f32 %v250_v7, %v246_v48  ;;  %v701_v21 = vadd.f32 %v251_v58, %v247_v57  ;;  %v660_v47 = vrot.slane %v659_v40, 4  ;;  %v263_v58 = vld [vmem:[%s4398_s7 + $0x2d8] sm:$0xff] }
  0x94   : > { %9386 = vst [vmem:[#allocation46_spill] sm:$0xff] %v4553_v51  ;;  %9387 = vst [vmem:[#allocation47_spill] sm:$0xff] %v4555_v13  ;;  %v708_v1 = vadd.f32 %v256_v27, %v252_v19  ;;  %v654_v55 = vadd.f32 %v653_v2, %v652_v38  ;;  %v715_v44 = vadd.f32 %v257_v3, %v253_v20  ;;  %v667_v60 = vrot.slane %v666_v31, 4  ;;  %v267_v19 = vld [vmem:[%s4398_s7 + $0x2f8] sm:$0xff] }
  0x95   : > { %v722_v41 = vadd.f32 %v258_v9, %v254_v52  ;;  %v729_v32 = vadd.f32 %v259_v34, %v255_v53  ;;  %v736_v33 = vadd.f32 %v264_v12, %v260_v10  ;;  %v674_v61 = vrot.slane %v673_v14, 4 }
  0x96   : > { %v681_v39 = vrot.slane %v680_v54, 4  ;;  %v743_v62 = vadd.f32 %v265_v17, %v261_v0  ;;  %v750_v43 = vadd.f32 %v266_v28, %v262_v49  ;;  %v688_v59 = vrot.slane %v687_v46, 4 }
  0x97   : > { %v695_v18 = vrot.slane %v694_v63, 4  ;;  %v702_v56 = vrot.slane %v701_v21, 4  ;;  %v709_v48 = vrot.slane %v708_v1, 4  ;;  %v4560_v57 = vadd.f32 %v650_v26, %v649_v8 }
  0x98   : > { %v655_v4 = vrot.slane %v654_v55, 2  ;;  %v716_v38 = vrot.slane %v715_v44, 4  ;;  %v723_v7 = vrot.slane %v722_v41, 4  ;;  %v661_v20 = vadd.f32 %v660_v47, %v659_v40 }
  0x99   : > { %9388 = vst [vmem:[#allocation48_spill] sm:$0xff] %v4560_v57  ;;  %v668_v52 = vadd.f32 %v667_v60, %v666_v31  ;;  %v730_v27 = vrot.slane %v729_v32, 4  ;;  %v737_v53 = vrot.slane %v736_v33, 4  ;;  %v675_v10 = vadd.f32 %v674_v61, %v673_v14 }
  0x9a   : > { %v682_v2 = vadd.f32 %v681_v39, %v680_v54  ;;  %v744_v3 = vrot.slane %v743_v62, 4  ;;  %v751_v0 = vrot.slane %v750_v43, 4  ;;  %v689_v17 = vadd.f32 %v688_v59, %v687_v46 }
  0x9b   : > { %v696_v28 = vadd.f32 %v695_v18, %v694_v63  ;;  %v703_v9 = vadd.f32 %v702_v56, %v701_v21  ;;  %v710_v34 = vadd.f32 %v709_v48, %v708_v1  ;;  %v656_v12 = vadd.f32 %v655_v4, %v654_v55 }
  0x9c   : > { %v717_v8 = vadd.f32 %v716_v38, %v715_v44  ;;  %v724_v49 = vadd.f32 %v723_v7, %v722_v41  ;;  %v757_v26 = vadd.f32 %v267_v19, %v263_v58  ;;  %v662_v57 = vrot.slane %v661_v20, 2 }
  0x9d   : > { %v669_v13 = vrot.slane %v668_v52, 2  ;;  %v731_v51 = vadd.f32 %v730_v27, %v729_v32  ;;  %v738_v11 = vadd.f32 %v737_v53, %v736_v33  ;;  %v676_v40 = vrot.slane %v675_v10, 2 }
  0x9e   : > { %v683_v31 = vrot.slane %v682_v2, 2  ;;  %v745_v47 = vadd.f32 %v744_v3, %v743_v62  ;;  %v752_v60 = vadd.f32 %v751_v0, %v750_v43  ;;  %v690_v14 = vrot.slane %v689_v17, 2 }
  0x9f   : > { %v697_v54 = vrot.slane %v696_v28, 2  ;;  %v704_v61 = vrot.slane %v703_v9, 2  ;;  %v711_v39 = vrot.slane %v710_v34, 2  ;;  %v657_v46 = vrot.slane %v656_v12, 1 }
  0xa0   : > { %v718_v63 = vrot.slane %v717_v8, 2  ;;  %v725_v21 = vrot.slane %v724_v49, 2  ;;  %v758_v1 = vrot.slane %v757_v26, 4  ;;  %v663_v55 = vadd.f32 %v662_v57, %v661_v20  ;;  %v268_v57 = vld [vmem:[%s4398_s7 + $0x300] sm:$0xff] }
  0xa1   : > { %v670_v44 = vadd.f32 %v669_v13, %v668_v52  ;;  %v732_v41 = vrot.slane %v731_v51, 2  ;;  %v739_v59 = vrot.slane %v738_v11, 2  ;;  %v677_v32 = vadd.f32 %v676_v40, %v675_v10  ;;  %v272_v13 = vld [vmem:[%s4398_s7 + $0x320] sm:$0xff] }
  0xa2   : > { %v684_v33 = vadd.f32 %v683_v31, %v682_v2  ;;  %v746_v18 = vrot.slane %v745_v47, 2  ;;  %v753_v56 = vrot.slane %v752_v60, 2  ;;  %v691_v62 = vadd.f32 %v690_v14, %v689_v17  ;;  %v271_v31 = vld [vmem:[%s4398_s7 + $0x318] sm:$0xff]  ;;  %v276_v14 = vld [vmem:[%s4398_s7 + $0x340] sm:$0xff] }
  0xa3   : > { %v698_v43 = vadd.f32 %v697_v54, %v696_v28  ;;  %v705_v48 = vadd.f32 %v704_v61, %v703_v9  ;;  %v712_v4 = vadd.f32 %v711_v39, %v710_v34  ;;  %v4564_v38 = vadd.f32 %v657_v46, %v656_v12  ;;  %v269_v12 = vld [vmem:[%s4398_s7 + $0x308] sm:$0xff] }
  0xa4   : > { %v719_v7 = vadd.f32 %v718_v63, %v717_v8  ;;  %v726_v58 = vadd.f32 %v725_v21, %v724_v49  ;;  %v759_v19 = vadd.f32 %v758_v1, %v757_v26  ;;  %v664_v20 = vrot.slane %v663_v55, 1  ;;  %v270_v8 = vld [vmem:[%s4398_s7 + $0x310] sm:$0xff]  ;;  %v273_v49 = vld [vmem:[%s4398_s7 + $0x328] sm:$0xff]  ;;  %v279_v1 = vld [vmem:[%s4398_s7 + $0x358] sm:$0xff] }
  0xa5   : > { %9389 = vst [vmem:[#allocation49_spill] sm:$0xff] %v4564_v38  ;;  %v671_v52 = vrot.slane %v670_v44, 1  ;;  %v733_v27 = vadd.f32 %v732_v41, %v731_v51  ;;  %v740_v53 = vadd.f32 %v739_v59, %v738_v11  ;;  %v678_v10 = vrot.slane %v677_v32, 1  ;;  %v277_v63 = vld [vmem:[%s4398_s7 + $0x348] sm:$0xff]  ;;  %v278_v21 = vld [vmem:[%s4398_s7 + $0x350] sm:$0xff]  ;;  %v280_v41 = vld [vmem:[%s4398_s7 + $0x360] sm:$0xff] }
  0xa6   : > { %v685_v2 = vrot.slane %v684_v33, 1  ;;  %v747_v3 = vadd.f32 %v746_v18, %v745_v47  ;;  %v754_v0 = vadd.f32 %v753_v56, %v752_v60  ;;  %v692_v17 = vrot.slane %v691_v62, 1  ;;  %v274_v47 = vld [vmem:[%s4398_s7 + $0x330] sm:$0xff]  ;;  %v275_v60 = vld [vmem:[%s4398_s7 + $0x338] sm:$0xff]  ;;  %v281_v59 = vld [vmem:[%s4398_s7 + $0x368] sm:$0xff] }
  0xa7   : > { %v699_v28 = vrot.slane %v698_v43, 1  ;;  %v706_v9 = vrot.slane %v705_v48, 1  ;;  %v713_v34 = vrot.slane %v712_v4, 1  ;;  %v720_v11 = vrot.slane %v719_v7, 1  ;;  %v282_v18 = vld [vmem:[%s4398_s7 + $0x370] sm:$0xff] }
  0xa8   : > { %v727_v51 = vrot.slane %v726_v58, 1  ;;  %v760_v26 = vrot.slane %v759_v19, 2  ;;  %v764_v40 = vadd.f32 %v272_v13, %v268_v57  ;;  %v4575_v54 = vadd.f32 %v664_v20, %v663_v55  ;;  %v284_v20 = vld [vmem:[%s4398_s7 + $0x380] sm:$0xff] }
  0xa9   : > { %v4577_v61 = vadd.f32 %v671_v52, %v670_v44  ;;  %v734_v39 = vrot.slane %v733_v27, 1  ;;  %v741_v46 = vrot.slane %v740_v53, 1  ;;  %v4585_v56 = vadd.f32 %v678_v10, %v677_v32  ;;  %v283_v44 = vld [vmem:[%s4398_s7 + $0x378] sm:$0xff]  ;;  %v285_v52 = vld [vmem:[%s4398_s7 + $0x388] sm:$0xff]  ;;  %v286_v32 = vld [vmem:[%s4398_s7 + $0x390] sm:$0xff] }
  0xaa   : > { %9390 = vst [vmem:[#allocation50_spill] sm:$0xff] %v4575_v54  ;;  %v4587_v57 = vadd.f32 %v685_v2, %v684_v33  ;;  %v748_v55 = vrot.slane %v747_v3, 1  ;;  %v755_v13 = vrot.slane %v754_v0, 1  ;;  %v4594_v54 = vadd.f32 %v699_v28, %v698_v43  ;;  %v287_v33 = vld [vmem:[%s4398_s7 + $0x398] sm:$0xff]  ;;  %v288_v10 = vld [vmem:[%s4398_s7 + $0x3a0] sm:$0xff]  ;;  %v289_v43 = vld [vmem:[%s4398_s7 + $0x3a8] sm:$0xff] }
  0xab   : > { %9391 = vst [vmem:[#allocation51_spill] sm:$0xff] %v4577_v61  ;;  %9392 = vst [vmem:[#allocation52_spill] sm:$0xff] %v4585_v56  ;;  %v4592_v61 = vadd.f32 %v692_v17, %v691_v62  ;;  %v4596_v38 = vadd.f32 %v706_v9, %v705_v48  ;;  %v4598_v35 = vadd.f32 %v713_v34, %v712_v4  ;;  %v765_v62 = vrot.slane %v764_v40, 4  ;;  %v290_v48 = vld [vmem:[%s4398_s7 + $0x3b0] sm:$0xff]  ;;  %v291_v17 = vld [vmem:[%s4398_s7 + $0x3b8] sm:$0xff] }
  0xac   : > { %9393 = vst [vmem:[#allocation53_spill] sm:$0xff] %v4587_v57  ;;  %9395 = vst [vmem:[#allocation55_spill] sm:$0xff] %v4594_v54  ;;  %v4603_v2 = vadd.f32 %v720_v11, %v719_v7  ;;  %v4605_v57 = vadd.f32 %v727_v51, %v726_v58  ;;  %v761_v56 = vadd.f32 %v760_v26, %v759_v19  ;;  %v296_v7 = vld [vmem:[%s4398_s7 + $0x3e0] sm:$0xff]  ;;  %v294_v26 = vld [vmem:[%s4398_s7 + $0x3d0] sm:$0xff] }
  0xad   : > { %9394 = vst [vmem:[#allocation54_spill] sm:$0xff] %v4592_v61  ;;  %9396 = vst [vmem:[#allocation56_spill] sm:$0xff] %v4596_v38  ;;  %v4610_v28 = vadd.f32 %v734_v39, %v733_v27  ;;  %v4612_v4 = vadd.f32 %v741_v46, %v740_v53  ;;  %v771_v9 = vadd.f32 %v273_v49, %v269_v12  ;;  %v293_v38 = vld [vmem:[%s4398_s7 + $0x3c8] sm:$0xff] }
  0xae   : > { %9397 = vst [vmem:[#allocation57_spill] sm:$0xff] %v4598_v35  ;;  %9398 = vst [vmem:[#allocation58_spill] sm:$0xff] %v4603_v2  ;;  %v778_v34 = vadd.f32 %v274_v47, %v270_v8  ;;  %v292_v35 = vld [vmem:[%s4398_s7 + $0x3c0] sm:$0xff]  ;;  %v4617_v11 = vadd.f32 %v748_v55, %v747_v3  ;;  %v4619_v58 = vadd.f32 %v755_v13, %v754_v0  ;;  %v298_v2 = vld [vmem:[%s4398_s7 + $0x3f0] sm:$0xff]  ;;  %v762_v53 = vrot.slane %v761_v56, 1 }
  0xaf   : > { %9399 = vst [vmem:[#allocation59_spill] sm:$0xff] %v4605_v57  ;;  %9400 = vst [vmem:[#allocation60_spill] sm:$0xff] %v4610_v28  ;;  %v785_v19 = vadd.f32 %v275_v60, %v271_v31  ;;  %v792_v51 = vadd.f32 %v280_v41, %v276_v14  ;;  %v297_v57 = vld [vmem:[%s4398_s7 + $0x3e8] sm:$0xff]  ;;  %v799_v54 = vadd.f32 %v281_v59, %v277_v63  ;;  %v772_v49 = vrot.slane %v771_v9, 4 }
  0xb0   : > { %9401 = vst [vmem:[#allocation61_spill] sm:$0xff] %v4612_v4  ;;  %9402 = vst [vmem:[#allocation62_spill] sm:$0xff] %v4617_v11  ;;  %v806_v61 = vadd.f32 %v282_v18, %v278_v21  ;;  %v813_v27 = vadd.f32 %v283_v44, %v279_v1  ;;  %v820_v39 = vadd.f32 %v288_v10, %v284_v20  ;;  %v779_v47 = vrot.slane %v778_v34, 4  ;;  %v295_v44 = vld [vmem:[%s4398_s7 + $0x3d8] sm:$0xff] }
  0xb1   : > { %9403 = vst [vmem:[#allocation63_spill] sm:$0xff] %v4619_v58  ;;  %v766_v46 = vadd.f32 %v765_v62, %v764_v40  ;;  %v827_v12 = vadd.f32 %v289_v43, %v285_v52  ;;  %v834_v8 = vadd.f32 %v290_v48, %v286_v32  ;;  %v841_v3 = vadd.f32 %v291_v17, %v287_v33  ;;  %v299_v20 = vld [vmem:[%s4398_s7 + $0x3f8] sm:$0xff] }
  0xb2   : > { %v848_v0 = vadd.f32 %v296_v7, %v292_v35  ;;  %v786_v55 = vrot.slane %v785_v19, 4  ;;  %v793_v31 = vrot.slane %v792_v51, 4  ;;  %v855_v60 = vadd.f32 %v297_v57, %v293_v38 }
  0xb3   : > { %v862_v14 = vadd.f32 %v298_v2, %v294_v26  ;;  %v800_v41 = vrot.slane %v799_v54, 4  ;;  %v807_v13 = vrot.slane %v806_v61, 4  ;;  %v814_v63 = vrot.slane %v813_v27, 4 }
  0xb4   : > { %v821_v21 = vrot.slane %v820_v39, 4  ;;  %v4624_v1 = vadd.f32 %v762_v53, %v761_v56  ;;  %v767_v59 = vrot.slane %v766_v46, 2  ;;  %v828_v40 = vrot.slane %v827_v12, 4 }
  0xb5   : > { %v835_v18 = vrot.slane %v834_v8, 4  ;;  %v773_v52 = vadd.f32 %v772_v49, %v771_v9  ;;  %v780_v32 = vadd.f32 %v779_v47, %v778_v34  ;;  %v842_v10 = vrot.slane %v841_v3, 4 }
  0xb6   : > { %9404 = vst [vmem:[#allocation64_spill] sm:$0xff] %v4624_v1  ;;  %v849_v33 = vrot.slane %v848_v0, 4  ;;  %v787_v35 = vadd.f32 %v786_v55, %v785_v19  ;;  %v794_v62 = vadd.f32 %v793_v31, %v792_v51  ;;  %v856_v43 = vrot.slane %v855_v60, 4 }
  0xb7   : > { %v863_v38 = vrot.slane %v862_v14, 4  ;;  %v801_v57 = vadd.f32 %v800_v41, %v799_v54  ;;  %v808_v2 = vadd.f32 %v807_v13, %v806_v61  ;;  %v815_v48 = vadd.f32 %v814_v63, %v813_v27 }
  0xb8   : > { %v822_v17 = vadd.f32 %v821_v21, %v820_v39  ;;  %v768_v7 = vadd.f32 %v767_v59, %v766_v46  ;;  %v829_v56 = vadd.f32 %v828_v40, %v827_v12  ;;  %v836_v26 = vadd.f32 %v835_v18, %v834_v8 }
  0xb9   : > { %v869_v53 = vadd.f32 %v299_v20, %v295_v44  ;;  %v774_v1 = vrot.slane %v773_v52, 2  ;;  %v781_v58 = vrot.slane %v780_v32, 2  ;;  %v843_v11 = vadd.f32 %v842_v10, %v841_v3 }
  0xba   : > { %v850_v4 = vadd.f32 %v849_v33, %v848_v0  ;;  %v788_v9 = vrot.slane %v787_v35, 2  ;;  %v795_v34 = vrot.slane %v794_v62, 2  ;;  %v857_v49 = vadd.f32 %v856_v43, %v855_v60 }
  0xbb   : > { %v864_v47 = vadd.f32 %v863_v38, %v862_v14  ;;  %v802_v19 = vrot.slane %v801_v57, 2  ;;  %v809_v51 = vrot.slane %v808_v2, 2  ;;  %v816_v55 = vrot.slane %v815_v48, 2 }
  0xbc   : > { %v823_v31 = vrot.slane %v822_v17, 2  ;;  %v769_v54 = vrot.slane %v768_v7, 1  ;;  %v830_v61 = vrot.slane %v829_v56, 2  ;;  %v837_v27 = vrot.slane %v836_v26, 2 }
  0xbd   : > { %v870_v39 = vrot.slane %v869_v53, 4  ;;  %v775_v46 = vadd.f32 %v774_v1, %v773_v52  ;;  %v782_v12 = vadd.f32 %v781_v58, %v780_v32  ;;  %v844_v8 = vrot.slane %v843_v11, 2  ;;  %v300_v1 = vld [vmem:[%s4398_s7 + $0x400] sm:$0xff] }
  0xbe   : > { %v851_v41 = vrot.slane %v850_v4, 2  ;;  %v789_v3 = vadd.f32 %v788_v9, %v787_v35  ;;  %v796_v0 = vadd.f32 %v795_v34, %v794_v62  ;;  %v858_v13 = vrot.slane %v857_v49, 2  ;;  %v304_v58 = vld [vmem:[%s4398_s7 + $0x420] sm:$0xff]  ;;  %v303_v34 = vld [vmem:[%s4398_s7 + $0x418] sm:$0xff] }
  0xbf   : > { %v865_v63 = vrot.slane %v864_v47, 2  ;;  %v803_v60 = vadd.f32 %v802_v19, %v801_v57  ;;  %v810_v14 = vadd.f32 %v809_v51, %v808_v2  ;;  %v817_v21 = vadd.f32 %v816_v55, %v815_v48  ;;  %v308_v19 = vld [vmem:[%s4398_s7 + $0x440] sm:$0xff] }
  0xc0   : > { %v824_v59 = vadd.f32 %v823_v31, %v822_v17  ;;  %v4628_v40 = vadd.f32 %v769_v54, %v768_v7  ;;  %v831_v18 = vadd.f32 %v830_v61, %v829_v56  ;;  %v838_v44 = vadd.f32 %v837_v27, %v836_v26  ;;  %v301_v7 = vld [vmem:[%s4398_s7 + $0x408] sm:$0xff]  ;;  %v302_v56 = vld [vmem:[%s4398_s7 + $0x410] sm:$0xff] }
  0xc1   : > { %v871_v20 = vadd.f32 %v870_v39, %v869_v53  ;;  %v776_v52 = vrot.slane %v775_v46, 1  ;;  %v783_v32 = vrot.slane %v782_v12, 1  ;;  %v845_v10 = vadd.f32 %v844_v8, %v843_v11  ;;  %v305_v26 = vld [vmem:[%s4398_s7 + $0x428] sm:$0xff]  ;;  %v310_v27 = vld [vmem:[%s4398_s7 + $0x450] sm:$0xff]  ;;  %v311_v39 = vld [vmem:[%s4398_s7 + $0x458] sm:$0xff] }
  0xc2   : > { %9405 = vst [vmem:[#allocation65_spill] sm:$0xff] %v4628_v40  ;;  %v852_v33 = vadd.f32 %v851_v41, %v850_v4  ;;  %v790_v35 = vrot.slane %v789_v3, 1  ;;  %v797_v62 = vrot.slane %v796_v0, 1  ;;  %v859_v43 = vadd.f32 %v858_v13, %v857_v49  ;;  %v306_v49 = vld [vmem:[%s4398_s7 + $0x430] sm:$0xff]  ;;  %v309_v61 = vld [vmem:[%s4398_s7 + $0x448] sm:$0xff]  ;;  %v312_v8 = vld [vmem:[%s4398_s7 + $0x460] sm:$0xff] }
  0xc3   : > { %v866_v38 = vadd.f32 %v865_v63, %v864_v47  ;;  %v804_v57 = vrot.slane %v803_v60, 1  ;;  %v811_v2 = vrot.slane %v810_v14, 1  ;;  %v818_v48 = vrot.slane %v817_v21, 1  ;;  %v307_v47 = vld [vmem:[%s4398_s7 + $0x438] sm:$0xff]  ;;  %v313_v41 = vld [vmem:[%s4398_s7 + $0x468] sm:$0xff]  ;;  %v314_v13 = vld [vmem:[%s4398_s7 + $0x470] sm:$0xff] }
  0xc4   : > { %v825_v17 = vrot.slane %v824_v59, 1  ;;  %v832_v4 = vrot.slane %v831_v18, 1  ;;  %v839_v11 = vrot.slane %v838_v44, 1  ;;  %v872_v53 = vrot.slane %v871_v20, 2 }
  0xc5   : > { %v876_v9 = vadd.f32 %v304_v58, %v300_v1  ;;  %v4639_v51 = vadd.f32 %v776_v52, %v775_v46  ;;  %v4641_v55 = vadd.f32 %v783_v32, %v782_v12  ;;  %v846_v31 = vrot.slane %v845_v10, 1  ;;  %v315_v12 = vld [vmem:[%s4398_s7 + $0x478] sm:$0xff]  ;;  %v316_v52 = vld [vmem:[%s4398_s7 + $0x480] sm:$0xff]  ;;  %v317_v32 = vld [vmem:[%s4398_s7 + $0x488] sm:$0xff] }
  0xc6   : > { %v853_v54 = vrot.slane %v852_v33, 1  ;;  %v4649_v63 = vadd.f32 %v790_v35, %v789_v3  ;;  %v4651_v1 = vadd.f32 %v797_v62, %v796_v0  ;;  %v860_v46 = vrot.slane %v859_v43, 1  ;;  %v318_v3 = vld [vmem:[%s4398_s7 + $0x490] sm:$0xff]  ;;  %v319_v0 = vld [vmem:[%s4398_s7 + $0x498] sm:$0xff]  ;;  %v320_v35 = vld [vmem:[%s4398_s7 + $0x4a0] sm:$0xff] }
  0xc7   : > { %9406 = vst [vmem:[#allocation66_spill] sm:$0xff] %v4639_v51  ;;  %9407 = vst [vmem:[#allocation67_spill] sm:$0xff] %v4641_v55  ;;  %v867_v58 = vrot.slane %v866_v38, 1  ;;  %v4656_v55 = vadd.f32 %v804_v57, %v803_v60  ;;  %v4658_v51 = vadd.f32 %v811_v2, %v810_v14  ;;  %v4660_v40 = vadd.f32 %v818_v48, %v817_v21  ;;  %v321_v14 = vld [vmem:[%s4398_s7 + $0x4a8] sm:$0xff]  ;;  %v322_v21 = vld [vmem:[%s4398_s7 + $0x4b0] sm:$0xff] }
  0xc8   : > { %9408 = vst [vmem:[#allocation68_spill] sm:$0xff] %v4649_v63  ;;  %9409 = vst [vmem:[#allocation69_spill] sm:$0xff] %v4651_v1  ;;  %v4662_v28 = vadd.f32 %v825_v17, %v824_v59  ;;  %v4667_v62 = vadd.f32 %v832_v4, %v831_v18  ;;  %v4669_v1 = vadd.f32 %v839_v11, %v838_v44  ;;  %v877_v60 = vrot.slane %v876_v9, 4  ;;  %v323_v57 = vld [vmem:[%s4398_s7 + $0x4b8] sm:$0xff]  ;;  %v328_v18 = vld [vmem:[%s4398_s7 + $0x4e0] sm:$0xff] }
  0xc9   : > { %9410 = vst [vmem:[#allocation70_spill] sm:$0xff] %v4656_v55  ;;  %9411 = vst [vmem:[#allocation71_spill] sm:$0xff] %v4658_v51  ;;  %v873_v63 = vadd.f32 %v872_v53, %v871_v20  ;;  %v4674_v2 = vadd.f32 %v846_v31, %v845_v10  ;;  %v4676_v59 = vadd.f32 %v853_v54, %v852_v33  ;;  %v326_v53 = vld [vmem:[%s4398_s7 + $0x4d0] sm:$0xff] }
  0xca   : > { %9412 = vst [vmem:[#allocation72_spill] sm:$0xff] %v4660_v40  ;;  %9413 = vst [vmem:[#allocation73_spill] sm:$0xff] %v4662_v28  ;;  %v883_v48 = vadd.f32 %v305_v26, %v301_v7  ;;  %v890_v17 = vadd.f32 %v306_v49, %v302_v56  ;;  %v324_v28 = vld [vmem:[%s4398_s7 + $0x4c0] sm:$0xff]  ;;  %v325_v40 = vld [vmem:[%s4398_s7 + $0x4c8] sm:$0xff]  ;;  %v4681_v4 = vadd.f32 %v860_v46, %v859_v43 }
  0xcb   : > { %9414 = vst [vmem:[#allocation74_spill] sm:$0xff] %v4667_v62  ;;  %9415 = vst [vmem:[#allocation75_spill] sm:$0xff] %v4669_v1  ;;  %v4683_v44 = vadd.f32 %v867_v58, %v866_v38  ;;  %v897_v20 = vadd.f32 %v307_v47, %v303_v34  ;;  %v904_v11 = vadd.f32 %v312_v8, %v308_v19  ;;  %v329_v1 = vld [vmem:[%s4398_s7 + $0x4e8] sm:$0xff]  ;;  %v330_v62 = vld [vmem:[%s4398_s7 + $0x4f0] sm:$0xff]  ;;  %v874_v33 = vrot.slane %v873_v63, 1 }
  0xcc   : > { %9416 = vst [vmem:[#allocation76_spill] sm:$0xff] %v4674_v2  ;;  %9417 = vst [vmem:[#allocation77_spill] sm:$0xff] %v4676_v59  ;;  %v911_v51 = vadd.f32 %v313_v41, %v309_v61  ;;  %v918_v55 = vadd.f32 %v314_v13, %v310_v27  ;;  %v925_v10 = vadd.f32 %v315_v12, %v311_v39  ;;  %v884_v26 = vrot.slane %v883_v48, 4  ;;  %v327_v12 = vld [vmem:[%s4398_s7 + $0x4d8] sm:$0xff] }
  0xcd   : > { %9418 = vst [vmem:[#allocation78_spill] sm:$0xff] %v4681_v4  ;;  %9419 = vst [vmem:[#allocation79_spill] sm:$0xff] %v4683_v44  ;;  %v932_v31 = vadd.f32 %v320_v35, %v316_v52  ;;  %v878_v54 = vadd.f32 %v877_v60, %v876_v9  ;;  %v939_v7 = vadd.f32 %v321_v14, %v317_v32  ;;  %v891_v49 = vrot.slane %v890_v17, 4  ;;  %v331_v52 = vld [vmem:[%s4398_s7 + $0x4f8] sm:$0xff] }
  0xce   : > { %v946_v56 = vadd.f32 %v322_v21, %v318_v3  ;;  %v953_v43 = vadd.f32 %v323_v57, %v319_v0  ;;  %v960_v38 = vadd.f32 %v328_v18, %v324_v28  ;;  %v898_v46 = vrot.slane %v897_v20, 4 }
  0xcf   : > { %v905_v34 = vrot.slane %v904_v11, 4  ;;  %v967_v47 = vadd.f32 %v329_v1, %v325_v40  ;;  %v974_v19 = vadd.f32 %v330_v62, %v326_v53  ;;  %v912_v8 = vrot.slane %v911_v51, 4 }
  0xd0   : > { %v919_v58 = vrot.slane %v918_v55, 4  ;;  %v926_v61 = vrot.slane %v925_v10, 4  ;;  %v933_v27 = vrot.slane %v932_v31, 4  ;;  %v4688_v39 = vadd.f32 %v874_v33, %v873_v63 }
  0xd1   : > { %v879_v41 = vrot.slane %v878_v54, 2  ;;  %v940_v9 = vrot.slane %v939_v7, 4  ;;  %v947_v13 = vrot.slane %v946_v56, 4  ;;  %v885_v32 = vadd.f32 %v884_v26, %v883_v48 }
  0xd2   : > { %9420 = vst [vmem:[#allocation80_spill] sm:$0xff] %v4688_v39  ;;  %v892_v3 = vadd.f32 %v891_v49, %v890_v17  ;;  %v954_v35 = vrot.slane %v953_v43, 4  ;;  %v961_v0 = vrot.slane %v960_v38, 4  ;;  %v899_v28 = vadd.f32 %v898_v46, %v897_v20 }
  0xd3   : > { %v906_v60 = vadd.f32 %v905_v34, %v904_v11  ;;  %v968_v14 = vrot.slane %v967_v47, 4  ;;  %v975_v40 = vrot.slane %v974_v19, 4  ;;  %v913_v1 = vadd.f32 %v912_v8, %v911_v51 }
  0xd4   : > { %v920_v62 = vadd.f32 %v919_v58, %v918_v55  ;;  %v927_v21 = vadd.f32 %v926_v61, %v925_v10  ;;  %v934_v57 = vadd.f32 %v933_v27, %v932_v31  ;;  %v880_v18 = vadd.f32 %v879_v41, %v878_v54 }
  0xd5   : > { %v941_v63 = vadd.f32 %v940_v9, %v939_v7  ;;  %v948_v53 = vadd.f32 %v947_v13, %v946_v56  ;;  %v981_v33 = vadd.f32 %v331_v52, %v327_v12  ;;  %v886_v39 = vrot.slane %v885_v32, 2 }
  0xd6   : > { %v893_v44 = vrot.slane %v892_v3, 2  ;;  %v955_v4 = vadd.f32 %v954_v35, %v953_v43  ;;  %v962_v59 = vadd.f32 %v961_v0, %v960_v38  ;;  %v900_v48 = vrot.slane %v899_v28, 2 }
  0xd7   : > { %v907_v17 = vrot.slane %v906_v60, 2  ;;  %v969_v26 = vadd.f32 %v968_v14, %v967_v47  ;;  %v976_v49 = vadd.f32 %v975_v40, %v974_v19  ;;  %v914_v20 = vrot.slane %v913_v1, 2 }
  0xd8   : > { %v921_v11 = vrot.slane %v920_v62, 2  ;;  %v928_v46 = vrot.slane %v927_v21, 2  ;;  %v935_v34 = vrot.slane %v934_v57, 2  ;;  %v881_v51 = vrot.slane %v880_v18, 1 }
  0xd9   : > { %v942_v55 = vrot.slane %v941_v63, 2  ;;  %v949_v10 = vrot.slane %v948_v53, 2  ;;  %v982_v31 = vrot.slane %v981_v33, 4  ;;  %v887_v54 = vadd.f32 %v886_v39, %v885_v32  ;;  %v332_v39 = vld [vmem:[%s4398_s7 + $0x500] sm:$0xff] }
  0xda   : > { %v894_v7 = vadd.f32 %v893_v44, %v892_v3  ;;  %v956_v56 = vrot.slane %v955_v4, 2  ;;  %v963_v8 = vrot.slane %v962_v59, 2  ;;  %v901_v43 = vadd.f32 %v900_v48, %v899_v28  ;;  %v336_v44 = vld [vmem:[%s4398_s7 + $0x520] sm:$0xff] }
  0xdb   : > { %v908_v38 = vadd.f32 %v907_v17, %v906_v60  ;;  %v970_v58 = vrot.slane %v969_v26, 2  ;;  %v977_v61 = vrot.slane %v976_v49, 2  ;;  %v915_v47 = vadd.f32 %v914_v20, %v913_v1  ;;  %v335_v17 = vld [vmem:[%s4398_s7 + $0x518] sm:$0xff]  ;;  %v340_v20 = vld [vmem:[%s4398_s7 + $0x540] sm:$0xff] }
  0xdc   : > { %v922_v19 = vadd.f32 %v921_v11, %v920_v62  ;;  %v929_v27 = vadd.f32 %v928_v46, %v927_v21  ;;  %v936_v41 = vadd.f32 %v935_v34, %v934_v57  ;;  %v4692_v9 = vadd.f32 %v881_v51, %v880_v18  ;;  %v333_v18 = vld [vmem:[%s4398_s7 + $0x508] sm:$0xff] }
  0xdd   : > { %v943_v13 = vadd.f32 %v942_v55, %v941_v63  ;;  %v950_v12 = vadd.f32 %v949_v10, %v948_v53  ;;  %v983_v52 = vadd.f32 %v982_v31, %v981_v33  ;;  %v888_v32 = vrot.slane %v887_v54, 1  ;;  %v334_v63 = vld [vmem:[%s4398_s7 + $0x510] sm:$0xff]  ;;  %v337_v53 = vld [vmem:[%s4398_s7 + $0x528] sm:$0xff]  ;;  %v343_v31 = vld [vmem:[%s4398_s7 + $0x558] sm:$0xff] }
  0xde   : > { %9421 = vst [vmem:[#allocation81_spill] sm:$0xff] %v4692_v9  ;;  %v895_v3 = vrot.slane %v894_v7, 1  ;;  %v957_v35 = vadd.f32 %v956_v56, %v955_v4  ;;  %v964_v0 = vadd.f32 %v963_v8, %v962_v59  ;;  %v902_v28 = vrot.slane %v901_v43, 1  ;;  %v341_v55 = vld [vmem:[%s4398_s7 + $0x548] sm:$0xff]  ;;  %v342_v10 = vld [vmem:[%s4398_s7 + $0x550] sm:$0xff]  ;;  %v344_v56 = vld [vmem:[%s4398_s7 + $0x560] sm:$0xff] }
  0xdf   : > { %v909_v60 = vrot.slane %v908_v38, 1  ;;  %v971_v14 = vadd.f32 %v970_v58, %v969_v26  ;;  %v978_v40 = vadd.f32 %v977_v61, %v976_v49  ;;  %v916_v1 = vrot.slane %v915_v47, 1  ;;  %v338_v26 = vld [vmem:[%s4398_s7 + $0x530] sm:$0xff]  ;;  %v339_v49 = vld [vmem:[%s4398_s7 + $0x538] sm:$0xff]  ;;  %v345_v8 = vld [vmem:[%s4398_s7 + $0x568] sm:$0xff] }
  0xe0   : > { %v923_v62 = vrot.slane %v922_v19, 1  ;;  %v930_v21 = vrot.slane %v929_v27, 1  ;;  %v937_v57 = vrot.slane %v936_v41, 1  ;;  %v944_v59 = vrot.slane %v943_v13, 1  ;;  %v346_v58 = vld [vmem:[%s4398_s7 + $0x570] sm:$0xff] }
  0xe1   : > { %v951_v4 = vrot.slane %v950_v12, 1  ;;  %v984_v33 = vrot.slane %v983_v52, 2  ;;  %v988_v48 = vadd.f32 %v336_v44, %v332_v39  ;;  %v4703_v11 = vadd.f32 %v888_v32, %v887_v54  ;;  %v348_v32 = vld [vmem:[%s4398_s7 + $0x580] sm:$0xff] }
  0xe2   : > { %v4705_v46 = vadd.f32 %v895_v3, %v894_v7  ;;  %v958_v34 = vrot.slane %v957_v35, 1  ;;  %v965_v51 = vrot.slane %v964_v0, 1  ;;  %v4713_v61 = vadd.f32 %v902_v28, %v901_v43  ;;  %v347_v7 = vld [vmem:[%s4398_s7 + $0x578] sm:$0xff]  ;;  %v349_v3 = vld [vmem:[%s4398_s7 + $0x588] sm:$0xff]  ;;  %v350_v43 = vld [vmem:[%s4398_s7 + $0x590] sm:$0xff] }
  0xe3   : > { %9422 = vst [vmem:[#allocation82_spill] sm:$0xff] %v4703_v11  ;;  %v4715_v39 = vadd.f32 %v909_v60, %v908_v38  ;;  %v972_v54 = vrot.slane %v971_v14, 1  ;;  %v979_v44 = vrot.slane %v978_v40, 1  ;;  %v4722_v11 = vadd.f32 %v923_v62, %v922_v19  ;;  %v351_v38 = vld [vmem:[%s4398_s7 + $0x598] sm:$0xff]  ;;  %v352_v28 = vld [vmem:[%s4398_s7 + $0x5a0] sm:$0xff]  ;;  %v353_v19 = vld [vmem:[%s4398_s7 + $0x5a8] sm:$0xff] }
  0xe4   : > { %9423 = vst [vmem:[#allocation83_spill] sm:$0xff] %v4705_v46  ;;  %9424 = vst [vmem:[#allocation84_spill] sm:$0xff] %v4713_v61  ;;  %v4720_v46 = vadd.f32 %v916_v1, %v915_v47  ;;  %v4724_v9 = vadd.f32 %v930_v21, %v929_v27  ;;  %v4726_v2 = vadd.f32 %v937_v57, %v936_v41  ;;  %v989_v47 = vrot.slane %v988_v48, 4  ;;  %v354_v27 = vld [vmem:[%s4398_s7 + $0x5b0] sm:$0xff]  ;;  %v355_v1 = vld [vmem:[%s4398_s7 + $0x5b8] sm:$0xff] }
  0xe5   : > { %9425 = vst [vmem:[#allocation85_spill] sm:$0xff] %v4715_v39  ;;  %9427 = vst [vmem:[#allocation87_spill] sm:$0xff] %v4722_v11  ;;  %v4731_v60 = vadd.f32 %v944_v59, %v943_v13  ;;  %v4733_v39 = vadd.f32 %v951_v4, %v950_v12  ;;  %v985_v61 = vadd.f32 %v984_v33, %v983_v52  ;;  %v360_v13 = vld [vmem:[%s4398_s7 + $0x5e0] sm:$0xff]  ;;  %v358_v33 = vld [vmem:[%s4398_s7 + $0x5d0] sm:$0xff] }
  0xe6   : > { %9426 = vst [vmem:[#allocation86_spill] sm:$0xff] %v4720_v46  ;;  %9428 = vst [vmem:[#allocation88_spill] sm:$0xff] %v4724_v9  ;;  %v4738_v62 = vadd.f32 %v958_v34, %v957_v35  ;;  %v4740_v41 = vadd.f32 %v965_v51, %v964_v0  ;;  %v995_v21 = vadd.f32 %v337_v53, %v333_v18  ;;  %v357_v9 = vld [vmem:[%s4398_s7 + $0x5c8] sm:$0xff] }
  0xe7   : > { %9429 = vst [vmem:[#allocation89_spill] sm:$0xff] %v4726_v2  ;;  %9430 = vst [vmem:[#allocation90_spill] sm:$0xff] %v4731_v60  ;;  %v1002_v57 = vadd.f32 %v338_v26, %v334_v63  ;;  %v356_v2 = vld [vmem:[%s4398_s7 + $0x5c0] sm:$0xff]  ;;  %v4745_v59 = vadd.f32 %v972_v54, %v971_v14  ;;  %v4747_v12 = vadd.f32 %v979_v44, %v978_v40  ;;  %v362_v60 = vld [vmem:[%s4398_s7 + $0x5f0] sm:$0xff]  ;;  %v986_v0 = vrot.slane %v985_v61, 1 }
  0xe8   : > { %9431 = vst [vmem:[#allocation91_spill] sm:$0xff] %v4733_v39  ;;  %9432 = vst [vmem:[#allocation92_spill] sm:$0xff] %v4738_v62  ;;  %v1009_v52 = vadd.f32 %v339_v49, %v335_v17  ;;  %v1016_v4 = vadd.f32 %v344_v56, %v340_v20  ;;  %v361_v39 = vld [vmem:[%s4398_s7 + $0x5e8] sm:$0xff]  ;;  %v1023_v11 = vadd.f32 %v345_v8, %v341_v55  ;;  %v996_v53 = vrot.slane %v995_v21, 4 }
  0xe9   : > { %9433 = vst [vmem:[#allocation93_spill] sm:$0xff] %v4740_v41  ;;  %9434 = vst [vmem:[#allocation94_spill] sm:$0xff] %v4745_v59  ;;  %v1030_v46 = vadd.f32 %v346_v58, %v342_v10  ;;  %v1037_v35 = vadd.f32 %v347_v7, %v343_v31  ;;  %v1044_v34 = vadd.f32 %v352_v28, %v348_v32  ;;  %v1003_v26 = vrot.slane %v1002_v57, 4  ;;  %v359_v7 = vld [vmem:[%s4398_s7 + $0x5d8] sm:$0xff] }
  0xea   : > { %9435 = vst [vmem:[#allocation95_spill] sm:$0xff] %v4747_v12  ;;  %v990_v51 = vadd.f32 %v989_v47, %v988_v48  ;;  %v1051_v18 = vadd.f32 %v353_v19, %v349_v3  ;;  %v1058_v63 = vadd.f32 %v354_v27, %v350_v43  ;;  %v1065_v14 = vadd.f32 %v355_v1, %v351_v38  ;;  %v363_v32 = vld [vmem:[%s4398_s7 + $0x5f8] sm:$0xff] }
  0xeb   : > { %v1072_v40 = vadd.f32 %v360_v13, %v356_v2  ;;  %v1010_v54 = vrot.slane %v1009_v52, 4  ;;  %v1017_v17 = vrot.slane %v1016_v4, 4  ;;  %v1079_v49 = vadd.f32 %v361_v39, %v357_v9 }
  0xec   : > { %v1086_v20 = vadd.f32 %v362_v60, %v358_v33  ;;  %v1024_v56 = vrot.slane %v1023_v11, 4  ;;  %v1031_v44 = vrot.slane %v1030_v46, 4  ;;  %v1038_v55 = vrot.slane %v1037_v35, 4 }
  0xed   : > { %v1045_v10 = vrot.slane %v1044_v34, 4  ;;  %v4752_v31 = vadd.f32 %v986_v0, %v985_v61  ;;  %v991_v8 = vrot.slane %v990_v51, 2  ;;  %v1052_v48 = vrot.slane %v1051_v18, 4 }
  0xee   : > { %v1059_v58 = vrot.slane %v1058_v63, 4  ;;  %v997_v3 = vadd.f32 %v996_v53, %v995_v21  ;;  %v1004_v43 = vadd.f32 %v1003_v26, %v1002_v57  ;;  %v1066_v28 = vrot.slane %v1065_v14, 4 }
  0xef   : > { %9436 = vst [vmem:[#allocation96_spill] sm:$0xff] %v4752_v31  ;;  %v1073_v38 = vrot.slane %v1072_v40, 4  ;;  %v1011_v2 = vadd.f32 %v1010_v54, %v1009_v52  ;;  %v1018_v47 = vadd.f32 %v1017_v17, %v1016_v4  ;;  %v1080_v19 = vrot.slane %v1079_v49, 4 }
  0xf0   : > { %v1087_v9 = vrot.slane %v1086_v20, 4  ;;  %v1025_v39 = vadd.f32 %v1024_v56, %v1023_v11  ;;  %v1032_v60 = vadd.f32 %v1031_v44, %v1030_v46  ;;  %v1039_v27 = vadd.f32 %v1038_v55, %v1037_v35 }
  0xf1   : > { %v1046_v1 = vadd.f32 %v1045_v10, %v1044_v34  ;;  %v992_v13 = vadd.f32 %v991_v8, %v990_v51  ;;  %v1053_v61 = vadd.f32 %v1052_v48, %v1051_v18  ;;  %v1060_v33 = vadd.f32 %v1059_v58, %v1058_v63 }
  0xf2   : > { %v1093_v0 = vadd.f32 %v363_v32, %v359_v7  ;;  %v998_v31 = vrot.slane %v997_v3, 2  ;;  %v1005_v12 = vrot.slane %v1004_v43, 2  ;;  %v1067_v59 = vadd.f32 %v1066_v28, %v1065_v14 }
  0xf3   : > { %v1074_v41 = vadd.f32 %v1073_v38, %v1072_v40  ;;  %v1012_v21 = vrot.slane %v1011_v2, 2  ;;  %v1019_v57 = vrot.slane %v1018_v47, 2  ;;  %v1081_v53 = vadd.f32 %v1080_v19, %v1079_v49 }
  0xf4   : > { %v1088_v26 = vadd.f32 %v1087_v9, %v1086_v20  ;;  %v1026_v52 = vrot.slane %v1025_v39, 2  ;;  %v1033_v4 = vrot.slane %v1032_v60, 2  ;;  %v1040_v54 = vrot.slane %v1039_v27, 2 }
  0xf5   : > { %v1047_v17 = vrot.slane %v1046_v1, 2  ;;  %v993_v11 = vrot.slane %v992_v13, 1  ;;  %v1054_v46 = vrot.slane %v1053_v61, 2  ;;  %v1061_v35 = vrot.slane %v1060_v33, 2 }
  0xf6   : > { %v1094_v34 = vrot.slane %v1093_v0, 4  ;;  %v999_v51 = vadd.f32 %v998_v31, %v997_v3  ;;  %v1006_v18 = vadd.f32 %v1005_v12, %v1004_v43  ;;  %v1068_v63 = vrot.slane %v1067_v59, 2  ;;  %v364_v31 = vld [vmem:[%s4398_s7 + $0x600] sm:$0xff] }
  0xf7   : > { %v1075_v56 = vrot.slane %v1074_v41, 2  ;;  %v1013_v14 = vadd.f32 %v1012_v21, %v1011_v2  ;;  %v1020_v40 = vadd.f32 %v1019_v57, %v1018_v47  ;;  %v1082_v44 = vrot.slane %v1081_v53, 2  ;;  %v368_v12 = vld [vmem:[%s4398_s7 + $0x620] sm:$0xff]  ;;  %v4770_v57 = vld [vmem:[%s4398_s7 + $0x618] sm:$0xff] }
  0xf8   : > { %v1089_v55 = vrot.slane %v1088_v26, 2  ;;  %v1027_v49 = vadd.f32 %v1026_v52, %v1025_v39  ;;  %v1034_v20 = vadd.f32 %v1033_v4, %v1032_v60  ;;  %v1041_v10 = vadd.f32 %v1040_v54, %v1039_v27  ;;  %v4779_v52 = vld [vmem:[%s4398_s7 + $0x640] sm:$0xff] }
  0xf9   : > { %v1048_v8 = vadd.f32 %v1047_v17, %v1046_v1  ;;  %v4756_v48 = vadd.f32 %v993_v11, %v992_v13  ;;  %v1055_v58 = vadd.f32 %v1054_v46, %v1053_v61  ;;  %v1062_v7 = vadd.f32 %v1061_v35, %v1060_v33  ;;  %v4761_v13 = vld [vmem:[%s4398_s7 + $0x608] sm:$0xff]  ;;  %v4764_v61 = vld [vmem:[%s4398_s7 + $0x610] sm:$0xff] }
  0xfa   : > { %v1095_v32 = vadd.f32 %v1094_v34, %v1093_v0  ;;  %v1000_v3 = vrot.slane %v999_v51, 1  ;;  %v1007_v43 = vrot.slane %v1006_v18, 1  ;;  %v1069_v28 = vadd.f32 %v1068_v63, %v1067_v59  ;;  %v4786_v46 = vld [vmem:[%s4398_s7 + $0x648] sm:$0xff]  ;;  %v4789_v35 = vld [vmem:[%s4398_s7 + $0x650] sm:$0xff]  ;;  %v4792_v34 = vld [vmem:[%s4398_s7 + $0x658] sm:$0xff] }
  0xfb   : > { %9437 = vst [vmem:[#allocation97_spill] sm:$0xff] %v4756_v48  ;;  %v1076_v38 = vadd.f32 %v1075_v56, %v1074_v41  ;;  %v1014_v2 = vrot.slane %v1013_v14, 1  ;;  %v1021_v47 = vrot.slane %v1020_v40, 1  ;;  %v1083_v19 = vadd.f32 %v1082_v44, %v1081_v53  ;;  %v4767_v41 = vld [vmem:[%s4398_s7 + $0x628] sm:$0xff]  ;;  %v4773_v53 = vld [vmem:[%s4398_s7 + $0x630] sm:$0xff]  ;;  %v4795_v63 = vld [vmem:[%s4398_s7 + $0x660] sm:$0xff] }
  0xfc   : > { %v1090_v9 = vadd.f32 %v1089_v55, %v1088_v26  ;;  %v1028_v39 = vrot.slane %v1027_v49, 1  ;;  %v1035_v60 = vrot.slane %v1034_v20, 1  ;;  %v1042_v27 = vrot.slane %v1041_v10, 1  ;;  %v4776_v26 = vld [vmem:[%s4398_s7 + $0x638] sm:$0xff]  ;;  %v4798_v56 = vld [vmem:[%s4398_s7 + $0x668] sm:$0xff] }
  0xfd   : > { %v1049_v1 = vrot.slane %v1048_v8, 1  ;;  %v1056_v59 = vrot.slane %v1055_v58, 1  ;;  %v1063_v33 = vrot.slane %v1062_v7, 1  ;;  %v1096_v0 = vrot.slane %v1095_v32, 2 }
  0xfe   : > { %v1100_v21 = vadd.f32 %v368_v12, %v364_v31  ;;  %v4781_v4 = vadd.f32 %v1000_v3, %v999_v51  ;;  %v4783_v54 = vadd.f32 %v1007_v43, %v1006_v18  ;;  %v1070_v17 = vrot.slane %v1069_v28, 1  ;;  %v4801_v51 = vld [vmem:[%s4398_s7 + $0x670] sm:$0xff]  ;;  %v4808_v12 = vld [vmem:[%s4398_s7 + $0x678] sm:$0xff]  ;;  %v4811_v3 = vld [vmem:[%s4398_s7 + $0x680] sm:$0xff] }
  0xff   : > { %v1077_v11 = vrot.slane %v1076_v38, 1  ;;  %v4803_v44 = vadd.f32 %v1014_v2, %v1013_v14  ;;  %v4805_v18 = vadd.f32 %v1021_v47, %v1020_v40  ;;  %v1084_v55 = vrot.slane %v1083_v19, 1  ;;  %v4814_v43 = vld [vmem:[%s4398_s7 + $0x688] sm:$0xff]  ;;  %v4825_v40 = vld [vmem:[%s4398_s7 + $0x690] sm:$0xff]  ;;  %v4828_v2 = vld [vmem:[%s4398_s7 + $0x698] sm:$0xff] }
 0x100   : > { %9438 = vst [vmem:[#allocation98_spill] sm:$0xff] %v4781_v4  ;;  %9439 = vst [vmem:[#allocation99_spill] sm:$0xff] %v4783_v54  ;;  %v1091_v31 = vrot.slane %v1090_v9, 1  ;;  %v4816_v54 = vadd.f32 %v1028_v39, %v1027_v49  ;;  %v4818_v4 = vadd.f32 %v1035_v60, %v1034_v20  ;;  %v4820_v48 = vadd.f32 %v1042_v27, %v1041_v10  ;;  %v4831_v47 = vld [vmem:[%s4398_s7 + $0x6a0] sm:$0xff]  ;;  %v4838_v10 = vld [vmem:[%s4398_s7 + $0x6a8] sm:$0xff] }
 0x101   : > { %9440 = vst [vmem:[#allocation100_spill] sm:$0xff] %v4803_v44  ;;  %9441 = vst [vmem:[#allocation101_spill] sm:$0xff] %v4805_v18  ;;  %v4822_v14 = vadd.f32 %v1049_v1, %v1048_v8  ;;  %v4833_v18 = vadd.f32 %v1056_v59, %v1055_v58  ;;  %v4835_v44 = vadd.f32 %v1063_v33, %v1062_v7  ;;  %v1101_v20 = vrot.slane %v1100_v21, 4  ;;  %v4841_v8 = vld [vmem:[%s4398_s7 + $0x6b0] sm:$0xff]  ;;  %v4844_v39 = vld [vmem:[%s4398_s7 + $0x6b8] sm:$0xff] }
 0x102   : > { %9442 = vst [vmem:[#allocation102_spill] sm:$0xff] %v4816_v54  ;;  %9443 = vst [vmem:[#allocation103_spill] sm:$0xff] %v4818_v4  ;;  %v1097_v49 = vadd.f32 %v1096_v0, %v1095_v32  ;;  %v4846_v60 = vadd.f32 %v1070_v17, %v1069_v28  ;;  %v4848_v27 = vadd.f32 %v1077_v11, %v1076_v38  ;;  %v4855_v32 = vld [vmem:[%s4398_s7 + $0x6c0] sm:$0xff]  ;;  %v4858_v1 = vld [vmem:[%s4398_s7 + $0x6c8] sm:$0xff] }
 0x103   : > { %9444 = vst [vmem:[#allocation104_spill] sm:$0xff] %v4820_v48  ;;  %9445 = vst [vmem:[#allocation105_spill] sm:$0xff] %v4822_v14  ;;  %v1107_v58 = vadd.f32 %v4767_v41, %v4761_v13  ;;  %v1114_v7 = vadd.f32 %v4773_v53, %v4764_v61  ;;  %v4861_v59 = vld [vmem:[%s4398_s7 + $0x6e0] sm:$0xff]  ;;  %v4863_v33 = vadd.f32 %v1084_v55, %v1083_v19  ;;  %v4872_v17 = vld [vmem:[%s4398_s7 + $0x6d0] sm:$0xff] }
 0x104   : > { %9446 = vst [vmem:[#allocation106_spill] sm:$0xff] %v4825_v40  ;;  %9447 = vst [vmem:[#allocation107_spill] sm:$0xff] %v4828_v2  ;;  %v4865_v0 = vadd.f32 %v1091_v31, %v1090_v9  ;;  %v1121_v28 = vadd.f32 %v4776_v26, %v4770_v57  ;;  %v1128_v38 = vadd.f32 %v4795_v63, %v4779_v52  ;;  %v4875_v11 = vld [vmem:[%s4398_s7 + $0x6e8] sm:$0xff]  ;;  %v1098_v31 = vrot.slane %v1097_v49, 1 }
 0x105   : > { %9448 = vst [vmem:[#allocation108_spill] sm:$0xff] %v4831_v47  ;;  %9449 = vst [vmem:[#allocation109_spill] sm:$0xff] %v4833_v18  ;;  %v1142_v19 = vadd.f32 %v4801_v51, %v4789_v35  ;;  %v1149_v9 = vadd.f32 %v4808_v12, %v4792_v34  ;;  %v1156_v55 = vadd.f32 %v4831_v47, %v4811_v3  ;;  %v1108_v18 = vrot.slane %v1107_v58, 4 }
 0x106   : > { %9450 = vst [vmem:[#allocation110_spill] sm:$0xff] %v4835_v44  ;;  %9451 = vst [vmem:[#allocation111_spill] sm:$0xff] %v4838_v10  ;;  %v1170_v44 = vadd.f32 %v4841_v8, %v4825_v40  ;;  %v1115_v14 = vrot.slane %v1114_v7, 4  ;;  %v1177_v48 = vadd.f32 %v4844_v39, %v4828_v2  ;;  %v1184_v4 = vadd.f32 %v4861_v59, %v4855_v32 }
 0x107   : > { %9452 = vst [vmem:[#allocation112_spill] sm:$0xff] %v4841_v8  ;;  %9453 = vst [vmem:[#allocation113_spill] sm:$0xff] %v4844_v39  ;;  %v1122_v54 = vrot.slane %v1121_v28, 4  ;;  %v1129_v62 = vrot.slane %v1128_v38, 4  ;;  %v1143_v45 = vrot.slane %v1142_v19, 4  ;;  %v1150_v37 = vrot.slane %v1149_v9, 4 }
 0x108   : > { %9454 = vst [vmem:[#allocation114_spill] sm:$0xff] %v4846_v60  ;;  %9455 = vst [vmem:[#allocation115_spill] sm:$0xff] %v4848_v27  ;;  %v4878_v27 = vld [vmem:[%s4398_s7 + $0x6f0] sm:$0xff]  ;;  %v1135_v60 = vadd.f32 %v4798_v56, %v4786_v46  ;;  %v1157_v36 = vrot.slane %v1156_v55, 4  ;;  %v4900_v30 = vadd.f32 %v1098_v31, %v1097_v49  ;;  %v1171_v24 = vrot.slane %v1170_v44, 4 }
 0x109   : > { %9456 = vst [vmem:[#allocation116_spill] sm:$0xff] %v4855_v32  ;;  %9457 = vst [vmem:[#allocation117_spill] sm:$0xff] %v4858_v1  ;;  %v1109_v16 = vadd.f32 %v1108_v18, %v1107_v58  ;;  %v1116_v15 = vadd.f32 %v1115_v14, %v1114_v7  ;;  %v1178_v6 = vrot.slane %v1177_v48, 4  ;;  %v1185_v5 = vrot.slane %v1184_v4, 4 }
 0x10a   : > { %9458 = vst [vmem:[#allocation118_spill] sm:$0xff] %v4861_v59  ;;  %9459 = vst [vmem:[#allocation119_spill] sm:$0xff] %v4863_v33  ;;  %v1163_v33 = vadd.f32 %v4838_v10, %v4814_v43  ;;  %v1136_v42 = vrot.slane %v1135_v60, 4  ;;  %v1123_v50 = vadd.f32 %v1122_v54, %v1121_v28  ;;  %v1151_v32 = vadd.f32 %v1150_v37, %v1149_v9 }
 0x10b   : > { %9460 = vst [vmem:[#allocation120_spill] sm:$0xff] %v4865_v0  ;;  %9461 = vst [vmem:[#allocation121_spill] sm:$0xff] %v4872_v17  ;;  %v1102_v0 = vadd.f32 %v1101_v20, %v1100_v21  ;;  %v1191_v21 = vadd.f32 %v4875_v11, %v4858_v1  ;;  %v1198_v20 = vadd.f32 %v4878_v27, %v4872_v17  ;;  %v1110_v10 = vrot.slane %v1109_v16, 2 }
 0x10c   : > { %9462 = vst [vmem:[#allocation122_spill] sm:$0xff] %v4875_v11  ;;  %9463 = vst [vmem:[#allocation123_spill] sm:$0xff] %v4878_v27  ;;  %v1164_v25 = vrot.slane %v1163_v33, 4  ;;  %v1130_v11 = vadd.f32 %v1129_v62, %v1128_v38  ;;  %v1137_v17 = vadd.f32 %v1136_v42, %v1135_v60  ;;  %v1144_v1 = vadd.f32 %v1143_v45, %v1142_v19 }
 0x10d   : > { %9464 = vst [vmem:[#allocation124_spill] sm:$0xff] %v4900_v30  ;;  %v1103_v29 = vrot.slane %v1102_v0, 2  ;;  %v1192_v27 = vrot.slane %v1191_v21, 4  ;;  %v1199_v59 = vrot.slane %v1198_v20, 4  ;;  %v1158_v49 = vadd.f32 %v1157_v36, %v1156_v55 }
 0x10e   : > { %v1165_v30 = vadd.f32 %v1164_v25, %v1163_v33  ;;  %v1172_v39 = vadd.f32 %v1171_v24, %v1170_v44  ;;  %v1205_v8 = vadd.f32 %v4906_v22, %v4903_v23  ;;  %v1117_v47 = vrot.slane %v1116_v15, 2  ;;  %v4974_v22 = vld [vmem:[%s4398_s7 + $0x788] sm:$0xff] }
 0x10f   : > { %v1104_v31 = vadd.f32 %v1103_v29, %v1102_v0  ;;  %v1179_v18 = vadd.f32 %v1178_v6, %v1177_v48  ;;  %v1186_v14 = vadd.f32 %v1185_v5, %v1184_v4  ;;  %v1124_v58 = vrot.slane %v1123_v50, 2  ;;  %9488 = vst [vmem:[#allocation148_spill] sm:$0xff] %v4974_v22 }
 0x110   : > { %v1131_v7 = vrot.slane %v1130_v11, 2  ;;  %v1193_v54 = vadd.f32 %v1192_v27, %v1191_v21  ;;  %v1200_v62 = vadd.f32 %v1199_v59, %v1198_v20  ;;  %v1138_v28 = vrot.slane %v1137_v17, 2 }
 0x111   : > { %v1145_v38 = vrot.slane %v1144_v1, 2  ;;  %v1152_v42 = vrot.slane %v1151_v32, 2  ;;  %v1159_v45 = vrot.slane %v1158_v49, 2  ;;  %v1105_v37 = vrot.slane %v1104_v31, 1 }
 0x112   : > { %v1166_v36 = vrot.slane %v1165_v30, 2  ;;  %v1173_v29 = vrot.slane %v1172_v39, 2  ;;  %v1206_v25 = vrot.slane %v1205_v8, 4  ;;  %v1111_v24 = vadd.f32 %v1110_v10, %v1109_v16  ;;  %v4913_v16 = vld [vmem:[%s4398_s7 + $0x700] sm:$0xff] }
 0x113   : > { %v1118_v44 = vadd.f32 %v1117_v47, %v1116_v15  ;;  %v1180_v60 = vrot.slane %v1179_v18, 2  ;;  %v1187_v33 = vrot.slane %v1186_v14, 2  ;;  %v1125_v6 = vadd.f32 %v1124_v58, %v1123_v50  ;;  %9468 = vst [vmem:[#allocation128_spill] sm:$0xff] %v4913_v16  ;;  %v4916_v15 = vld [vmem:[%s4398_s7 + $0x720] sm:$0xff]  ;;  %v4919_v58 = vld [vmem:[%s4398_s7 + $0x708] sm:$0xff] }
 0x114   : > { %v1132_v5 = vadd.f32 %v1131_v7, %v1130_v11  ;;  %v1194_v48 = vrot.slane %v1193_v54, 2  ;;  %v1201_v4 = vrot.slane %v1200_v62, 2  ;;  %v1139_v27 = vadd.f32 %v1138_v28, %v1137_v17  ;;  %9469 = vst [vmem:[#allocation129_spill] sm:$0xff] %v4916_v15  ;;  %v4922_v7 = vld [vmem:[%s4398_s7 + $0x710] sm:$0xff] }
 0x115   : > { %v1146_v59 = vadd.f32 %v1145_v38, %v1144_v1  ;;  %v1153_v0 = vadd.f32 %v1152_v42, %v1151_v32  ;;  %v1160_v19 = vadd.f32 %v1159_v45, %v1158_v49  ;;  %v4910_v9 = vadd.f32 %v1105_v37, %v1104_v31  ;;  %9470 = vst [vmem:[#allocation130_spill] sm:$0xff] %v4922_v7  ;;  %v4930_v38 = vld [vmem:[%s4398_s7 + $0x718] sm:$0xff]  ;;  %v4933_v42 = vld [vmem:[%s4398_s7 + $0x730] sm:$0xff]  ;;  %v4939_v37 = vld [vmem:[%s4398_s7 + $0x740] sm:$0xff] }
 0x116   : > { %v1167_v55 = vadd.f32 %v1166_v36, %v1165_v30  ;;  %v1174_v21 = vadd.f32 %v1173_v29, %v1172_v39  ;;  %v1207_v20 = vadd.f32 %v1206_v25, %v1205_v8  ;;  %v1112_v50 = vrot.slane %v1111_v24, 1  ;;  %9472 = vst [vmem:[#allocation132_spill] sm:$0xff] %v4930_v38  ;;  %9473 = vst [vmem:[#allocation133_spill] sm:$0xff] %v4933_v42  ;;  %v4936_v45 = vld [vmem:[%s4398_s7 + $0x738] sm:$0xff] }
 0x117   : > { %9467 = vst [vmem:[#allocation127_spill] sm:$0xff] %v4910_v9  ;;  %v1119_v47 = vrot.slane %v1118_v44, 1  ;;  %v1181_v10 = vadd.f32 %v1180_v60, %v1179_v18  ;;  %v1188_v11 = vadd.f32 %v1187_v33, %v1186_v14  ;;  %v1126_v1 = vrot.slane %v1125_v6, 1  ;;  %v4925_v18 = vld [vmem:[%s4398_s7 + $0x728] sm:$0xff]  ;;  %9474 = vst [vmem:[#allocation134_spill] sm:$0xff] %v4936_v45  ;;  %v4955_v9 = vld [vmem:[%s4398_s7 + $0x760] sm:$0xff] }
 0x118   : > { %v1133_v32 = vrot.slane %v1132_v5, 1  ;;  %v1195_v17 = vadd.f32 %v1194_v48, %v1193_v54  ;;  %v1202_v30 = vadd.f32 %v1201_v4, %v1200_v62  ;;  %v1140_v39 = vrot.slane %v1139_v27, 1  ;;  %9471 = vst [vmem:[#allocation131_spill] sm:$0xff] %v4925_v18  ;;  %9475 = vst [vmem:[#allocation135_spill] sm:$0xff] %v4939_v37  ;;  %v4946_v33 = vld [vmem:[%s4398_s7 + $0x748] sm:$0xff]  ;;  %v4949_v48 = vld [vmem:[%s4398_s7 + $0x750] sm:$0xff] }
 0x119   : > { %v1147_v8 = vrot.slane %v1146_v59, 1  ;;  %v1154_v49 = vrot.slane %v1153_v0, 1  ;;  %v1161_v31 = vrot.slane %v1160_v19, 1  ;;  %v1168_v14 = vrot.slane %v1167_v55, 1  ;;  %9478 = vst [vmem:[#allocation138_spill] sm:$0xff] %v4946_v33  ;;  %9479 = vst [vmem:[#allocation139_spill] sm:$0xff] %v4949_v48 }
 0x11a   : > { %v1175_v28 = vrot.slane %v1174_v21, 1  ;;  %v1208_v54 = vrot.slane %v1207_v20, 2  ;;  %v1212_v62 = vadd.f32 %v4916_v15, %v4913_v16  ;;  %v4941_v36 = vadd.f32 %v1112_v50, %v1111_v24  ;;  %v4952_v4 = vld [vmem:[%s4398_s7 + $0x758] sm:$0xff]  ;;  %9481 = vst [vmem:[#allocation141_spill] sm:$0xff] %v4955_v9  ;;  %v4958_v15 = vld [vmem:[%s4398_s7 + $0x768] sm:$0xff]  ;;  %v4961_v24 = vld [vmem:[%s4398_s7 + $0x770] sm:$0xff] }
 0x11b   : > { %v4943_v29 = vadd.f32 %v1119_v47, %v1118_v44  ;;  %v1182_v25 = vrot.slane %v1181_v10, 1  ;;  %v1189_v60 = vrot.slane %v1188_v11, 1  ;;  %9480 = vst [vmem:[#allocation140_spill] sm:$0xff] %v4952_v4  ;;  %9482 = vst [vmem:[#allocation142_spill] sm:$0xff] %v4958_v15  ;;  %v4963_v50 = vadd.f32 %v1126_v1, %v1125_v6  ;;  %v4971_v16 = vld [vmem:[%s4398_s7 + $0x780] sm:$0xff]  ;;  %v4988_v1 = vld [vmem:[%s4398_s7 + $0x798] sm:$0xff] }
 0x11c   : > { %9476 = vst [vmem:[#allocation136_spill] sm:$0xff] %v4941_v36  ;;  %9483 = vst [vmem:[#allocation143_spill] sm:$0xff] %v4961_v24  ;;  %v4965_v44 = vadd.f32 %v1133_v32, %v1132_v5  ;;  %v1196_v47 = vrot.slane %v1195_v17, 1  ;;  %v4968_v36 = vld [vmem:[%s4398_s7 + $0x778] sm:$0xff]  ;;  %v4976_v23 = vadd.f32 %v1140_v39, %v1139_v27  ;;  %v4978_v2 = vadd.f32 %v1147_v8, %v1146_v59  ;;  %v4985_v5 = vld [vmem:[%s4398_s7 + $0x790] sm:$0xff] }
 0x11d   : > { %9477 = vst [vmem:[#allocation137_spill] sm:$0xff] %v4943_v29  ;;  %9484 = vst [vmem:[#allocation144_spill] sm:$0xff] %v4963_v50  ;;  %v1203_v29 = vrot.slane %v1202_v30, 1  ;;  %v4980_v40 = vadd.f32 %v1154_v49, %v1153_v0  ;;  %v4982_v6 = vadd.f32 %v1161_v31, %v1160_v19  ;;  %v4991_v32 = vld [vmem:[%s4398_s7 + $0x7a0] sm:$0xff]  ;;  %v4995_v50 = vadd.f32 %v1175_v28, %v1174_v21  ;;  %v4998_v0 = vld [vmem:[%s4398_s7 + $0x7a8] sm:$0xff] }
 0x11e   : > { %9485 = vst [vmem:[#allocation145_spill] sm:$0xff] %v4965_v44  ;;  %9486 = vst [vmem:[#allocation146_spill] sm:$0xff] %v4968_v36  ;;  %v4993_v44 = vadd.f32 %v1168_v14, %v1167_v55  ;;  %v1209_v27 = vadd.f32 %v1208_v54, %v1207_v20  ;;  %v1213_v59 = vrot.slane %v1212_v62, 4  ;;  %v5001_v19 = vld [vmem:[%s4398_s7 + $0x7b0] sm:$0xff]  ;;  %v5004_v39 = vld [vmem:[%s4398_s7 + $0x7b8] sm:$0xff]  ;;  %v5006_v8 = vadd.f32 %v1182_v25, %v1181_v10 }
 0x11f   : > { %9487 = vst [vmem:[#allocation147_spill] sm:$0xff] %v4971_v16  ;;  %9489 = vst [vmem:[#allocation149_spill] sm:$0xff] %v4976_v23  ;;  %v5008_v49 = vadd.f32 %v1189_v60, %v1188_v11  ;;  %v1219_v55 = vadd.f32 %v4925_v18, %v4919_v58  ;;  %v1226_v21 = vadd.f32 %v4933_v42, %v4922_v7  ;;  %v5015_v20 = vld [vmem:[%s4398_s7 + $0x7c0] sm:$0xff]  ;;  %v5018_v31 = vld [vmem:[%s4398_s7 + $0x7c8] sm:$0xff] }
 0x120   : > { %9490 = vst [vmem:[#allocation150_spill] sm:$0xff] %v4978_v2  ;;  %9491 = vst [vmem:[#allocation151_spill] sm:$0xff] %v4980_v40  ;;  %v5021_v14 = vld [vmem:[%s4398_s7 + $0x7e0] sm:$0xff]  ;;  %v5023_v28 = vadd.f32 %v1196_v47, %v1195_v17  ;;  %v5025_v10 = vadd.f32 %v1203_v29, %v1202_v30  ;;  %v1233_v11 = vadd.f32 %v4936_v45, %v4930_v38  ;;  %v5032_v25 = vld [vmem:[%s4398_s7 + $0x7d0] sm:$0xff]  ;;  %v1210_v47 = vrot.slane %v1209_v27, 1 }
 0x121   : > { %9492 = vst [vmem:[#allocation152_spill] sm:$0xff] %v4982_v6  ;;  %9493 = vst [vmem:[#allocation153_spill] sm:$0xff] %v4985_v5  ;;  %v1240_v54 = vadd.f32 %v4955_v9, %v4939_v37  ;;  %v5035_v60 = vld [vmem:[%s4398_s7 + $0x7e8] sm:$0xff]  ;;  %v1254_v17 = vadd.f32 %v4961_v24, %v4949_v48  ;;  %v1261_v30 = vadd.f32 %v4968_v36, %v4952_v4  ;;  %v5056_v6 = vld [vmem:[%s4398_s7 + $0x7f8] sm:$0xff]  ;;  %v1220_v40 = vrot.slane %v1219_v55, 4 }
 0x122   : > { %9494 = vst [vmem:[#allocation154_spill] sm:$0xff] %v4988_v1  ;;  %9495 = vst [vmem:[#allocation155_spill] sm:$0xff] %v4991_v32  ;;  %v1268_v29 = vadd.f32 %v4991_v32, %v4971_v16  ;;  %v1227_v2 = vrot.slane %v1226_v21, 4  ;;  %v1289_v23 = vadd.f32 %v5004_v39, %v4988_v1  ;;  %v1296_v32 = vadd.f32 %v5021_v14, %v5015_v20 }
 0x123   : > { %9496 = vst [vmem:[#allocation156_spill] sm:$0xff] %v4993_v44  ;;  %9497 = vst [vmem:[#allocation157_spill] sm:$0xff] %v4995_v50  ;;  %v1282_v50 = vadd.f32 %v5001_v19, %v4985_v5  ;;  %v5053_v44 = vld [vmem:[%s4398_s7 + $0x7d8] sm:$0xff]  ;;  %v1234_v16 = vrot.slane %v1233_v11, 4  ;;  %v1255_v5 = vrot.slane %v1254_v17, 4  ;;  %v5066_v24 = vadd.f32 %v1210_v47, %v1209_v27 }
 0x124   : > { %9498 = vst [vmem:[#allocation158_spill] sm:$0xff] %v4998_v0  ;;  %9499 = vst [vmem:[#allocation159_spill] sm:$0xff] %v5001_v19  ;;  %v1269_v36 = vrot.slane %v1268_v29, 4  ;;  %v1290_v1 = vrot.slane %v1289_v23, 4  ;;  %v1297_v4 = vrot.slane %v1296_v32, 4 }
 0x125   : > { %9500 = vst [vmem:[#allocation160_spill] sm:$0xff] %v5004_v39  ;;  %9501 = vst [vmem:[#allocation161_spill] sm:$0xff] %v5006_v8  ;;  %v1247_v8 = vadd.f32 %v4958_v15, %v4946_v33  ;;  %v1283_v9 = vrot.slane %v1282_v50, 4  ;;  %v1317_v39 = vadd.f32 %v5056_v6, %v5053_v44  ;;  %v1235_v48 = vadd.f32 %v1234_v16, %v1233_v11 }
 0x126   : > { %9502 = vst [vmem:[#allocation162_spill] sm:$0xff] %v5008_v49  ;;  %9503 = vst [vmem:[#allocation163_spill] sm:$0xff] %v5015_v20  ;;  %v5038_v49 = vld [vmem:[%s4398_s7 + $0x7f0] sm:$0xff]  ;;  %v1228_v20 = vadd.f32 %v1227_v2, %v1226_v21  ;;  %v1270_v45 = vadd.f32 %v1269_v36, %v1268_v29  ;;  %v1291_v7 = vadd.f32 %v1290_v1, %v1289_v23 }
 0x127   : > { %9504 = vst [vmem:[#allocation164_spill] sm:$0xff] %v5018_v31  ;;  %9505 = vst [vmem:[#allocation165_spill] sm:$0xff] %v5021_v14  ;;  %v1310_v19 = vadd.f32 %v5038_v49, %v5032_v25  ;;  %v1221_v14 = vadd.f32 %v1220_v40, %v1219_v55  ;;  %v1284_v47 = vadd.f32 %v1283_v9, %v1282_v50  ;;  %v1236_v40 = vrot.slane %v1235_v48, 2 }
 0x128   : > { %9506 = vst [vmem:[#allocation166_spill] sm:$0xff] %v5023_v28  ;;  %9507 = vst [vmem:[#allocation167_spill] sm:$0xff] %v5025_v10  ;;  %v1214_v10 = vadd.f32 %v1213_v59, %v1212_v62  ;;  %v1275_v28 = vadd.f32 %v4998_v0, %v4974_v22  ;;  %v1241_v62 = vrot.slane %v1240_v54, 4  ;;  %v1303_v59 = vadd.f32 %v5035_v60, %v5018_v31 }
 0x129   : > { %9508 = vst [vmem:[#allocation168_spill] sm:$0xff] %v5032_v25  ;;  %9509 = vst [vmem:[#allocation169_spill] sm:$0xff] %v5035_v60  ;;  %v1248_v0 = vrot.slane %v1247_v8, 4  ;;  %v1262_v22 = vrot.slane %v1261_v30, 4  ;;  %v1311_v33 = vrot.slane %v1310_v19, 4  ;;  %v1256_v25 = vadd.f32 %v1255_v5, %v1254_v17 }
 0x12a   : > { %9510 = vst [vmem:[#allocation170_spill] sm:$0xff] %v5038_v49  ;;  %9511 = vst [vmem:[#allocation171_spill] sm:$0xff] %v5053_v44  ;;  %v1276_v15 = vrot.slane %v1275_v28, 4  ;;  %v1242_v60 = vadd.f32 %v1241_v62, %v1240_v54  ;;  %v1304_v31 = vrot.slane %v1303_v59, 4  ;;  %v1215_v42 = vrot.slane %v1214_v10, 2 }
 0x12b   : > { %9512 = vst [vmem:[#allocation172_spill] sm:$0xff] %v5056_v6  ;;  %9513 = vst [vmem:[#allocation173_spill] sm:$0xff] %v5066_v24  ;;  %v1249_v49 = vadd.f32 %v1248_v0, %v1247_v8  ;;  %v1263_v37 = vadd.f32 %v1262_v22, %v1261_v30  ;;  %v1318_v24 = vrot.slane %v1317_v39, 4  ;;  %v1222_v18 = vrot.slane %v1221_v14, 2 }
 0x12c   : > { %v1277_v27 = vadd.f32 %v1276_v15, %v1275_v28  ;;  %v1229_v38 = vrot.slane %v1228_v20, 2  ;;  %v1298_v6 = vadd.f32 %v1297_v4, %v1296_v32  ;;  %v1243_v2 = vrot.slane %v1242_v60, 2 }
 0x12d   : > { %v1305_v55 = vadd.f32 %v1304_v31, %v1303_v59  ;;  %v1312_v21 = vadd.f32 %v1311_v33, %v1310_v19  ;;  %v1250_v16 = vrot.slane %v1249_v49, 2  ;;  %v1257_v11 = vrot.slane %v1256_v25, 2 }
 0x12e   : > { %v1264_v54 = vrot.slane %v1263_v37, 2  ;;  %v1271_v62 = vrot.slane %v1270_v45, 2  ;;  %v1216_v0 = vadd.f32 %v1215_v42, %v1214_v10  ;;  %v1278_v5 = vrot.slane %v1277_v27, 2 }
 0x12f   : > { %v1285_v22 = vrot.slane %v1284_v47, 2  ;;  %v1319_v36 = vadd.f32 %v1318_v24, %v1317_v39  ;;  %v1223_v8 = vadd.f32 %v1222_v18, %v1221_v14  ;;  %v1230_v15 = vadd.f32 %v1229_v38, %v1228_v20 }
 0x130   : > { %v1292_v9 = vrot.slane %v1291_v7, 2  ;;  %v1299_v50 = vrot.slane %v1298_v6, 2  ;;  %v1237_v28 = vadd.f32 %v1236_v40, %v1235_v48  ;;  %v1244_v17 = vadd.f32 %v1243_v2, %v1242_v60 }
 0x131   : > { %v1306_v23 = vrot.slane %v1305_v55, 2  ;;  %v1313_v4 = vrot.slane %v1312_v21, 2  ;;  %v1251_v1 = vadd.f32 %v1250_v16, %v1249_v49  ;;  %v1258_v32 = vadd.f32 %v1257_v11, %v1256_v25 }
 0x132   : > { %v1265_v31 = vadd.f32 %v1264_v54, %v1263_v37  ;;  %v1272_v33 = vadd.f32 %v1271_v62, %v1270_v45  ;;  %v1217_v19 = vrot.slane %v1216_v0, 1  ;;  %v1279_v30 = vadd.f32 %v1278_v5, %v1277_v27 }
 0x133   : > { %v1286_v29 = vadd.f32 %v1285_v22, %v1284_v47  ;;  %v1320_v59 = vrot.slane %v1319_v36, 2  ;;  %v1224_v42 = vrot.slane %v1223_v8, 1  ;;  %v1231_v10 = vrot.slane %v1230_v15, 1 }
 0x134   : > { %v1293_v44 = vadd.f32 %v1292_v9, %v1291_v7  ;;  %v1300_v24 = vadd.f32 %v1299_v50, %v1298_v6  ;;  %v1238_v18 = vrot.slane %v1237_v28, 1  ;;  %v1245_v38 = vrot.slane %v1244_v17, 1 }
 0x135   : > { %v1307_v39 = vadd.f32 %v1306_v23, %v1305_v55  ;;  %v1314_v20 = vadd.f32 %v1313_v4, %v1312_v21  ;;  %v1252_v48 = vrot.slane %v1251_v1, 1  ;;  %v1259_v14 = vrot.slane %v1258_v32, 1  ;;  %v3844_v23 = vld [vmem:[%s4398_s7 + $0x10] sm:$0xff] }
 0x136   : > { %v1266_v60 = vrot.slane %v1265_v31, 1  ;;  %v1273_v40 = vrot.slane %v1272_v33, 1  ;;  %v5070_v49 = vadd.f32 %v1217_v19, %v1216_v0  ;;  %v1280_v37 = vrot.slane %v1279_v30, 1 }
 0x137   : > { %v1287_v45 = vrot.slane %v1286_v29, 1  ;;  %v1321_v25 = vadd.f32 %v1320_v59, %v1319_v36  ;;  %v5072_v27 = vadd.f32 %v1224_v42, %v1223_v8  ;;  %v5074_v47 = vadd.f32 %v1231_v10, %v1230_v15  ;;  %v3842_v8 = vld [vmem:[%s4398_s7] sm:$0xff]  ;;  %v3848_v59 = vld [vmem:[%s4398_s7 + $0x30] sm:$0xff]  ;;  %v3849_v10 = vld [vmem:[%s4398_s7 + $0x38] sm:$0xff] }
 0x138   : > { %9514 = vst [vmem:[#allocation174_spill] sm:$0xff] %v5070_v49  ;;  %v1294_v7 = vrot.slane %v1293_v44, 1  ;;  %v1301_v6 = vrot.slane %v1300_v24, 1  ;;  %v5076_v2 = vadd.f32 %v1238_v18, %v1237_v28  ;;  %v5078_v55 = vadd.f32 %v1245_v38, %v1244_v17  ;;  %v3843_v28 = vld [vmem:[%s4398_s7 + $0x8] sm:$0xff]  ;;  %v3850_v18 = vld [vmem:[%s4398_s7 + $0x40] sm:$0xff] }
 0x139   : > { %9515 = vst [vmem:[#allocation175_spill] sm:$0xff] %v5072_v27  ;;  %9516 = vst [vmem:[#allocation176_spill] sm:$0xff] %v5074_v47  ;;  %v1308_v21 = vrot.slane %v1307_v39, 1  ;;  %v1315_v16 = vrot.slane %v1314_v20, 1  ;;  %v5080_v11 = vadd.f32 %v1252_v48, %v1251_v1  ;;  %v5082_v54 = vadd.f32 %v1259_v14, %v1258_v32  ;;  %v3852_v14 = vld [vmem:[%s4398_s7 + $0x50] sm:$0xff]  ;;  %v3881_v47 = vld [vmem:[%s4398_s7 + $0x138] sm:$0xff] }
 0x13a   : > { %9517 = vst [vmem:[#allocation177_spill] sm:$0xff] %v5076_v2  ;;  %9518 = vst [vmem:[#allocation178_spill] sm:$0xff] %v5078_v55  ;;  %v5084_v62 = vadd.f32 %v1266_v60, %v1265_v31  ;;  %v5086_v0 = vadd.f32 %v1273_v40, %v1272_v33  ;;  %v5088_v5 = vadd.f32 %v1280_v37, %v1279_v30  ;;  %v1322_v36 = vrot.slane %v1321_v25, 1  ;;  %v3845_v31 = vld [vmem:[%s4398_s7 + $0x18] sm:$0xff]  ;;  %v3847_v30 = vld [vmem:[%s4398_s7 + $0x28] sm:$0xff] }
 0x13b   : > { %9519 = vst [vmem:[#allocation179_spill] sm:$0xff] %v5080_v11  ;;  %9520 = vst [vmem:[#allocation180_spill] sm:$0xff] %v5082_v54  ;;  %v5090_v22 = vadd.f32 %v1287_v45, %v1286_v29  ;;  %v5093_v15 = vmul.f32 %v3842_v8, %v3842_v8  ;;  %v5095_v9 = vadd.f32 %v1294_v7, %v1293_v44  ;;  %v3846_v44 = vld [vmem:[%s4398_s7 + $0x20] sm:$0xff]  ;;  %v3853_v40 = vld [vmem:[%s4398_s7 + $0x58] sm:$0xff] }
 0x13c   : > { %9521 = vst [vmem:[#allocation181_spill] sm:$0xff] %v5084_v62  ;;  %9522 = vst [vmem:[#allocation182_spill] sm:$0xff] %v5086_v0  ;;  %v5097_v50 = vadd.f32 %v1301_v6, %v1300_v24  ;;  %v5100_v17 = vmul.f32 %v3843_v28, %v3843_v28  ;;  %v5103_v4 = vmul.f32 %v3844_v23, %v3844_v23  ;;  %v3854_v45 = vld [vmem:[%s4398_s7 + $0x60] sm:$0xff]  ;;  %v3855_v6 = vld [vmem:[%s4398_s7 + $0x68] sm:$0xff] }
 0x13d   : > { %9523 = vst [vmem:[#allocation183_spill] sm:$0xff] %v5088_v5  ;;  %9524 = vst [vmem:[#allocation184_spill] sm:$0xff] %v5090_v22  ;;  %v5105_v1 = vadd.f32 %v1308_v21, %v1307_v39  ;;  %v5107_v32 = vadd.f32 %v1315_v16, %v1314_v20  ;;  %v5110_v33 = vmul.f32 %v3845_v31, %v3845_v31  ;;  %v3851_v20 = vld [vmem:[%s4398_s7 + $0x48] sm:$0xff]  ;;  %v3856_v21 = vld [vmem:[%s4398_s7 + $0x70] sm:$0xff] }
 0x13e   : > { %9525 = vst [vmem:[#allocation185_spill] sm:$0xff] %v5095_v9  ;;  %9526 = vst [vmem:[#allocation186_spill] sm:$0xff] %v5097_v50  ;;  %v5113_v19 = vmul.f32 %v3846_v44, %v3846_v44  ;;  %v5116_v29 = vmul.f32 %v3847_v30, %v3847_v30  ;;  %v5119_v42 = vmul.f32 %v3848_v59, %v3848_v59  ;;  %v3858_v28 = vld [vmem:[%s4398_s7 + $0x80] sm:$0xff]  ;;  %v3859_v31 = vld [vmem:[%s4398_s7 + $0x88] sm:$0xff] }
 0x13f   : > { %9527 = vst [vmem:[#allocation187_spill] sm:$0xff] %v5105_v1  ;;  %9528 = vst [vmem:[#allocation188_spill] sm:$0xff] %v5107_v32  ;;  %v5122_v24 = vmul.f32 %v3849_v10, %v3849_v10  ;;  %v5125_v38 = vmul.f32 %v3850_v18, %v3850_v18  ;;  %v5127_v39 = vadd.f32 %v1322_v36, %v1321_v25  ;;  %v3857_v36 = vld [vmem:[%s4398_s7 + $0x78] sm:$0xff]  ;;  %v3860_v30 = vld [vmem:[%s4398_s7 + $0x90] sm:$0xff] }
 0x140   : > { %v5130_v48 = vmul.f32 %v3851_v20, %v3851_v20  ;;  %v5133_v60 = vmul.f32 %v3852_v14, %v3852_v14  ;;  %v5136_v37 = vmul.f32 %v3853_v40, %v3853_v40  ;;  %v5139_v7 = vmul.f32 %v3854_v45, %v3854_v45  ;;  %v3861_v10 = vld [vmem:[%s4398_s7 + $0x98] sm:$0xff]  ;;  %v3862_v20 = vld [vmem:[%s4398_s7 + $0xa0] sm:$0xff]  ;;  %v3863_v40 = vld [vmem:[%s4398_s7 + $0xa8] sm:$0xff] }
 0x141   : > { %9529 = vst [vmem:[#allocation189_spill] sm:$0xff] %v5127_v39  ;;  %v5142_v25 = vmul.f32 %v3855_v6, %v3855_v6  ;;  %v5145_v16 = vmul.f32 %v3856_v21, %v3856_v21  ;;  %v5148_v8 = vmul.f32 %v3857_v36, %v3857_v36  ;;  %v5151_v23 = vmul.f32 %v3858_v28, %v3858_v28  ;;  %v3864_v6 = vld [vmem:[%s4398_s7 + $0xb0] sm:$0xff]  ;;  %v3865_v36 = vld [vmem:[%s4398_s7 + $0xb8] sm:$0xff]  ;;  %v3870_v1 = vld [vmem:[%s4398_s7 + $0xe0] sm:$0xff] }
 0x142   : > { %v5154_v44 = vmul.f32 %v3859_v31, %v3859_v31  ;;  %v5157_v59 = vmul.f32 %v3860_v30, %v3860_v30  ;;  %v5160_v18 = vmul.f32 %v3861_v10, %v3861_v10  ;;  %v5163_v14 = vmul.f32 %v3862_v20, %v3862_v20  ;;  %v3866_v31 = vld [vmem:[%s4398_s7 + $0xc0] sm:$0xff]  ;;  %v3867_v10 = vld [vmem:[%s4398_s7 + $0xc8] sm:$0xff]  ;;  %v3868_v39 = vld [vmem:[%s4398_s7 + $0xd0] sm:$0xff] }
 0x143   : > { %v5166_v45 = vmul.f32 %v3863_v40, %v3863_v40  ;;  %v5169_v21 = vmul.f32 %v3864_v6, %v3864_v6  ;;  %v5172_v28 = vmul.f32 %v3865_v36, %v3865_v36  ;;  %v5175_v30 = vmul.f32 %v3866_v31, %v3866_v31  ;;  %v3869_v32 = vld [vmem:[%s4398_s7 + $0xd8] sm:$0xff]  ;;  %v3871_v50 = vld [vmem:[%s4398_s7 + $0xe8] sm:$0xff]  ;;  %v3872_v9 = vld [vmem:[%s4398_s7 + $0xf0] sm:$0xff] }
 0x144   : > { %v5178_v20 = vmul.f32 %v3867_v10, %v3867_v10  ;;  %v5181_v40 = vmul.f32 %v3868_v39, %v3868_v39  ;;  %v5184_v6 = vmul.f32 %v3869_v32, %v3869_v32  ;;  %v5187_v36 = vmul.f32 %v3870_v1, %v3870_v1  ;;  %v3873_v22 = vld [vmem:[%s4398_s7 + $0xf8] sm:$0xff]  ;;  %v3874_v5 = vld [vmem:[%s4398_s7 + $0x100] sm:$0xff]  ;;  %v3875_v0 = vld [vmem:[%s4398_s7 + $0x108] sm:$0xff] }
 0x145   : > { %v5190_v31 = vmul.f32 %v3871_v50, %v3871_v50  ;;  %v5193_v10 = vmul.f32 %v3872_v9, %v3872_v9  ;;  %v5196_v39 = vmul.f32 %v3873_v22, %v3873_v22  ;;  %v5199_v32 = vmul.f32 %v3874_v5, %v3874_v5  ;;  %v3876_v62 = vld [vmem:[%s4398_s7 + $0x110] sm:$0xff]  ;;  %v3877_v54 = vld [vmem:[%s4398_s7 + $0x118] sm:$0xff]  ;;  %v3878_v11 = vld [vmem:[%s4398_s7 + $0x120] sm:$0xff] }
 0x146   : > { %v5202_v1 = vmul.f32 %v3875_v0, %v3875_v0  ;;  %v5205_v50 = vmul.f32 %v3876_v62, %v3876_v62  ;;  %v5208_v9 = vmul.f32 %v3877_v54, %v3877_v54  ;;  %v5211_v22 = vmul.f32 %v3878_v11, %v3878_v11  ;;  %v3879_v55 = vld [vmem:[%s4398_s7 + $0x128] sm:$0xff]  ;;  %v3880_v2 = vld [vmem:[%s4398_s7 + $0x130] sm:$0xff]  ;;  %v3882_v27 = vld [vmem:[%s4398_s7 + $0x140] sm:$0xff] }
 0x147   : > { %v5214_v5 = vmul.f32 %v3879_v55, %v3879_v55  ;;  %v5217_v0 = vmul.f32 %v3880_v2, %v3880_v2  ;;  %v5220_v62 = vmul.f32 %v3881_v47, %v3881_v47  ;;  %v5223_v54 = vmul.f32 %v3882_v27, %v3882_v27  ;;  %v3883_v49 = vld [vmem:[%s4398_s7 + $0x148] sm:$0xff] }
 0x148   : > { %9530 = vst [vmem:[#allocation190_spill] sm:$0xff] %v5202_v1  ;;  %9531 = vst [vmem:[#allocation191_spill] sm:$0xff] %v5205_v50  ;;  %v5226_v11 = vmul.f32 %v3883_v49, %v3883_v49  ;;  %v3885_v50 = vld [vmem:[%s4398_s7 + $0x158] sm:$0xff]  ;;  %v4031_v1 = vld [vmem:[%s4398_s7 + $0x5e8] sm:$0xff] }
 0x149   : > { %9532 = vst [vmem:[#allocation192_spill] sm:$0xff] %v5208_v9  ;;  %9533 = vst [vmem:[#allocation193_spill] sm:$0xff] %v5211_v22  ;;  %v3884_v9 = vld [vmem:[%s4398_s7 + $0x150] sm:$0xff]  ;;  %v5232_v2 = vmul.f32 %v3885_v50, %v3885_v50 }
 0x14a   : > { %9534 = vst [vmem:[#allocation194_spill] sm:$0xff] %v5214_v5  ;;  %9535 = vst [vmem:[#allocation195_spill] sm:$0xff] %v5217_v0  ;;  %v5229_v55 = vmul.f32 %v3884_v9, %v3884_v9  ;;  %v3886_v0 = vld [vmem:[%s4398_s7 + $0x160] sm:$0xff] }
 0x14b   : > { %9536 = vst [vmem:[#allocation196_spill] sm:$0xff] %v5220_v62  ;;  %9537 = vst [vmem:[#allocation197_spill] sm:$0xff] %v5223_v54  ;;  %v5235_v47 = vmul.f32 %v3886_v0, %v3886_v0  ;;  %v3887_v62 = vld [vmem:[%s4398_s7 + $0x168] sm:$0xff]  ;;  %v3888_v54 = vld [vmem:[%s4398_s7 + $0x170] sm:$0xff] }
 0x14c   : > { %9538 = vst [vmem:[#allocation198_spill] sm:$0xff] %v5226_v11  ;;  %9539 = vst [vmem:[#allocation199_spill] sm:$0xff] %v5229_v55  ;;  %v5238_v27 = vmul.f32 %v3887_v62, %v3887_v62  ;;  %v5241_v49 = vmul.f32 %v3888_v54, %v3888_v54  ;;  %v3889_v11 = vld [vmem:[%s4398_s7 + $0x178] sm:$0xff]  ;;  %v3890_v55 = vld [vmem:[%s4398_s7 + $0x180] sm:$0xff] }
 0x14d   : > { %9540 = vst [vmem:[#allocation200_spill] sm:$0xff] %v5232_v2  ;;  %9541 = vst [vmem:[#allocation201_spill] sm:$0xff] %v5235_v47  ;;  %v5244_v9 = vmul.f32 %v3889_v11, %v3889_v11  ;;  %v5247_v50 = vmul.f32 %v3890_v55, %v3890_v55  ;;  %v3891_v2 = vld [vmem:[%s4398_s7 + $0x188] sm:$0xff]  ;;  %v3892_v47 = vld [vmem:[%s4398_s7 + $0x190] sm:$0xff] }
 0x14e   : > { %9542 = vst [vmem:[#allocation202_spill] sm:$0xff] %v5238_v27  ;;  %9543 = vst [vmem:[#allocation203_spill] sm:$0xff] %v5241_v49  ;;  %v5250_v0 = vmul.f32 %v3891_v2, %v3891_v2  ;;  %v5253_v62 = vmul.f32 %v3892_v47, %v3892_v47  ;;  %v3893_v27 = vld [vmem:[%s4398_s7 + $0x198] sm:$0xff]  ;;  %v3894_v49 = vld [vmem:[%s4398_s7 + $0x1a0] sm:$0xff] }
 0x14f   : > { %9544 = vst [vmem:[#allocation204_spill] sm:$0xff] %v5244_v9  ;;  %9545 = vst [vmem:[#allocation205_spill] sm:$0xff] %v5247_v50  ;;  %v5256_v54 = vmul.f32 %v3893_v27, %v3893_v27  ;;  %v5259_v11 = vmul.f32 %v3894_v49, %v3894_v49  ;;  %v3895_v9 = vld [vmem:[%s4398_s7 + $0x1a8] sm:$0xff]  ;;  %v3896_v50 = vld [vmem:[%s4398_s7 + $0x1b0] sm:$0xff] }
 0x150   : > { %9546 = vst [vmem:[#allocation206_spill] sm:$0xff] %v5250_v0  ;;  %9547 = vst [vmem:[#allocation207_spill] sm:$0xff] %v5253_v62  ;;  %v5262_v55 = vmul.f32 %v3895_v9, %v3895_v9  ;;  %v5265_v2 = vmul.f32 %v3896_v50, %v3896_v50  ;;  %v3897_v0 = vld [vmem:[%s4398_s7 + $0x1b8] sm:$0xff]  ;;  %v3898_v62 = vld [vmem:[%s4398_s7 + $0x1c0] sm:$0xff] }
 0x151   : > { %9548 = vst [vmem:[#allocation208_spill] sm:$0xff] %v5256_v54  ;;  %9549 = vst [vmem:[#allocation209_spill] sm:$0xff] %v5259_v11  ;;  %v5268_v47 = vmul.f32 %v3897_v0, %v3897_v0  ;;  %v5271_v27 = vmul.f32 %v3898_v62, %v3898_v62  ;;  %v3899_v54 = vld [vmem:[%s4398_s7 + $0x1c8] sm:$0xff]  ;;  %v3900_v11 = vld [vmem:[%s4398_s7 + $0x1d0] sm:$0xff] }
 0x152   : > { %9550 = vst [vmem:[#allocation210_spill] sm:$0xff] %v5262_v55  ;;  %9551 = vst [vmem:[#allocation211_spill] sm:$0xff] %v5265_v2  ;;  %v5274_v49 = vmul.f32 %v3899_v54, %v3899_v54  ;;  %v5277_v9 = vmul.f32 %v3900_v11, %v3900_v11  ;;  %v3901_v55 = vld [vmem:[%s4398_s7 + $0x1d8] sm:$0xff]  ;;  %v3902_v2 = vld [vmem:[%s4398_s7 + $0x1e0] sm:$0xff] }
 0x153   : > { %9552 = vst [vmem:[#allocation212_spill] sm:$0xff] %v5268_v47  ;;  %9553 = vst [vmem:[#allocation213_spill] sm:$0xff] %v5271_v27  ;;  %v5280_v50 = vmul.f32 %v3901_v55, %v3901_v55  ;;  %v5283_v0 = vmul.f32 %v3902_v2, %v3902_v2  ;;  %v3903_v47 = vld [vmem:[%s4398_s7 + $0x1e8] sm:$0xff]  ;;  %v3904_v27 = vld [vmem:[%s4398_s7 + $0x1f0] sm:$0xff] }
 0x154   : > { %9554 = vst [vmem:[#allocation214_spill] sm:$0xff] %v5274_v49  ;;  %9555 = vst [vmem:[#allocation215_spill] sm:$0xff] %v5277_v9  ;;  %v5286_v62 = vmul.f32 %v3903_v47, %v3903_v47  ;;  %v5289_v54 = vmul.f32 %v3904_v27, %v3904_v27  ;;  %v3905_v49 = vld [vmem:[%s4398_s7 + $0x1f8] sm:$0xff]  ;;  %v3906_v9 = vld [vmem:[%s4398_s7 + $0x200] sm:$0xff] }
 0x155   : > { %9556 = vst [vmem:[#allocation216_spill] sm:$0xff] %v5280_v50  ;;  %9557 = vst [vmem:[#allocation217_spill] sm:$0xff] %v5283_v0  ;;  %v5292_v11 = vmul.f32 %v3905_v49, %v3905_v49  ;;  %v5295_v55 = vmul.f32 %v3906_v9, %v3906_v9  ;;  %v3907_v50 = vld [vmem:[%s4398_s7 + $0x208] sm:$0xff]  ;;  %v3908_v0 = vld [vmem:[%s4398_s7 + $0x210] sm:$0xff] }
 0x156   : > { %9558 = vst [vmem:[#allocation218_spill] sm:$0xff] %v5286_v62  ;;  %9559 = vst [vmem:[#allocation219_spill] sm:$0xff] %v5289_v54  ;;  %v5298_v2 = vmul.f32 %v3907_v50, %v3907_v50  ;;  %v5301_v47 = vmul.f32 %v3908_v0, %v3908_v0  ;;  %v3909_v62 = vld [vmem:[%s4398_s7 + $0x218] sm:$0xff]  ;;  %v3910_v54 = vld [vmem:[%s4398_s7 + $0x220] sm:$0xff] }
 0x157   : > { %9560 = vst [vmem:[#allocation220_spill] sm:$0xff] %v5292_v11  ;;  %9561 = vst [vmem:[#allocation221_spill] sm:$0xff] %v5295_v55  ;;  %v5304_v27 = vmul.f32 %v3909_v62, %v3909_v62  ;;  %v5307_v49 = vmul.f32 %v3910_v54, %v3910_v54  ;;  %v3911_v11 = vld [vmem:[%s4398_s7 + $0x228] sm:$0xff]  ;;  %v3912_v55 = vld [vmem:[%s4398_s7 + $0x230] sm:$0xff] }
 0x158   : > { %9562 = vst [vmem:[#allocation222_spill] sm:$0xff] %v5298_v2  ;;  %9563 = vst [vmem:[#allocation223_spill] sm:$0xff] %v5301_v47  ;;  %v5310_v9 = vmul.f32 %v3911_v11, %v3911_v11  ;;  %v5313_v50 = vmul.f32 %v3912_v55, %v3912_v55  ;;  %v3913_v2 = vld [vmem:[%s4398_s7 + $0x238] sm:$0xff]  ;;  %v3914_v47 = vld [vmem:[%s4398_s7 + $0x240] sm:$0xff] }
 0x159   : > { %9564 = vst [vmem:[#allocation224_spill] sm:$0xff] %v5304_v27  ;;  %9565 = vst [vmem:[#allocation225_spill] sm:$0xff] %v5307_v49  ;;  %v5316_v0 = vmul.f32 %v3913_v2, %v3913_v2  ;;  %v5319_v62 = vmul.f32 %v3914_v47, %v3914_v47  ;;  %v3915_v27 = vld [vmem:[%s4398_s7 + $0x248] sm:$0xff]  ;;  %v3916_v49 = vld [vmem:[%s4398_s7 + $0x250] sm:$0xff] }
 0x15a   : > { %9566 = vst [vmem:[#allocation226_spill] sm:$0xff] %v5310_v9  ;;  %9567 = vst [vmem:[#allocation227_spill] sm:$0xff] %v5313_v50  ;;  %v5322_v54 = vmul.f32 %v3915_v27, %v3915_v27  ;;  %v5325_v11 = vmul.f32 %v3916_v49, %v3916_v49  ;;  %v3917_v9 = vld [vmem:[%s4398_s7 + $0x258] sm:$0xff]  ;;  %v3918_v50 = vld [vmem:[%s4398_s7 + $0x260] sm:$0xff] }
 0x15b   : > { %9568 = vst [vmem:[#allocation228_spill] sm:$0xff] %v5316_v0  ;;  %9569 = vst [vmem:[#allocation229_spill] sm:$0xff] %v5319_v62  ;;  %v5328_v55 = vmul.f32 %v3917_v9, %v3917_v9  ;;  %v5331_v2 = vmul.f32 %v3918_v50, %v3918_v50  ;;  %v3919_v0 = vld [vmem:[%s4398_s7 + $0x268] sm:$0xff]  ;;  %v3920_v62 = vld [vmem:[%s4398_s7 + $0x270] sm:$0xff] }
 0x15c   : > { %9570 = vst [vmem:[#allocation230_spill] sm:$0xff] %v5322_v54  ;;  %9571 = vst [vmem:[#allocation231_spill] sm:$0xff] %v5325_v11  ;;  %v5334_v47 = vmul.f32 %v3919_v0, %v3919_v0  ;;  %v5337_v27 = vmul.f32 %v3920_v62, %v3920_v62  ;;  %v3921_v54 = vld [vmem:[%s4398_s7 + $0x278] sm:$0xff]  ;;  %v3922_v11 = vld [vmem:[%s4398_s7 + $0x280] sm:$0xff] }
 0x15d   : > { %9572 = vst [vmem:[#allocation232_spill] sm:$0xff] %v5328_v55  ;;  %9573 = vst [vmem:[#allocation233_spill] sm:$0xff] %v5331_v2  ;;  %v5340_v49 = vmul.f32 %v3921_v54, %v3921_v54  ;;  %v5343_v9 = vmul.f32 %v3922_v11, %v3922_v11  ;;  %v3923_v55 = vld [vmem:[%s4398_s7 + $0x288] sm:$0xff]  ;;  %v3924_v2 = vld [vmem:[%s4398_s7 + $0x290] sm:$0xff] }
 0x15e   : > { %9574 = vst [vmem:[#allocation234_spill] sm:$0xff] %v5334_v47  ;;  %9575 = vst [vmem:[#allocation235_spill] sm:$0xff] %v5337_v27  ;;  %v5346_v50 = vmul.f32 %v3923_v55, %v3923_v55  ;;  %v5349_v0 = vmul.f32 %v3924_v2, %v3924_v2  ;;  %v3925_v47 = vld [vmem:[%s4398_s7 + $0x298] sm:$0xff]  ;;  %v3926_v27 = vld [vmem:[%s4398_s7 + $0x2a0] sm:$0xff] }
 0x15f   : > { %9576 = vst [vmem:[#allocation236_spill] sm:$0xff] %v5340_v49  ;;  %9577 = vst [vmem:[#allocation237_spill] sm:$0xff] %v5343_v9  ;;  %v5352_v62 = vmul.f32 %v3925_v47, %v3925_v47  ;;  %v5355_v54 = vmul.f32 %v3926_v27, %v3926_v27  ;;  %v3927_v49 = vld [vmem:[%s4398_s7 + $0x2a8] sm:$0xff]  ;;  %v3928_v9 = vld [vmem:[%s4398_s7 + $0x2b0] sm:$0xff] }
 0x160   : > { %9578 = vst [vmem:[#allocation238_spill] sm:$0xff] %v5346_v50  ;;  %9579 = vst [vmem:[#allocation239_spill] sm:$0xff] %v5349_v0  ;;  %v5358_v11 = vmul.f32 %v3927_v49, %v3927_v49  ;;  %v5361_v55 = vmul.f32 %v3928_v9, %v3928_v9  ;;  %v3929_v50 = vld [vmem:[%s4398_s7 + $0x2b8] sm:$0xff]  ;;  %v3930_v0 = vld [vmem:[%s4398_s7 + $0x2c0] sm:$0xff] }
 0x161   : > { %9580 = vst [vmem:[#allocation240_spill] sm:$0xff] %v5352_v62  ;;  %9581 = vst [vmem:[#allocation241_spill] sm:$0xff] %v5355_v54  ;;  %v5364_v2 = vmul.f32 %v3929_v50, %v3929_v50  ;;  %v5367_v47 = vmul.f32 %v3930_v0, %v3930_v0  ;;  %v3931_v62 = vld [vmem:[%s4398_s7 + $0x2c8] sm:$0xff]  ;;  %v3932_v54 = vld [vmem:[%s4398_s7 + $0x2d0] sm:$0xff] }
 0x162   : > { %9582 = vst [vmem:[#allocation242_spill] sm:$0xff] %v5358_v11  ;;  %9583 = vst [vmem:[#allocation243_spill] sm:$0xff] %v5361_v55  ;;  %v5370_v27 = vmul.f32 %v3931_v62, %v3931_v62  ;;  %v5373_v49 = vmul.f32 %v3932_v54, %v3932_v54  ;;  %v3933_v11 = vld [vmem:[%s4398_s7 + $0x2d8] sm:$0xff]  ;;  %v3934_v55 = vld [vmem:[%s4398_s7 + $0x2e0] sm:$0xff] }
 0x163   : > { %9584 = vst [vmem:[#allocation244_spill] sm:$0xff] %v5364_v2  ;;  %9585 = vst [vmem:[#allocation245_spill] sm:$0xff] %v5367_v47  ;;  %v5376_v9 = vmul.f32 %v3933_v11, %v3933_v11  ;;  %v5379_v50 = vmul.f32 %v3934_v55, %v3934_v55  ;;  %v3935_v2 = vld [vmem:[%s4398_s7 + $0x2e8] sm:$0xff]  ;;  %v3936_v47 = vld [vmem:[%s4398_s7 + $0x2f0] sm:$0xff] }
 0x164   : > { %9586 = vst [vmem:[#allocation246_spill] sm:$0xff] %v5370_v27  ;;  %9587 = vst [vmem:[#allocation247_spill] sm:$0xff] %v5373_v49  ;;  %v5382_v0 = vmul.f32 %v3935_v2, %v3935_v2  ;;  %v5385_v62 = vmul.f32 %v3936_v47, %v3936_v47  ;;  %v3937_v27 = vld [vmem:[%s4398_s7 + $0x2f8] sm:$0xff]  ;;  %v3938_v49 = vld [vmem:[%s4398_s7 + $0x300] sm:$0xff] }
 0x165   : > { %9588 = vst [vmem:[#allocation248_spill] sm:$0xff] %v5376_v9  ;;  %9589 = vst [vmem:[#allocation249_spill] sm:$0xff] %v5379_v50  ;;  %v5388_v54 = vmul.f32 %v3937_v27, %v3937_v27  ;;  %v5391_v11 = vmul.f32 %v3938_v49, %v3938_v49  ;;  %v3939_v9 = vld [vmem:[%s4398_s7 + $0x308] sm:$0xff]  ;;  %v3940_v50 = vld [vmem:[%s4398_s7 + $0x310] sm:$0xff] }
 0x166   : > { %9590 = vst [vmem:[#allocation250_spill] sm:$0xff] %v5382_v0  ;;  %9591 = vst [vmem:[#allocation251_spill] sm:$0xff] %v5385_v62  ;;  %v5394_v55 = vmul.f32 %v3939_v9, %v3939_v9  ;;  %v5397_v2 = vmul.f32 %v3940_v50, %v3940_v50  ;;  %v3941_v0 = vld [vmem:[%s4398_s7 + $0x318] sm:$0xff]  ;;  %v3942_v62 = vld [vmem:[%s4398_s7 + $0x320] sm:$0xff] }
 0x167   : > { %9592 = vst [vmem:[#allocation252_spill] sm:$0xff] %v5388_v54  ;;  %9593 = vst [vmem:[#allocation253_spill] sm:$0xff] %v5391_v11  ;;  %v5400_v47 = vmul.f32 %v3941_v0, %v3941_v0  ;;  %v5403_v27 = vmul.f32 %v3942_v62, %v3942_v62  ;;  %v3943_v54 = vld [vmem:[%s4398_s7 + $0x328] sm:$0xff]  ;;  %v3944_v11 = vld [vmem:[%s4398_s7 + $0x330] sm:$0xff] }
 0x168   : > { %9594 = vst [vmem:[#allocation254_spill] sm:$0xff] %v5394_v55  ;;  %9595 = vst [vmem:[#allocation255_spill] sm:$0xff] %v5397_v2  ;;  %v5406_v49 = vmul.f32 %v3943_v54, %v3943_v54  ;;  %v5409_v9 = vmul.f32 %v3944_v11, %v3944_v11  ;;  %v3945_v55 = vld [vmem:[%s4398_s7 + $0x338] sm:$0xff]  ;;  %v3946_v2 = vld [vmem:[%s4398_s7 + $0x340] sm:$0xff] }
 0x169   : > { %9596 = vst [vmem:[#allocation256_spill] sm:$0xff] %v5400_v47  ;;  %9597 = vst [vmem:[#allocation257_spill] sm:$0xff] %v5403_v27  ;;  %v5412_v50 = vmul.f32 %v3945_v55, %v3945_v55  ;;  %v5415_v0 = vmul.f32 %v3946_v2, %v3946_v2  ;;  %v3947_v47 = vld [vmem:[%s4398_s7 + $0x348] sm:$0xff]  ;;  %v3948_v27 = vld [vmem:[%s4398_s7 + $0x350] sm:$0xff] }
 0x16a   : > { %9598 = vst [vmem:[#allocation258_spill] sm:$0xff] %v5406_v49  ;;  %9599 = vst [vmem:[#allocation259_spill] sm:$0xff] %v5409_v9  ;;  %v5418_v62 = vmul.f32 %v3947_v47, %v3947_v47  ;;  %v5421_v54 = vmul.f32 %v3948_v27, %v3948_v27  ;;  %v3949_v49 = vld [vmem:[%s4398_s7 + $0x358] sm:$0xff]  ;;  %v3950_v9 = vld [vmem:[%s4398_s7 + $0x360] sm:$0xff] }
 0x16b   : > { %9600 = vst [vmem:[#allocation260_spill] sm:$0xff] %v5412_v50  ;;  %9601 = vst [vmem:[#allocation261_spill] sm:$0xff] %v5415_v0  ;;  %v5424_v11 = vmul.f32 %v3949_v49, %v3949_v49  ;;  %v5427_v55 = vmul.f32 %v3950_v9, %v3950_v9  ;;  %v3951_v50 = vld [vmem:[%s4398_s7 + $0x368] sm:$0xff]  ;;  %v3952_v0 = vld [vmem:[%s4398_s7 + $0x370] sm:$0xff] }
 0x16c   : > { %9602 = vst [vmem:[#allocation262_spill] sm:$0xff] %v5418_v62  ;;  %9603 = vst [vmem:[#allocation263_spill] sm:$0xff] %v5421_v54  ;;  %v5430_v2 = vmul.f32 %v3951_v50, %v3951_v50  ;;  %v5433_v47 = vmul.f32 %v3952_v0, %v3952_v0  ;;  %v3953_v62 = vld [vmem:[%s4398_s7 + $0x378] sm:$0xff]  ;;  %v3954_v54 = vld [vmem:[%s4398_s7 + $0x380] sm:$0xff] }
 0x16d   : > { %9604 = vst [vmem:[#allocation264_spill] sm:$0xff] %v5424_v11  ;;  %9605 = vst [vmem:[#allocation265_spill] sm:$0xff] %v5427_v55  ;;  %v5436_v27 = vmul.f32 %v3953_v62, %v3953_v62  ;;  %v5439_v49 = vmul.f32 %v3954_v54, %v3954_v54  ;;  %v3955_v11 = vld [vmem:[%s4398_s7 + $0x388] sm:$0xff]  ;;  %v3956_v55 = vld [vmem:[%s4398_s7 + $0x390] sm:$0xff] }
 0x16e   : > { %9606 = vst [vmem:[#allocation266_spill] sm:$0xff] %v5430_v2  ;;  %9607 = vst [vmem:[#allocation267_spill] sm:$0xff] %v5433_v47  ;;  %v5442_v9 = vmul.f32 %v3955_v11, %v3955_v11  ;;  %v5445_v50 = vmul.f32 %v3956_v55, %v3956_v55  ;;  %v3957_v2 = vld [vmem:[%s4398_s7 + $0x398] sm:$0xff]  ;;  %v3958_v47 = vld [vmem:[%s4398_s7 + $0x3a0] sm:$0xff] }
 0x16f   : > { %9608 = vst [vmem:[#allocation268_spill] sm:$0xff] %v5436_v27  ;;  %9609 = vst [vmem:[#allocation269_spill] sm:$0xff] %v5439_v49  ;;  %v5448_v0 = vmul.f32 %v3957_v2, %v3957_v2  ;;  %v5451_v62 = vmul.f32 %v3958_v47, %v3958_v47  ;;  %v3959_v27 = vld [vmem:[%s4398_s7 + $0x3a8] sm:$0xff]  ;;  %v3960_v49 = vld [vmem:[%s4398_s7 + $0x3b0] sm:$0xff] }
 0x170   : > { %9610 = vst [vmem:[#allocation270_spill] sm:$0xff] %v5442_v9  ;;  %9611 = vst [vmem:[#allocation271_spill] sm:$0xff] %v5445_v50  ;;  %v5454_v54 = vmul.f32 %v3959_v27, %v3959_v27  ;;  %v5457_v11 = vmul.f32 %v3960_v49, %v3960_v49  ;;  %v3961_v9 = vld [vmem:[%s4398_s7 + $0x3b8] sm:$0xff]  ;;  %v3962_v50 = vld [vmem:[%s4398_s7 + $0x3c0] sm:$0xff] }
 0x171   : > { %9612 = vst [vmem:[#allocation272_spill] sm:$0xff] %v5448_v0  ;;  %9613 = vst [vmem:[#allocation273_spill] sm:$0xff] %v5451_v62  ;;  %v5460_v55 = vmul.f32 %v3961_v9, %v3961_v9  ;;  %v5463_v2 = vmul.f32 %v3962_v50, %v3962_v50  ;;  %v3963_v0 = vld [vmem:[%s4398_s7 + $0x3c8] sm:$0xff]  ;;  %v3964_v62 = vld [vmem:[%s4398_s7 + $0x3d0] sm:$0xff] }
 0x172   : > { %9614 = vst [vmem:[#allocation274_spill] sm:$0xff] %v5454_v54  ;;  %9615 = vst [vmem:[#allocation275_spill] sm:$0xff] %v5457_v11  ;;  %v5466_v47 = vmul.f32 %v3963_v0, %v3963_v0  ;;  %v5469_v27 = vmul.f32 %v3964_v62, %v3964_v62  ;;  %v3965_v54 = vld [vmem:[%s4398_s7 + $0x3d8] sm:$0xff]  ;;  %v3966_v11 = vld [vmem:[%s4398_s7 + $0x3e0] sm:$0xff] }
 0x173   : > { %9616 = vst [vmem:[#allocation276_spill] sm:$0xff] %v5460_v55  ;;  %9617 = vst [vmem:[#allocation277_spill] sm:$0xff] %v5463_v2  ;;  %v5472_v49 = vmul.f32 %v3965_v54, %v3965_v54  ;;  %v5475_v9 = vmul.f32 %v3966_v11, %v3966_v11  ;;  %v3967_v55 = vld [vmem:[%s4398_s7 + $0x3e8] sm:$0xff]  ;;  %v3968_v2 = vld [vmem:[%s4398_s7 + $0x3f0] sm:$0xff] }
 0x174   : > { %9618 = vst [vmem:[#allocation278_spill] sm:$0xff] %v5466_v47  ;;  %9619 = vst [vmem:[#allocation279_spill] sm:$0xff] %v5469_v27  ;;  %v5478_v50 = vmul.f32 %v3967_v55, %v3967_v55  ;;  %v5481_v0 = vmul.f32 %v3968_v2, %v3968_v2  ;;  %v3969_v47 = vld [vmem:[%s4398_s7 + $0x3f8] sm:$0xff]  ;;  %v3970_v27 = vld [vmem:[%s4398_s7 + $0x400] sm:$0xff] }
 0x175   : > { %9620 = vst [vmem:[#allocation280_spill] sm:$0xff] %v5472_v49  ;;  %9621 = vst [vmem:[#allocation281_spill] sm:$0xff] %v5475_v9  ;;  %v5484_v62 = vmul.f32 %v3969_v47, %v3969_v47  ;;  %v5487_v54 = vmul.f32 %v3970_v27, %v3970_v27  ;;  %v3971_v49 = vld [vmem:[%s4398_s7 + $0x408] sm:$0xff]  ;;  %v3972_v9 = vld [vmem:[%s4398_s7 + $0x410] sm:$0xff] }
 0x176   : > { %9622 = vst [vmem:[#allocation282_spill] sm:$0xff] %v5478_v50  ;;  %9623 = vst [vmem:[#allocation283_spill] sm:$0xff] %v5481_v0  ;;  %v5490_v11 = vmul.f32 %v3971_v49, %v3971_v49  ;;  %v5493_v55 = vmul.f32 %v3972_v9, %v3972_v9  ;;  %v3973_v50 = vld [vmem:[%s4398_s7 + $0x418] sm:$0xff]  ;;  %v3974_v0 = vld [vmem:[%s4398_s7 + $0x420] sm:$0xff] }
 0x177   : > { %9624 = vst [vmem:[#allocation284_spill] sm:$0xff] %v5484_v62  ;;  %9625 = vst [vmem:[#allocation285_spill] sm:$0xff] %v5487_v54  ;;  %v5496_v2 = vmul.f32 %v3973_v50, %v3973_v50  ;;  %v5499_v47 = vmul.f32 %v3974_v0, %v3974_v0  ;;  %v3975_v62 = vld [vmem:[%s4398_s7 + $0x428] sm:$0xff]  ;;  %v3976_v54 = vld [vmem:[%s4398_s7 + $0x430] sm:$0xff] }
 0x178   : > { %9626 = vst [vmem:[#allocation286_spill] sm:$0xff] %v5490_v11  ;;  %9627 = vst [vmem:[#allocation287_spill] sm:$0xff] %v5493_v55  ;;  %v5502_v27 = vmul.f32 %v3975_v62, %v3975_v62  ;;  %v5505_v49 = vmul.f32 %v3976_v54, %v3976_v54  ;;  %v3977_v11 = vld [vmem:[%s4398_s7 + $0x438] sm:$0xff]  ;;  %v3978_v55 = vld [vmem:[%s4398_s7 + $0x440] sm:$0xff] }
 0x179   : > { %9628 = vst [vmem:[#allocation288_spill] sm:$0xff] %v5496_v2  ;;  %9629 = vst [vmem:[#allocation289_spill] sm:$0xff] %v5499_v47  ;;  %v5508_v9 = vmul.f32 %v3977_v11, %v3977_v11  ;;  %v5511_v50 = vmul.f32 %v3978_v55, %v3978_v55  ;;  %v3979_v2 = vld [vmem:[%s4398_s7 + $0x448] sm:$0xff]  ;;  %v3980_v47 = vld [vmem:[%s4398_s7 + $0x450] sm:$0xff] }
 0x17a   : > { %9630 = vst [vmem:[#allocation290_spill] sm:$0xff] %v5502_v27  ;;  %9631 = vst [vmem:[#allocation291_spill] sm:$0xff] %v5505_v49  ;;  %v5514_v0 = vmul.f32 %v3979_v2, %v3979_v2  ;;  %v5517_v62 = vmul.f32 %v3980_v47, %v3980_v47  ;;  %v3981_v27 = vld [vmem:[%s4398_s7 + $0x458] sm:$0xff]  ;;  %v3982_v49 = vld [vmem:[%s4398_s7 + $0x460] sm:$0xff] }
 0x17b   : > { %9632 = vst [vmem:[#allocation292_spill] sm:$0xff] %v5508_v9  ;;  %9633 = vst [vmem:[#allocation293_spill] sm:$0xff] %v5511_v50  ;;  %v5520_v54 = vmul.f32 %v3981_v27, %v3981_v27  ;;  %v5523_v11 = vmul.f32 %v3982_v49, %v3982_v49  ;;  %v3983_v9 = vld [vmem:[%s4398_s7 + $0x468] sm:$0xff]  ;;  %v3984_v50 = vld [vmem:[%s4398_s7 + $0x470] sm:$0xff] }
 0x17c   : > { %9634 = vst [vmem:[#allocation294_spill] sm:$0xff] %v5514_v0  ;;  %9635 = vst [vmem:[#allocation295_spill] sm:$0xff] %v5517_v62  ;;  %v5526_v55 = vmul.f32 %v3983_v9, %v3983_v9  ;;  %v5529_v2 = vmul.f32 %v3984_v50, %v3984_v50  ;;  %v3985_v0 = vld [vmem:[%s4398_s7 + $0x478] sm:$0xff]  ;;  %v3986_v62 = vld [vmem:[%s4398_s7 + $0x480] sm:$0xff] }
 0x17d   : > { %9636 = vst [vmem:[#allocation296_spill] sm:$0xff] %v5520_v54  ;;  %9637 = vst [vmem:[#allocation297_spill] sm:$0xff] %v5523_v11  ;;  %v5532_v47 = vmul.f32 %v3985_v0, %v3985_v0  ;;  %v5535_v27 = vmul.f32 %v3986_v62, %v3986_v62  ;;  %v3987_v54 = vld [vmem:[%s4398_s7 + $0x488] sm:$0xff]  ;;  %v3988_v11 = vld [vmem:[%s4398_s7 + $0x490] sm:$0xff] }
 0x17e   : > { %9638 = vst [vmem:[#allocation298_spill] sm:$0xff] %v5526_v55  ;;  %9639 = vst [vmem:[#allocation299_spill] sm:$0xff] %v5529_v2  ;;  %v5538_v49 = vmul.f32 %v3987_v54, %v3987_v54  ;;  %v5541_v9 = vmul.f32 %v3988_v11, %v3988_v11  ;;  %v3989_v55 = vld [vmem:[%s4398_s7 + $0x498] sm:$0xff]  ;;  %v3990_v2 = vld [vmem:[%s4398_s7 + $0x4a0] sm:$0xff] }
 0x17f   : > { %9640 = vst [vmem:[#allocation300_spill] sm:$0xff] %v5532_v47  ;;  %9641 = vst [vmem:[#allocation301_spill] sm:$0xff] %v5535_v27  ;;  %v5544_v50 = vmul.f32 %v3989_v55, %v3989_v55  ;;  %v5547_v0 = vmul.f32 %v3990_v2, %v3990_v2  ;;  %v3991_v47 = vld [vmem:[%s4398_s7 + $0x4a8] sm:$0xff]  ;;  %v3992_v27 = vld [vmem:[%s4398_s7 + $0x4b0] sm:$0xff] }
 0x180   : > { %9642 = vst [vmem:[#allocation302_spill] sm:$0xff] %v5538_v49  ;;  %9643 = vst [vmem:[#allocation303_spill] sm:$0xff] %v5541_v9  ;;  %v5550_v62 = vmul.f32 %v3991_v47, %v3991_v47  ;;  %v5553_v54 = vmul.f32 %v3992_v27, %v3992_v27  ;;  %v3993_v49 = vld [vmem:[%s4398_s7 + $0x4b8] sm:$0xff]  ;;  %v3994_v9 = vld [vmem:[%s4398_s7 + $0x4c0] sm:$0xff] }
 0x181   : > { %9644 = vst [vmem:[#allocation304_spill] sm:$0xff] %v5544_v50  ;;  %9645 = vst [vmem:[#allocation305_spill] sm:$0xff] %v5547_v0  ;;  %v5556_v11 = vmul.f32 %v3993_v49, %v3993_v49  ;;  %v5559_v55 = vmul.f32 %v3994_v9, %v3994_v9  ;;  %v3995_v50 = vld [vmem:[%s4398_s7 + $0x4c8] sm:$0xff]  ;;  %v3996_v0 = vld [vmem:[%s4398_s7 + $0x4d0] sm:$0xff] }
 0x182   : > { %9646 = vst [vmem:[#allocation306_spill] sm:$0xff] %v5550_v62  ;;  %9647 = vst [vmem:[#allocation307_spill] sm:$0xff] %v5553_v54  ;;  %v5562_v2 = vmul.f32 %v3995_v50, %v3995_v50  ;;  %v5565_v47 = vmul.f32 %v3996_v0, %v3996_v0  ;;  %v3997_v62 = vld [vmem:[%s4398_s7 + $0x4d8] sm:$0xff]  ;;  %v3998_v54 = vld [vmem:[%s4398_s7 + $0x4e0] sm:$0xff] }
 0x183   : > { %9648 = vst [vmem:[#allocation308_spill] sm:$0xff] %v5556_v11  ;;  %9649 = vst [vmem:[#allocation309_spill] sm:$0xff] %v5559_v55  ;;  %v5568_v27 = vmul.f32 %v3997_v62, %v3997_v62  ;;  %v5571_v49 = vmul.f32 %v3998_v54, %v3998_v54  ;;  %v3999_v11 = vld [vmem:[%s4398_s7 + $0x4e8] sm:$0xff]  ;;  %v4000_v55 = vld [vmem:[%s4398_s7 + $0x4f0] sm:$0xff] }
 0x184   : > { %9650 = vst [vmem:[#allocation310_spill] sm:$0xff] %v5562_v2  ;;  %9651 = vst [vmem:[#allocation311_spill] sm:$0xff] %v5565_v47  ;;  %v5574_v9 = vmul.f32 %v3999_v11, %v3999_v11  ;;  %v5577_v50 = vmul.f32 %v4000_v55, %v4000_v55  ;;  %v4001_v2 = vld [vmem:[%s4398_s7 + $0x4f8] sm:$0xff]  ;;  %v4002_v47 = vld [vmem:[%s4398_s7 + $0x500] sm:$0xff] }
 0x185   : > { %9652 = vst [vmem:[#allocation312_spill] sm:$0xff] %v5568_v27  ;;  %9653 = vst [vmem:[#allocation313_spill] sm:$0xff] %v5571_v49  ;;  %v5580_v0 = vmul.f32 %v4001_v2, %v4001_v2  ;;  %v5583_v62 = vmul.f32 %v4002_v47, %v4002_v47  ;;  %v4003_v27 = vld [vmem:[%s4398_s7 + $0x508] sm:$0xff]  ;;  %v4004_v49 = vld [vmem:[%s4398_s7 + $0x510] sm:$0xff] }
 0x186   : > { %9654 = vst [vmem:[#allocation314_spill] sm:$0xff] %v5574_v9  ;;  %9655 = vst [vmem:[#allocation315_spill] sm:$0xff] %v5577_v50  ;;  %v5586_v54 = vmul.f32 %v4003_v27, %v4003_v27  ;;  %v5589_v11 = vmul.f32 %v4004_v49, %v4004_v49  ;;  %v4005_v9 = vld [vmem:[%s4398_s7 + $0x518] sm:$0xff]  ;;  %v4006_v50 = vld [vmem:[%s4398_s7 + $0x520] sm:$0xff] }
 0x187   : > { %9656 = vst [vmem:[#allocation316_spill] sm:$0xff] %v5580_v0  ;;  %9657 = vst [vmem:[#allocation317_spill] sm:$0xff] %v5583_v62  ;;  %v5592_v55 = vmul.f32 %v4005_v9, %v4005_v9  ;;  %v5595_v2 = vmul.f32 %v4006_v50, %v4006_v50  ;;  %v4007_v0 = vld [vmem:[%s4398_s7 + $0x528] sm:$0xff]  ;;  %v4008_v62 = vld [vmem:[%s4398_s7 + $0x530] sm:$0xff] }
 0x188   : > { %9658 = vst [vmem:[#allocation318_spill] sm:$0xff] %v5586_v54  ;;  %9659 = vst [vmem:[#allocation319_spill] sm:$0xff] %v5589_v11  ;;  %v5598_v47 = vmul.f32 %v4007_v0, %v4007_v0  ;;  %v5601_v27 = vmul.f32 %v4008_v62, %v4008_v62  ;;  %v4009_v54 = vld [vmem:[%s4398_s7 + $0x538] sm:$0xff]  ;;  %v4010_v11 = vld [vmem:[%s4398_s7 + $0x540] sm:$0xff] }
 0x189   : > { %9660 = vst [vmem:[#allocation320_spill] sm:$0xff] %v5592_v55  ;;  %9661 = vst [vmem:[#allocation321_spill] sm:$0xff] %v5595_v2  ;;  %v5604_v49 = vmul.f32 %v4009_v54, %v4009_v54  ;;  %v5607_v9 = vmul.f32 %v4010_v11, %v4010_v11  ;;  %v4011_v55 = vld [vmem:[%s4398_s7 + $0x548] sm:$0xff]  ;;  %v4012_v2 = vld [vmem:[%s4398_s7 + $0x550] sm:$0xff] }
 0x18a   : > { %9662 = vst [vmem:[#allocation322_spill] sm:$0xff] %v5598_v47  ;;  %9663 = vst [vmem:[#allocation323_spill] sm:$0xff] %v5601_v27  ;;  %v5610_v50 = vmul.f32 %v4011_v55, %v4011_v55  ;;  %v5613_v0 = vmul.f32 %v4012_v2, %v4012_v2  ;;  %v4013_v47 = vld [vmem:[%s4398_s7 + $0x558] sm:$0xff]  ;;  %v4014_v27 = vld [vmem:[%s4398_s7 + $0x560] sm:$0xff] }
 0x18b   : > { %9664 = vst [vmem:[#allocation324_spill] sm:$0xff] %v5604_v49  ;;  %9665 = vst [vmem:[#allocation325_spill] sm:$0xff] %v5607_v9  ;;  %v5616_v62 = vmul.f32 %v4013_v47, %v4013_v47  ;;  %v5619_v54 = vmul.f32 %v4014_v27, %v4014_v27  ;;  %v4015_v49 = vld [vmem:[%s4398_s7 + $0x568] sm:$0xff]  ;;  %v4016_v9 = vld [vmem:[%s4398_s7 + $0x570] sm:$0xff] }
 0x18c   : > { %9666 = vst [vmem:[#allocation326_spill] sm:$0xff] %v5610_v50  ;;  %9667 = vst [vmem:[#allocation327_spill] sm:$0xff] %v5613_v0  ;;  %v5622_v11 = vmul.f32 %v4015_v49, %v4015_v49  ;;  %v5625_v55 = vmul.f32 %v4016_v9, %v4016_v9  ;;  %v4017_v50 = vld [vmem:[%s4398_s7 + $0x578] sm:$0xff]  ;;  %v4018_v0 = vld [vmem:[%s4398_s7 + $0x580] sm:$0xff] }
 0x18d   : > { %9668 = vst [vmem:[#allocation328_spill] sm:$0xff] %v5616_v62  ;;  %9669 = vst [vmem:[#allocation329_spill] sm:$0xff] %v5619_v54  ;;  %v5628_v2 = vmul.f32 %v4017_v50, %v4017_v50  ;;  %v5631_v47 = vmul.f32 %v4018_v0, %v4018_v0  ;;  %v4019_v62 = vld [vmem:[%s4398_s7 + $0x588] sm:$0xff]  ;;  %v4020_v54 = vld [vmem:[%s4398_s7 + $0x590] sm:$0xff] }
 0x18e   : > { %9670 = vst [vmem:[#allocation330_spill] sm:$0xff] %v5622_v11  ;;  %9671 = vst [vmem:[#allocation331_spill] sm:$0xff] %v5625_v55  ;;  %v5634_v27 = vmul.f32 %v4019_v62, %v4019_v62  ;;  %v5637_v49 = vmul.f32 %v4020_v54, %v4020_v54  ;;  %v4021_v11 = vld [vmem:[%s4398_s7 + $0x598] sm:$0xff]  ;;  %v4022_v55 = vld [vmem:[%s4398_s7 + $0x5a0] sm:$0xff] }
 0x18f   : > { %9672 = vst [vmem:[#allocation332_spill] sm:$0xff] %v5628_v2  ;;  %9673 = vst [vmem:[#allocation333_spill] sm:$0xff] %v5631_v47  ;;  %v5640_v9 = vmul.f32 %v4021_v11, %v4021_v11  ;;  %v5643_v50 = vmul.f32 %v4022_v55, %v4022_v55  ;;  %v4023_v2 = vld [vmem:[%s4398_s7 + $0x5a8] sm:$0xff]  ;;  %v4024_v47 = vld [vmem:[%s4398_s7 + $0x5b0] sm:$0xff] }
 0x190   : > { %9674 = vst [vmem:[#allocation334_spill] sm:$0xff] %v5634_v27  ;;  %9675 = vst [vmem:[#allocation335_spill] sm:$0xff] %v5637_v49  ;;  %v5646_v0 = vmul.f32 %v4023_v2, %v4023_v2  ;;  %v5649_v62 = vmul.f32 %v4024_v47, %v4024_v47  ;;  %v4025_v27 = vld [vmem:[%s4398_s7 + $0x5b8] sm:$0xff]  ;;  %v4026_v49 = vld [vmem:[%s4398_s7 + $0x5c0] sm:$0xff] }
 0x191   : > { %9676 = vst [vmem:[#allocation336_spill] sm:$0xff] %v5640_v9  ;;  %9677 = vst [vmem:[#allocation337_spill] sm:$0xff] %v5643_v50  ;;  %v5652_v54 = vmul.f32 %v4025_v27, %v4025_v27  ;;  %v5655_v11 = vmul.f32 %v4026_v49, %v4026_v49  ;;  %v4027_v9 = vld [vmem:[%s4398_s7 + $0x5c8] sm:$0xff]  ;;  %v4028_v55 = vld [vmem:[%s4398_s7 + $0x5d0] sm:$0xff]  ;;  %v5670_v27 = vmul.f32 %v4031_v1, %v4031_v1 }
 0x192   : > { %9678 = vst [vmem:[#allocation338_spill] sm:$0xff] %v5646_v0  ;;  %9679 = vst [vmem:[#allocation339_spill] sm:$0xff] %v5649_v62  ;;  %v5658_v5 = vmul.f32 %v4027_v9, %v4027_v9  ;;  %v5661_v50 = vmul.f32 %v4028_v55, %v4028_v55  ;;  %v4029_v2 = vld [vmem:[%s4398_s7 + $0x5d8] sm:$0xff]  ;;  %v4030_v47 = vld [vmem:[%s4398_s7 + $0x5e0] sm:$0xff]  ;;  %v5683_v55 = vmul.f32 %v4761_v13, %v4761_v13 }
 0x193   : > { %9680 = vst [vmem:[#allocation340_spill] sm:$0xff] %v5652_v54  ;;  %9681 = vst [vmem:[#allocation341_spill] sm:$0xff] %v5655_v11  ;;  %v5664_v0 = vmul.f32 %v4029_v2, %v4029_v2  ;;  %v5667_v62 = vmul.f32 %v4030_v47, %v4030_v47  ;;  %v4032_v54 = vld [vmem:[%s4398_s7 + $0x5f0] sm:$0xff]  ;;  %v4033_v49 = vld [vmem:[%s4398_s7 + $0x5f8] sm:$0xff]  ;;  %v5687_v2 = vmul.f32 %v4764_v61, %v4764_v61 }
 0x194   : > { %9682 = vst [vmem:[#allocation342_spill] sm:$0xff] %v5658_v5  ;;  %v5673_v22 = vmul.f32 %v4032_v54, %v4032_v54  ;;  %v5676_v11 = vmul.f32 %v4033_v49, %v4033_v49  ;;  %v4034_v9 = vld [vmem:[%s4398_s7 + $0x600] sm:$0xff]  ;;  %v5691_v1 = vmul.f32 %v4770_v57, %v4770_v57  ;;  %v5698_v49 = vmul.f32 %v4767_v41, %v4767_v41 }
 0x195   : > { %v5679_v5 = vmul.f32 %v4034_v9, %v4034_v9  ;;  %v4035_v54 = vld [vmem:[%s4398_s7 + $0x620] sm:$0xff]  ;;  %v5702_v9 = vmul.f32 %v4773_v53, %v4773_v53  ;;  %v5706_v13 = vmul.f32 %v4776_v26, %v4776_v26  ;;  %v5710_v61 = vmul.f32 %v4779_v52, %v4779_v52  ;;  %s4086_s7 = scalar_lea.vmem %s4085_s14, 4096 }
 0x196   : > { %9683 = vst [vmem:[#allocation343_spill] sm:$0xff] %v5691_v1  ;;  %v5694_v47 = vmul.f32 %v4035_v54, %v4035_v54  ;;  %v5714_v57 = vmul.f32 %v4786_v46, %v4786_v46  ;;  %v5718_v41 = vmul.f32 %v4789_v35, %v4789_v35  ;;  %v5722_v53 = vmul.f32 %v4792_v34, %v4792_v34  ;;  %v9696_v54 = vld [vmem:[#allocation106_spill] sm:$0xff]  ;;  %p4088_p13 = scmp.lt.s32.totalorder %s4086_s7, %s4080_s13 }
 0x197   : > { %9684 = vst [vmem:[#allocation344_spill] sm:$0xff] %v5702_v9  ;;  %9685 = vst [vmem:[#allocation345_spill] sm:$0xff] %v5706_v13  ;;  %v5726_v26 = vmul.f32 %v4795_v63, %v4795_v63  ;;  %v5730_v52 = vmul.f32 %v4798_v56, %v4798_v56  ;;  %v5734_v46 = vmul.f32 %v4801_v51, %v4801_v51 }
 0x198   : > { %9686 = vst [vmem:[#allocation346_spill] sm:$0xff] %v5710_v61  ;;  %9687 = vst [vmem:[#allocation347_spill] sm:$0xff] %v5714_v57  ;;  %v5738_v35 = vmul.f32 %v4808_v12, %v4808_v12  ;;  %v5742_v34 = vmul.f32 %v4811_v3, %v4811_v3  ;;  %v5746_v63 = vmul.f32 %v4814_v43, %v4814_v43  ;;  %p4089_p0 = por %p4088_p13, %p4087_p12 }
 0x199   : > { %9688 = vst [vmem:[#allocation348_spill] sm:$0xff] %v5718_v41  ;;  %9689 = vst [vmem:[#allocation349_spill] sm:$0xff] %v5722_v53  ;;  %v5750_v56 = vmul.f32 %v9696_v54, %v9696_v54  ;;  %v9698_v53 = vld [vmem:[#allocation107_spill] sm:$0xff] }
 0x19a   : > { %9690 = vst [vmem:[#allocation350_spill] sm:$0xff] %v5726_v26  ;;  %9691 = vst [vmem:[#allocation351_spill] sm:$0xff] %v5730_v52  ;;  %v5754_v51 = vmul.f32 %v9698_v53, %v9698_v53  ;;  %p4090_p1 = pnand %p4089_p0, %p4083_p8 }
 0x19b   : > { %9692 = vst [vmem:[#allocation352_spill] sm:$0xff] %v5734_v46  ;;  %9693 = vst [vmem:[#allocation353_spill] sm:$0xff] %v5738_v35  ;;  %v9700_v46 = vld [vmem:[#allocation108_spill] sm:$0xff]  ;;  %v9702_v35 = vld [vmem:[#allocation111_spill] sm:$0xff] }
 0x19c   : > { %9694 = vst [vmem:[#allocation354_spill] sm:$0xff] %v5742_v34  ;;  %9695 = vst [vmem:[#allocation355_spill] sm:$0xff] %v5746_v63  ;;  %v5758_v12 = vmul.f32 %v9700_v46, %v9700_v46  ;;  %v5762_v3 = vmul.f32 %v9702_v35, %v9702_v35  ;;  %v9704_v34 = vld [vmem:[#allocation112_spill] sm:$0xff]  ;;  %v9706_v63 = vld [vmem:[#allocation113_spill] sm:$0xff] }
 0x19d   : > { %9697 = vst [vmem:[#allocation106_spill] sm:$0xff] %v5750_v56  ;;  %9699 = vst [vmem:[#allocation107_spill] sm:$0xff] %v5754_v51  ;;  %v5766_v43 = vmul.f32 %v9704_v34, %v9704_v34  ;;  %v5770_v54 = vmul.f32 %v9706_v63, %v9706_v63  ;;  %v9708_v56 = vld [vmem:[#allocation116_spill] sm:$0xff]  ;;  %v9710_v51 = vld [vmem:[#allocation117_spill] sm:$0xff] }
 0x19e   : > { %9701 = vst [vmem:[#allocation108_spill] sm:$0xff] %v5758_v12  ;;  %9703 = vst [vmem:[#allocation111_spill] sm:$0xff] %v5762_v3  ;;  %v5774_v53 = vmul.f32 %v9708_v56, %v9708_v56  ;;  %v5778_v46 = vmul.f32 %v9710_v51, %v9710_v51  ;;  %v9712_v12 = vld [vmem:[#allocation121_spill] sm:$0xff] }
 0x19f   : > { %9705 = vst [vmem:[#allocation112_spill] sm:$0xff] %v5766_v43  ;;  %9707 = vst [vmem:[#allocation113_spill] sm:$0xff] %v5770_v54  ;;  %v5782_v35 = vmul.f32 %v9712_v12, %v9712_v12  ;;  %v9714_v3 = vld [vmem:[#allocation125_spill] sm:$0xff]  ;;  %v9716_v43 = vld [vmem:[#allocation118_spill] sm:$0xff] }
 0x1a0   : > { %9709 = vst [vmem:[#allocation116_spill] sm:$0xff] %v5774_v53  ;;  %9711 = vst [vmem:[#allocation117_spill] sm:$0xff] %v5778_v46  ;;  %v5786_v34 = vmul.f32 %v9714_v3, %v9714_v3  ;;  %v5790_v63 = vmul.f32 %v9716_v43, %v9716_v43  ;;  %v9718_v54 = vld [vmem:[#allocation122_spill] sm:$0xff]  ;;  %v9720_v53 = vld [vmem:[#allocation123_spill] sm:$0xff]  ;;  %v5810_v43 = vmul.f32 %v4919_v58, %v4919_v58 }
 0x1a1   : > { %9713 = vst [vmem:[#allocation121_spill] sm:$0xff] %v5782_v35  ;;  %v5794_v56 = vmul.f32 %v9718_v54, %v9718_v54  ;;  %v5798_v51 = vmul.f32 %v9720_v53, %v9720_v53  ;;  %v9722_v46 = vld [vmem:[#allocation126_spill] sm:$0xff]  ;;  %v9724_v35 = vld [vmem:[#allocation128_spill] sm:$0xff] }
 0x1a2   : > { %9715 = vst [vmem:[#allocation125_spill] sm:$0xff] %v5786_v34  ;;  %9717 = vst [vmem:[#allocation118_spill] sm:$0xff] %v5790_v63  ;;  %v5802_v12 = vmul.f32 %v9722_v46, %v9722_v46  ;;  %v5806_v3 = vmul.f32 %v9724_v35, %v9724_v35  ;;  %v9727_v34 = vld [vmem:[#allocation130_spill] sm:$0xff] }
 0x1a3   : > { %9719 = vst [vmem:[#allocation122_spill] sm:$0xff] %v5794_v56  ;;  %9721 = vst [vmem:[#allocation123_spill] sm:$0xff] %v5798_v51  ;;  %v5814_v54 = vmul.f32 %v9727_v34, %v9727_v34  ;;  %v9729_v56 = vld [vmem:[#allocation132_spill] sm:$0xff]  ;;  %v9731_v51 = vld [vmem:[#allocation129_spill] sm:$0xff] }
 0x1a4   : > { %9723 = vst [vmem:[#allocation126_spill] sm:$0xff] %v5802_v12  ;;  %9725 = vst [vmem:[#allocation128_spill] sm:$0xff] %v5806_v3  ;;  %v5818_v53 = vmul.f32 %v9729_v56, %v9729_v56  ;;  %v5822_v46 = vmul.f32 %v9731_v51, %v9731_v51  ;;  %v9733_v12 = vld [vmem:[#allocation131_spill] sm:$0xff]  ;;  %v9735_v3 = vld [vmem:[#allocation133_spill] sm:$0xff] }
 0x1a5   : > { %9726 = vst [vmem:[#allocation356_spill] sm:$0xff] %v5810_v43  ;;  %9728 = vst [vmem:[#allocation130_spill] sm:$0xff] %v5814_v54  ;;  %v5826_v35 = vmul.f32 %v9733_v12, %v9733_v12  ;;  %v5830_v58 = vmul.f32 %v9735_v3, %v9735_v3  ;;  %v9737_v43 = vld [vmem:[#allocation134_spill] sm:$0xff]  ;;  %v9739_v54 = vld [vmem:[#allocation135_spill] sm:$0xff] }
 0x1a6   : > { %9730 = vst [vmem:[#allocation132_spill] sm:$0xff] %v5818_v53  ;;  %9732 = vst [vmem:[#allocation129_spill] sm:$0xff] %v5822_v46  ;;  %v5834_v34 = vmul.f32 %v9737_v43, %v9737_v43  ;;  %v5838_v56 = vmul.f32 %v9739_v54, %v9739_v54  ;;  %v9741_v53 = vld [vmem:[#allocation138_spill] sm:$0xff]  ;;  %v9743_v46 = vld [vmem:[#allocation139_spill] sm:$0xff] }
 0x1a7   : > { %9734 = vst [vmem:[#allocation131_spill] sm:$0xff] %v5826_v35  ;;  %9736 = vst [vmem:[#allocation133_spill] sm:$0xff] %v5830_v58  ;;  %v5842_v51 = vmul.f32 %v9741_v53, %v9741_v53  ;;  %v5846_v12 = vmul.f32 %v9743_v46, %v9743_v46  ;;  %v9745_v35 = vld [vmem:[#allocation140_spill] sm:$0xff]  ;;  %v9747_v58 = vld [vmem:[#allocation141_spill] sm:$0xff] }
 0x1a8   : > { %9738 = vst [vmem:[#allocation134_spill] sm:$0xff] %v5834_v34  ;;  %9740 = vst [vmem:[#allocation135_spill] sm:$0xff] %v5838_v56  ;;  %v5850_v3 = vmul.f32 %v9745_v35, %v9745_v35  ;;  %v5854_v43 = vmul.f32 %v9747_v58, %v9747_v58  ;;  %v9749_v34 = vld [vmem:[#allocation142_spill] sm:$0xff]  ;;  %v9751_v56 = vld [vmem:[#allocation143_spill] sm:$0xff] }
 0x1a9   : > { %9742 = vst [vmem:[#allocation138_spill] sm:$0xff] %v5842_v51  ;;  %9744 = vst [vmem:[#allocation139_spill] sm:$0xff] %v5846_v12  ;;  %v5858_v54 = vmul.f32 %v9749_v34, %v9749_v34  ;;  %v5862_v53 = vmul.f32 %v9751_v56, %v9751_v56  ;;  %v9753_v51 = vld [vmem:[#allocation146_spill] sm:$0xff]  ;;  %v9755_v12 = vld [vmem:[#allocation147_spill] sm:$0xff] }
 0x1aa   : > { %9746 = vst [vmem:[#allocation140_spill] sm:$0xff] %v5850_v3  ;;  %9748 = vst [vmem:[#allocation141_spill] sm:$0xff] %v5854_v43  ;;  %v5866_v46 = vmul.f32 %v9753_v51, %v9753_v51  ;;  %v5870_v35 = vmul.f32 %v9755_v12, %v9755_v12  ;;  %v9757_v3 = vld [vmem:[#allocation148_spill] sm:$0xff]  ;;  %v9759_v43 = vld [vmem:[#allocation153_spill] sm:$0xff] }
 0x1ab   : > { %9750 = vst [vmem:[#allocation142_spill] sm:$0xff] %v5858_v54  ;;  %9752 = vst [vmem:[#allocation143_spill] sm:$0xff] %v5862_v53  ;;  %v5874_v58 = vmul.f32 %v9757_v3, %v9757_v3  ;;  %v5878_v34 = vmul.f32 %v9759_v43, %v9759_v43  ;;  %v9761_v54 = vld [vmem:[#allocation154_spill] sm:$0xff]  ;;  %v9763_v53 = vld [vmem:[#allocation155_spill] sm:$0xff] }
 0x1ac   : > { %9754 = vst [vmem:[#allocation146_spill] sm:$0xff] %v5866_v46  ;;  %9756 = vst [vmem:[#allocation147_spill] sm:$0xff] %v5870_v35  ;;  %v5882_v56 = vmul.f32 %v9761_v54, %v9761_v54  ;;  %v5886_v51 = vmul.f32 %v9763_v53, %v9763_v53  ;;  %v9765_v46 = vld [vmem:[#allocation158_spill] sm:$0xff]  ;;  %v9767_v35 = vld [vmem:[#allocation159_spill] sm:$0xff] }
 0x1ad   : > { %9758 = vst [vmem:[#allocation148_spill] sm:$0xff] %v5874_v58  ;;  %9760 = vst [vmem:[#allocation153_spill] sm:$0xff] %v5878_v34  ;;  %v5890_v12 = vmul.f32 %v9765_v46, %v9765_v46  ;;  %v5894_v3 = vmul.f32 %v9767_v35, %v9767_v35  ;;  %v9769_v58 = vld [vmem:[#allocation160_spill] sm:$0xff]  ;;  %v9771_v34 = vld [vmem:[#allocation163_spill] sm:$0xff] }
 0x1ae   : > { %9762 = vst [vmem:[#allocation154_spill] sm:$0xff] %v5882_v56  ;;  %9764 = vst [vmem:[#allocation155_spill] sm:$0xff] %v5886_v51  ;;  %v5898_v43 = vmul.f32 %v9769_v58, %v9769_v58  ;;  %v5902_v54 = vmul.f32 %v9771_v34, %v9771_v34  ;;  %v9773_v56 = vld [vmem:[#allocation164_spill] sm:$0xff] }
 0x1af   : > { %9766 = vst [vmem:[#allocation158_spill] sm:$0xff] %v5890_v12  ;;  %9768 = vst [vmem:[#allocation159_spill] sm:$0xff] %v5894_v3  ;;  %v5906_v53 = vmul.f32 %v9773_v56, %v9773_v56  ;;  %v9775_v51 = vld [vmem:[#allocation168_spill] sm:$0xff]  ;;  %v9777_v12 = vld [vmem:[#allocation171_spill] sm:$0xff] }
 0x1b0   : > { %9770 = vst [vmem:[#allocation160_spill] sm:$0xff] %v5898_v43  ;;  %9772 = vst [vmem:[#allocation163_spill] sm:$0xff] %v5902_v54  ;;  %v5910_v46 = vmul.f32 %v9775_v51, %v9775_v51  ;;  %v5914_v35 = vmul.f32 %v9777_v12, %v9777_v12  ;;  %v9779_v3 = vld [vmem:[#allocation165_spill] sm:$0xff]  ;;  %v9783_v54 = vld [vmem:[#allocation170_spill] sm:$0xff]  ;;  %v1580_v12 = vadd.f32 %v5113_v19, %v5093_v15 }
 0x1b1   : > { %9774 = vst [vmem:[#allocation164_spill] sm:$0xff] %v5906_v53  ;;  %v5918_v58 = vmul.f32 %v9779_v3, %v9779_v3  ;;  %v9781_v43 = vld [vmem:[#allocation169_spill] sm:$0xff]  ;;  %v5926_v56 = vmul.f32 %v9783_v54, %v9783_v54  ;;  %v9785_v53 = vld [vmem:[#allocation172_spill] sm:$0xff]  ;;  %v1594_v3 = vadd.f32 %v5119_v42, %v5103_v4  ;;  %v1608_v54 = vadd.f32 %v5139_v7, %v5125_v38 }
 0x1b2   : > { %9776 = vst [vmem:[#allocation168_spill] sm:$0xff] %v5910_v46  ;;  %9778 = vst [vmem:[#allocation171_spill] sm:$0xff] %v5914_v35  ;;  %v5922_v34 = vmul.f32 %v9781_v43, %v9781_v43  ;;  %v5930_v51 = vmul.f32 %v9785_v53, %v9785_v53  ;;  %v1587_v35 = vadd.f32 %v5116_v29, %v5100_v17 }
 0x1b3   : > { %9780 = vst [vmem:[#allocation165_spill] sm:$0xff] %v5918_v58  ;;  %9784 = vst [vmem:[#allocation170_spill] sm:$0xff] %v5926_v56  ;;  %v1601_v43 = vadd.f32 %v5122_v24, %v5110_v33  ;;  %v1615_v56 = vadd.f32 %v5142_v25, %v5130_v48  ;;  %v1622_v53 = vadd.f32 %v5145_v16, %v5133_v60  ;;  %v1581_v48 = vrot.slane %v1580_v12, 4 }
 0x1b4   : > { %9782 = vst [vmem:[#allocation169_spill] sm:$0xff] %v5922_v34  ;;  %9786 = vst [vmem:[#allocation172_spill] sm:$0xff] %v5930_v51  ;;  %v1629_v15 = vadd.f32 %v5148_v8, %v5136_v37  ;;  %v1636_v17 = vadd.f32 %v5163_v14, %v5151_v23  ;;  %v1643_v4 = vadd.f32 %v5166_v45, %v5154_v44  ;;  %v1588_v60 = vrot.slane %v1587_v35, 4 }
 0x1b5   : > { %v1650_v33 = vadd.f32 %v5169_v21, %v5157_v59  ;;  %v1657_v19 = vadd.f32 %v5172_v28, %v5160_v18  ;;  %v1664_v29 = vadd.f32 %v5187_v36, %v5175_v30  ;;  %v1671_v42 = vadd.f32 %v5190_v31, %v5178_v20 }
 0x1b6   : > { %v1678_v24 = vadd.f32 %v5193_v10, %v5181_v40  ;;  %v1685_v38 = vadd.f32 %v5196_v39, %v5184_v6  ;;  %v1595_v37 = vrot.slane %v1594_v3, 4  ;;  %v1602_v7 = vrot.slane %v1601_v43, 4 }
 0x1b7   : > { %v1609_v25 = vrot.slane %v1608_v54, 4  ;;  %v1616_v16 = vrot.slane %v1615_v56, 4  ;;  %v1623_v8 = vrot.slane %v1622_v53, 4  ;;  %v1630_v23 = vrot.slane %v1629_v15, 4 }
 0x1b8   : > { %v1637_v44 = vrot.slane %v1636_v17, 4  ;;  %v1644_v59 = vrot.slane %v1643_v4, 4  ;;  %v1651_v18 = vrot.slane %v1650_v33, 4  ;;  %v1658_v14 = vrot.slane %v1657_v19, 4 }
 0x1b9   : > { %v1665_v45 = vrot.slane %v1664_v29, 4  ;;  %v1672_v21 = vrot.slane %v1671_v42, 4  ;;  %v1679_v28 = vrot.slane %v1678_v24, 4  ;;  %v1686_v30 = vrot.slane %v1685_v38, 4 }
 0x1ba   : > { %v1582_v20 = vadd.f32 %v1581_v48, %v1580_v12  ;;  %v1589_v40 = vadd.f32 %v1588_v60, %v1587_v35  ;;  %v1596_v36 = vadd.f32 %v1595_v37, %v1594_v3  ;;  %v1603_v6 = vadd.f32 %v1602_v7, %v1601_v43 }
 0x1bb   : > { %v1610_v31 = vadd.f32 %v1609_v25, %v1608_v54  ;;  %v1617_v10 = vadd.f32 %v1616_v16, %v1615_v56  ;;  %v1624_v39 = vadd.f32 %v1623_v8, %v1622_v53  ;;  %v1631_v51 = vadd.f32 %v1630_v23, %v1629_v15 }
 0x1bc   : > { %v1638_v46 = vadd.f32 %v1637_v44, %v1636_v17  ;;  %v1645_v34 = vadd.f32 %v1644_v59, %v1643_v4  ;;  %v1652_v58 = vadd.f32 %v1651_v18, %v1650_v33  ;;  %v1659_v63 = vadd.f32 %v1658_v14, %v1657_v19 }
 0x1bd   : > { %v1666_v41 = vadd.f32 %v1665_v45, %v1664_v29  ;;  %v1673_v52 = vadd.f32 %v1672_v21, %v1671_v42  ;;  %v1680_v57 = vadd.f32 %v1679_v28, %v1678_v24  ;;  %v1687_v26 = vadd.f32 %v1686_v30, %v1685_v38 }
 0x1be   : > { %v1583_v61 = vrot.slane %v1582_v20, 2  ;;  %v1590_v13 = vrot.slane %v1589_v40, 2  ;;  %v1597_v1 = vrot.slane %v1596_v36, 2  ;;  %v1604_v9 = vrot.slane %v1603_v6, 2 }
 0x1bf   : > { %v1611_v12 = vrot.slane %v1610_v31, 2  ;;  %v1618_v35 = vrot.slane %v1617_v10, 2  ;;  %v1625_v3 = vrot.slane %v1624_v39, 2  ;;  %v1632_v43 = vrot.slane %v1631_v51, 2 }
 0x1c0   : > { %v1639_v54 = vrot.slane %v1638_v46, 2  ;;  %v1646_v56 = vrot.slane %v1645_v34, 2  ;;  %v1653_v53 = vrot.slane %v1652_v58, 2  ;;  %v1660_v15 = vrot.slane %v1659_v63, 2 }
 0x1c1   : > { %v1667_v17 = vrot.slane %v1666_v41, 2  ;;  %v1674_v4 = vrot.slane %v1673_v52, 2  ;;  %v1681_v33 = vrot.slane %v1680_v57, 2  ;;  %v1688_v19 = vrot.slane %v1687_v26, 2 }
 0x1c2   : > { %v1584_v29 = vadd.f32 %v1583_v61, %v1582_v20  ;;  %v1591_v42 = vadd.f32 %v1590_v13, %v1589_v40  ;;  %v1598_v24 = vadd.f32 %v1597_v1, %v1596_v36  ;;  %v1605_v38 = vadd.f32 %v1604_v9, %v1603_v6 }
 0x1c3   : > { %v1612_v48 = vadd.f32 %v1611_v12, %v1610_v31  ;;  %v1619_v60 = vadd.f32 %v1618_v35, %v1617_v10  ;;  %v1626_v37 = vadd.f32 %v1625_v3, %v1624_v39  ;;  %v1633_v7 = vadd.f32 %v1632_v43, %v1631_v51 }
 0x1c4   : > { %v1640_v25 = vadd.f32 %v1639_v54, %v1638_v46  ;;  %v1647_v16 = vadd.f32 %v1646_v56, %v1645_v34  ;;  %v1654_v8 = vadd.f32 %v1653_v53, %v1652_v58  ;;  %v1661_v23 = vadd.f32 %v1660_v15, %v1659_v63 }
 0x1c5   : > { %v1668_v44 = vadd.f32 %v1667_v17, %v1666_v41  ;;  %v1675_v59 = vadd.f32 %v1674_v4, %v1673_v52  ;;  %v1682_v18 = vadd.f32 %v1681_v33, %v1680_v57  ;;  %v1689_v14 = vadd.f32 %v1688_v19, %v1687_v26  ;;  %v9803_v17 = vld [vmem:[#allocation193_spill] sm:$0xff]  ;;  %v9804_v33 = vld [vmem:[#allocation190_spill] sm:$0xff] }
 0x1c6   : > { %v1585_v45 = vrot.slane %v1584_v29, 1  ;;  %v1592_v21 = vrot.slane %v1591_v42, 1  ;;  %v1599_v28 = vrot.slane %v1598_v24, 1  ;;  %v1606_v30 = vrot.slane %v1605_v38, 1  ;;  %v9805_v19 = vld [vmem:[#allocation194_spill] sm:$0xff] }
 0x1c7   : > { %v1613_v61 = vrot.slane %v1612_v48, 1  ;;  %v1620_v13 = vrot.slane %v1619_v60, 1  ;;  %v1627_v1 = vrot.slane %v1626_v37, 1  ;;  %v1634_v9 = vrot.slane %v1633_v7, 1 }
 0x1c8   : > { %v1641_v20 = vrot.slane %v1640_v25, 1  ;;  %v1648_v40 = vrot.slane %v1647_v16, 1  ;;  %v1655_v36 = vrot.slane %v1654_v8, 1  ;;  %v1662_v51 = vrot.slane %v1661_v23, 1 }
 0x1c9   : > { %v1669_v46 = vrot.slane %v1668_v44, 1  ;;  %v1676_v34 = vrot.slane %v1675_v59, 1  ;;  %v1683_v58 = vrot.slane %v1682_v18, 1  ;;  %v1690_v63 = vrot.slane %v1689_v14, 1 }
 0x1ca   : > { %v5964_v41 = vadd.f32 %v1585_v45, %v1584_v29  ;;  %v5966_v57 = vadd.f32 %v1592_v21, %v1591_v42  ;;  %v5968_v26 = vadd.f32 %v1599_v28, %v1598_v24  ;;  %v5970_v52 = vadd.f32 %v1606_v30, %v1605_v38  ;;  %v9806_v42 = vld [vmem:[#allocation191_spill] sm:$0xff]  ;;  %v9816_v45 = vld [vmem:[#allocation200_spill] sm:$0xff]  ;;  %v9818_v28 = vld [vmem:[#allocation205_spill] sm:$0xff] }
 0x1cb   : > { %v5972_v6 = vadd.f32 %v1613_v61, %v1612_v48  ;;  %v5974_v31 = vadd.f32 %v1620_v13, %v1619_v60  ;;  %v5976_v10 = vadd.f32 %v1627_v1, %v1626_v37  ;;  %v5978_v39 = vadd.f32 %v1634_v9, %v1633_v7  ;;  %v9807_v24 = vld [vmem:[#allocation195_spill] sm:$0xff]  ;;  %v9808_v48 = vld [vmem:[#allocation192_spill] sm:$0xff]  ;;  %v9810_v7 = vld [vmem:[#allocation197_spill] sm:$0xff] }
 0x1cc   : > { %9787 = vst [vmem:[#allocation357_spill] sm:$0xff] %v5964_v41  ;;  %9788 = vst [vmem:[#allocation358_spill] sm:$0xff] %v5966_v57  ;;  %v5980_v12 = vadd.f32 %v1641_v20, %v1640_v25  ;;  %v5982_v35 = vadd.f32 %v1648_v40, %v1647_v16  ;;  %v5984_v3 = vadd.f32 %v1655_v36, %v1654_v8  ;;  %v9809_v60 = vld [vmem:[#allocation196_spill] sm:$0xff]  ;;  %v9811_v25 = vld [vmem:[#allocation201_spill] sm:$0xff] }
 0x1cd   : > { %9789 = vst [vmem:[#allocation359_spill] sm:$0xff] %v5968_v26  ;;  %9790 = vst [vmem:[#allocation360_spill] sm:$0xff] %v5970_v52  ;;  %v5986_v43 = vadd.f32 %v1662_v51, %v1661_v23  ;;  %v5988_v54 = vadd.f32 %v1669_v46, %v1668_v44  ;;  %v5990_v56 = vadd.f32 %v1676_v34, %v1675_v59  ;;  %v9812_v8 = vld [vmem:[#allocation198_spill] sm:$0xff]  ;;  %v9814_v59 = vld [vmem:[#allocation199_spill] sm:$0xff] }
 0x1ce   : > { %9791 = vst [vmem:[#allocation361_spill] sm:$0xff] %v5972_v6  ;;  %9792 = vst [vmem:[#allocation362_spill] sm:$0xff] %v5974_v31  ;;  %v5992_v53 = vadd.f32 %v1683_v58, %v1682_v18  ;;  %v5994_v15 = vadd.f32 %v1690_v63, %v1689_v14  ;;  %v1692_v4 = vadd.f32 %v9803_v17, %v5199_v32  ;;  %v9813_v23 = vld [vmem:[#allocation202_spill] sm:$0xff]  ;;  %v9815_v18 = vld [vmem:[#allocation203_spill] sm:$0xff] }
 0x1cf   : > { %9793 = vst [vmem:[#allocation363_spill] sm:$0xff] %v5976_v10  ;;  %9794 = vst [vmem:[#allocation364_spill] sm:$0xff] %v5978_v39  ;;  %v1699_v29 = vadd.f32 %v9805_v19, %v9804_v33  ;;  %v1706_v38 = vadd.f32 %v9807_v24, %v9806_v42  ;;  %v1713_v37 = vadd.f32 %v9809_v60, %v9808_v48  ;;  %v9817_v32 = vld [vmem:[#allocation204_spill] sm:$0xff]  ;;  %v9819_v30 = vld [vmem:[#allocation209_spill] sm:$0xff] }
 0x1d0   : > { %9795 = vst [vmem:[#allocation365_spill] sm:$0xff] %v5980_v12  ;;  %9796 = vst [vmem:[#allocation366_spill] sm:$0xff] %v5982_v35  ;;  %v1720_v16 = vadd.f32 %v9811_v25, %v9810_v7  ;;  %v1727_v44 = vadd.f32 %v9813_v23, %v9812_v8  ;;  %v1734_v14 = vadd.f32 %v9815_v18, %v9814_v59  ;;  %v9820_v13 = vld [vmem:[#allocation206_spill] sm:$0xff]  ;;  %v9822_v20 = vld [vmem:[#allocation207_spill] sm:$0xff]  ;;  %v1693_v23 = vrot.slane %v1692_v4, 4 }
 0x1d1   : > { %9797 = vst [vmem:[#allocation367_spill] sm:$0xff] %v5984_v3  ;;  %9798 = vst [vmem:[#allocation368_spill] sm:$0xff] %v5986_v43  ;;  %v1741_v21 = vadd.f32 %v9817_v32, %v9816_v45  ;;  %v1748_v61 = vadd.f32 %v9819_v30, %v9818_v28  ;;  %v9821_v1 = vld [vmem:[#allocation210_spill] sm:$0xff]  ;;  %v9823_v40 = vld [vmem:[#allocation211_spill] sm:$0xff]  ;;  %v1700_v59 = vrot.slane %v1699_v29, 4  ;;  %v1707_v18 = vrot.slane %v1706_v38, 4 }
 0x1d2   : > { %9799 = vst [vmem:[#allocation369_spill] sm:$0xff] %v5988_v54  ;;  %9800 = vst [vmem:[#allocation370_spill] sm:$0xff] %v5990_v56  ;;  %v1755_v9 = vadd.f32 %v9821_v1, %v9820_v13  ;;  %v1762_v36 = vadd.f32 %v9823_v40, %v9822_v20  ;;  %v9824_v51 = vld [vmem:[#allocation208_spill] sm:$0xff]  ;;  %v9826_v58 = vld [vmem:[#allocation213_spill] sm:$0xff]  ;;  %v1714_v45 = vrot.slane %v1713_v37, 4  ;;  %v1721_v32 = vrot.slane %v1720_v16, 4 }
 0x1d3   : > { %9801 = vst [vmem:[#allocation371_spill] sm:$0xff] %v5992_v53  ;;  %9802 = vst [vmem:[#allocation372_spill] sm:$0xff] %v5994_v15  ;;  %v9825_v46 = vld [vmem:[#allocation212_spill] sm:$0xff]  ;;  %v9827_v63 = vld [vmem:[#allocation217_spill] sm:$0xff]  ;;  %v1728_v28 = vrot.slane %v1727_v44, 4  ;;  %v1735_v30 = vrot.slane %v1734_v14, 4 }
 0x1d4   : > { %v1769_v34 = vadd.f32 %v9825_v46, %v9824_v51  ;;  %v1776_v17 = vadd.f32 %v9827_v63, %v9826_v58  ;;  %v9828_v33 = vld [vmem:[#allocation214_spill] sm:$0xff]  ;;  %v9830_v24 = vld [vmem:[#allocation215_spill] sm:$0xff]  ;;  %v9832_v7 = vld [vmem:[#allocation216_spill] sm:$0xff]  ;;  %v1742_v13 = vrot.slane %v1741_v21, 4  ;;  %v1749_v1 = vrot.slane %v1748_v61, 4 }
 0x1d5   : > { %v9829_v19 = vld [vmem:[#allocation218_spill] sm:$0xff]  ;;  %v9831_v48 = vld [vmem:[#allocation219_spill] sm:$0xff]  ;;  %v9833_v25 = vld [vmem:[#allocation220_spill] sm:$0xff]  ;;  %v1756_v20 = vrot.slane %v1755_v9, 4  ;;  %v1763_v40 = vrot.slane %v1762_v36, 4  ;;  %v1729_v15 = vadd.f32 %v1728_v28, %v1727_v44  ;;  %v1736_v53 = vadd.f32 %v1735_v30, %v1734_v14 }
 0x1d6   : > { %v1783_v42 = vadd.f32 %v9829_v19, %v9828_v33  ;;  %v1790_v60 = vadd.f32 %v9831_v48, %v9830_v24  ;;  %v1797_v8 = vadd.f32 %v9833_v25, %v9832_v7  ;;  %v1770_v51 = vrot.slane %v1769_v34, 4  ;;  %v10190_v41 = vld [vmem:[#allocation75_spill] sm:$0xff] }
 0x1d7   : > { %v1777_v46 = vrot.slane %v1776_v17, 4  ;;  %v1694_v19 = vadd.f32 %v1693_v23, %v1692_v4  ;;  %v1701_v24 = vadd.f32 %v1700_v59, %v1699_v29  ;;  %v1708_v48 = vadd.f32 %v1707_v18, %v1706_v38 }
 0x1d8   : > { %v1784_v58 = vrot.slane %v1783_v42, 4  ;;  %v1791_v63 = vrot.slane %v1790_v60, 4  ;;  %v1798_v33 = vrot.slane %v1797_v8, 4  ;;  %v1715_v7 = vadd.f32 %v1714_v45, %v1713_v37 }
 0x1d9   : > { %v1722_v25 = vadd.f32 %v1721_v32, %v1720_v16  ;;  %v1743_v56 = vadd.f32 %v1742_v13, %v1741_v21  ;;  %v1750_v54 = vadd.f32 %v1749_v1, %v1748_v61  ;;  %v1757_v43 = vadd.f32 %v1756_v20, %v1755_v9 }
 0x1da   : > { %v1764_v3 = vadd.f32 %v1763_v40, %v1762_v36  ;;  %v1771_v35 = vadd.f32 %v1770_v51, %v1769_v34  ;;  %v1778_v12 = vadd.f32 %v1777_v46, %v1776_v17  ;;  %v1785_v39 = vadd.f32 %v1784_v58, %v1783_v42 }
 0x1db   : > { %v1792_v10 = vadd.f32 %v1791_v63, %v1790_v60  ;;  %v1799_v31 = vadd.f32 %v1798_v33, %v1797_v8  ;;  %v1695_v6 = vrot.slane %v1694_v19, 2  ;;  %v1702_v52 = vrot.slane %v1701_v24, 2 }
 0x1dc   : > { %v1709_v26 = vrot.slane %v1708_v48, 2  ;;  %v1716_v57 = vrot.slane %v1715_v7, 2  ;;  %v1723_v4 = vrot.slane %v1722_v25, 2  ;;  %v1730_v29 = vrot.slane %v1729_v15, 2 }
 0x1dd   : > { %v1737_v38 = vrot.slane %v1736_v53, 2  ;;  %v1744_v37 = vrot.slane %v1743_v56, 2  ;;  %v1751_v16 = vrot.slane %v1750_v54, 2  ;;  %v1758_v44 = vrot.slane %v1757_v43, 2 }
 0x1de   : > { %v1765_v14 = vrot.slane %v1764_v3, 2  ;;  %v1772_v21 = vrot.slane %v1771_v35, 2  ;;  %v1779_v61 = vrot.slane %v1778_v12, 2  ;;  %v1786_v9 = vrot.slane %v1785_v39, 2 }
 0x1df   : > { %v1793_v36 = vrot.slane %v1792_v10, 2  ;;  %v1800_v34 = vrot.slane %v1799_v31, 2  ;;  %v1696_v17 = vadd.f32 %v1695_v6, %v1694_v19  ;;  %v1703_v42 = vadd.f32 %v1702_v52, %v1701_v24 }
 0x1e0   : > { %v1710_v60 = vadd.f32 %v1709_v26, %v1708_v48  ;;  %v1717_v8 = vadd.f32 %v1716_v57, %v1715_v7  ;;  %v1724_v23 = vadd.f32 %v1723_v4, %v1722_v25  ;;  %v1731_v59 = vadd.f32 %v1730_v29, %v1729_v15 }
 0x1e1   : > { %v1738_v18 = vadd.f32 %v1737_v38, %v1736_v53  ;;  %v1745_v45 = vadd.f32 %v1744_v37, %v1743_v56  ;;  %v1752_v32 = vadd.f32 %v1751_v16, %v1750_v54  ;;  %v1759_v28 = vadd.f32 %v1758_v44, %v1757_v43 }
 0x1e2   : > { %v1766_v30 = vadd.f32 %v1765_v14, %v1764_v3  ;;  %v1773_v13 = vadd.f32 %v1772_v21, %v1771_v35  ;;  %v1780_v1 = vadd.f32 %v1779_v61, %v1778_v12  ;;  %v1787_v20 = vadd.f32 %v1786_v9, %v1785_v39  ;;  %v9850_v61 = vld [vmem:[#allocation221_spill] sm:$0xff] }
 0x1e3   : > { %v1794_v40 = vadd.f32 %v1793_v36, %v1792_v10  ;;  %v1801_v51 = vadd.f32 %v1800_v34, %v1799_v31  ;;  %v1697_v46 = vrot.slane %v1696_v17, 1  ;;  %v1704_v58 = vrot.slane %v1703_v42, 1  ;;  %v9851_v9 = vld [vmem:[#allocation225_spill] sm:$0xff]  ;;  %v9852_v34 = vld [vmem:[#allocation222_spill] sm:$0xff] }
 0x1e4   : > { %v1711_v63 = vrot.slane %v1710_v60, 1  ;;  %v1718_v33 = vrot.slane %v1717_v8, 1  ;;  %v1725_v6 = vrot.slane %v1724_v23, 1  ;;  %v1732_v52 = vrot.slane %v1731_v59, 1 }
 0x1e5   : > { %v1739_v26 = vrot.slane %v1738_v18, 1  ;;  %v1746_v57 = vrot.slane %v1745_v45, 1  ;;  %v1753_v19 = vrot.slane %v1752_v32, 1  ;;  %v1760_v15 = vrot.slane %v1759_v28, 1 }
 0x1e6   : > { %v1767_v53 = vrot.slane %v1766_v30, 1  ;;  %v1774_v56 = vrot.slane %v1773_v13, 1  ;;  %v1781_v54 = vrot.slane %v1780_v1, 1  ;;  %v1788_v43 = vrot.slane %v1787_v20, 1 }
 0x1e7   : > { %v1795_v3 = vrot.slane %v1794_v40, 1  ;;  %v1802_v35 = vrot.slane %v1801_v51, 1  ;;  %v6028_v12 = vadd.f32 %v1697_v46, %v1696_v17  ;;  %v6030_v10 = vadd.f32 %v1704_v58, %v1703_v42  ;;  %v9853_v17 = vld [vmem:[#allocation226_spill] sm:$0xff]  ;;  %v9864_v58 = vld [vmem:[#allocation232_spill] sm:$0xff] }
 0x1e8   : > { %v6032_v31 = vadd.f32 %v1711_v63, %v1710_v60  ;;  %v6034_v39 = vadd.f32 %v1718_v33, %v1717_v8  ;;  %v6036_v24 = vadd.f32 %v1725_v6, %v1724_v23  ;;  %v6038_v48 = vadd.f32 %v1732_v52, %v1731_v59  ;;  %v9854_v60 = vld [vmem:[#allocation223_spill] sm:$0xff]  ;;  %v9856_v59 = vld [vmem:[#allocation224_spill] sm:$0xff]  ;;  %v9866_v6 = vld [vmem:[#allocation237_spill] sm:$0xff] }
 0x1e9   : > { %9834 = vst [vmem:[#allocation193_spill] sm:$0xff] %v6028_v12  ;;  %9835 = vst [vmem:[#allocation190_spill] sm:$0xff] %v6030_v10  ;;  %v6040_v7 = vadd.f32 %v1739_v26, %v1738_v18  ;;  %v6042_v25 = vadd.f32 %v1746_v57, %v1745_v45  ;;  %v6044_v4 = vadd.f32 %v1753_v19, %v1752_v32  ;;  %v9855_v8 = vld [vmem:[#allocation227_spill] sm:$0xff]  ;;  %v9857_v18 = vld [vmem:[#allocation228_spill] sm:$0xff] }
 0x1ea   : > { %9836 = vst [vmem:[#allocation194_spill] sm:$0xff] %v6032_v31  ;;  %9837 = vst [vmem:[#allocation191_spill] sm:$0xff] %v6034_v39  ;;  %v6046_v29 = vadd.f32 %v1760_v15, %v1759_v28  ;;  %v6048_v38 = vadd.f32 %v1767_v53, %v1766_v30  ;;  %v6050_v37 = vadd.f32 %v1774_v56, %v1773_v13  ;;  %v9858_v32 = vld [vmem:[#allocation229_spill] sm:$0xff]  ;;  %v9860_v13 = vld [vmem:[#allocation230_spill] sm:$0xff] }
 0x1eb   : > { %9838 = vst [vmem:[#allocation195_spill] sm:$0xff] %v6036_v24  ;;  %9839 = vst [vmem:[#allocation192_spill] sm:$0xff] %v6038_v48  ;;  %v6052_v16 = vadd.f32 %v1781_v54, %v1780_v1  ;;  %v6054_v44 = vadd.f32 %v1788_v43, %v1787_v20  ;;  %v6056_v14 = vadd.f32 %v1795_v3, %v1794_v40  ;;  %v9859_v28 = vld [vmem:[#allocation233_spill] sm:$0xff]  ;;  %v9861_v1 = vld [vmem:[#allocation234_spill] sm:$0xff] }
 0x1ec   : > { %9840 = vst [vmem:[#allocation196_spill] sm:$0xff] %v6040_v7  ;;  %9841 = vst [vmem:[#allocation197_spill] sm:$0xff] %v6042_v25  ;;  %v6058_v21 = vadd.f32 %v1802_v35, %v1801_v51  ;;  %v1804_v36 = vadd.f32 %v9851_v9, %v9850_v61  ;;  %v1811_v42 = vadd.f32 %v9853_v17, %v9852_v34  ;;  %v9862_v40 = vld [vmem:[#allocation231_spill] sm:$0xff]  ;;  %v9865_v63 = vld [vmem:[#allocation236_spill] sm:$0xff] }
 0x1ed   : > { %9842 = vst [vmem:[#allocation201_spill] sm:$0xff] %v6044_v4  ;;  %9843 = vst [vmem:[#allocation198_spill] sm:$0xff] %v6046_v29  ;;  %v1818_v23 = vadd.f32 %v9855_v8, %v9854_v60  ;;  %v1825_v45 = vadd.f32 %v9857_v18, %v9856_v59  ;;  %v1832_v30 = vadd.f32 %v9859_v28, %v9858_v32  ;;  %v9863_v51 = vld [vmem:[#allocation235_spill] sm:$0xff]  ;;  %v9867_v52 = vld [vmem:[#allocation241_spill] sm:$0xff] }
 0x1ee   : > { %9844 = vst [vmem:[#allocation202_spill] sm:$0xff] %v6048_v38  ;;  %9845 = vst [vmem:[#allocation199_spill] sm:$0xff] %v6050_v37  ;;  %v1839_v20 = vadd.f32 %v9861_v1, %v9860_v13  ;;  %v1846_v46 = vadd.f32 %v9863_v51, %v9862_v40  ;;  %v1853_v33 = vadd.f32 %v9865_v63, %v9864_v58  ;;  %v9868_v57 = vld [vmem:[#allocation238_spill] sm:$0xff]  ;;  %v9870_v53 = vld [vmem:[#allocation239_spill] sm:$0xff]  ;;  %v1805_v40 = vrot.slane %v1804_v36, 4 }
 0x1ef   : > { %9846 = vst [vmem:[#allocation203_spill] sm:$0xff] %v6052_v16  ;;  %9847 = vst [vmem:[#allocation200_spill] sm:$0xff] %v6054_v44  ;;  %v1860_v26 = vadd.f32 %v9867_v52, %v9866_v6  ;;  %v9869_v19 = vld [vmem:[#allocation242_spill] sm:$0xff]  ;;  %v9871_v56 = vld [vmem:[#allocation243_spill] sm:$0xff]  ;;  %v1812_v51 = vrot.slane %v1811_v42, 4  ;;  %v1819_v58 = vrot.slane %v1818_v23, 4 }
 0x1f0   : > { %9848 = vst [vmem:[#allocation204_spill] sm:$0xff] %v6056_v14  ;;  %9849 = vst [vmem:[#allocation205_spill] sm:$0xff] %v6058_v21  ;;  %v1867_v15 = vadd.f32 %v9869_v19, %v9868_v57  ;;  %v1874_v54 = vadd.f32 %v9871_v56, %v9870_v53  ;;  %v9872_v43 = vld [vmem:[#allocation240_spill] sm:$0xff]  ;;  %v9874_v61 = vld [vmem:[#allocation245_spill] sm:$0xff]  ;;  %v1826_v63 = vrot.slane %v1825_v45, 4  ;;  %v1833_v6 = vrot.slane %v1832_v30, 4 }
 0x1f1   : > { %v9873_v3 = vld [vmem:[#allocation244_spill] sm:$0xff]  ;;  %v9875_v9 = vld [vmem:[#allocation249_spill] sm:$0xff]  ;;  %v9876_v17 = vld [vmem:[#allocation246_spill] sm:$0xff]  ;;  %v1840_v52 = vrot.slane %v1839_v20, 4  ;;  %v1847_v57 = vrot.slane %v1846_v46, 4  ;;  %v1854_v19 = vrot.slane %v1853_v33, 4  ;;  %v1820_v21 = vadd.f32 %v1819_v58, %v1818_v23 }
 0x1f2   : > { %v1881_v35 = vadd.f32 %v9873_v3, %v9872_v43  ;;  %v1888_v34 = vadd.f32 %v9875_v9, %v9874_v61  ;;  %v9877_v60 = vld [vmem:[#allocation250_spill] sm:$0xff]  ;;  %v9878_v59 = vld [vmem:[#allocation247_spill] sm:$0xff]  ;;  %v9880_v28 = vld [vmem:[#allocation248_spill] sm:$0xff]  ;;  %v1861_v53 = vrot.slane %v1860_v26, 4  ;;  %v1868_v56 = vrot.slane %v1867_v15, 4 }
 0x1f3   : > { %v1895_v8 = vadd.f32 %v9877_v60, %v9876_v17  ;;  %v9879_v18 = vld [vmem:[#allocation251_spill] sm:$0xff]  ;;  %v9881_v13 = vld [vmem:[#allocation252_spill] sm:$0xff]  ;;  %v1875_v43 = vrot.slane %v1874_v54, 4  ;;  %v1841_v14 = vadd.f32 %v1840_v52, %v1839_v20  ;;  %v1848_v44 = vadd.f32 %v1847_v57, %v1846_v46 }
 0x1f4   : > { %v1902_v32 = vadd.f32 %v9879_v18, %v9878_v59  ;;  %v1909_v1 = vadd.f32 %v9881_v13, %v9880_v28  ;;  %v1882_v3 = vrot.slane %v1881_v35, 4  ;;  %v1889_v61 = vrot.slane %v1888_v34, 4 }
 0x1f5   : > { %v1896_v9 = vrot.slane %v1895_v8, 4  ;;  %v1806_v59 = vadd.f32 %v1805_v40, %v1804_v36  ;;  %v1813_v18 = vadd.f32 %v1812_v51, %v1811_v42  ;;  %v1827_v28 = vadd.f32 %v1826_v63, %v1825_v45 }
 0x1f6   : > { %v1903_v17 = vrot.slane %v1902_v32, 4  ;;  %v1910_v60 = vrot.slane %v1909_v1, 4  ;;  %v1834_v13 = vadd.f32 %v1833_v6, %v1832_v30  ;;  %v1855_v16 = vadd.f32 %v1854_v19, %v1853_v33 }
 0x1f7   : > { %v1862_v37 = vadd.f32 %v1861_v53, %v1860_v26  ;;  %v1869_v38 = vadd.f32 %v1868_v56, %v1867_v15  ;;  %v1876_v29 = vadd.f32 %v1875_v43, %v1874_v54  ;;  %v1883_v4 = vadd.f32 %v1882_v3, %v1881_v35 }
 0x1f8   : > { %v1890_v25 = vadd.f32 %v1889_v61, %v1888_v34  ;;  %v1897_v7 = vadd.f32 %v1896_v9, %v1895_v8  ;;  %v1904_v48 = vadd.f32 %v1903_v17, %v1902_v32  ;;  %v1911_v24 = vadd.f32 %v1910_v60, %v1909_v1 }
 0x1f9   : > { %v1807_v39 = vrot.slane %v1806_v59, 2  ;;  %v1814_v31 = vrot.slane %v1813_v18, 2  ;;  %v1821_v10 = vrot.slane %v1820_v21, 2  ;;  %v1828_v12 = vrot.slane %v1827_v28, 2 }
 0x1fa   : > { %v1835_v36 = vrot.slane %v1834_v13, 2  ;;  %v1842_v42 = vrot.slane %v1841_v14, 2  ;;  %v1849_v23 = vrot.slane %v1848_v44, 2  ;;  %v1856_v45 = vrot.slane %v1855_v16, 2 }
 0x1fb   : > { %v1863_v30 = vrot.slane %v1862_v37, 2  ;;  %v1870_v20 = vrot.slane %v1869_v38, 2  ;;  %v1877_v46 = vrot.slane %v1876_v29, 2  ;;  %v1884_v33 = vrot.slane %v1883_v4, 2 }
 0x1fc   : > { %v1891_v26 = vrot.slane %v1890_v25, 2  ;;  %v1898_v15 = vrot.slane %v1897_v7, 2  ;;  %v1905_v54 = vrot.slane %v1904_v48, 2  ;;  %v1912_v35 = vrot.slane %v1911_v24, 2 }
 0x1fd   : > { %v1808_v34 = vadd.f32 %v1807_v39, %v1806_v59  ;;  %v1815_v8 = vadd.f32 %v1814_v31, %v1813_v18  ;;  %v1822_v32 = vadd.f32 %v1821_v10, %v1820_v21  ;;  %v1829_v1 = vadd.f32 %v1828_v12, %v1827_v28 }
 0x1fe   : > { %v1836_v40 = vadd.f32 %v1835_v36, %v1834_v13  ;;  %v1843_v51 = vadd.f32 %v1842_v42, %v1841_v14  ;;  %v1850_v58 = vadd.f32 %v1849_v23, %v1848_v44  ;;  %v1857_v63 = vadd.f32 %v1856_v45, %v1855_v16 }
 0x1ff   : > { %v1864_v6 = vadd.f32 %v1863_v30, %v1862_v37  ;;  %v1871_v52 = vadd.f32 %v1870_v20, %v1869_v38  ;;  %v1878_v57 = vadd.f32 %v1877_v46, %v1876_v29  ;;  %v1885_v19 = vadd.f32 %v1884_v33, %v1883_v4 }
 0x200   : > { %v1892_v53 = vadd.f32 %v1891_v26, %v1890_v25  ;;  %v1899_v56 = vadd.f32 %v1898_v15, %v1897_v7  ;;  %v1906_v43 = vadd.f32 %v1905_v54, %v1904_v48  ;;  %v1913_v3 = vadd.f32 %v1912_v35, %v1911_v24  ;;  %v9898_v26 = vld [vmem:[#allocation253_spill] sm:$0xff]  ;;  %v9900_v35 = vld [vmem:[#allocation254_spill] sm:$0xff] }
 0x201   : > { %v1809_v61 = vrot.slane %v1808_v34, 1  ;;  %v1816_v9 = vrot.slane %v1815_v8, 1  ;;  %v1823_v17 = vrot.slane %v1822_v32, 1  ;;  %v1830_v60 = vrot.slane %v1829_v1, 1  ;;  %v9899_v15 = vld [vmem:[#allocation257_spill] sm:$0xff] }
 0x202   : > { %v1837_v39 = vrot.slane %v1836_v40, 1  ;;  %v1844_v31 = vrot.slane %v1843_v51, 1  ;;  %v1851_v10 = vrot.slane %v1850_v58, 1  ;;  %v1858_v12 = vrot.slane %v1857_v63, 1 }
 0x203   : > { %v1865_v21 = vrot.slane %v1864_v6, 1  ;;  %v1872_v14 = vrot.slane %v1871_v52, 1  ;;  %v1879_v44 = vrot.slane %v1878_v57, 1  ;;  %v1886_v16 = vrot.slane %v1885_v19, 1 }
 0x204   : > { %v1893_v37 = vrot.slane %v1892_v53, 1  ;;  %v1900_v38 = vrot.slane %v1899_v56, 1  ;;  %v1907_v29 = vrot.slane %v1906_v43, 1  ;;  %v1914_v4 = vrot.slane %v1913_v3, 1 }
 0x205   : > { %v6092_v25 = vadd.f32 %v1809_v61, %v1808_v34  ;;  %v6094_v48 = vadd.f32 %v1816_v9, %v1815_v8  ;;  %v6096_v24 = vadd.f32 %v1823_v17, %v1822_v32  ;;  %v6098_v7 = vadd.f32 %v1830_v60, %v1829_v1  ;;  %v9901_v34 = vld [vmem:[#allocation258_spill] sm:$0xff]  ;;  %v9902_v32 = vld [vmem:[#allocation255_spill] sm:$0xff]  ;;  %v9912_v9 = vld [vmem:[#allocation264_spill] sm:$0xff] }
 0x206   : > { %v6100_v59 = vadd.f32 %v1837_v39, %v1836_v40  ;;  %v6102_v18 = vadd.f32 %v1844_v31, %v1843_v51  ;;  %v6104_v28 = vadd.f32 %v1851_v10, %v1850_v58  ;;  %v6106_v13 = vadd.f32 %v1858_v12, %v1857_v63  ;;  %v9903_v1 = vld [vmem:[#allocation259_spill] sm:$0xff]  ;;  %v9904_v51 = vld [vmem:[#allocation256_spill] sm:$0xff]  ;;  %v9914_v39 = vld [vmem:[#allocation269_spill] sm:$0xff] }
 0x207   : > { %9882 = vst [vmem:[#allocation209_spill] sm:$0xff] %v6092_v25  ;;  %9883 = vst [vmem:[#allocation206_spill] sm:$0xff] %v6094_v48  ;;  %v6108_v36 = vadd.f32 %v1865_v21, %v1864_v6  ;;  %v6110_v42 = vadd.f32 %v1872_v14, %v1871_v52  ;;  %v6112_v23 = vadd.f32 %v1879_v44, %v1878_v57  ;;  %v9905_v58 = vld [vmem:[#allocation260_spill] sm:$0xff]  ;;  %v9906_v6 = vld [vmem:[#allocation261_spill] sm:$0xff] }
 0x208   : > { %9884 = vst [vmem:[#allocation210_spill] sm:$0xff] %v6096_v24  ;;  %9885 = vst [vmem:[#allocation207_spill] sm:$0xff] %v6098_v7  ;;  %v6114_v45 = vadd.f32 %v1886_v16, %v1885_v19  ;;  %v6116_v30 = vadd.f32 %v1893_v37, %v1892_v53  ;;  %v6118_v20 = vadd.f32 %v1900_v38, %v1899_v56  ;;  %v9907_v52 = vld [vmem:[#allocation265_spill] sm:$0xff]  ;;  %v9908_v19 = vld [vmem:[#allocation262_spill] sm:$0xff] }
 0x209   : > { %9886 = vst [vmem:[#allocation211_spill] sm:$0xff] %v6100_v59  ;;  %9887 = vst [vmem:[#allocation208_spill] sm:$0xff] %v6102_v18  ;;  %v6120_v46 = vadd.f32 %v1907_v29, %v1906_v43  ;;  %v6122_v33 = vadd.f32 %v1914_v4, %v1913_v3  ;;  %v1916_v54 = vadd.f32 %v9899_v15, %v9898_v26  ;;  %v9909_v53 = vld [vmem:[#allocation266_spill] sm:$0xff]  ;;  %v9910_v43 = vld [vmem:[#allocation263_spill] sm:$0xff] }
 0x20a   : > { %9888 = vst [vmem:[#allocation212_spill] sm:$0xff] %v6104_v28  ;;  %9889 = vst [vmem:[#allocation213_spill] sm:$0xff] %v6106_v13  ;;  %v1923_v8 = vadd.f32 %v9901_v34, %v9900_v35  ;;  %v1930_v40 = vadd.f32 %v9903_v1, %v9902_v32  ;;  %v1937_v63 = vadd.f32 %v9905_v58, %v9904_v51  ;;  %v9911_v3 = vld [vmem:[#allocation267_spill] sm:$0xff]  ;;  %v9913_v17 = vld [vmem:[#allocation268_spill] sm:$0xff] }
 0x20b   : > { %9890 = vst [vmem:[#allocation217_spill] sm:$0xff] %v6108_v36  ;;  %9891 = vst [vmem:[#allocation214_spill] sm:$0xff] %v6110_v42  ;;  %v1944_v57 = vadd.f32 %v9907_v52, %v9906_v6  ;;  %v1951_v56 = vadd.f32 %v9909_v53, %v9908_v19  ;;  %v1958_v61 = vadd.f32 %v9911_v3, %v9910_v43  ;;  %v9915_v31 = vld [vmem:[#allocation273_spill] sm:$0xff]  ;;  %v9916_v12 = vld [vmem:[#allocation270_spill] sm:$0xff]  ;;  %v1917_v43 = vrot.slane %v1916_v54, 4 }
 0x20c   : > { %9892 = vst [vmem:[#allocation218_spill] sm:$0xff] %v6112_v23  ;;  %9893 = vst [vmem:[#allocation215_spill] sm:$0xff] %v6114_v45  ;;  %v1965_v60 = vadd.f32 %v9913_v17, %v9912_v9  ;;  %v1972_v10 = vadd.f32 %v9915_v31, %v9914_v39  ;;  %v9917_v21 = vld [vmem:[#allocation274_spill] sm:$0xff]  ;;  %v9918_v44 = vld [vmem:[#allocation271_spill] sm:$0xff]  ;;  %v1924_v3 = vrot.slane %v1923_v8, 4  ;;  %v1931_v9 = vrot.slane %v1930_v40, 4 }
 0x20d   : > { %9894 = vst [vmem:[#allocation219_spill] sm:$0xff] %v6116_v30  ;;  %9895 = vst [vmem:[#allocation216_spill] sm:$0xff] %v6118_v20  ;;  %v1979_v14 = vadd.f32 %v9917_v21, %v9916_v12  ;;  %v9919_v16 = vld [vmem:[#allocation275_spill] sm:$0xff]  ;;  %v9920_v38 = vld [vmem:[#allocation272_spill] sm:$0xff]  ;;  %v1938_v17 = vrot.slane %v1937_v63, 4  ;;  %v1945_v39 = vrot.slane %v1944_v57, 4 }
 0x20e   : > { %9896 = vst [vmem:[#allocation220_spill] sm:$0xff] %v6120_v46  ;;  %9897 = vst [vmem:[#allocation221_spill] sm:$0xff] %v6122_v33  ;;  %v1986_v37 = vadd.f32 %v9919_v16, %v9918_v44  ;;  %v9921_v29 = vld [vmem:[#allocation276_spill] sm:$0xff]  ;;  %v9922_v26 = vld [vmem:[#allocation277_spill] sm:$0xff]  ;;  %v1952_v31 = vrot.slane %v1951_v56, 4  ;;  %v1959_v12 = vrot.slane %v1958_v61, 4  ;;  %v1932_v33 = vadd.f32 %v1931_v9, %v1930_v40 }
 0x20f   : > { %v1993_v4 = vadd.f32 %v9921_v29, %v9920_v38  ;;  %v9923_v15 = vld [vmem:[#allocation281_spill] sm:$0xff]  ;;  %v9924_v34 = vld [vmem:[#allocation278_spill] sm:$0xff]  ;;  %v9926_v51 = vld [vmem:[#allocation279_spill] sm:$0xff]  ;;  %v1966_v21 = vrot.slane %v1965_v60, 4  ;;  %v1973_v44 = vrot.slane %v1972_v10, 4  ;;  %v1980_v16 = vrot.slane %v1979_v14, 4 }
 0x210   : > { %v2000_v35 = vadd.f32 %v9923_v15, %v9922_v26  ;;  %v9925_v32 = vld [vmem:[#allocation282_spill] sm:$0xff]  ;;  %v9927_v58 = vld [vmem:[#allocation283_spill] sm:$0xff]  ;;  %v9928_v52 = vld [vmem:[#allocation280_spill] sm:$0xff]  ;;  %v1987_v38 = vrot.slane %v1986_v37, 4  ;;  %v1953_v46 = vadd.f32 %v1952_v31, %v1951_v56  ;;  %v1960_v20 = vadd.f32 %v1959_v12, %v1958_v61 }
 0x211   : > { %v2007_v1 = vadd.f32 %v9925_v32, %v9924_v34  ;;  %v2014_v6 = vadd.f32 %v9927_v58, %v9926_v51  ;;  %v9929_v19 = vld [vmem:[#allocation284_spill] sm:$0xff]  ;;  %v1994_v29 = vrot.slane %v1993_v4, 4  ;;  %v1918_v51 = vadd.f32 %v1917_v43, %v1916_v54 }
 0x212   : > { %v2021_v53 = vadd.f32 %v9929_v19, %v9928_v52  ;;  %v2001_v26 = vrot.slane %v2000_v35, 4  ;;  %v1925_v58 = vadd.f32 %v1924_v3, %v1923_v8  ;;  %v1939_v52 = vadd.f32 %v1938_v17, %v1937_v63 }
 0x213   : > { %v2008_v15 = vrot.slane %v2007_v1, 4  ;;  %v2015_v34 = vrot.slane %v2014_v6, 4  ;;  %v1946_v19 = vadd.f32 %v1945_v39, %v1944_v57  ;;  %v1967_v30 = vadd.f32 %v1966_v21, %v1965_v60 }
 0x214   : > { %v2022_v32 = vrot.slane %v2021_v53, 4  ;;  %v1974_v45 = vadd.f32 %v1973_v44, %v1972_v10  ;;  %v1981_v23 = vadd.f32 %v1980_v16, %v1979_v14  ;;  %v1988_v42 = vadd.f32 %v1987_v38, %v1986_v37 }
 0x215   : > { %v1995_v36 = vadd.f32 %v1994_v29, %v1993_v4  ;;  %v2002_v13 = vadd.f32 %v2001_v26, %v2000_v35  ;;  %v2009_v28 = vadd.f32 %v2008_v15, %v2007_v1  ;;  %v2016_v18 = vadd.f32 %v2015_v34, %v2014_v6 }
 0x216   : > { %v2023_v59 = vadd.f32 %v2022_v32, %v2021_v53  ;;  %v1919_v7 = vrot.slane %v1918_v51, 2  ;;  %v1926_v24 = vrot.slane %v1925_v58, 2  ;;  %v1933_v48 = vrot.slane %v1932_v33, 2 }
 0x217   : > { %v1940_v25 = vrot.slane %v1939_v52, 2  ;;  %v1947_v54 = vrot.slane %v1946_v19, 2  ;;  %v1954_v8 = vrot.slane %v1953_v46, 2  ;;  %v1961_v40 = vrot.slane %v1960_v20, 2 }
 0x218   : > { %v1968_v63 = vrot.slane %v1967_v30, 2  ;;  %v1975_v57 = vrot.slane %v1974_v45, 2  ;;  %v1982_v56 = vrot.slane %v1981_v23, 2  ;;  %v1989_v61 = vrot.slane %v1988_v42, 2 }
 0x219   : > { %v1996_v60 = vrot.slane %v1995_v36, 2  ;;  %v2003_v10 = vrot.slane %v2002_v13, 2  ;;  %v2010_v14 = vrot.slane %v2009_v28, 2  ;;  %v2017_v37 = vrot.slane %v2016_v18, 2 }
 0x21a   : > { %v2024_v4 = vrot.slane %v2023_v59, 2  ;;  %v1920_v35 = vadd.f32 %v1919_v7, %v1918_v51  ;;  %v1927_v1 = vadd.f32 %v1926_v24, %v1925_v58  ;;  %v1934_v6 = vadd.f32 %v1933_v48, %v1932_v33 }
 0x21b   : > { %v1941_v53 = vadd.f32 %v1940_v25, %v1939_v52  ;;  %v1948_v43 = vadd.f32 %v1947_v54, %v1946_v19  ;;  %v1955_v3 = vadd.f32 %v1954_v8, %v1953_v46  ;;  %v1962_v9 = vadd.f32 %v1961_v40, %v1960_v20 }
 0x21c   : > { %v1969_v17 = vadd.f32 %v1968_v63, %v1967_v30  ;;  %v1976_v39 = vadd.f32 %v1975_v57, %v1974_v45  ;;  %v1983_v31 = vadd.f32 %v1982_v56, %v1981_v23  ;;  %v1990_v12 = vadd.f32 %v1989_v61, %v1988_v42 }
 0x21d   : > { %v1997_v21 = vadd.f32 %v1996_v60, %v1995_v36  ;;  %v2004_v44 = vadd.f32 %v2003_v10, %v2002_v13  ;;  %v2011_v16 = vadd.f32 %v2010_v14, %v2009_v28  ;;  %v2018_v38 = vadd.f32 %v2017_v37, %v2016_v18  ;;  %v9946_v10 = vld [vmem:[#allocation285_spill] sm:$0xff] }
 0x21e   : > { %v2025_v29 = vadd.f32 %v2024_v4, %v2023_v59  ;;  %v1921_v26 = vrot.slane %v1920_v35, 1  ;;  %v1928_v15 = vrot.slane %v1927_v1, 1  ;;  %v1935_v34 = vrot.slane %v1934_v6, 1  ;;  %v9947_v14 = vld [vmem:[#allocation289_spill] sm:$0xff]  ;;  %v9948_v4 = vld [vmem:[#allocation286_spill] sm:$0xff] }
 0x21f   : > { %v1942_v32 = vrot.slane %v1941_v53, 1  ;;  %v1949_v7 = vrot.slane %v1948_v43, 1  ;;  %v1956_v24 = vrot.slane %v1955_v3, 1  ;;  %v1963_v48 = vrot.slane %v1962_v9, 1 }
 0x220   : > { %v1970_v25 = vrot.slane %v1969_v17, 1  ;;  %v1977_v33 = vrot.slane %v1976_v39, 1  ;;  %v1984_v46 = vrot.slane %v1983_v31, 1  ;;  %v1991_v20 = vrot.slane %v1990_v12, 1 }
 0x221   : > { %v1998_v30 = vrot.slane %v1997_v21, 1  ;;  %v2005_v45 = vrot.slane %v2004_v44, 1  ;;  %v2012_v23 = vrot.slane %v2011_v16, 1  ;;  %v2019_v42 = vrot.slane %v2018_v38, 1 }
 0x222   : > { %v2026_v36 = vrot.slane %v2025_v29, 1  ;;  %v6156_v13 = vadd.f32 %v1921_v26, %v1920_v35  ;;  %v6158_v18 = vadd.f32 %v1928_v15, %v1927_v1  ;;  %v6160_v59 = vadd.f32 %v1935_v34, %v1934_v6  ;;  %v9949_v35 = vld [vmem:[#allocation290_spill] sm:$0xff]  ;;  %v9950_v6 = vld [vmem:[#allocation287_spill] sm:$0xff]  ;;  %v9960_v15 = vld [vmem:[#allocation296_spill] sm:$0xff] }
 0x223   : > { %v6162_v28 = vadd.f32 %v1942_v32, %v1941_v53  ;;  %v6164_v51 = vadd.f32 %v1949_v7, %v1948_v43  ;;  %v6166_v58 = vadd.f32 %v1956_v24, %v1955_v3  ;;  %v6168_v52 = vadd.f32 %v1963_v48, %v1962_v9  ;;  %v9951_v53 = vld [vmem:[#allocation291_spill] sm:$0xff]  ;;  %v9952_v3 = vld [vmem:[#allocation288_spill] sm:$0xff]  ;;  %v9962_v7 = vld [vmem:[#allocation301_spill] sm:$0xff] }
 0x224   : > { %9930 = vst [vmem:[#allocation225_spill] sm:$0xff] %v6156_v13  ;;  %9931 = vst [vmem:[#allocation222_spill] sm:$0xff] %v6158_v18  ;;  %v6170_v19 = vadd.f32 %v1970_v25, %v1969_v17  ;;  %v6172_v54 = vadd.f32 %v1977_v33, %v1976_v39  ;;  %v6174_v8 = vadd.f32 %v1984_v46, %v1983_v31  ;;  %v9953_v9 = vld [vmem:[#allocation292_spill] sm:$0xff]  ;;  %v9954_v39 = vld [vmem:[#allocation293_spill] sm:$0xff] }
 0x225   : > { %9932 = vst [vmem:[#allocation226_spill] sm:$0xff] %v6160_v59  ;;  %9933 = vst [vmem:[#allocation223_spill] sm:$0xff] %v6162_v28  ;;  %v6176_v40 = vadd.f32 %v1991_v20, %v1990_v12  ;;  %v6178_v63 = vadd.f32 %v1998_v30, %v1997_v21  ;;  %v6180_v57 = vadd.f32 %v2005_v45, %v2004_v44  ;;  %v9955_v31 = vld [vmem:[#allocation297_spill] sm:$0xff]  ;;  %v9956_v21 = vld [vmem:[#allocation294_spill] sm:$0xff] }
 0x226   : > { %9934 = vst [vmem:[#allocation227_spill] sm:$0xff] %v6164_v51  ;;  %9935 = vst [vmem:[#allocation224_spill] sm:$0xff] %v6166_v58  ;;  %v6182_v56 = vadd.f32 %v2012_v23, %v2011_v16  ;;  %v6184_v61 = vadd.f32 %v2019_v42, %v2018_v38  ;;  %v6186_v60 = vadd.f32 %v2026_v36, %v2025_v29  ;;  %v9957_v44 = vld [vmem:[#allocation298_spill] sm:$0xff]  ;;  %v9958_v38 = vld [vmem:[#allocation295_spill] sm:$0xff] }
 0x227   : > { %9936 = vst [vmem:[#allocation228_spill] sm:$0xff] %v6168_v52  ;;  %9937 = vst [vmem:[#allocation229_spill] sm:$0xff] %v6170_v19  ;;  %v2028_v37 = vadd.f32 %v9947_v14, %v9946_v10  ;;  %v2035_v1 = vadd.f32 %v9949_v35, %v9948_v4  ;;  %v2042_v43 = vadd.f32 %v9951_v53, %v9950_v6  ;;  %v9959_v29 = vld [vmem:[#allocation299_spill] sm:$0xff]  ;;  %v9961_v34 = vld [vmem:[#allocation300_spill] sm:$0xff] }
 0x228   : > { %9938 = vst [vmem:[#allocation233_spill] sm:$0xff] %v6172_v54  ;;  %9939 = vst [vmem:[#allocation230_spill] sm:$0xff] %v6174_v8  ;;  %v2049_v17 = vadd.f32 %v9953_v9, %v9952_v3  ;;  %v2056_v12 = vadd.f32 %v9955_v31, %v9954_v39  ;;  %v2063_v16 = vadd.f32 %v9957_v44, %v9956_v21  ;;  %v9963_v24 = vld [vmem:[#allocation305_spill] sm:$0xff]  ;;  %v9964_v25 = vld [vmem:[#allocation302_spill] sm:$0xff] }
 0x229   : > { %9940 = vst [vmem:[#allocation234_spill] sm:$0xff] %v6176_v40  ;;  %9941 = vst [vmem:[#allocation231_spill] sm:$0xff] %v6178_v63  ;;  %v2070_v26 = vadd.f32 %v9959_v29, %v9958_v38  ;;  %v2077_v32 = vadd.f32 %v9961_v34, %v9960_v15  ;;  %v2084_v48 = vadd.f32 %v9963_v24, %v9962_v7  ;;  %v9965_v33 = vld [vmem:[#allocation306_spill] sm:$0xff]  ;;  %v9966_v20 = vld [vmem:[#allocation303_spill] sm:$0xff]  ;;  %v2029_v38 = vrot.slane %v2028_v37, 4 }
 0x22a   : > { %9942 = vst [vmem:[#allocation235_spill] sm:$0xff] %v6180_v57  ;;  %9943 = vst [vmem:[#allocation232_spill] sm:$0xff] %v6182_v56  ;;  %v2091_v46 = vadd.f32 %v9965_v33, %v9964_v25  ;;  %v9967_v30 = vld [vmem:[#allocation307_spill] sm:$0xff]  ;;  %v9968_v23 = vld [vmem:[#allocation304_spill] sm:$0xff]  ;;  %v2036_v29 = vrot.slane %v2035_v1, 4  ;;  %v2043_v15 = vrot.slane %v2042_v43, 4 }
 0x22b   : > { %9944 = vst [vmem:[#allocation236_spill] sm:$0xff] %v6184_v61  ;;  %9945 = vst [vmem:[#allocation237_spill] sm:$0xff] %v6186_v60  ;;  %v2098_v45 = vadd.f32 %v9967_v30, %v9966_v20  ;;  %v9969_v42 = vld [vmem:[#allocation308_spill] sm:$0xff]  ;;  %v9970_v10 = vld [vmem:[#allocation309_spill] sm:$0xff]  ;;  %v2050_v34 = vrot.slane %v2049_v17, 4  ;;  %v2057_v7 = vrot.slane %v2056_v12, 4 }
 0x22c   : > { %v2105_v36 = vadd.f32 %v9969_v42, %v9968_v23  ;;  %v9971_v14 = vld [vmem:[#allocation313_spill] sm:$0xff]  ;;  %v9972_v35 = vld [vmem:[#allocation310_spill] sm:$0xff]  ;;  %v9974_v3 = vld [vmem:[#allocation311_spill] sm:$0xff]  ;;  %v2064_v24 = vrot.slane %v2063_v16, 4  ;;  %v2071_v25 = vrot.slane %v2070_v26, 4  ;;  %v2078_v33 = vrot.slane %v2077_v32, 4 }
 0x22d   : > { %v2112_v4 = vadd.f32 %v9971_v14, %v9970_v10  ;;  %v9973_v6 = vld [vmem:[#allocation314_spill] sm:$0xff]  ;;  %v9975_v9 = vld [vmem:[#allocation315_spill] sm:$0xff]  ;;  %v9976_v31 = vld [vmem:[#allocation312_spill] sm:$0xff]  ;;  %v2085_v20 = vrot.slane %v2084_v48, 4  ;;  %v2092_v30 = vrot.slane %v2091_v46, 4  ;;  %v2099_v23 = vrot.slane %v2098_v45, 4 }
 0x22e   : > { %v2119_v53 = vadd.f32 %v9973_v6, %v9972_v35  ;;  %v2126_v39 = vadd.f32 %v9975_v9, %v9974_v3  ;;  %v9977_v21 = vld [vmem:[#allocation316_spill] sm:$0xff]  ;;  %v2106_v42 = vrot.slane %v2105_v36, 4  ;;  %v2030_v3 = vadd.f32 %v2029_v38, %v2028_v37 }
 0x22f   : > { %v2133_v44 = vadd.f32 %v9977_v21, %v9976_v31  ;;  %v2113_v10 = vrot.slane %v2112_v4, 4  ;;  %v2037_v9 = vadd.f32 %v2036_v29, %v2035_v1  ;;  %v2044_v60 = vadd.f32 %v2043_v15, %v2042_v43 }
 0x230   : > { %v2120_v14 = vrot.slane %v2119_v53, 4  ;;  %v2127_v35 = vrot.slane %v2126_v39, 4  ;;  %v2051_v31 = vadd.f32 %v2050_v34, %v2049_v17  ;;  %v2058_v21 = vadd.f32 %v2057_v7, %v2056_v12 }
 0x231   : > { %v2134_v6 = vrot.slane %v2133_v44, 4  ;;  %v2065_v61 = vadd.f32 %v2064_v24, %v2063_v16  ;;  %v2072_v56 = vadd.f32 %v2071_v25, %v2070_v26  ;;  %v2079_v57 = vadd.f32 %v2078_v33, %v2077_v32 }
 0x232   : > { %v2086_v63 = vadd.f32 %v2085_v20, %v2084_v48  ;;  %v2093_v40 = vadd.f32 %v2092_v30, %v2091_v46  ;;  %v2100_v8 = vadd.f32 %v2099_v23, %v2098_v45  ;;  %v2107_v54 = vadd.f32 %v2106_v42, %v2105_v36 }
 0x233   : > { %v2114_v19 = vadd.f32 %v2113_v10, %v2112_v4  ;;  %v2121_v52 = vadd.f32 %v2120_v14, %v2119_v53  ;;  %v2128_v58 = vadd.f32 %v2127_v35, %v2126_v39  ;;  %v2135_v51 = vadd.f32 %v2134_v6, %v2133_v44 }
 0x234   : > { %v2031_v28 = vrot.slane %v2030_v3, 2  ;;  %v2038_v59 = vrot.slane %v2037_v9, 2  ;;  %v2045_v18 = vrot.slane %v2044_v60, 2  ;;  %v2052_v13 = vrot.slane %v2051_v31, 2 }
 0x235   : > { %v2059_v37 = vrot.slane %v2058_v21, 2  ;;  %v2066_v1 = vrot.slane %v2065_v61, 2  ;;  %v2073_v43 = vrot.slane %v2072_v56, 2  ;;  %v2080_v17 = vrot.slane %v2079_v57, 2 }
 0x236   : > { %v2087_v12 = vrot.slane %v2086_v63, 2  ;;  %v2094_v16 = vrot.slane %v2093_v40, 2  ;;  %v2101_v26 = vrot.slane %v2100_v8, 2  ;;  %v2108_v32 = vrot.slane %v2107_v54, 2 }
 0x237   : > { %v2115_v48 = vrot.slane %v2114_v19, 2  ;;  %v2122_v46 = vrot.slane %v2121_v52, 2  ;;  %v2129_v45 = vrot.slane %v2128_v58, 2  ;;  %v2136_v36 = vrot.slane %v2135_v51, 2 }
 0x238   : > { %v2032_v4 = vadd.f32 %v2031_v28, %v2030_v3  ;;  %v2039_v53 = vadd.f32 %v2038_v59, %v2037_v9  ;;  %v2046_v39 = vadd.f32 %v2045_v18, %v2044_v60  ;;  %v2053_v44 = vadd.f32 %v2052_v13, %v2051_v31 }
 0x239   : > { %v2060_v38 = vadd.f32 %v2059_v37, %v2058_v21  ;;  %v2067_v29 = vadd.f32 %v2066_v1, %v2065_v61  ;;  %v2074_v15 = vadd.f32 %v2073_v43, %v2072_v56  ;;  %v2081_v34 = vadd.f32 %v2080_v17, %v2079_v57 }
 0x23a   : > { %v2088_v7 = vadd.f32 %v2087_v12, %v2086_v63  ;;  %v2095_v24 = vadd.f32 %v2094_v16, %v2093_v40  ;;  %v2102_v25 = vadd.f32 %v2101_v26, %v2100_v8  ;;  %v2109_v33 = vadd.f32 %v2108_v32, %v2107_v54 }
 0x23b   : > { %v2116_v20 = vadd.f32 %v2115_v48, %v2114_v19  ;;  %v2123_v30 = vadd.f32 %v2122_v46, %v2121_v52  ;;  %v2130_v23 = vadd.f32 %v2129_v45, %v2128_v58  ;;  %v2137_v42 = vadd.f32 %v2136_v36, %v2135_v51  ;;  %v9994_v48 = vld [vmem:[#allocation317_spill] sm:$0xff]  ;;  %v9996_v36 = vld [vmem:[#allocation318_spill] sm:$0xff] }
 0x23c   : > { %v2033_v10 = vrot.slane %v2032_v4, 1  ;;  %v2040_v14 = vrot.slane %v2039_v53, 1  ;;  %v2047_v35 = vrot.slane %v2046_v39, 1  ;;  %v2054_v6 = vrot.slane %v2053_v44, 1  ;;  %v9995_v46 = vld [vmem:[#allocation321_spill] sm:$0xff] }
 0x23d   : > { %v2061_v28 = vrot.slane %v2060_v38, 1  ;;  %v2068_v59 = vrot.slane %v2067_v29, 1  ;;  %v2075_v18 = vrot.slane %v2074_v15, 1  ;;  %v2082_v13 = vrot.slane %v2081_v34, 1 }
 0x23e   : > { %v2089_v60 = vrot.slane %v2088_v7, 1  ;;  %v2096_v61 = vrot.slane %v2095_v24, 1  ;;  %v2103_v56 = vrot.slane %v2102_v25, 1  ;;  %v2110_v57 = vrot.slane %v2109_v33, 1 }
 0x23f   : > { %v2117_v63 = vrot.slane %v2116_v20, 1  ;;  %v2124_v40 = vrot.slane %v2123_v30, 1  ;;  %v2131_v8 = vrot.slane %v2130_v23, 1  ;;  %v2138_v54 = vrot.slane %v2137_v42, 1 }
 0x240   : > { %v6220_v19 = vadd.f32 %v2033_v10, %v2032_v4  ;;  %v6222_v58 = vadd.f32 %v2040_v14, %v2039_v53  ;;  %v6224_v51 = vadd.f32 %v2047_v35, %v2046_v39  ;;  %v6226_v52 = vadd.f32 %v2054_v6, %v2053_v44  ;;  %v9997_v4 = vld [vmem:[#allocation322_spill] sm:$0xff]  ;;  %v9998_v39 = vld [vmem:[#allocation319_spill] sm:$0xff]  ;;  %v10008_v14 = vld [vmem:[#allocation328_spill] sm:$0xff] }
 0x241   : > { %v6228_v3 = vadd.f32 %v2061_v28, %v2060_v38  ;;  %v6230_v9 = vadd.f32 %v2068_v59, %v2067_v29  ;;  %v6232_v31 = vadd.f32 %v2075_v18, %v2074_v15  ;;  %v6234_v21 = vadd.f32 %v2082_v13, %v2081_v34  ;;  %v9999_v44 = vld [vmem:[#allocation323_spill] sm:$0xff]  ;;  %v10000_v29 = vld [vmem:[#allocation320_spill] sm:$0xff]  ;;  %v10010_v28 = vld [vmem:[#allocation333_spill] sm:$0xff] }
 0x242   : > { %9978 = vst [vmem:[#allocation241_spill] sm:$0xff] %v6220_v19  ;;  %9979 = vst [vmem:[#allocation238_spill] sm:$0xff] %v6222_v58  ;;  %v6236_v37 = vadd.f32 %v2089_v60, %v2088_v7  ;;  %v6238_v1 = vadd.f32 %v2096_v61, %v2095_v24  ;;  %v6240_v43 = vadd.f32 %v2103_v56, %v2102_v25  ;;  %v10001_v15 = vld [vmem:[#allocation324_spill] sm:$0xff]  ;;  %v10002_v7 = vld [vmem:[#allocation325_spill] sm:$0xff] }
 0x243   : > { %9980 = vst [vmem:[#allocation242_spill] sm:$0xff] %v6224_v51  ;;  %9981 = vst [vmem:[#allocation239_spill] sm:$0xff] %v6226_v52  ;;  %v6242_v17 = vadd.f32 %v2110_v57, %v2109_v33  ;;  %v6244_v12 = vadd.f32 %v2117_v63, %v2116_v20  ;;  %v6246_v16 = vadd.f32 %v2124_v40, %v2123_v30  ;;  %v10003_v24 = vld [vmem:[#allocation329_spill] sm:$0xff]  ;;  %v10004_v33 = vld [vmem:[#allocation326_spill] sm:$0xff] }
 0x244   : > { %9982 = vst [vmem:[#allocation243_spill] sm:$0xff] %v6228_v3  ;;  %9983 = vst [vmem:[#allocation240_spill] sm:$0xff] %v6230_v9  ;;  %v6248_v26 = vadd.f32 %v2131_v8, %v2130_v23  ;;  %v6250_v32 = vadd.f32 %v2138_v54, %v2137_v42  ;;  %v2140_v45 = vadd.f32 %v9995_v46, %v9994_v48  ;;  %v10005_v20 = vld [vmem:[#allocation330_spill] sm:$0xff]  ;;  %v10006_v23 = vld [vmem:[#allocation327_spill] sm:$0xff] }
 0x245   : > { %9984 = vst [vmem:[#allocation244_spill] sm:$0xff] %v6232_v31  ;;  %9985 = vst [vmem:[#allocation245_spill] sm:$0xff] %v6234_v21  ;;  %v2147_v53 = vadd.f32 %v9997_v4, %v9996_v36  ;;  %v2154_v38 = vadd.f32 %v9999_v44, %v9998_v39  ;;  %v2161_v34 = vadd.f32 %v10001_v15, %v10000_v29  ;;  %v10007_v42 = vld [vmem:[#allocation331_spill] sm:$0xff]  ;;  %v10009_v35 = vld [vmem:[#allocation332_spill] sm:$0xff] }
 0x246   : > { %9986 = vst [vmem:[#allocation249_spill] sm:$0xff] %v6236_v37  ;;  %9987 = vst [vmem:[#allocation246_spill] sm:$0xff] %v6238_v1  ;;  %v2168_v25 = vadd.f32 %v10003_v24, %v10002_v7  ;;  %v2175_v30 = vadd.f32 %v10005_v20, %v10004_v33  ;;  %v2182_v10 = vadd.f32 %v10007_v42, %v10006_v23  ;;  %v10011_v59 = vld [vmem:[#allocation337_spill] sm:$0xff]  ;;  %v10012_v13 = vld [vmem:[#allocation334_spill] sm:$0xff]  ;;  %v2141_v29 = vrot.slane %v2140_v45, 4 }
 0x247   : > { %9988 = vst [vmem:[#allocation250_spill] sm:$0xff] %v6240_v43  ;;  %9989 = vst [vmem:[#allocation247_spill] sm:$0xff] %v6242_v17  ;;  %v2189_v6 = vadd.f32 %v10009_v35, %v10008_v14  ;;  %v2196_v18 = vadd.f32 %v10011_v59, %v10010_v28  ;;  %v10013_v60 = vld [vmem:[#allocation338_spill] sm:$0xff]  ;;  %v10014_v56 = vld [vmem:[#allocation335_spill] sm:$0xff]  ;;  %v2238_v39 = vadd.f32 %v5673_v22, %v5661_v50  ;;  %v2148_v15 = vrot.slane %v2147_v53, 4 }
 0x248   : > { %9990 = vst [vmem:[#allocation251_spill] sm:$0xff] %v6244_v12  ;;  %9991 = vst [vmem:[#allocation248_spill] sm:$0xff] %v6246_v16  ;;  %v2203_v61 = vadd.f32 %v10013_v60, %v10012_v13  ;;  %v10015_v57 = vld [vmem:[#allocation339_spill] sm:$0xff]  ;;  %v10016_v40 = vld [vmem:[#allocation336_spill] sm:$0xff]  ;;  %v2245_v44 = vadd.f32 %v5676_v11, %v5664_v0  ;;  %v2155_v7 = vrot.slane %v2154_v38, 4  ;;  %v2162_v24 = vrot.slane %v2161_v34, 4 }
 0x249   : > { %9992 = vst [vmem:[#allocation252_spill] sm:$0xff] %v6248_v26  ;;  %9993 = vst [vmem:[#allocation253_spill] sm:$0xff] %v6250_v32  ;;  %v2210_v63 = vadd.f32 %v10015_v57, %v10014_v56  ;;  %v10017_v8 = vld [vmem:[#allocation340_spill] sm:$0xff]  ;;  %v10018_v48 = vld [vmem:[#allocation341_spill] sm:$0xff]  ;;  %v2169_v33 = vrot.slane %v2168_v25, 4  ;;  %v2176_v20 = vrot.slane %v2175_v30, 4  ;;  %v2142_v22 = vadd.f32 %v2141_v29, %v2140_v45 }
 0x24a   : > { %v2217_v54 = vadd.f32 %v10017_v8, %v10016_v40  ;;  %v2224_v46 = vadd.f32 %v5667_v62, %v10018_v48  ;;  %v10019_v36 = vld [vmem:[#allocation342_spill] sm:$0xff]  ;;  %v2183_v23 = vrot.slane %v2182_v10, 4  ;;  %v2190_v42 = vrot.slane %v2189_v6, 4  ;;  %v10179_v9 = vld [vmem:[#allocation69_spill] sm:$0xff]  ;;  %v10182_v52 = vld [vmem:[#allocation71_spill] sm:$0xff] }
 0x24b   : > { %v2231_v4 = vadd.f32 %v5670_v27, %v10019_v36  ;;  %v2197_v14 = vrot.slane %v2196_v18, 4  ;;  %v2204_v35 = vrot.slane %v2203_v61, 4  ;;  %v2211_v62 = vrot.slane %v2210_v63, 4  ;;  %v10180_v3 = vld [vmem:[#allocation70_spill] sm:$0xff]  ;;  %v10184_v51 = vld [vmem:[#allocation72_spill] sm:$0xff]  ;;  %v10186_v58 = vld [vmem:[#allocation73_spill] sm:$0xff] }
 0x24c   : > { %v2218_v28 = vrot.slane %v2217_v54, 4  ;;  %v2225_v59 = vrot.slane %v2224_v46, 4  ;;  %v2239_v13 = vrot.slane %v2238_v39, 4  ;;  %v2246_v60 = vrot.slane %v2245_v44, 4  ;;  %v10188_v19 = vld [vmem:[#allocation74_spill] sm:$0xff] }
 0x24d   : > { %v2232_v27 = vrot.slane %v2231_v4, 4  ;;  %v2149_v50 = vadd.f32 %v2148_v15, %v2147_v53  ;;  %v2156_v56 = vadd.f32 %v2155_v7, %v2154_v38  ;;  %v2163_v0 = vadd.f32 %v2162_v24, %v2161_v34 }
 0x24e   : > { %v2170_v11 = vadd.f32 %v2169_v33, %v2168_v25  ;;  %v2177_v57 = vadd.f32 %v2176_v20, %v2175_v30  ;;  %v2184_v40 = vadd.f32 %v2183_v23, %v2182_v10  ;;  %v2191_v8 = vadd.f32 %v2190_v42, %v2189_v6 }
 0x24f   : > { %v2198_v48 = vadd.f32 %v2197_v14, %v2196_v18  ;;  %v2205_v36 = vadd.f32 %v2204_v35, %v2203_v61  ;;  %v2212_v32 = vadd.f32 %v2211_v62, %v2210_v63  ;;  %v2219_v26 = vadd.f32 %v2218_v28, %v2217_v54 }
 0x250   : > { %v2226_v16 = vadd.f32 %v2225_v59, %v2224_v46  ;;  %v2233_v12 = vadd.f32 %v2232_v27, %v2231_v4  ;;  %v2240_v17 = vadd.f32 %v2239_v13, %v2238_v39  ;;  %v2247_v43 = vadd.f32 %v2246_v60, %v2245_v44 }
 0x251   : > { %v2143_v1 = vrot.slane %v2142_v22, 2  ;;  %v2150_v37 = vrot.slane %v2149_v50, 2  ;;  %v2157_v21 = vrot.slane %v2156_v56, 2  ;;  %v2164_v31 = vrot.slane %v2163_v0, 2 }
 0x252   : > { %v2171_v45 = vrot.slane %v2170_v11, 2  ;;  %v2178_v53 = vrot.slane %v2177_v57, 2  ;;  %v2185_v38 = vrot.slane %v2184_v40, 2  ;;  %v2192_v34 = vrot.slane %v2191_v8, 2 }
 0x253   : > { %v2199_v25 = vrot.slane %v2198_v48, 2  ;;  %v2206_v30 = vrot.slane %v2205_v36, 2  ;;  %v2213_v10 = vrot.slane %v2212_v32, 2  ;;  %v2220_v6 = vrot.slane %v2219_v26, 2 }
 0x254   : > { %v2227_v18 = vrot.slane %v2226_v16, 2  ;;  %v2234_v61 = vrot.slane %v2233_v12, 2  ;;  %v2241_v63 = vrot.slane %v2240_v17, 2  ;;  %v2248_v54 = vrot.slane %v2247_v43, 2 }
 0x255   : > { %v2144_v46 = vadd.f32 %v2143_v1, %v2142_v22  ;;  %v2151_v4 = vadd.f32 %v2150_v37, %v2149_v50  ;;  %v2158_v39 = vadd.f32 %v2157_v21, %v2156_v56  ;;  %v2165_v44 = vadd.f32 %v2164_v31, %v2163_v0 }
 0x256   : > { %v2172_v29 = vadd.f32 %v2171_v45, %v2170_v11  ;;  %v2179_v15 = vadd.f32 %v2178_v53, %v2177_v57  ;;  %v2186_v7 = vadd.f32 %v2185_v38, %v2184_v40  ;;  %v2193_v24 = vadd.f32 %v2192_v34, %v2191_v8 }
 0x257   : > { %v2200_v33 = vadd.f32 %v2199_v25, %v2198_v48  ;;  %v2207_v20 = vadd.f32 %v2206_v30, %v2205_v36  ;;  %v2214_v23 = vadd.f32 %v2213_v10, %v2212_v32  ;;  %v2221_v42 = vadd.f32 %v2220_v6, %v2219_v26 }
 0x258   : > { %v2228_v14 = vadd.f32 %v2227_v18, %v2226_v16  ;;  %v2235_v35 = vadd.f32 %v2234_v61, %v2233_v12  ;;  %v2242_v62 = vadd.f32 %v2241_v63, %v2240_v17  ;;  %v2249_v28 = vadd.f32 %v2248_v54, %v2247_v43  ;;  %v10036_v63 = vld [vmem:[#allocation344_spill] sm:$0xff] }
 0x259   : > { %v2145_v59 = vrot.slane %v2144_v46, 1  ;;  %v2152_v27 = vrot.slane %v2151_v4, 1  ;;  %v2159_v13 = vrot.slane %v2158_v39, 1  ;;  %v2166_v60 = vrot.slane %v2165_v44, 1 }
 0x25a   : > { %v2173_v1 = vrot.slane %v2172_v29, 1  ;;  %v2180_v37 = vrot.slane %v2179_v15, 1  ;;  %v2187_v21 = vrot.slane %v2186_v7, 1  ;;  %v2194_v31 = vrot.slane %v2193_v24, 1 }
 0x25b   : > { %v2201_v22 = vrot.slane %v2200_v33, 1  ;;  %v2208_v50 = vrot.slane %v2207_v20, 1  ;;  %v2215_v56 = vrot.slane %v2214_v23, 1  ;;  %v2222_v0 = vrot.slane %v2221_v42, 1 }
 0x25c   : > { %v2229_v11 = vrot.slane %v2228_v14, 1  ;;  %v2236_v57 = vrot.slane %v2235_v35, 1  ;;  %v2243_v32 = vrot.slane %v2242_v62, 1  ;;  %v2250_v26 = vrot.slane %v2249_v28, 1 }
 0x25d   : > { %v6284_v16 = vadd.f32 %v2145_v59, %v2144_v46  ;;  %v6286_v17 = vadd.f32 %v2152_v27, %v2151_v4  ;;  %v6288_v43 = vadd.f32 %v2159_v13, %v2158_v39  ;;  %v6290_v12 = vadd.f32 %v2166_v60, %v2165_v44  ;;  %v10037_v46 = vld [vmem:[#allocation343_spill] sm:$0xff]  ;;  %v10038_v4 = vld [vmem:[#allocation345_spill] sm:$0xff]  ;;  %v10039_v44 = vld [vmem:[#allocation346_spill] sm:$0xff] }
 0x25e   : > { %v6292_v40 = vadd.f32 %v2173_v1, %v2172_v29  ;;  %v6294_v8 = vadd.f32 %v2180_v37, %v2179_v15  ;;  %v6296_v48 = vadd.f32 %v2187_v21, %v2186_v7  ;;  %v6298_v36 = vadd.f32 %v2194_v31, %v2193_v24  ;;  %v10040_v29 = vld [vmem:[#allocation350_spill] sm:$0xff]  ;;  %v10041_v7 = vld [vmem:[#allocation347_spill] sm:$0xff]  ;;  %v10052_v27 = vld [vmem:[#allocation112_spill] sm:$0xff] }
 0x25f   : > { %10020 = vst [vmem:[#allocation257_spill] sm:$0xff] %v6284_v16  ;;  %10021 = vst [vmem:[#allocation254_spill] sm:$0xff] %v6286_v17  ;;  %v6300_v45 = vadd.f32 %v2201_v22, %v2200_v33  ;;  %v6302_v53 = vadd.f32 %v2208_v50, %v2207_v20  ;;  %v6304_v38 = vadd.f32 %v2215_v56, %v2214_v23  ;;  %v10042_v24 = vld [vmem:[#allocation351_spill] sm:$0xff]  ;;  %v10043_v20 = vld [vmem:[#allocation348_spill] sm:$0xff] }
 0x260   : > { %10022 = vst [vmem:[#allocation258_spill] sm:$0xff] %v6288_v43  ;;  %10023 = vst [vmem:[#allocation255_spill] sm:$0xff] %v6290_v12  ;;  %v6306_v34 = vadd.f32 %v2222_v0, %v2221_v42  ;;  %v6308_v25 = vadd.f32 %v2229_v11, %v2228_v14  ;;  %v6310_v30 = vadd.f32 %v2236_v57, %v2235_v35  ;;  %v10044_v23 = vld [vmem:[#allocation352_spill] sm:$0xff]  ;;  %v10045_v14 = vld [vmem:[#allocation349_spill] sm:$0xff] }
 0x261   : > { %10024 = vst [vmem:[#allocation259_spill] sm:$0xff] %v6292_v40  ;;  %10025 = vst [vmem:[#allocation256_spill] sm:$0xff] %v6294_v8  ;;  %v6312_v10 = vadd.f32 %v2243_v32, %v2242_v62  ;;  %v6314_v6 = vadd.f32 %v2250_v26, %v2249_v28  ;;  %v2252_v18 = vadd.f32 %v5694_v47, %v5679_v5  ;;  %v10046_v5 = vld [vmem:[#allocation353_spill] sm:$0xff]  ;;  %v10047_v35 = vld [vmem:[#allocation354_spill] sm:$0xff] }
 0x262   : > { %10026 = vst [vmem:[#allocation260_spill] sm:$0xff] %v6296_v48  ;;  %10027 = vst [vmem:[#allocation261_spill] sm:$0xff] %v6298_v36  ;;  %v2259_v61 = vadd.f32 %v5698_v49, %v5683_v55  ;;  %v2266_v54 = vadd.f32 %v10036_v63, %v5687_v2  ;;  %v2273_v39 = vadd.f32 %v10038_v4, %v10037_v46  ;;  %v10048_v55 = vld [vmem:[#allocation108_spill] sm:$0xff]  ;;  %v10049_v62 = vld [vmem:[#allocation355_spill] sm:$0xff] }
 0x263   : > { %10028 = vst [vmem:[#allocation265_spill] sm:$0xff] %v6300_v45  ;;  %10029 = vst [vmem:[#allocation262_spill] sm:$0xff] %v6302_v53  ;;  %v2280_v15 = vadd.f32 %v10040_v29, %v10039_v44  ;;  %v2287_v33 = vadd.f32 %v10042_v24, %v10041_v7  ;;  %v2294_v42 = vadd.f32 %v10044_v23, %v10043_v20  ;;  %v10050_v2 = vld [vmem:[#allocation111_spill] sm:$0xff]  ;;  %v10051_v59 = vld [vmem:[#allocation106_spill] sm:$0xff]  ;;  %v2253_v4 = vrot.slane %v2252_v18, 4 }
 0x264   : > { %10030 = vst [vmem:[#allocation266_spill] sm:$0xff] %v6304_v38  ;;  %10031 = vst [vmem:[#allocation263_spill] sm:$0xff] %v6306_v34  ;;  %v2301_v47 = vadd.f32 %v10046_v5, %v10045_v14  ;;  %v2308_v49 = vadd.f32 %v10048_v55, %v10047_v35  ;;  %v2315_v28 = vadd.f32 %v10050_v2, %v10049_v62  ;;  %v10053_v60 = vld [vmem:[#allocation107_spill] sm:$0xff]  ;;  %v10054_v1 = vld [vmem:[#allocation113_spill] sm:$0xff]  ;;  %v2260_v44 = vrot.slane %v2259_v61, 4 }
 0x265   : > { %10032 = vst [vmem:[#allocation267_spill] sm:$0xff] %v6308_v25  ;;  %10033 = vst [vmem:[#allocation264_spill] sm:$0xff] %v6310_v30  ;;  %v2322_v13 = vadd.f32 %v10052_v27, %v10051_v59  ;;  %v2329_v37 = vadd.f32 %v10054_v1, %v10053_v60  ;;  %v10055_v21 = vld [vmem:[#allocation116_spill] sm:$0xff]  ;;  %v10056_v31 = vld [vmem:[#allocation118_spill] sm:$0xff]  ;;  %v2267_v29 = vrot.slane %v2266_v54, 4  ;;  %v2274_v7 = vrot.slane %v2273_v39, 4 }
 0x266   : > { %10034 = vst [vmem:[#allocation268_spill] sm:$0xff] %v6312_v10  ;;  %10035 = vst [vmem:[#allocation269_spill] sm:$0xff] %v6314_v6  ;;  %v2336_v22 = vadd.f32 %v10056_v31, %v10055_v21  ;;  %v10057_v50 = vld [vmem:[#allocation117_spill] sm:$0xff]  ;;  %v10058_v56 = vld [vmem:[#allocation122_spill] sm:$0xff]  ;;  %v2281_v24 = vrot.slane %v2280_v15, 4  ;;  %v2288_v20 = vrot.slane %v2287_v33, 4  ;;  %v2254_v1 = vadd.f32 %v2253_v4, %v2252_v18 }
 0x267   : > { %v2343_v0 = vadd.f32 %v10058_v56, %v10057_v50  ;;  %v10059_v11 = vld [vmem:[#allocation121_spill] sm:$0xff]  ;;  %v10060_v57 = vld [vmem:[#allocation123_spill] sm:$0xff]  ;;  %v10062_v63 = vld [vmem:[#allocation126_spill] sm:$0xff]  ;;  %v2295_v23 = vrot.slane %v2294_v42, 4  ;;  %v2302_v14 = vrot.slane %v2301_v47, 4  ;;  %v2309_v5 = vrot.slane %v2308_v49, 4 }
 0x268   : > { %v2350_v32 = vadd.f32 %v10060_v57, %v10059_v11  ;;  %v10061_v26 = vld [vmem:[#allocation125_spill] sm:$0xff]  ;;  %v2316_v35 = vrot.slane %v2315_v28, 4  ;;  %v2323_v55 = vrot.slane %v2322_v13, 4  ;;  %v2330_v62 = vrot.slane %v2329_v37, 4  ;;  %v10174_v40 = vld [vmem:[#allocation64_spill] sm:$0xff]  ;;  %v10176_v43 = vld [vmem:[#allocation66_spill] sm:$0xff] }
 0x269   : > { %v2357_v46 = vadd.f32 %v10062_v63, %v10061_v26  ;;  %v2337_v2 = vrot.slane %v2336_v22, 4  ;;  %v2344_v59 = vrot.slane %v2343_v0, 4  ;;  %v2261_v21 = vadd.f32 %v2260_v44, %v2259_v61  ;;  %v10175_v12 = vld [vmem:[#allocation65_spill] sm:$0xff]  ;;  %v10177_v17 = vld [vmem:[#allocation67_spill] sm:$0xff]  ;;  %v10178_v16 = vld [vmem:[#allocation68_spill] sm:$0xff] }
 0x26a   : > { %v2351_v27 = vrot.slane %v2350_v32, 4  ;;  %v2268_v31 = vadd.f32 %v2267_v29, %v2266_v54  ;;  %v2275_v50 = vadd.f32 %v2274_v7, %v2273_v39  ;;  %v2282_v56 = vadd.f32 %v2281_v24, %v2280_v15 }
 0x26b   : > { %v2358_v60 = vrot.slane %v2357_v46, 4  ;;  %v2289_v11 = vadd.f32 %v2288_v20, %v2287_v33  ;;  %v2296_v57 = vadd.f32 %v2295_v23, %v2294_v42  ;;  %v2303_v26 = vadd.f32 %v2302_v14, %v2301_v47 }
 0x26c   : > { %v2310_v63 = vadd.f32 %v2309_v5, %v2308_v49  ;;  %v2317_v6 = vadd.f32 %v2316_v35, %v2315_v28  ;;  %v2324_v10 = vadd.f32 %v2323_v55, %v2322_v13  ;;  %v2331_v30 = vadd.f32 %v2330_v62, %v2329_v37 }
 0x26d   : > { %v2338_v25 = vadd.f32 %v2337_v2, %v2336_v22  ;;  %v2345_v34 = vadd.f32 %v2344_v59, %v2343_v0  ;;  %v2352_v38 = vadd.f32 %v2351_v27, %v2350_v32  ;;  %v2359_v53 = vadd.f32 %v2358_v60, %v2357_v46 }
 0x26e   : > { %v2255_v45 = vrot.slane %v2254_v1, 2  ;;  %v2262_v36 = vrot.slane %v2261_v21, 2  ;;  %v2269_v48 = vrot.slane %v2268_v31, 2  ;;  %v2276_v8 = vrot.slane %v2275_v50, 2 }
 0x26f   : > { %v2283_v18 = vrot.slane %v2282_v56, 2  ;;  %v2290_v61 = vrot.slane %v2289_v11, 2  ;;  %v2297_v54 = vrot.slane %v2296_v57, 2  ;;  %v2304_v39 = vrot.slane %v2303_v26, 2 }
 0x270   : > { %v2311_v15 = vrot.slane %v2310_v63, 2  ;;  %v2318_v33 = vrot.slane %v2317_v6, 2  ;;  %v2325_v42 = vrot.slane %v2324_v10, 2  ;;  %v2332_v47 = vrot.slane %v2331_v30, 2 }
 0x271   : > { %v2339_v49 = vrot.slane %v2338_v25, 2  ;;  %v2346_v28 = vrot.slane %v2345_v34, 2  ;;  %v2353_v13 = vrot.slane %v2352_v38, 2  ;;  %v2360_v37 = vrot.slane %v2359_v53, 2 }
 0x272   : > { %v2256_v22 = vadd.f32 %v2255_v45, %v2254_v1  ;;  %v2263_v0 = vadd.f32 %v2262_v36, %v2261_v21  ;;  %v2270_v32 = vadd.f32 %v2269_v48, %v2268_v31  ;;  %v2277_v46 = vadd.f32 %v2276_v8, %v2275_v50 }
 0x273   : > { %v2284_v4 = vadd.f32 %v2283_v18, %v2282_v56  ;;  %v2291_v44 = vadd.f32 %v2290_v61, %v2289_v11  ;;  %v2298_v29 = vadd.f32 %v2297_v54, %v2296_v57  ;;  %v2305_v7 = vadd.f32 %v2304_v39, %v2303_v26 }
 0x274   : > { %v2312_v24 = vadd.f32 %v2311_v15, %v2310_v63  ;;  %v2319_v20 = vadd.f32 %v2318_v33, %v2317_v6  ;;  %v2326_v23 = vadd.f32 %v2325_v42, %v2324_v10  ;;  %v2333_v14 = vadd.f32 %v2332_v47, %v2331_v30 }
 0x275   : > { %v2340_v5 = vadd.f32 %v2339_v49, %v2338_v25  ;;  %v2347_v35 = vadd.f32 %v2346_v28, %v2345_v34  ;;  %v2354_v55 = vadd.f32 %v2353_v13, %v2352_v38  ;;  %v2361_v62 = vadd.f32 %v2360_v37, %v2359_v53  ;;  %v10079_v49 = vld [vmem:[#allocation128_spill] sm:$0xff]  ;;  %v10080_v28 = vld [vmem:[#allocation129_spill] sm:$0xff] }
 0x276   : > { %v2257_v2 = vrot.slane %v2256_v22, 1  ;;  %v2264_v59 = vrot.slane %v2263_v0, 1  ;;  %v2271_v27 = vrot.slane %v2270_v32, 1  ;;  %v2278_v60 = vrot.slane %v2277_v46, 1  ;;  %v10081_v37 = vld [vmem:[#allocation356_spill] sm:$0xff] }
 0x277   : > { %v2285_v45 = vrot.slane %v2284_v4, 1  ;;  %v2292_v36 = vrot.slane %v2291_v44, 1  ;;  %v2299_v48 = vrot.slane %v2298_v29, 1  ;;  %v2306_v8 = vrot.slane %v2305_v7, 1 }
 0x278   : > { %v2313_v1 = vrot.slane %v2312_v24, 1  ;;  %v2320_v21 = vrot.slane %v2319_v20, 1  ;;  %v2327_v31 = vrot.slane %v2326_v23, 1  ;;  %v2334_v50 = vrot.slane %v2333_v14, 1 }
 0x279   : > { %v2341_v56 = vrot.slane %v2340_v5, 1  ;;  %v2348_v6 = vrot.slane %v2347_v35, 1  ;;  %v2355_v10 = vrot.slane %v2354_v55, 1  ;;  %v2362_v30 = vrot.slane %v2361_v62, 1 }
 0x27a   : > { %v6348_v25 = vadd.f32 %v2257_v2, %v2256_v22  ;;  %v6350_v38 = vadd.f32 %v2264_v59, %v2263_v0  ;;  %v6352_v53 = vadd.f32 %v2271_v27, %v2270_v32  ;;  %v6354_v34 = vadd.f32 %v2278_v60, %v2277_v46  ;;  %v10082_v22 = vld [vmem:[#allocation131_spill] sm:$0xff]  ;;  %v10083_v32 = vld [vmem:[#allocation130_spill] sm:$0xff]  ;;  %v10084_v46 = vld [vmem:[#allocation133_spill] sm:$0xff] }
 0x27b   : > { %v6356_v11 = vadd.f32 %v2285_v45, %v2284_v4  ;;  %v6358_v57 = vadd.f32 %v2292_v36, %v2291_v44  ;;  %v6360_v26 = vadd.f32 %v2299_v48, %v2298_v29  ;;  %v6362_v63 = vadd.f32 %v2306_v8, %v2305_v7  ;;  %v10085_v44 = vld [vmem:[#allocation132_spill] sm:$0xff]  ;;  %v10086_v29 = vld [vmem:[#allocation134_spill] sm:$0xff]  ;;  %v10095_v45 = vld [vmem:[#allocation147_spill] sm:$0xff] }
 0x27c   : > { %10063 = vst [vmem:[#allocation273_spill] sm:$0xff] %v6348_v25  ;;  %10064 = vst [vmem:[#allocation270_spill] sm:$0xff] %v6350_v38  ;;  %v6364_v18 = vadd.f32 %v2313_v1, %v2312_v24  ;;  %v6366_v61 = vadd.f32 %v2320_v21, %v2319_v20  ;;  %v6368_v54 = vadd.f32 %v2327_v31, %v2326_v23  ;;  %v10087_v24 = vld [vmem:[#allocation135_spill] sm:$0xff]  ;;  %v10088_v20 = vld [vmem:[#allocation141_spill] sm:$0xff] }
 0x27d   : > { %10065 = vst [vmem:[#allocation274_spill] sm:$0xff] %v6352_v53  ;;  %10066 = vst [vmem:[#allocation271_spill] sm:$0xff] %v6354_v34  ;;  %v6370_v39 = vadd.f32 %v2334_v50, %v2333_v14  ;;  %v6372_v15 = vadd.f32 %v2341_v56, %v2340_v5  ;;  %v6374_v33 = vadd.f32 %v2348_v6, %v2347_v35  ;;  %v10089_v14 = vld [vmem:[#allocation138_spill] sm:$0xff]  ;;  %v10093_v59 = vld [vmem:[#allocation140_spill] sm:$0xff] }
 0x27e   : > { %10067 = vst [vmem:[#allocation275_spill] sm:$0xff] %v6356_v11  ;;  %10068 = vst [vmem:[#allocation272_spill] sm:$0xff] %v6358_v57  ;;  %v6376_v42 = vadd.f32 %v2355_v10, %v2354_v55  ;;  %v6378_v47 = vadd.f32 %v2362_v30, %v2361_v62  ;;  %v2364_v13 = vadd.f32 %v10080_v28, %v10079_v49  ;;  %v10090_v5 = vld [vmem:[#allocation142_spill] sm:$0xff]  ;;  %v10091_v55 = vld [vmem:[#allocation139_spill] sm:$0xff] }
 0x27f   : > { %10069 = vst [vmem:[#allocation276_spill] sm:$0xff] %v6360_v26  ;;  %10070 = vst [vmem:[#allocation277_spill] sm:$0xff] %v6362_v63  ;;  %v2371_v0 = vadd.f32 %v10082_v22, %v10081_v37  ;;  %v2378_v4 = vadd.f32 %v10084_v46, %v10083_v32  ;;  %v2385_v7 = vadd.f32 %v10086_v29, %v10085_v44  ;;  %v10092_v62 = vld [vmem:[#allocation143_spill] sm:$0xff]  ;;  %v10094_v27 = vld [vmem:[#allocation146_spill] sm:$0xff] }
 0x280   : > { %10071 = vst [vmem:[#allocation281_spill] sm:$0xff] %v6364_v18  ;;  %10072 = vst [vmem:[#allocation278_spill] sm:$0xff] %v6366_v61  ;;  %v2392_v23 = vadd.f32 %v10088_v20, %v10087_v24  ;;  %v2399_v35 = vadd.f32 %v10090_v5, %v10089_v14  ;;  %v2406_v2 = vadd.f32 %v10092_v62, %v10091_v55  ;;  %v10096_v36 = vld [vmem:[#allocation155_spill] sm:$0xff]  ;;  %v10097_v8 = vld [vmem:[#allocation148_spill] sm:$0xff]  ;;  %v2365_v55 = vrot.slane %v2364_v13, 4 }
 0x281   : > { %10073 = vst [vmem:[#allocation282_spill] sm:$0xff] %v6368_v54  ;;  %10074 = vst [vmem:[#allocation279_spill] sm:$0xff] %v6370_v39  ;;  %v2413_v60 = vadd.f32 %v10094_v27, %v10093_v59  ;;  %v2420_v48 = vadd.f32 %v10096_v36, %v10095_v45  ;;  %v10098_v1 = vld [vmem:[#allocation158_spill] sm:$0xff]  ;;  %v10099_v31 = vld [vmem:[#allocation153_spill] sm:$0xff]  ;;  %v2372_v62 = vrot.slane %v2371_v0, 4  ;;  %v2379_v59 = vrot.slane %v2378_v4, 4 }
 0x282   : > { %10075 = vst [vmem:[#allocation283_spill] sm:$0xff] %v6372_v15  ;;  %10076 = vst [vmem:[#allocation280_spill] sm:$0xff] %v6374_v33  ;;  %v2427_v21 = vadd.f32 %v10098_v1, %v10097_v8  ;;  %v10100_v50 = vld [vmem:[#allocation159_spill] sm:$0xff]  ;;  %v10101_v6 = vld [vmem:[#allocation154_spill] sm:$0xff]  ;;  %v2386_v27 = vrot.slane %v2385_v7, 4  ;;  %v2393_v45 = vrot.slane %v2392_v23, 4 }
 0x283   : > { %10077 = vst [vmem:[#allocation284_spill] sm:$0xff] %v6376_v42  ;;  %10078 = vst [vmem:[#allocation285_spill] sm:$0xff] %v6378_v47  ;;  %v2434_v56 = vadd.f32 %v10100_v50, %v10099_v31  ;;  %v10102_v10 = vld [vmem:[#allocation160_spill] sm:$0xff]  ;;  %v10103_v49 = vld [vmem:[#allocation163_spill] sm:$0xff]  ;;  %v2400_v36 = vrot.slane %v2399_v35, 4  ;;  %v2407_v8 = vrot.slane %v2406_v2, 4  ;;  %v2380_v47 = vadd.f32 %v2379_v59, %v2378_v4 }
 0x284   : > { %v2441_v30 = vadd.f32 %v10102_v10, %v10101_v6  ;;  %v10104_v28 = vld [vmem:[#allocation165_spill] sm:$0xff]  ;;  %v10105_v22 = vld [vmem:[#allocation164_spill] sm:$0xff]  ;;  %v10108_v29 = vld [vmem:[#allocation170_spill] sm:$0xff]  ;;  %v2414_v1 = vrot.slane %v2413_v60, 4  ;;  %v2421_v31 = vrot.slane %v2420_v48, 4  ;;  %v2428_v50 = vrot.slane %v2427_v21, 4 }
 0x285   : > { %v2448_v37 = vadd.f32 %v10104_v28, %v10103_v49  ;;  %v10106_v32 = vld [vmem:[#allocation169_spill] sm:$0xff]  ;;  %v10107_v44 = vld [vmem:[#allocation168_spill] sm:$0xff]  ;;  %v10109_v20 = vld [vmem:[#allocation171_spill] sm:$0xff]  ;;  %v2435_v6 = vrot.slane %v2434_v56, 4  ;;  %v2401_v42 = vadd.f32 %v2400_v36, %v2399_v35  ;;  %v2408_v33 = vadd.f32 %v2407_v8, %v2406_v2 }
 0x286   : > { %v2455_v46 = vadd.f32 %v10106_v32, %v10105_v22  ;;  %v2462_v24 = vadd.f32 %v10108_v29, %v10107_v44  ;;  %v10110_v14 = vld [vmem:[#allocation172_spill] sm:$0xff]  ;;  %v2442_v10 = vrot.slane %v2441_v30, 4  ;;  %v2366_v44 = vadd.f32 %v2365_v55, %v2364_v13 }
 0x287   : > { %v2469_v5 = vadd.f32 %v10110_v14, %v10109_v20  ;;  %v2449_v49 = vrot.slane %v2448_v37, 4  ;;  %v2373_v29 = vadd.f32 %v2372_v62, %v2371_v0  ;;  %v2387_v20 = vadd.f32 %v2386_v27, %v2385_v7 }
 0x288   : > { %v2456_v28 = vrot.slane %v2455_v46, 4  ;;  %v2463_v22 = vrot.slane %v2462_v24, 4  ;;  %v2394_v14 = vadd.f32 %v2393_v45, %v2392_v23  ;;  %v2415_v15 = vadd.f32 %v2414_v1, %v2413_v60 }
 0x289   : > { %v2470_v32 = vrot.slane %v2469_v5, 4  ;;  %v2422_v39 = vadd.f32 %v2421_v31, %v2420_v48  ;;  %v2429_v54 = vadd.f32 %v2428_v50, %v2427_v21  ;;  %v2436_v61 = vadd.f32 %v2435_v6, %v2434_v56 }
 0x28a   : > { %v2443_v18 = vadd.f32 %v2442_v10, %v2441_v30  ;;  %v2450_v63 = vadd.f32 %v2449_v49, %v2448_v37  ;;  %v2457_v26 = vadd.f32 %v2456_v28, %v2455_v46  ;;  %v2464_v57 = vadd.f32 %v2463_v22, %v2462_v24 }
 0x28b   : > { %v2471_v11 = vadd.f32 %v2470_v32, %v2469_v5  ;;  %v2367_v34 = vrot.slane %v2366_v44, 2  ;;  %v2374_v53 = vrot.slane %v2373_v29, 2  ;;  %v2381_v38 = vrot.slane %v2380_v47, 2 }
 0x28c   : > { %v2388_v25 = vrot.slane %v2387_v20, 2  ;;  %v2395_v13 = vrot.slane %v2394_v14, 2  ;;  %v2402_v0 = vrot.slane %v2401_v42, 2  ;;  %v2409_v4 = vrot.slane %v2408_v33, 2 }
 0x28d   : > { %v2416_v7 = vrot.slane %v2415_v15, 2  ;;  %v2423_v23 = vrot.slane %v2422_v39, 2  ;;  %v2430_v35 = vrot.slane %v2429_v54, 2  ;;  %v2437_v2 = vrot.slane %v2436_v61, 2 }
 0x28e   : > { %v2444_v60 = vrot.slane %v2443_v18, 2  ;;  %v2451_v48 = vrot.slane %v2450_v63, 2  ;;  %v2458_v21 = vrot.slane %v2457_v26, 2  ;;  %v2465_v56 = vrot.slane %v2464_v57, 2 }
 0x28f   : > { %v2472_v30 = vrot.slane %v2471_v11, 2  ;;  %v2368_v37 = vadd.f32 %v2367_v34, %v2366_v44  ;;  %v2375_v46 = vadd.f32 %v2374_v53, %v2373_v29  ;;  %v2382_v24 = vadd.f32 %v2381_v38, %v2380_v47 }
 0x290   : > { %v2389_v5 = vadd.f32 %v2388_v25, %v2387_v20  ;;  %v2396_v55 = vadd.f32 %v2395_v13, %v2394_v14  ;;  %v2403_v62 = vadd.f32 %v2402_v0, %v2401_v42  ;;  %v2410_v59 = vadd.f32 %v2409_v4, %v2408_v33 }
 0x291   : > { %v2417_v27 = vadd.f32 %v2416_v7, %v2415_v15  ;;  %v2424_v45 = vadd.f32 %v2423_v23, %v2422_v39  ;;  %v2431_v36 = vadd.f32 %v2430_v35, %v2429_v54  ;;  %v2438_v8 = vadd.f32 %v2437_v2, %v2436_v61 }
 0x292   : > { %v2445_v1 = vadd.f32 %v2444_v60, %v2443_v18  ;;  %v2452_v31 = vadd.f32 %v2451_v48, %v2450_v63  ;;  %v2459_v50 = vadd.f32 %v2458_v21, %v2457_v26  ;;  %v2466_v6 = vadd.f32 %v2465_v56, %v2464_v57  ;;  %v10127_v48 = vld [vmem:[#allocation17_spill] sm:$0xff]  ;;  %v10128_v56 = vld [vmem:[#allocation18_spill] sm:$0xff] }
 0x293   : > { %v2473_v10 = vadd.f32 %v2472_v30, %v2471_v11  ;;  %v2369_v49 = vrot.slane %v2368_v37, 1  ;;  %v2376_v28 = vrot.slane %v2375_v46, 1  ;;  %v2383_v22 = vrot.slane %v2382_v24, 1 }
 0x294   : > { %v2390_v32 = vrot.slane %v2389_v5, 1  ;;  %v2397_v34 = vrot.slane %v2396_v55, 1  ;;  %v2404_v53 = vrot.slane %v2403_v62, 1  ;;  %v2411_v38 = vrot.slane %v2410_v59, 1 }
 0x295   : > { %v2418_v25 = vrot.slane %v2417_v27, 1  ;;  %v2425_v47 = vrot.slane %v2424_v45, 1  ;;  %v2432_v42 = vrot.slane %v2431_v36, 1  ;;  %v2439_v33 = vrot.slane %v2438_v8, 1 }
 0x296   : > { %v2446_v15 = vrot.slane %v2445_v1, 1  ;;  %v2453_v39 = vrot.slane %v2452_v31, 1  ;;  %v2460_v54 = vrot.slane %v2459_v50, 1  ;;  %v2467_v61 = vrot.slane %v2466_v6, 1 }
 0x297   : > { %v2474_v18 = vrot.slane %v2473_v10, 1  ;;  %v6412_v63 = vadd.f32 %v2369_v49, %v2368_v37  ;;  %v6414_v57 = vadd.f32 %v2376_v28, %v2375_v46  ;;  %v6416_v11 = vadd.f32 %v2383_v22, %v2382_v24  ;;  %v10129_v37 = vld [vmem:[#allocation19_spill] sm:$0xff]  ;;  %v10130_v24 = vld [vmem:[#allocation20_spill] sm:$0xff] }
 0x298   : > { %v6418_v26 = vadd.f32 %v2390_v32, %v2389_v5  ;;  %v6420_v44 = vadd.f32 %v2397_v34, %v2396_v55  ;;  %v6422_v29 = vadd.f32 %v2404_v53, %v2403_v62  ;;  %v6424_v20 = vadd.f32 %v2411_v38, %v2410_v59  ;;  %v10131_v55 = vld [vmem:[#allocation21_spill] sm:$0xff]  ;;  %v10132_v59 = vld [vmem:[#allocation22_spill] sm:$0xff]  ;;  %v10137_v49 = vld [vmem:[#allocation27_spill] sm:$0xff] }
 0x299   : > { %10111 = vst [vmem:[#allocation289_spill] sm:$0xff] %v6412_v63  ;;  %10112 = vst [vmem:[#allocation286_spill] sm:$0xff] %v6414_v57  ;;  %v6426_v14 = vadd.f32 %v2418_v25, %v2417_v27  ;;  %v6428_v13 = vadd.f32 %v2425_v47, %v2424_v45  ;;  %v6430_v0 = vadd.f32 %v2432_v42, %v2431_v36  ;;  %v10133_v45 = vld [vmem:[#allocation23_spill] sm:$0xff]  ;;  %v10138_v22 = vld [vmem:[#allocation28_spill] sm:$0xff] }
 0x29a   : > { %10113 = vst [vmem:[#allocation290_spill] sm:$0xff] %v6416_v11  ;;  %10114 = vst [vmem:[#allocation287_spill] sm:$0xff] %v6418_v26  ;;  %v6432_v4 = vadd.f32 %v2439_v33, %v2438_v8  ;;  %v6434_v7 = vadd.f32 %v2446_v15, %v2445_v1  ;;  %v6436_v23 = vadd.f32 %v2453_v39, %v2452_v31  ;;  %v10134_v8 = vld [vmem:[#allocation24_spill] sm:$0xff]  ;;  %v10135_v31 = vld [vmem:[#allocation25_spill] sm:$0xff] }
 0x29b   : > { %10115 = vst [vmem:[#allocation291_spill] sm:$0xff] %v6420_v44  ;;  %10116 = vst [vmem:[#allocation288_spill] sm:$0xff] %v6422_v29  ;;  %v6438_v35 = vadd.f32 %v2460_v54, %v2459_v50  ;;  %v6440_v2 = vadd.f32 %v2467_v61, %v2466_v6  ;;  %v6442_v60 = vadd.f32 %v2474_v18, %v2473_v10  ;;  %v10136_v6 = vld [vmem:[#allocation26_spill] sm:$0xff]  ;;  %v10139_v34 = vld [vmem:[#allocation29_spill] sm:$0xff] }
 0x29c   : > { %10117 = vst [vmem:[#allocation292_spill] sm:$0xff] %v6424_v20  ;;  %10118 = vst [vmem:[#allocation293_spill] sm:$0xff] %v6426_v14  ;;  %v6446_v21 = vmul.f32 %v10127_v48, %v10127_v48  ;;  %v6450_v30 = vmul.f32 %v10128_v56, %v10128_v56  ;;  %v6454_v46 = vmul.f32 %v10129_v37, %v10129_v37  ;;  %v10140_v38 = vld [vmem:[#allocation30_spill] sm:$0xff]  ;;  %v10141_v47 = vld [vmem:[#allocation31_spill] sm:$0xff] }
 0x29d   : > { %10119 = vst [vmem:[#allocation297_spill] sm:$0xff] %v6428_v13  ;;  %10120 = vst [vmem:[#allocation294_spill] sm:$0xff] %v6430_v0  ;;  %v6458_v5 = vmul.f32 %v10130_v24, %v10130_v24  ;;  %v6462_v62 = vmul.f32 %v10131_v55, %v10131_v55  ;;  %v6466_v27 = vmul.f32 %v10132_v59, %v10132_v59  ;;  %v10142_v33 = vld [vmem:[#allocation32_spill] sm:$0xff]  ;;  %v10143_v39 = vld [vmem:[#allocation33_spill] sm:$0xff] }
 0x29e   : > { %10121 = vst [vmem:[#allocation298_spill] sm:$0xff] %v6432_v4  ;;  %10122 = vst [vmem:[#allocation295_spill] sm:$0xff] %v6434_v7  ;;  %v6470_v36 = vmul.f32 %v10133_v45, %v10133_v45  ;;  %v6474_v1 = vmul.f32 %v10134_v8, %v10134_v8  ;;  %v6478_v50 = vmul.f32 %v10135_v31, %v10135_v31  ;;  %v10144_v61 = vld [vmem:[#allocation34_spill] sm:$0xff]  ;;  %v10145_v48 = vld [vmem:[#allocation35_spill] sm:$0xff] }
 0x29f   : > { %10123 = vst [vmem:[#allocation299_spill] sm:$0xff] %v6436_v23  ;;  %10124 = vst [vmem:[#allocation296_spill] sm:$0xff] %v6438_v35  ;;  %v6482_v10 = vmul.f32 %v10136_v6, %v10136_v6  ;;  %v6486_v28 = vmul.f32 %v10137_v49, %v10137_v49  ;;  %v6490_v32 = vmul.f32 %v10138_v22, %v10138_v22  ;;  %v10146_v37 = vld [vmem:[#allocation36_spill] sm:$0xff]  ;;  %v10147_v55 = vld [vmem:[#allocation37_spill] sm:$0xff] }
 0x2a0   : > { %10125 = vst [vmem:[#allocation300_spill] sm:$0xff] %v6440_v2  ;;  %10126 = vst [vmem:[#allocation301_spill] sm:$0xff] %v6442_v60  ;;  %v6494_v53 = vmul.f32 %v10139_v34, %v10139_v34  ;;  %v6498_v25 = vmul.f32 %v10140_v38, %v10140_v38  ;;  %v6502_v42 = vmul.f32 %v10141_v47, %v10141_v47  ;;  %v10148_v45 = vld [vmem:[#allocation38_spill] sm:$0xff]  ;;  %v10149_v31 = vld [vmem:[#allocation39_spill] sm:$0xff] }
 0x2a1   : > { %v6506_v15 = vmul.f32 %v10142_v33, %v10142_v33  ;;  %v6510_v54 = vmul.f32 %v10143_v39, %v10143_v39  ;;  %v6514_v18 = vmul.f32 %v10144_v61, %v10144_v61  ;;  %v6518_v56 = vmul.f32 %v10145_v48, %v10145_v48  ;;  %v10150_v49 = vld [vmem:[#allocation40_spill] sm:$0xff]  ;;  %v10151_v34 = vld [vmem:[#allocation41_spill] sm:$0xff]  ;;  %v10152_v47 = vld [vmem:[#allocation42_spill] sm:$0xff] }
 0x2a2   : > { %v6522_v24 = vmul.f32 %v10146_v37, %v10146_v37  ;;  %v6526_v59 = vmul.f32 %v10147_v55, %v10147_v55  ;;  %v6530_v8 = vmul.f32 %v10148_v45, %v10148_v45  ;;  %v6534_v6 = vmul.f32 %v10149_v31, %v10149_v31  ;;  %v10153_v39 = vld [vmem:[#allocation43_spill] sm:$0xff]  ;;  %v10154_v48 = vld [vmem:[#allocation44_spill] sm:$0xff]  ;;  %v10155_v55 = vld [vmem:[#allocation45_spill] sm:$0xff] }
 0x2a3   : > { %v6538_v22 = vmul.f32 %v10150_v49, %v10150_v49  ;;  %v6542_v38 = vmul.f32 %v10151_v34, %v10151_v34  ;;  %v6546_v33 = vmul.f32 %v10152_v47, %v10152_v47  ;;  %v6550_v61 = vmul.f32 %v10153_v39, %v10153_v39  ;;  %v10156_v31 = vld [vmem:[#allocation46_spill] sm:$0xff]  ;;  %v10157_v34 = vld [vmem:[#allocation47_spill] sm:$0xff]  ;;  %v10158_v60 = vld [vmem:[#allocation48_spill] sm:$0xff] }
 0x2a4   : > { %v6554_v37 = vmul.f32 %v10154_v48, %v10154_v48  ;;  %v6558_v45 = vmul.f32 %v10155_v55, %v10155_v55  ;;  %v6562_v49 = vmul.f32 %v10156_v31, %v10156_v31  ;;  %v6566_v47 = vmul.f32 %v10157_v34, %v10157_v34  ;;  %v10159_v2 = vld [vmem:[#allocation49_spill] sm:$0xff]  ;;  %v10160_v35 = vld [vmem:[#allocation50_spill] sm:$0xff]  ;;  %v10161_v23 = vld [vmem:[#allocation51_spill] sm:$0xff] }
 0x2a5   : > { %v6570_v39 = vmul.f32 %v10158_v60, %v10158_v60  ;;  %v6574_v48 = vmul.f32 %v10159_v2, %v10159_v2  ;;  %v6578_v55 = vmul.f32 %v10160_v35, %v10160_v35  ;;  %v6582_v31 = vmul.f32 %v10161_v23, %v10161_v23  ;;  %v10162_v7 = vld [vmem:[#allocation52_spill] sm:$0xff]  ;;  %v10163_v4 = vld [vmem:[#allocation53_spill] sm:$0xff]  ;;  %v10164_v0 = vld [vmem:[#allocation54_spill] sm:$0xff] }
 0x2a6   : > { %v6586_v34 = vmul.f32 %v10162_v7, %v10162_v7  ;;  %v6590_v60 = vmul.f32 %v10163_v4, %v10163_v4  ;;  %v6594_v2 = vmul.f32 %v10164_v0, %v10164_v0  ;;  %v10165_v13 = vld [vmem:[#allocation55_spill] sm:$0xff]  ;;  %v10166_v14 = vld [vmem:[#allocation56_spill] sm:$0xff]  ;;  %v10167_v20 = vld [vmem:[#allocation57_spill] sm:$0xff] }
 0x2a7   : > { %v6598_v35 = vmul.f32 %v10165_v13, %v10165_v13  ;;  %v6602_v23 = vmul.f32 %v10166_v14, %v10166_v14  ;;  %v6606_v7 = vmul.f32 %v10167_v20, %v10167_v20  ;;  %v10168_v29 = vld [vmem:[#allocation58_spill] sm:$0xff]  ;;  %v10169_v44 = vld [vmem:[#allocation59_spill] sm:$0xff]  ;;  %v10170_v26 = vld [vmem:[#allocation60_spill] sm:$0xff] }
 0x2a8   : > { %v6610_v4 = vmul.f32 %v10168_v29, %v10168_v29  ;;  %v6614_v0 = vmul.f32 %v10169_v44, %v10169_v44  ;;  %v6618_v13 = vmul.f32 %v10170_v26, %v10170_v26  ;;  %v10171_v11 = vld [vmem:[#allocation61_spill] sm:$0xff]  ;;  %v10172_v57 = vld [vmem:[#allocation62_spill] sm:$0xff]  ;;  %v10173_v63 = vld [vmem:[#allocation63_spill] sm:$0xff]  ;;  %v6634_v44 = vmul.f32 %v10174_v40, %v10174_v40 }
 0x2a9   : > { %v6622_v14 = vmul.f32 %v10171_v11, %v10171_v11  ;;  %v6626_v20 = vmul.f32 %v10172_v57, %v10172_v57  ;;  %v6630_v29 = vmul.f32 %v10173_v63, %v10173_v63  ;;  %v6638_v26 = vmul.f32 %v10175_v12, %v10175_v12 }
 0x2aa   : > { %v6642_v11 = vmul.f32 %v10176_v43, %v10176_v43  ;;  %v6646_v57 = vmul.f32 %v10177_v17, %v10177_v17  ;;  %v6650_v63 = vmul.f32 %v10178_v16, %v10178_v16  ;;  %v6654_v40 = vmul.f32 %v10179_v9, %v10179_v9 }
 0x2ab   : > { %v6658_v12 = vmul.f32 %v10180_v3, %v10180_v3  ;;  %v6662_v43 = vmul.f32 %v10182_v52, %v10182_v52  ;;  %v6666_v17 = vmul.f32 %v10184_v51, %v10184_v51  ;;  %v6670_v16 = vmul.f32 %v10186_v58, %v10186_v58 }
 0x2ac   : > { %v6674_v9 = vmul.f32 %v10188_v19, %v10188_v19  ;;  %v6678_v3 = vmul.f32 %v10190_v41, %v10190_v41 }
 0x2ad   : > { %10181 = vst [vmem:[#allocation305_spill] sm:$0xff] %v6658_v12  ;;  %10183 = vst [vmem:[#allocation302_spill] sm:$0xff] %v6662_v43  ;;  %v10192_v12 = vld [vmem:[#allocation76_spill] sm:$0xff]  ;;  %v10194_v43 = vld [vmem:[#allocation77_spill] sm:$0xff] }
 0x2ae   : > { %10185 = vst [vmem:[#allocation306_spill] sm:$0xff] %v6666_v17  ;;  %10187 = vst [vmem:[#allocation303_spill] sm:$0xff] %v6670_v16  ;;  %v6682_v52 = vmul.f32 %v10192_v12, %v10192_v12  ;;  %v6686_v51 = vmul.f32 %v10194_v43, %v10194_v43  ;;  %v10196_v17 = vld [vmem:[#allocation78_spill] sm:$0xff]  ;;  %v10198_v16 = vld [vmem:[#allocation79_spill] sm:$0xff] }
 0x2af   : > { %10189 = vst [vmem:[#allocation307_spill] sm:$0xff] %v6674_v9  ;;  %10191 = vst [vmem:[#allocation304_spill] sm:$0xff] %v6678_v3  ;;  %v6690_v58 = vmul.f32 %v10196_v17, %v10196_v17  ;;  %v6694_v19 = vmul.f32 %v10198_v16, %v10198_v16  ;;  %v10200_v9 = vld [vmem:[#allocation80_spill] sm:$0xff]  ;;  %v10202_v3 = vld [vmem:[#allocation81_spill] sm:$0xff] }
 0x2b0   : > { %10193 = vst [vmem:[#allocation308_spill] sm:$0xff] %v6682_v52  ;;  %10195 = vst [vmem:[#allocation309_spill] sm:$0xff] %v6686_v51  ;;  %v6698_v41 = vmul.f32 %v10200_v9, %v10200_v9  ;;  %v6702_v12 = vmul.f32 %v10202_v3, %v10202_v3  ;;  %v10204_v52 = vld [vmem:[#allocation82_spill] sm:$0xff]  ;;  %v10206_v51 = vld [vmem:[#allocation83_spill] sm:$0xff] }
 0x2b1   : > { %10197 = vst [vmem:[#allocation313_spill] sm:$0xff] %v6690_v58  ;;  %10199 = vst [vmem:[#allocation310_spill] sm:$0xff] %v6694_v19  ;;  %v6706_v43 = vmul.f32 %v10204_v52, %v10204_v52  ;;  %v6710_v17 = vmul.f32 %v10206_v51, %v10206_v51  ;;  %v10208_v58 = vld [vmem:[#allocation84_spill] sm:$0xff]  ;;  %v10210_v19 = vld [vmem:[#allocation85_spill] sm:$0xff] }
 0x2b2   : > { %10201 = vst [vmem:[#allocation314_spill] sm:$0xff] %v6698_v41  ;;  %10203 = vst [vmem:[#allocation311_spill] sm:$0xff] %v6702_v12  ;;  %v6714_v16 = vmul.f32 %v10208_v58, %v10208_v58  ;;  %v6718_v9 = vmul.f32 %v10210_v19, %v10210_v19  ;;  %v10212_v41 = vld [vmem:[#allocation86_spill] sm:$0xff]  ;;  %v10214_v12 = vld [vmem:[#allocation87_spill] sm:$0xff] }
 0x2b3   : > { %10205 = vst [vmem:[#allocation315_spill] sm:$0xff] %v6706_v43  ;;  %10207 = vst [vmem:[#allocation312_spill] sm:$0xff] %v6710_v17  ;;  %v6722_v3 = vmul.f32 %v10212_v41, %v10212_v41  ;;  %v6726_v52 = vmul.f32 %v10214_v12, %v10214_v12  ;;  %v10216_v43 = vld [vmem:[#allocation88_spill] sm:$0xff]  ;;  %v10218_v17 = vld [vmem:[#allocation89_spill] sm:$0xff] }
 0x2b4   : > { %10209 = vst [vmem:[#allocation316_spill] sm:$0xff] %v6714_v16  ;;  %10211 = vst [vmem:[#allocation317_spill] sm:$0xff] %v6718_v9  ;;  %v6730_v51 = vmul.f32 %v10216_v43, %v10216_v43  ;;  %v6734_v58 = vmul.f32 %v10218_v17, %v10218_v17  ;;  %v10220_v16 = vld [vmem:[#allocation90_spill] sm:$0xff]  ;;  %v10222_v9 = vld [vmem:[#allocation91_spill] sm:$0xff] }
 0x2b5   : > { %10213 = vst [vmem:[#allocation321_spill] sm:$0xff] %v6722_v3  ;;  %10215 = vst [vmem:[#allocation318_spill] sm:$0xff] %v6726_v52  ;;  %v6738_v19 = vmul.f32 %v10220_v16, %v10220_v16  ;;  %v6742_v41 = vmul.f32 %v10222_v9, %v10222_v9  ;;  %v10224_v3 = vld [vmem:[#allocation92_spill] sm:$0xff]  ;;  %v10226_v52 = vld [vmem:[#allocation93_spill] sm:$0xff] }
 0x2b6   : > { %10217 = vst [vmem:[#allocation322_spill] sm:$0xff] %v6730_v51  ;;  %10219 = vst [vmem:[#allocation319_spill] sm:$0xff] %v6734_v58  ;;  %v6746_v12 = vmul.f32 %v10224_v3, %v10224_v3  ;;  %v6750_v43 = vmul.f32 %v10226_v52, %v10226_v52  ;;  %v10228_v51 = vld [vmem:[#allocation94_spill] sm:$0xff]  ;;  %v10230_v58 = vld [vmem:[#allocation95_spill] sm:$0xff] }
 0x2b7   : > { %10221 = vst [vmem:[#allocation323_spill] sm:$0xff] %v6738_v19  ;;  %10223 = vst [vmem:[#allocation320_spill] sm:$0xff] %v6742_v41  ;;  %v6754_v17 = vmul.f32 %v10228_v51, %v10228_v51  ;;  %v6758_v16 = vmul.f32 %v10230_v58, %v10230_v58  ;;  %v10232_v19 = vld [vmem:[#allocation96_spill] sm:$0xff]  ;;  %v10234_v41 = vld [vmem:[#allocation97_spill] sm:$0xff] }
 0x2b8   : > { %10225 = vst [vmem:[#allocation324_spill] sm:$0xff] %v6746_v12  ;;  %10227 = vst [vmem:[#allocation325_spill] sm:$0xff] %v6750_v43  ;;  %v6762_v9 = vmul.f32 %v10232_v19, %v10232_v19  ;;  %v6766_v3 = vmul.f32 %v10234_v41, %v10234_v41  ;;  %v10236_v12 = vld [vmem:[#allocation98_spill] sm:$0xff]  ;;  %v10238_v43 = vld [vmem:[#allocation99_spill] sm:$0xff] }
 0x2b9   : > { %10229 = vst [vmem:[#allocation329_spill] sm:$0xff] %v6754_v17  ;;  %10231 = vst [vmem:[#allocation326_spill] sm:$0xff] %v6758_v16  ;;  %v6770_v52 = vmul.f32 %v10236_v12, %v10236_v12  ;;  %v6774_v51 = vmul.f32 %v10238_v43, %v10238_v43  ;;  %v10240_v17 = vld [vmem:[#allocation100_spill] sm:$0xff]  ;;  %v10242_v16 = vld [vmem:[#allocation101_spill] sm:$0xff] }
 0x2ba   : > { %10233 = vst [vmem:[#allocation330_spill] sm:$0xff] %v6762_v9  ;;  %10235 = vst [vmem:[#allocation327_spill] sm:$0xff] %v6766_v3  ;;  %v6778_v58 = vmul.f32 %v10240_v17, %v10240_v17  ;;  %v6782_v19 = vmul.f32 %v10242_v16, %v10242_v16  ;;  %v10244_v9 = vld [vmem:[#allocation102_spill] sm:$0xff]  ;;  %v10246_v3 = vld [vmem:[#allocation103_spill] sm:$0xff] }
 0x2bb   : > { %10237 = vst [vmem:[#allocation331_spill] sm:$0xff] %v6770_v52  ;;  %10239 = vst [vmem:[#allocation328_spill] sm:$0xff] %v6774_v51  ;;  %v6786_v41 = vmul.f32 %v10244_v9, %v10244_v9  ;;  %v6790_v12 = vmul.f32 %v10246_v3, %v10246_v3  ;;  %v10248_v52 = vld [vmem:[#allocation104_spill] sm:$0xff]  ;;  %v10250_v51 = vld [vmem:[#allocation105_spill] sm:$0xff] }
 0x2bc   : > { %10241 = vst [vmem:[#allocation332_spill] sm:$0xff] %v6778_v58  ;;  %10243 = vst [vmem:[#allocation333_spill] sm:$0xff] %v6782_v19  ;;  %v6794_v43 = vmul.f32 %v10248_v52, %v10248_v52  ;;  %v6798_v17 = vmul.f32 %v10250_v51, %v10250_v51  ;;  %v10252_v58 = vld [vmem:[#allocation109_spill] sm:$0xff]  ;;  %v10254_v19 = vld [vmem:[#allocation110_spill] sm:$0xff] }
 0x2bd   : > { %10245 = vst [vmem:[#allocation337_spill] sm:$0xff] %v6786_v41  ;;  %10247 = vst [vmem:[#allocation334_spill] sm:$0xff] %v6790_v12  ;;  %v6802_v16 = vmul.f32 %v10252_v58, %v10252_v58  ;;  %v6806_v9 = vmul.f32 %v10254_v19, %v10254_v19  ;;  %v10256_v41 = vld [vmem:[#allocation114_spill] sm:$0xff]  ;;  %v10258_v12 = vld [vmem:[#allocation115_spill] sm:$0xff] }
 0x2be   : > { %10249 = vst [vmem:[#allocation338_spill] sm:$0xff] %v6794_v43  ;;  %10251 = vst [vmem:[#allocation335_spill] sm:$0xff] %v6798_v17  ;;  %v6810_v3 = vmul.f32 %v10256_v41, %v10256_v41  ;;  %v6814_v52 = vmul.f32 %v10258_v12, %v10258_v12  ;;  %v10260_v43 = vld [vmem:[#allocation119_spill] sm:$0xff]  ;;  %v10262_v17 = vld [vmem:[#allocation120_spill] sm:$0xff] }
 0x2bf   : > { %10253 = vst [vmem:[#allocation339_spill] sm:$0xff] %v6802_v16  ;;  %10255 = vst [vmem:[#allocation336_spill] sm:$0xff] %v6806_v9  ;;  %v6818_v51 = vmul.f32 %v10260_v43, %v10260_v43  ;;  %v6822_v58 = vmul.f32 %v10262_v17, %v10262_v17  ;;  %v10264_v16 = vld [vmem:[#allocation124_spill] sm:$0xff]  ;;  %v10266_v9 = vld [vmem:[#allocation127_spill] sm:$0xff] }
 0x2c0   : > { %10257 = vst [vmem:[#allocation340_spill] sm:$0xff] %v6810_v3  ;;  %10259 = vst [vmem:[#allocation341_spill] sm:$0xff] %v6814_v52  ;;  %v6826_v19 = vmul.f32 %v10264_v16, %v10264_v16  ;;  %v6830_v41 = vmul.f32 %v10266_v9, %v10266_v9  ;;  %v10268_v3 = vld [vmem:[#allocation136_spill] sm:$0xff]  ;;  %v10270_v52 = vld [vmem:[#allocation137_spill] sm:$0xff] }
 0x2c1   : > { %10261 = vst [vmem:[#allocation342_spill] sm:$0xff] %v6818_v51  ;;  %10263 = vst [vmem:[#allocation344_spill] sm:$0xff] %v6822_v58  ;;  %v6834_v12 = vmul.f32 %v10268_v3, %v10268_v3  ;;  %v6838_v43 = vmul.f32 %v10270_v52, %v10270_v52  ;;  %v10272_v51 = vld [vmem:[#allocation144_spill] sm:$0xff]  ;;  %v10274_v58 = vld [vmem:[#allocation145_spill] sm:$0xff] }
 0x2c2   : > { %10265 = vst [vmem:[#allocation343_spill] sm:$0xff] %v6826_v19  ;;  %10267 = vst [vmem:[#allocation345_spill] sm:$0xff] %v6830_v41  ;;  %v6842_v17 = vmul.f32 %v10272_v51, %v10272_v51  ;;  %v6846_v16 = vmul.f32 %v10274_v58, %v10274_v58  ;;  %v10276_v19 = vld [vmem:[#allocation149_spill] sm:$0xff]  ;;  %v10278_v41 = vld [vmem:[#allocation150_spill] sm:$0xff] }
 0x2c3   : > { %10269 = vst [vmem:[#allocation346_spill] sm:$0xff] %v6834_v12  ;;  %10271 = vst [vmem:[#allocation350_spill] sm:$0xff] %v6838_v43  ;;  %v6850_v9 = vmul.f32 %v10276_v19, %v10276_v19  ;;  %v6854_v3 = vmul.f32 %v10278_v41, %v10278_v41  ;;  %v10280_v12 = vld [vmem:[#allocation151_spill] sm:$0xff]  ;;  %v10282_v43 = vld [vmem:[#allocation152_spill] sm:$0xff] }
 0x2c4   : > { %10273 = vst [vmem:[#allocation347_spill] sm:$0xff] %v6842_v17  ;;  %10275 = vst [vmem:[#allocation351_spill] sm:$0xff] %v6846_v16  ;;  %v6858_v52 = vmul.f32 %v10280_v12, %v10280_v12  ;;  %v6862_v51 = vmul.f32 %v10282_v43, %v10282_v43  ;;  %v10284_v17 = vld [vmem:[#allocation156_spill] sm:$0xff]  ;;  %v10286_v16 = vld [vmem:[#allocation157_spill] sm:$0xff] }
 0x2c5   : > { %10277 = vst [vmem:[#allocation348_spill] sm:$0xff] %v6850_v9  ;;  %10279 = vst [vmem:[#allocation352_spill] sm:$0xff] %v6854_v3  ;;  %v6866_v58 = vmul.f32 %v10284_v17, %v10284_v17  ;;  %v6870_v19 = vmul.f32 %v10286_v16, %v10286_v16  ;;  %v10288_v9 = vld [vmem:[#allocation161_spill] sm:$0xff]  ;;  %v10290_v3 = vld [vmem:[#allocation162_spill] sm:$0xff] }
 0x2c6   : > { %10281 = vst [vmem:[#allocation349_spill] sm:$0xff] %v6858_v52  ;;  %10283 = vst [vmem:[#allocation353_spill] sm:$0xff] %v6862_v51  ;;  %v6874_v41 = vmul.f32 %v10288_v9, %v10288_v9  ;;  %v6878_v12 = vmul.f32 %v10290_v3, %v10290_v3  ;;  %v10292_v52 = vld [vmem:[#allocation166_spill] sm:$0xff]  ;;  %v10294_v51 = vld [vmem:[#allocation167_spill] sm:$0xff] }
 0x2c7   : > { %10285 = vst [vmem:[#allocation354_spill] sm:$0xff] %v6866_v58  ;;  %10287 = vst [vmem:[#allocation108_spill] sm:$0xff] %v6870_v19  ;;  %v6882_v43 = vmul.f32 %v10292_v52, %v10292_v52  ;;  %v6886_v17 = vmul.f32 %v10294_v51, %v10294_v51  ;;  %v10296_v58 = vld [vmem:[#allocation173_spill] sm:$0xff]  ;;  %v10298_v19 = vld [vmem:[#allocation174_spill] sm:$0xff] }
 0x2c8   : > { %10289 = vst [vmem:[#allocation355_spill] sm:$0xff] %v6874_v41  ;;  %10291 = vst [vmem:[#allocation111_spill] sm:$0xff] %v6878_v12  ;;  %v6890_v16 = vmul.f32 %v10296_v58, %v10296_v58  ;;  %v6894_v9 = vmul.f32 %v10298_v19, %v10298_v19  ;;  %v10300_v41 = vld [vmem:[#allocation175_spill] sm:$0xff]  ;;  %v10302_v12 = vld [vmem:[#allocation176_spill] sm:$0xff] }
 0x2c9   : > { %10293 = vst [vmem:[#allocation106_spill] sm:$0xff] %v6882_v43  ;;  %10295 = vst [vmem:[#allocation112_spill] sm:$0xff] %v6886_v17  ;;  %v6898_v3 = vmul.f32 %v10300_v41, %v10300_v41  ;;  %v6902_v52 = vmul.f32 %v10302_v12, %v10302_v12  ;;  %v10304_v43 = vld [vmem:[#allocation177_spill] sm:$0xff]  ;;  %v10306_v17 = vld [vmem:[#allocation178_spill] sm:$0xff] }
 0x2ca   : > { %10297 = vst [vmem:[#allocation107_spill] sm:$0xff] %v6890_v16  ;;  %10299 = vst [vmem:[#allocation113_spill] sm:$0xff] %v6894_v9  ;;  %v6906_v51 = vmul.f32 %v10304_v43, %v10304_v43  ;;  %v6910_v58 = vmul.f32 %v10306_v17, %v10306_v17  ;;  %v10308_v16 = vld [vmem:[#allocation179_spill] sm:$0xff]  ;;  %v10310_v9 = vld [vmem:[#allocation180_spill] sm:$0xff] }
 0x2cb   : > { %10301 = vst [vmem:[#allocation116_spill] sm:$0xff] %v6898_v3  ;;  %10303 = vst [vmem:[#allocation118_spill] sm:$0xff] %v6902_v52  ;;  %v6914_v19 = vmul.f32 %v10308_v16, %v10308_v16  ;;  %v6918_v41 = vmul.f32 %v10310_v9, %v10310_v9  ;;  %v10312_v3 = vld [vmem:[#allocation181_spill] sm:$0xff]  ;;  %v10314_v52 = vld [vmem:[#allocation182_spill] sm:$0xff] }
 0x2cc   : > { %10305 = vst [vmem:[#allocation117_spill] sm:$0xff] %v6906_v51  ;;  %10307 = vst [vmem:[#allocation122_spill] sm:$0xff] %v6910_v58  ;;  %v6922_v12 = vmul.f32 %v10312_v3, %v10312_v3  ;;  %v6926_v43 = vmul.f32 %v10314_v52, %v10314_v52  ;;  %v10316_v51 = vld [vmem:[#allocation183_spill] sm:$0xff]  ;;  %v10318_v58 = vld [vmem:[#allocation184_spill] sm:$0xff] }
 0x2cd   : > { %10309 = vst [vmem:[#allocation121_spill] sm:$0xff] %v6914_v19  ;;  %10311 = vst [vmem:[#allocation123_spill] sm:$0xff] %v6918_v41  ;;  %v6930_v17 = vmul.f32 %v10316_v51, %v10316_v51  ;;  %v6934_v16 = vmul.f32 %v10318_v58, %v10318_v58  ;;  %v10320_v19 = vld [vmem:[#allocation185_spill] sm:$0xff]  ;;  %v10321_v41 = vld [vmem:[#allocation186_spill] sm:$0xff] }
 0x2ce   : > { %10313 = vst [vmem:[#allocation125_spill] sm:$0xff] %v6922_v12  ;;  %10315 = vst [vmem:[#allocation126_spill] sm:$0xff] %v6926_v43  ;;  %v6938_v9 = vmul.f32 %v10320_v19, %v10320_v19  ;;  %v6942_v3 = vmul.f32 %v10321_v41, %v10321_v41  ;;  %v10322_v12 = vld [vmem:[#allocation187_spill] sm:$0xff]  ;;  %v10324_v43 = vld [vmem:[#allocation188_spill] sm:$0xff]  ;;  %v6960_v19 = vmul.f32 0.0625, %v6450_v30  ;;  %v6963_v41 = vmul.f32 0.0625, %v6454_v46 }
 0x2cf   : > { %10317 = vst [vmem:[#allocation128_spill] sm:$0xff] %v6930_v17  ;;  %10319 = vst [vmem:[#allocation129_spill] sm:$0xff] %v6934_v16  ;;  %v6946_v52 = vmul.f32 %v10322_v12, %v10322_v12  ;;  %v6950_v51 = vmul.f32 %v10324_v43, %v10324_v43  ;;  %v10325_v17 = vld [vmem:[#allocation189_spill] sm:$0xff]  ;;  %v6957_v16 = vmul.f32 0.0625, %v6446_v21  ;;  %v6966_v12 = vmul.f32 0.0625, %v6458_v5 }
 0x2d0   : > { %v6954_v58 = vmul.f32 %v10325_v17, %v10325_v17  ;;  %v6972_v43 = vmul.f32 0.0625, %v6466_v27  ;;  %v6975_v17 = vmul.f32 0.0625, %v6470_v36  ;;  %v6978_v21 = vmul.f32 0.0625, %v6474_v1 }
 0x2d1   : > { %10323 = vst [vmem:[#allocation356_spill] sm:$0xff] %v6946_v52  ;;  %v6969_v52 = vmul.f32 0.0625, %v6462_v62  ;;  %v6981_v30 = vmul.f32 0.0625, %v6478_v50  ;;  %v6984_v46 = vmul.f32 0.0625, %v6482_v10  ;;  %v6987_v5 = vmul.f32 0.0625, %v6486_v28 }
 0x2d2   : > { %10327 = vst [vmem:[#allocation130_spill] sm:$0xff] %v6972_v43  ;;  %10328 = vst [vmem:[#allocation133_spill] sm:$0xff] %v6975_v17  ;;  %v6990_v62 = vmul.f32 0.0625, %v6490_v32  ;;  %v6993_v27 = vmul.f32 0.0625, %v6494_v53  ;;  %v6996_v36 = vmul.f32 0.0625, %v6498_v25  ;;  %v6999_v1 = vmul.f32 0.0625, %v6502_v42 }
 0x2d3   : > { %10326 = vst [vmem:[#allocation131_spill] sm:$0xff] %v6969_v52  ;;  %10329 = vst [vmem:[#allocation132_spill] sm:$0xff] %v6978_v21  ;;  %v7002_v50 = vmul.f32 0.0625, %v6506_v15  ;;  %v7005_v10 = vmul.f32 0.0625, %v6510_v54  ;;  %v7008_v28 = vmul.f32 0.0625, %v6514_v18  ;;  %v7011_v32 = vmul.f32 0.0625, %v6518_v56 }
 0x2d4   : > { %10330 = vst [vmem:[#allocation134_spill] sm:$0xff] %v6981_v30  ;;  %10331 = vst [vmem:[#allocation135_spill] sm:$0xff] %v6984_v46  ;;  %v7014_v53 = vmul.f32 0.0625, %v6522_v24  ;;  %v7017_v25 = vmul.f32 0.0625, %v6526_v59  ;;  %v7020_v42 = vmul.f32 0.0625, %v6530_v8  ;;  %v7023_v15 = vmul.f32 0.0625, %v6534_v6 }
 0x2d5   : > { %10332 = vst [vmem:[#allocation141_spill] sm:$0xff] %v6987_v5  ;;  %10333 = vst [vmem:[#allocation138_spill] sm:$0xff] %v6990_v62  ;;  %v7026_v54 = vmul.f32 0.0625, %v6538_v22  ;;  %v7029_v18 = vmul.f32 0.0625, %v6542_v38  ;;  %v7032_v56 = vmul.f32 0.0625, %v6546_v33  ;;  %v7035_v24 = vmul.f32 0.0625, %v6550_v61 }
 0x2d6   : > { %10334 = vst [vmem:[#allocation142_spill] sm:$0xff] %v6993_v27  ;;  %10335 = vst [vmem:[#allocation139_spill] sm:$0xff] %v6996_v36  ;;  %v7038_v59 = vmul.f32 0.0625, %v6554_v37  ;;  %v7041_v8 = vmul.f32 0.0625, %v6558_v45  ;;  %v7044_v6 = vmul.f32 0.0625, %v6562_v49  ;;  %v7047_v22 = vmul.f32 0.0625, %v6566_v47 }
 0x2d7   : > { %10336 = vst [vmem:[#allocation143_spill] sm:$0xff] %v6999_v1  ;;  %10337 = vst [vmem:[#allocation140_spill] sm:$0xff] %v7002_v50  ;;  %v7050_v38 = vmul.f32 0.0625, %v6570_v39  ;;  %v7053_v33 = vmul.f32 0.0625, %v6574_v48  ;;  %v7056_v61 = vmul.f32 0.0625, %v6578_v55  ;;  %v7059_v37 = vmul.f32 0.0625, %v6582_v31 }
 0x2d8   : > { %10338 = vst [vmem:[#allocation146_spill] sm:$0xff] %v7005_v10  ;;  %10339 = vst [vmem:[#allocation147_spill] sm:$0xff] %v7008_v28  ;;  %v7062_v45 = vmul.f32 0.0625, %v6586_v34  ;;  %v7065_v49 = vmul.f32 0.0625, %v6590_v60  ;;  %v7068_v47 = vmul.f32 0.0625, %v6594_v2  ;;  %v7071_v39 = vmul.f32 0.0625, %v6598_v35 }
 0x2d9   : > { %10340 = vst [vmem:[#allocation155_spill] sm:$0xff] %v7011_v32  ;;  %10341 = vst [vmem:[#allocation148_spill] sm:$0xff] %v7014_v53  ;;  %v7074_v48 = vmul.f32 0.0625, %v6602_v23  ;;  %v7077_v55 = vmul.f32 0.0625, %v6606_v7  ;;  %v7080_v31 = vmul.f32 0.0625, %v6610_v4  ;;  %v7083_v34 = vmul.f32 0.0625, %v6614_v0 }
 0x2da   : > { %10342 = vst [vmem:[#allocation158_spill] sm:$0xff] %v7017_v25  ;;  %10343 = vst [vmem:[#allocation153_spill] sm:$0xff] %v7020_v42  ;;  %v7086_v60 = vmul.f32 0.0625, %v6618_v13  ;;  %v7089_v2 = vmul.f32 0.0625, %v6622_v14  ;;  %v7092_v35 = vmul.f32 0.0625, %v6626_v20  ;;  %v7095_v23 = vmul.f32 0.0625, %v6630_v29 }
 0x2db   : > { %10344 = vst [vmem:[#allocation159_spill] sm:$0xff] %v7023_v15  ;;  %10345 = vst [vmem:[#allocation154_spill] sm:$0xff] %v7026_v54  ;;  %v7098_v7 = vmul.f32 0.0625, %v6634_v44  ;;  %v7101_v4 = vmul.f32 0.0625, %v6638_v26  ;;  %v7104_v0 = vmul.f32 0.0625, %v6642_v11  ;;  %v7107_v13 = vmul.f32 0.0625, %v6646_v57 }
 0x2dc   : > { %10346 = vst [vmem:[#allocation160_spill] sm:$0xff] %v7029_v18  ;;  %10347 = vst [vmem:[#allocation163_spill] sm:$0xff] %v7032_v56  ;;  %v7110_v14 = vmul.f32 0.0625, %v6650_v63  ;;  %v7113_v20 = vmul.f32 0.0625, %v6654_v40  ;;  %v10375_v29 = vld [vmem:[#allocation305_spill] sm:$0xff]  ;;  %v10377_v44 = vld [vmem:[#allocation302_spill] sm:$0xff] }
 0x2dd   : > { %10348 = vst [vmem:[#allocation165_spill] sm:$0xff] %v7035_v24  ;;  %10349 = vst [vmem:[#allocation164_spill] sm:$0xff] %v7038_v59  ;;  %v10379_v26 = vld [vmem:[#allocation306_spill] sm:$0xff]  ;;  %v10381_v11 = vld [vmem:[#allocation303_spill] sm:$0xff] }
 0x2de   : > { %10350 = vst [vmem:[#allocation169_spill] sm:$0xff] %v7041_v8  ;;  %10351 = vst [vmem:[#allocation168_spill] sm:$0xff] %v7044_v6  ;;  %v10383_v57 = vld [vmem:[#allocation307_spill] sm:$0xff]  ;;  %v10385_v63 = vld [vmem:[#allocation304_spill] sm:$0xff] }
 0x2df   : > { %10352 = vst [vmem:[#allocation170_spill] sm:$0xff] %v7047_v22  ;;  %10353 = vst [vmem:[#allocation171_spill] sm:$0xff] %v7050_v38  ;;  %v10387_v40 = vld [vmem:[#allocation308_spill] sm:$0xff]  ;;  %v10539_v52 = vld [vmem:[#allocation194_spill] sm:$0xff] }
 0x2e0   : > { %10354 = vst [vmem:[#allocation172_spill] sm:$0xff] %v7053_v33  ;;  %10355 = vst [vmem:[#allocation17_spill] sm:$0xff] %v7056_v61  ;;  %v10540_v43 = vld [vmem:[#allocation191_spill] sm:$0xff]  ;;  %v10542_v21 = vld [vmem:[#allocation192_spill] sm:$0xff] }
 0x2e1   : > { %10356 = vst [vmem:[#allocation18_spill] sm:$0xff] %v7059_v37  ;;  %10357 = vst [vmem:[#allocation19_spill] sm:$0xff] %v7062_v45  ;;  %v10541_v17 = vld [vmem:[#allocation195_spill] sm:$0xff]  ;;  %v10543_v30 = vld [vmem:[#allocation196_spill] sm:$0xff] }
 0x2e2   : > { %10358 = vst [vmem:[#allocation20_spill] sm:$0xff] %v7065_v49  ;;  %10359 = vst [vmem:[#allocation21_spill] sm:$0xff] %v7068_v47  ;;  %v10544_v46 = vld [vmem:[#allocation197_spill] sm:$0xff]  ;;  %v10546_v62 = vld [vmem:[#allocation198_spill] sm:$0xff] }
 0x2e3   : > { %10360 = vst [vmem:[#allocation22_spill] sm:$0xff] %v7071_v39  ;;  %10361 = vst [vmem:[#allocation23_spill] sm:$0xff] %v7074_v48  ;;  %v10545_v5 = vld [vmem:[#allocation201_spill] sm:$0xff]  ;;  %v10547_v27 = vld [vmem:[#allocation202_spill] sm:$0xff] }
 0x2e4   : > { %10362 = vst [vmem:[#allocation24_spill] sm:$0xff] %v7077_v55  ;;  %10363 = vst [vmem:[#allocation25_spill] sm:$0xff] %v7080_v31  ;;  %v10548_v36 = vld [vmem:[#allocation199_spill] sm:$0xff]  ;;  %v10550_v50 = vld [vmem:[#allocation200_spill] sm:$0xff] }
 0x2e5   : > { %10364 = vst [vmem:[#allocation26_spill] sm:$0xff] %v7083_v34  ;;  %10365 = vst [vmem:[#allocation27_spill] sm:$0xff] %v7086_v60  ;;  %v10549_v1 = vld [vmem:[#allocation203_spill] sm:$0xff]  ;;  %v10551_v10 = vld [vmem:[#allocation204_spill] sm:$0xff] }
 0x2e6   : > { %10366 = vst [vmem:[#allocation28_spill] sm:$0xff] %v7089_v2  ;;  %10367 = vst [vmem:[#allocation29_spill] sm:$0xff] %v7092_v35  ;;  %v10552_v28 = vld [vmem:[#allocation205_spill] sm:$0xff]  ;;  %v10554_v53 = vld [vmem:[#allocation206_spill] sm:$0xff] }
 0x2e7   : > { %10368 = vst [vmem:[#allocation30_spill] sm:$0xff] %v7095_v23  ;;  %10369 = vst [vmem:[#allocation31_spill] sm:$0xff] %v7098_v7  ;;  %v7116_v23 = vmul.f32 0.0625, %v10375_v29  ;;  %v7119_v7 = vmul.f32 0.0625, %v10377_v44  ;;  %v10389_v29 = vld [vmem:[#allocation309_spill] sm:$0xff]  ;;  %v10555_v25 = vld [vmem:[#allocation210_spill] sm:$0xff] }
 0x2e8   : > { %10370 = vst [vmem:[#allocation32_spill] sm:$0xff] %v7101_v4  ;;  %10371 = vst [vmem:[#allocation33_spill] sm:$0xff] %v7104_v0  ;;  %v7122_v4 = vmul.f32 0.0625, %v10379_v26  ;;  %v7125_v0 = vmul.f32 0.0625, %v10381_v11  ;;  %v10391_v44 = vld [vmem:[#allocation313_spill] sm:$0xff]  ;;  %v10393_v26 = vld [vmem:[#allocation310_spill] sm:$0xff] }
 0x2e9   : > { %10372 = vst [vmem:[#allocation34_spill] sm:$0xff] %v7107_v13  ;;  %10373 = vst [vmem:[#allocation35_spill] sm:$0xff] %v7110_v14  ;;  %v7128_v13 = vmul.f32 0.0625, %v10383_v57  ;;  %v7131_v14 = vmul.f32 0.0625, %v10385_v63  ;;  %v10395_v11 = vld [vmem:[#allocation314_spill] sm:$0xff]  ;;  %v10397_v57 = vld [vmem:[#allocation311_spill] sm:$0xff] }
 0x2ea   : > { %10374 = vst [vmem:[#allocation36_spill] sm:$0xff] %v7113_v20  ;;  %10376 = vst [vmem:[#allocation37_spill] sm:$0xff] %v7116_v23  ;;  %v7134_v20 = vmul.f32 0.0625, %v10387_v40  ;;  %v7137_v23 = vmul.f32 0.0625, %v10389_v29  ;;  %v10399_v63 = vld [vmem:[#allocation315_spill] sm:$0xff]  ;;  %v10401_v40 = vld [vmem:[#allocation312_spill] sm:$0xff] }
 0x2eb   : > { %10378 = vst [vmem:[#allocation38_spill] sm:$0xff] %v7119_v7  ;;  %10380 = vst [vmem:[#allocation39_spill] sm:$0xff] %v7122_v4  ;;  %v7140_v7 = vmul.f32 0.0625, %v10391_v44  ;;  %v7143_v4 = vmul.f32 0.0625, %v10393_v26  ;;  %v10403_v29 = vld [vmem:[#allocation316_spill] sm:$0xff]  ;;  %v10405_v44 = vld [vmem:[#allocation317_spill] sm:$0xff] }
 0x2ec   : > { %10382 = vst [vmem:[#allocation40_spill] sm:$0xff] %v7125_v0  ;;  %10384 = vst [vmem:[#allocation41_spill] sm:$0xff] %v7128_v13  ;;  %v7146_v0 = vmul.f32 0.0625, %v10395_v11  ;;  %v7149_v13 = vmul.f32 0.0625, %v10397_v57  ;;  %v10407_v26 = vld [vmem:[#allocation321_spill] sm:$0xff]  ;;  %v10409_v11 = vld [vmem:[#allocation318_spill] sm:$0xff] }
 0x2ed   : > { %10386 = vst [vmem:[#allocation42_spill] sm:$0xff] %v7131_v14  ;;  %10388 = vst [vmem:[#allocation43_spill] sm:$0xff] %v7134_v20  ;;  %v7152_v14 = vmul.f32 0.0625, %v10399_v63  ;;  %v7155_v20 = vmul.f32 0.0625, %v10401_v40  ;;  %v10411_v57 = vld [vmem:[#allocation322_spill] sm:$0xff]  ;;  %v10413_v63 = vld [vmem:[#allocation319_spill] sm:$0xff] }
 0x2ee   : > { %10390 = vst [vmem:[#allocation44_spill] sm:$0xff] %v7137_v23  ;;  %10392 = vst [vmem:[#allocation45_spill] sm:$0xff] %v7140_v7  ;;  %v7158_v23 = vmul.f32 0.0625, %v10403_v29  ;;  %v7161_v7 = vmul.f32 0.0625, %v10405_v44  ;;  %v10415_v40 = vld [vmem:[#allocation323_spill] sm:$0xff]  ;;  %v10417_v29 = vld [vmem:[#allocation320_spill] sm:$0xff] }
 0x2ef   : > { %10394 = vst [vmem:[#allocation46_spill] sm:$0xff] %v7143_v4  ;;  %10396 = vst [vmem:[#allocation47_spill] sm:$0xff] %v7146_v0  ;;  %v7164_v4 = vmul.f32 0.0625, %v10407_v26  ;;  %v7167_v0 = vmul.f32 0.0625, %v10409_v11  ;;  %v10419_v44 = vld [vmem:[#allocation324_spill] sm:$0xff]  ;;  %v10421_v26 = vld [vmem:[#allocation325_spill] sm:$0xff] }
 0x2f0   : > { %10398 = vst [vmem:[#allocation48_spill] sm:$0xff] %v7149_v13  ;;  %10400 = vst [vmem:[#allocation49_spill] sm:$0xff] %v7152_v14  ;;  %v7170_v13 = vmul.f32 0.0625, %v10411_v57  ;;  %v7173_v14 = vmul.f32 0.0625, %v10413_v63  ;;  %v10423_v11 = vld [vmem:[#allocation329_spill] sm:$0xff]  ;;  %v10425_v57 = vld [vmem:[#allocation326_spill] sm:$0xff] }
 0x2f1   : > { %10402 = vst [vmem:[#allocation50_spill] sm:$0xff] %v7155_v20  ;;  %10404 = vst [vmem:[#allocation51_spill] sm:$0xff] %v7158_v23  ;;  %v7176_v20 = vmul.f32 0.0625, %v10415_v40  ;;  %v7179_v23 = vmul.f32 0.0625, %v10417_v29  ;;  %v10427_v63 = vld [vmem:[#allocation330_spill] sm:$0xff]  ;;  %v10429_v40 = vld [vmem:[#allocation327_spill] sm:$0xff] }
 0x2f2   : > { %10406 = vst [vmem:[#allocation52_spill] sm:$0xff] %v7161_v7  ;;  %10408 = vst [vmem:[#allocation53_spill] sm:$0xff] %v7164_v4  ;;  %v7182_v7 = vmul.f32 0.0625, %v10419_v44  ;;  %v7185_v4 = vmul.f32 0.0625, %v10421_v26  ;;  %v10431_v29 = vld [vmem:[#allocation331_spill] sm:$0xff]  ;;  %v10433_v44 = vld [vmem:[#allocation328_spill] sm:$0xff] }
 0x2f3   : > { %10410 = vst [vmem:[#allocation54_spill] sm:$0xff] %v7167_v0  ;;  %10412 = vst [vmem:[#allocation55_spill] sm:$0xff] %v7170_v13  ;;  %v7188_v0 = vmul.f32 0.0625, %v10423_v11  ;;  %v7191_v13 = vmul.f32 0.0625, %v10425_v57  ;;  %v10435_v26 = vld [vmem:[#allocation332_spill] sm:$0xff]  ;;  %v10437_v11 = vld [vmem:[#allocation333_spill] sm:$0xff] }
 0x2f4   : > { %10414 = vst [vmem:[#allocation56_spill] sm:$0xff] %v7173_v14  ;;  %10416 = vst [vmem:[#allocation57_spill] sm:$0xff] %v7176_v20  ;;  %v7194_v14 = vmul.f32 0.0625, %v10427_v63  ;;  %v7197_v20 = vmul.f32 0.0625, %v10429_v40  ;;  %v10439_v57 = vld [vmem:[#allocation337_spill] sm:$0xff]  ;;  %v10441_v63 = vld [vmem:[#allocation334_spill] sm:$0xff] }
 0x2f5   : > { %10418 = vst [vmem:[#allocation58_spill] sm:$0xff] %v7179_v23  ;;  %10420 = vst [vmem:[#allocation59_spill] sm:$0xff] %v7182_v7  ;;  %v7200_v23 = vmul.f32 0.0625, %v10431_v29  ;;  %v7203_v7 = vmul.f32 0.0625, %v10433_v44  ;;  %v10443_v40 = vld [vmem:[#allocation338_spill] sm:$0xff]  ;;  %v10445_v29 = vld [vmem:[#allocation335_spill] sm:$0xff] }
 0x2f6   : > { %10422 = vst [vmem:[#allocation60_spill] sm:$0xff] %v7185_v4  ;;  %10424 = vst [vmem:[#allocation61_spill] sm:$0xff] %v7188_v0  ;;  %v7206_v4 = vmul.f32 0.0625, %v10435_v26  ;;  %v7209_v0 = vmul.f32 0.0625, %v10437_v11  ;;  %v10447_v44 = vld [vmem:[#allocation339_spill] sm:$0xff]  ;;  %v10449_v26 = vld [vmem:[#allocation336_spill] sm:$0xff] }
 0x2f7   : > { %10426 = vst [vmem:[#allocation62_spill] sm:$0xff] %v7191_v13  ;;  %10428 = vst [vmem:[#allocation63_spill] sm:$0xff] %v7194_v14  ;;  %v7212_v13 = vmul.f32 0.0625, %v10439_v57  ;;  %v7215_v14 = vmul.f32 0.0625, %v10441_v63  ;;  %v10451_v11 = vld [vmem:[#allocation340_spill] sm:$0xff]  ;;  %v10453_v57 = vld [vmem:[#allocation341_spill] sm:$0xff] }
 0x2f8   : > { %10430 = vst [vmem:[#allocation64_spill] sm:$0xff] %v7197_v20  ;;  %10432 = vst [vmem:[#allocation65_spill] sm:$0xff] %v7200_v23  ;;  %v7218_v20 = vmul.f32 0.0625, %v10443_v40  ;;  %v7221_v23 = vmul.f32 0.0625, %v10445_v29  ;;  %v10455_v63 = vld [vmem:[#allocation342_spill] sm:$0xff]  ;;  %v10457_v40 = vld [vmem:[#allocation344_spill] sm:$0xff] }
 0x2f9   : > { %10434 = vst [vmem:[#allocation66_spill] sm:$0xff] %v7203_v7  ;;  %10436 = vst [vmem:[#allocation67_spill] sm:$0xff] %v7206_v4  ;;  %v7224_v7 = vmul.f32 0.0625, %v10447_v44  ;;  %v7227_v4 = vmul.f32 0.0625, %v10449_v26  ;;  %v10459_v29 = vld [vmem:[#allocation343_spill] sm:$0xff]  ;;  %v10461_v44 = vld [vmem:[#allocation345_spill] sm:$0xff] }
 0x2fa   : > { %10438 = vst [vmem:[#allocation68_spill] sm:$0xff] %v7209_v0  ;;  %10440 = vst [vmem:[#allocation69_spill] sm:$0xff] %v7212_v13  ;;  %v7230_v0 = vmul.f32 0.0625, %v10451_v11  ;;  %v7233_v13 = vmul.f32 0.0625, %v10453_v57  ;;  %v10463_v26 = vld [vmem:[#allocation346_spill] sm:$0xff]  ;;  %v10467_v57 = vld [vmem:[#allocation347_spill] sm:$0xff] }
 0x2fb   : > { %10442 = vst [vmem:[#allocation70_spill] sm:$0xff] %v7215_v14  ;;  %10444 = vst [vmem:[#allocation71_spill] sm:$0xff] %v7218_v20  ;;  %v7236_v14 = vmul.f32 0.0625, %v10455_v63  ;;  %v7239_v20 = vmul.f32 0.0625, %v10457_v40  ;;  %v10465_v11 = vld [vmem:[#allocation350_spill] sm:$0xff]  ;;  %v10469_v63 = vld [vmem:[#allocation351_spill] sm:$0xff] }
 0x2fc   : > { %10446 = vst [vmem:[#allocation72_spill] sm:$0xff] %v7221_v23  ;;  %10448 = vst [vmem:[#allocation73_spill] sm:$0xff] %v7224_v7  ;;  %v7242_v23 = vmul.f32 0.0625, %v10459_v29  ;;  %v7245_v7 = vmul.f32 0.0625, %v10461_v44  ;;  %v10471_v40 = vld [vmem:[#allocation348_spill] sm:$0xff]  ;;  %v10475_v44 = vld [vmem:[#allocation349_spill] sm:$0xff] }
 0x2fd   : > { %10450 = vst [vmem:[#allocation74_spill] sm:$0xff] %v7227_v4  ;;  %10452 = vst [vmem:[#allocation75_spill] sm:$0xff] %v7230_v0  ;;  %v7248_v4 = vmul.f32 0.0625, %v10463_v26  ;;  %v7251_v0 = vmul.f32 0.0625, %v10465_v11  ;;  %v10473_v29 = vld [vmem:[#allocation352_spill] sm:$0xff]  ;;  %v10477_v26 = vld [vmem:[#allocation353_spill] sm:$0xff] }
 0x2fe   : > { %10454 = vst [vmem:[#allocation76_spill] sm:$0xff] %v7233_v13  ;;  %10456 = vst [vmem:[#allocation77_spill] sm:$0xff] %v7236_v14  ;;  %v7254_v13 = vmul.f32 0.0625, %v10467_v57  ;;  %v7257_v14 = vmul.f32 0.0625, %v10469_v63  ;;  %v10479_v11 = vld [vmem:[#allocation354_spill] sm:$0xff]  ;;  %v10481_v57 = vld [vmem:[#allocation108_spill] sm:$0xff] }
 0x2ff   : > { %10458 = vst [vmem:[#allocation78_spill] sm:$0xff] %v7239_v20  ;;  %10460 = vst [vmem:[#allocation79_spill] sm:$0xff] %v7242_v23  ;;  %v7260_v20 = vmul.f32 0.0625, %v10471_v40  ;;  %v7263_v23 = vmul.f32 0.0625, %v10473_v29  ;;  %v10483_v63 = vld [vmem:[#allocation355_spill] sm:$0xff]  ;;  %v10487_v29 = vld [vmem:[#allocation106_spill] sm:$0xff] }
 0x300   : > { %10462 = vst [vmem:[#allocation80_spill] sm:$0xff] %v7245_v7  ;;  %10464 = vst [vmem:[#allocation81_spill] sm:$0xff] %v7248_v4  ;;  %v7266_v7 = vmul.f32 0.0625, %v10475_v44  ;;  %v7269_v4 = vmul.f32 0.0625, %v10477_v26  ;;  %v10485_v40 = vld [vmem:[#allocation111_spill] sm:$0xff]  ;;  %v10489_v44 = vld [vmem:[#allocation112_spill] sm:$0xff] }
 0x301   : > { %10466 = vst [vmem:[#allocation82_spill] sm:$0xff] %v7251_v0  ;;  %10468 = vst [vmem:[#allocation83_spill] sm:$0xff] %v7254_v13  ;;  %v7272_v0 = vmul.f32 0.0625, %v10479_v11  ;;  %v7275_v13 = vmul.f32 0.0625, %v10481_v57  ;;  %v10491_v26 = vld [vmem:[#allocation107_spill] sm:$0xff]  ;;  %v10493_v11 = vld [vmem:[#allocation113_spill] sm:$0xff] }
 0x302   : > { %10470 = vst [vmem:[#allocation84_spill] sm:$0xff] %v7257_v14  ;;  %10472 = vst [vmem:[#allocation85_spill] sm:$0xff] %v7260_v20  ;;  %v7278_v14 = vmul.f32 0.0625, %v10483_v63  ;;  %v7281_v20 = vmul.f32 0.0625, %v10485_v40  ;;  %v10495_v57 = vld [vmem:[#allocation116_spill] sm:$0xff]  ;;  %v10497_v63 = vld [vmem:[#allocation118_spill] sm:$0xff] }
 0x303   : > { %10474 = vst [vmem:[#allocation86_spill] sm:$0xff] %v7263_v23  ;;  %10476 = vst [vmem:[#allocation87_spill] sm:$0xff] %v7266_v7  ;;  %v7284_v23 = vmul.f32 0.0625, %v10487_v29  ;;  %v7287_v7 = vmul.f32 0.0625, %v10489_v44  ;;  %v10499_v40 = vld [vmem:[#allocation117_spill] sm:$0xff]  ;;  %v10501_v29 = vld [vmem:[#allocation122_spill] sm:$0xff] }
 0x304   : > { %10478 = vst [vmem:[#allocation88_spill] sm:$0xff] %v7269_v4  ;;  %10480 = vst [vmem:[#allocation89_spill] sm:$0xff] %v7272_v0  ;;  %v7290_v4 = vmul.f32 0.0625, %v10491_v26  ;;  %v7293_v0 = vmul.f32 0.0625, %v10493_v11  ;;  %v10503_v44 = vld [vmem:[#allocation121_spill] sm:$0xff]  ;;  %v10505_v26 = vld [vmem:[#allocation123_spill] sm:$0xff] }
 0x305   : > { %10482 = vst [vmem:[#allocation90_spill] sm:$0xff] %v7275_v13  ;;  %10484 = vst [vmem:[#allocation91_spill] sm:$0xff] %v7278_v14  ;;  %v7296_v13 = vmul.f32 0.0625, %v10495_v57  ;;  %v7299_v14 = vmul.f32 0.0625, %v10497_v63  ;;  %v10507_v11 = vld [vmem:[#allocation125_spill] sm:$0xff]  ;;  %v10509_v57 = vld [vmem:[#allocation126_spill] sm:$0xff] }
 0x306   : > { %10486 = vst [vmem:[#allocation92_spill] sm:$0xff] %v7281_v20  ;;  %10488 = vst [vmem:[#allocation93_spill] sm:$0xff] %v7284_v23  ;;  %v7302_v20 = vmul.f32 0.0625, %v10499_v40  ;;  %v7305_v23 = vmul.f32 0.0625, %v10501_v29  ;;  %v10511_v63 = vld [vmem:[#allocation128_spill] sm:$0xff]  ;;  %v10513_v40 = vld [vmem:[#allocation129_spill] sm:$0xff] }
 0x307   : > { %10490 = vst [vmem:[#allocation94_spill] sm:$0xff] %v7287_v7  ;;  %10492 = vst [vmem:[#allocation95_spill] sm:$0xff] %v7290_v4  ;;  %v7308_v7 = vmul.f32 0.0625, %v10503_v44  ;;  %v7311_v4 = vmul.f32 0.0625, %v10505_v26  ;;  %v7326_v29 = vmul.f32 0.0625, %v6938_v9  ;;  %v7329_v44 = vmul.f32 0.0625, %v6942_v3 }
 0x308   : > { %10494 = vst [vmem:[#allocation96_spill] sm:$0xff] %v7293_v0  ;;  %10496 = vst [vmem:[#allocation97_spill] sm:$0xff] %v7296_v13  ;;  %v7314_v0 = vmul.f32 0.0625, %v10507_v11  ;;  %v7317_v13 = vmul.f32 0.0625, %v10509_v57  ;;  %v10517_v26 = vld [vmem:[#allocation356_spill] sm:$0xff]  ;;  %v7335_v11 = vmul.f32 0.0625, %v6950_v51 }
 0x309   : > { %10498 = vst [vmem:[#allocation98_spill] sm:$0xff] %v7299_v14  ;;  %10500 = vst [vmem:[#allocation99_spill] sm:$0xff] %v7302_v20  ;;  %v7320_v14 = vmul.f32 0.0625, %v10511_v63  ;;  %v7323_v20 = vmul.f32 0.0625, %v10513_v40  ;;  %v7338_v57 = vmul.f32 0.0625, %v6954_v58  ;;  %v10521_v63 = vld [vmem:[#allocation357_spill] sm:$0xff] }
 0x30a   : > { %10502 = vst [vmem:[#allocation100_spill] sm:$0xff] %v7305_v23  ;;  %10504 = vst [vmem:[#allocation101_spill] sm:$0xff] %v7308_v7  ;;  %v10522_v40 = vld [vmem:[#allocation358_spill] sm:$0xff]  ;;  %v10523_v9 = vld [vmem:[#allocation359_spill] sm:$0xff]  ;;  %v10655_v45 = vsub.f32 %v10521_v63, %v6957_v16 }
 0x30b   : > { %10506 = vst [vmem:[#allocation102_spill] sm:$0xff] %v7311_v4  ;;  %10508 = vst [vmem:[#allocation103_spill] sm:$0xff] %v7314_v0  ;;  %v7332_v4 = vmul.f32 0.0625, %v10517_v26  ;;  %v10524_v3 = vld [vmem:[#allocation360_spill] sm:$0xff]  ;;  %v10525_v26 = vld [vmem:[#allocation361_spill] sm:$0xff]  ;;  %v10657_v34 = vsub.f32 %v10522_v40, %v6960_v19  ;;  %v10661_v22 = vsub.f32 %v10523_v9, %v6963_v41 }
 0x30c   : > { %10510 = vst [vmem:[#allocation104_spill] sm:$0xff] %v7317_v13  ;;  %10512 = vst [vmem:[#allocation105_spill] sm:$0xff] %v7320_v14  ;;  %v10526_v51 = vld [vmem:[#allocation362_spill] sm:$0xff]  ;;  %v10527_v58 = vld [vmem:[#allocation363_spill] sm:$0xff]  ;;  %v7523_v33 = vmul.f32 0.06666667, %v10655_v45  ;;  %v10663_v16 = vsub.f32 %v10524_v3, %v6966_v12 }
 0x30d   : > { %10514 = vst [vmem:[#allocation109_spill] sm:$0xff] %v7323_v20  ;;  %10515 = vst [vmem:[#allocation110_spill] sm:$0xff] %v7326_v29  ;;  %v10528_v14 = vld [vmem:[#allocation364_spill] sm:$0xff]  ;;  %v10529_v20 = vld [vmem:[#allocation365_spill] sm:$0xff]  ;;  %v7528_v31 = vmul.f32 0.06666667, %v10657_v34 }
 0x30e   : > { %10516 = vst [vmem:[#allocation114_spill] sm:$0xff] %v7329_v44  ;;  %10518 = vst [vmem:[#allocation115_spill] sm:$0xff] %v7332_v4  ;;  %v10530_v29 = vld [vmem:[#allocation366_spill] sm:$0xff]  ;;  %v10531_v44 = vld [vmem:[#allocation367_spill] sm:$0xff]  ;;  %v7539_v38 = vmul.f32 0.06666667, %v10661_v22 }
 0x30f   : > { %10519 = vst [vmem:[#allocation119_spill] sm:$0xff] %v7335_v11  ;;  %10520 = vst [vmem:[#allocation120_spill] sm:$0xff] %v7338_v57  ;;  %v10532_v4 = vld [vmem:[#allocation368_spill] sm:$0xff]  ;;  %v10533_v11 = vld [vmem:[#allocation369_spill] sm:$0xff]  ;;  %v7544_v45 = vmul.f32 0.06666667, %v10663_v16 }
 0x310   : > { %v10534_v57 = vld [vmem:[#allocation370_spill] sm:$0xff]  ;;  %v10535_v13 = vld [vmem:[#allocation371_spill] sm:$0xff]  ;;  %v10536_v0 = vld [vmem:[#allocation372_spill] sm:$0xff]  ;;  %10656 = vst [vmem:[#allocation124_spill] sm:$0xff] %v7523_v33 }
 0x311   : > { %v10537_v7 = vld [vmem:[#allocation193_spill] sm:$0xff]  ;;  %v10538_v23 = vld [vmem:[#allocation190_spill] sm:$0xff]  ;;  %v10556_v42 = vld [vmem:[#allocation207_spill] sm:$0xff]  ;;  %10658 = vst [vmem:[#allocation127_spill] sm:$0xff] %v7528_v31 }
 0x312   : > { %v10553_v32 = vld [vmem:[#allocation209_spill] sm:$0xff]  ;;  %v10557_v15 = vld [vmem:[#allocation211_spill] sm:$0xff]  ;;  %v10558_v54 = vld [vmem:[#allocation208_spill] sm:$0xff]  ;;  %10662 = vst [vmem:[#allocation136_spill] sm:$0xff] %v7539_v38 }
 0x313   : > { %v10640_v48 = vld [vmem:[#allocation258_spill] sm:$0xff]  ;;  %v10642_v55 = vld [vmem:[#allocation255_spill] sm:$0xff]  ;;  %v10643_v24 = vld [vmem:[#allocation68_spill] sm:$0xff]  ;;  %10664 = vst [vmem:[#allocation137_spill] sm:$0xff] %v7544_v45 }
 0x314   : > { %v10644_v61 = vld [vmem:[#allocation259_spill] sm:$0xff]  ;;  %v10645_v37 = vld [vmem:[#allocation69_spill] sm:$0xff]  ;;  %v10646_v60 = vld [vmem:[#allocation256_spill] sm:$0xff] }
 0x315   : > { %v10647_v59 = vld [vmem:[#allocation70_spill] sm:$0xff]  ;;  %v10648_v2 = vld [vmem:[#allocation260_spill] sm:$0xff]  ;;  %v10650_v35 = vld [vmem:[#allocation261_spill] sm:$0xff] }
 0x316   : > { %v10651_v47 = vld [vmem:[#allocation72_spill] sm:$0xff]  ;;  %v10652_v18 = vld [vmem:[#allocation265_spill] sm:$0xff]  ;;  %v10654_v56 = vld [vmem:[#allocation262_spill] sm:$0xff] }
 0x317   : > { %v10653_v39 = vld [vmem:[#allocation73_spill] sm:$0xff]  ;;  %v10665_v19 = vld [vmem:[#allocation131_spill] sm:$0xff]  ;;  %v10670_v49 = vld [vmem:[#allocation130_spill] sm:$0xff] }
 0x318   : > { %v10666_v34 = vsub.f32 %v10525_v26, %v10665_v19  ;;  %v10668_v40 = vld [vmem:[#allocation75_spill] sm:$0xff]  ;;  %v10671_v6 = vsub.f32 %v10526_v51, %v10670_v49  ;;  %v10673_v41 = vld [vmem:[#allocation133_spill] sm:$0xff]  ;;  %v10676_v12 = vld [vmem:[#allocation132_spill] sm:$0xff] }
 0x319   : > { %v10669_v31 = vld [vmem:[#allocation263_spill] sm:$0xff]  ;;  %v10674_v22 = vsub.f32 %v10527_v58, %v10673_v41  ;;  %v10677_v3 = vsub.f32 %v10528_v14, %v10676_v12  ;;  %v10679_v26 = vld [vmem:[#allocation76_spill] sm:$0xff]  ;;  %v10681_v33 = vld [vmem:[#allocation134_spill] sm:$0xff] }
 0x31a   : > { %v7549_v63 = vmul.f32 0.06666667, %v10666_v34  ;;  %v7556_v8 = vmul.f32 0.06666667, %v10671_v6  ;;  %v10680_v19 = vld [vmem:[#allocation267_spill] sm:$0xff]  ;;  %v10687_v58 = vld [vmem:[#allocation141_spill] sm:$0xff] }
 0x31b   : > { %v7561_v9 = vmul.f32 0.06666667, %v10674_v22  ;;  %v7566_v16 = vmul.f32 0.06666667, %v10677_v3  ;;  %v10684_v6 = vld [vmem:[#allocation135_spill] sm:$0xff]  ;;  %v10688_v41 = vsub.f32 %v10531_v44, %v10687_v58  ;;  %v10690_v14 = vld [vmem:[#allocation77_spill] sm:$0xff] }
 0x31c   : > { %10667 = vst [vmem:[#allocation144_spill] sm:$0xff] %v7549_v63  ;;  %10672 = vst [vmem:[#allocation145_spill] sm:$0xff] %v7556_v8  ;;  %v10682_v63 = vsub.f32 %v10529_v20, %v10681_v33  ;;  %v10685_v49 = vsub.f32 %v10530_v29, %v10684_v6  ;;  %v10691_v12 = vld [vmem:[#allocation264_spill] sm:$0xff]  ;;  %v10692_v34 = vld [vmem:[#allocation138_spill] sm:$0xff] }
 0x31d   : > { %10675 = vst [vmem:[#allocation149_spill] sm:$0xff] %v7561_v9  ;;  %10678 = vst [vmem:[#allocation150_spill] sm:$0xff] %v7566_v16  ;;  %v7583_v22 = vmul.f32 0.06666667, %v10688_v41  ;;  %v10693_v16 = vsub.f32 %v10532_v4, %v10692_v34  ;;  %v10695_v33 = vld [vmem:[#allocation142_spill] sm:$0xff]  ;;  %v10698_v29 = vld [vmem:[#allocation139_spill] sm:$0xff] }
 0x31e   : > { %v7573_v45 = vmul.f32 0.06666667, %v10682_v63  ;;  %v7578_v51 = vmul.f32 0.06666667, %v10685_v49  ;;  %v10696_v20 = vsub.f32 %v10533_v11, %v10695_v33  ;;  %v10699_v6 = vsub.f32 %v10534_v57, %v10698_v29  ;;  %v10701_v44 = vld [vmem:[#allocation78_spill] sm:$0xff]  ;;  %v10702_v58 = vld [vmem:[#allocation268_spill] sm:$0xff] }
 0x31f   : > { %10689 = vst [vmem:[#allocation156_spill] sm:$0xff] %v7583_v22  ;;  %v7590_v9 = vmul.f32 0.06666667, %v10693_v16  ;;  %v10703_v3 = vld [vmem:[#allocation143_spill] sm:$0xff]  ;;  %v10706_v4 = vld [vmem:[#allocation140_spill] sm:$0xff]  ;;  %v10709_v11 = vld [vmem:[#allocation146_spill] sm:$0xff] }
 0x320   : > { %10683 = vst [vmem:[#allocation151_spill] sm:$0xff] %v7573_v45  ;;  %10686 = vst [vmem:[#allocation152_spill] sm:$0xff] %v7578_v51  ;;  %v7595_v63 = vmul.f32 0.06666667, %v10696_v20  ;;  %v7600_v49 = vmul.f32 0.06666667, %v10699_v6  ;;  %v10704_v22 = vsub.f32 %v10535_v13, %v10703_v3  ;;  %v10707_v16 = vsub.f32 %v10536_v0, %v10706_v4 }
 0x321   : > { %10694 = vst [vmem:[#allocation157_spill] sm:$0xff] %v7590_v9  ;;  %v10710_v33 = vsub.f32 %v10537_v7, %v10709_v11  ;;  %v10712_v57 = vld [vmem:[#allocation79_spill] sm:$0xff]  ;;  %v10713_v29 = vld [vmem:[#allocation269_spill] sm:$0xff]  ;;  %v10720_v0 = vld [vmem:[#allocation148_spill] sm:$0xff] }
 0x322   : > { %10697 = vst [vmem:[#allocation161_spill] sm:$0xff] %v7595_v63  ;;  %10700 = vst [vmem:[#allocation162_spill] sm:$0xff] %v7600_v49  ;;  %v7607_v51 = vmul.f32 0.06666667, %v10704_v22  ;;  %v7612_v34 = vmul.f32 0.06666667, %v10707_v16  ;;  %v10721_v4 = vsub.f32 %v10540_v43, %v10720_v0 }
 0x323   : > { %v7617_v20 = vmul.f32 0.06666667, %v10710_v33  ;;  %v10714_v41 = vld [vmem:[#allocation147_spill] sm:$0xff]  ;;  %v10723_v7 = vld [vmem:[#allocation80_spill] sm:$0xff]  ;;  %v10724_v11 = vld [vmem:[#allocation273_spill] sm:$0xff] }
 0x324   : > { %10705 = vst [vmem:[#allocation166_spill] sm:$0xff] %v7607_v51  ;;  %10708 = vst [vmem:[#allocation167_spill] sm:$0xff] %v7612_v34  ;;  %v10715_v49 = vsub.f32 %v10538_v23, %v10714_v41  ;;  %v10717_v13 = vld [vmem:[#allocation155_spill] sm:$0xff]  ;;  %v7634_v16 = vmul.f32 0.06666667, %v10721_v4  ;;  %v10725_v6 = vld [vmem:[#allocation158_spill] sm:$0xff] }
 0x325   : > { %10711 = vst [vmem:[#allocation173_spill] sm:$0xff] %v7617_v20  ;;  %v10718_v22 = vsub.f32 %v10539_v52, %v10717_v13  ;;  %v10726_v20 = vsub.f32 %v10541_v17, %v10725_v6  ;;  %v10728_v23 = vld [vmem:[#allocation153_spill] sm:$0xff]  ;;  %v10731_v52 = vld [vmem:[#allocation159_spill] sm:$0xff]  ;;  %v10735_v0 = vld [vmem:[#allocation270_spill] sm:$0xff] }
 0x326   : > { %v7624_v63 = vmul.f32 0.06666667, %v10715_v49  ;;  %10722 = vst [vmem:[#allocation176_spill] sm:$0xff] %v7634_v16  ;;  %v10729_v49 = vsub.f32 %v10542_v21, %v10728_v23  ;;  %v10732_v13 = vsub.f32 %v10543_v30, %v10731_v52  ;;  %v10734_v43 = vld [vmem:[#allocation81_spill] sm:$0xff]  ;;  %v10736_v33 = vld [vmem:[#allocation154_spill] sm:$0xff]  ;;  %v10739_v17 = vld [vmem:[#allocation160_spill] sm:$0xff] }
 0x327   : > { %v7629_v3 = vmul.f32 0.06666667, %v10718_v22  ;;  %v7641_v34 = vmul.f32 0.06666667, %v10726_v20  ;;  %v10737_v16 = vsub.f32 %v10544_v46, %v10736_v33  ;;  %v10740_v20 = vsub.f32 %v10545_v5, %v10739_v17  ;;  %v10742_v21 = vld [vmem:[#allocation163_spill] sm:$0xff]  ;;  %v10745_v30 = vld [vmem:[#allocation82_spill] sm:$0xff] }
 0x328   : > { %10716 = vst [vmem:[#allocation174_spill] sm:$0xff] %v7624_v63  ;;  %v7646_v41 = vmul.f32 0.06666667, %v10729_v49  ;;  %v7651_v22 = vmul.f32 0.06666667, %v10732_v13  ;;  %v10743_v23 = vsub.f32 %v10546_v62, %v10742_v21  ;;  %v10746_v52 = vld [vmem:[#allocation274_spill] sm:$0xff] }
 0x329   : > { %10719 = vst [vmem:[#allocation175_spill] sm:$0xff] %v7629_v3  ;;  %10727 = vst [vmem:[#allocation177_spill] sm:$0xff] %v7641_v34  ;;  %v7658_v3 = vmul.f32 0.06666667, %v10737_v16  ;;  %v7663_v6 = vmul.f32 0.06666667, %v10740_v20 }
 0x32a   : > { %10730 = vst [vmem:[#allocation178_spill] sm:$0xff] %v7646_v41  ;;  %10733 = vst [vmem:[#allocation179_spill] sm:$0xff] %v7651_v22  ;;  %v7668_v49 = vmul.f32 0.06666667, %v10743_v23  ;;  %v10747_v4 = vld [vmem:[#allocation165_spill] sm:$0xff]  ;;  %v10750_v46 = vld [vmem:[#allocation164_spill] sm:$0xff] }
 0x32b   : > { %10738 = vst [vmem:[#allocation180_spill] sm:$0xff] %v7658_v3  ;;  %10741 = vst [vmem:[#allocation181_spill] sm:$0xff] %v7663_v6  ;;  %v10748_v22 = vsub.f32 %v10547_v27, %v10747_v4  ;;  %v10751_v16 = vsub.f32 %v10548_v36, %v10750_v46  ;;  %v10753_v5 = vld [vmem:[#allocation169_spill] sm:$0xff]  ;;  %v10756_v62 = vld [vmem:[#allocation83_spill] sm:$0xff] }
 0x32c   : > { %10744 = vst [vmem:[#allocation182_spill] sm:$0xff] %v7668_v49  ;;  %v10754_v17 = vsub.f32 %v10549_v1, %v10753_v5  ;;  %v10757_v21 = vld [vmem:[#allocation271_spill] sm:$0xff]  ;;  %v10758_v13 = vld [vmem:[#allocation168_spill] sm:$0xff]  ;;  %v10761_v27 = vld [vmem:[#allocation170_spill] sm:$0xff] }
 0x32d   : > { %v7675_v41 = vmul.f32 0.06666667, %v10748_v22  ;;  %v7680_v33 = vmul.f32 0.06666667, %v10751_v16  ;;  %v10759_v49 = vsub.f32 %v10550_v50, %v10758_v13  ;;  %v10762_v22 = vsub.f32 %v10551_v10, %v10761_v27  ;;  %v10764_v36 = vld [vmem:[#allocation171_spill] sm:$0xff]  ;;  %v10767_v1 = vld [vmem:[#allocation84_spill] sm:$0xff] }
 0x32e   : > { %v7685_v20 = vmul.f32 0.06666667, %v10754_v17  ;;  %v10765_v46 = vsub.f32 %v10552_v28, %v10764_v36  ;;  %v10768_v5 = vld [vmem:[#allocation275_spill] sm:$0xff]  ;;  %v10769_v23 = vld [vmem:[#allocation172_spill] sm:$0xff]  ;;  %v10772_v50 = vld [vmem:[#allocation17_spill] sm:$0xff] }
 0x32f   : > { %10749 = vst [vmem:[#allocation183_spill] sm:$0xff] %v7675_v41  ;;  %10752 = vst [vmem:[#allocation184_spill] sm:$0xff] %v7680_v33  ;;  %v7692_v6 = vmul.f32 0.06666667, %v10759_v49  ;;  %v7697_v4 = vmul.f32 0.06666667, %v10762_v22  ;;  %v10773_v49 = vsub.f32 %v10554_v53, %v10772_v50 }
 0x330   : > { %10755 = vst [vmem:[#allocation185_spill] sm:$0xff] %v7685_v20  ;;  %v7702_v16 = vmul.f32 0.06666667, %v10765_v46  ;;  %v10770_v20 = vsub.f32 %v10553_v32, %v10769_v23  ;;  %v10775_v10 = vld [vmem:[#allocation18_spill] sm:$0xff]  ;;  %v10778_v28 = vld [vmem:[#allocation85_spill] sm:$0xff]  ;;  %v10779_v36 = vld [vmem:[#allocation272_spill] sm:$0xff] }
 0x331   : > { %10760 = vst [vmem:[#allocation186_spill] sm:$0xff] %v7692_v6  ;;  %10763 = vst [vmem:[#allocation187_spill] sm:$0xff] %v7697_v4  ;;  %v7714_v13 = vmul.f32 0.06666667, %v10773_v49  ;;  %v10776_v27 = vsub.f32 %v10555_v25, %v10775_v10  ;;  %v10780_v17 = vld [vmem:[#allocation19_spill] sm:$0xff]  ;;  %v10783_v32 = vld [vmem:[#allocation20_spill] sm:$0xff] }
 0x332   : > { %10766 = vst [vmem:[#allocation188_spill] sm:$0xff] %v7702_v16  ;;  %v7709_v33 = vmul.f32 0.06666667, %v10770_v20  ;;  %v10781_v16 = vsub.f32 %v10556_v42, %v10780_v17  ;;  %v10784_v20 = vsub.f32 %v10557_v15, %v10783_v32  ;;  %v10786_v53 = vld [vmem:[#allocation21_spill] sm:$0xff]  ;;  %v10789_v25 = vld [vmem:[#allocation86_spill] sm:$0xff]  ;;  %v10790_v10 = vld [vmem:[#allocation276_spill] sm:$0xff] }
 0x333   : > { %10774 = vst [vmem:[#allocation305_spill] sm:$0xff] %v7714_v13  ;;  %v7719_v22 = vmul.f32 0.06666667, %v10776_v27  ;;  %v10787_v50 = vsub.f32 %v10558_v54, %v10786_v53  ;;  %v10792_v46 = vld [vmem:[#allocation22_spill] sm:$0xff]  ;;  %v10795_v42 = vld [vmem:[#allocation213_spill] sm:$0xff]  ;;  %v10800_v32 = vld [vmem:[#allocation24_spill] sm:$0xff] }
 0x334   : > { %10771 = vst [vmem:[#allocation189_spill] sm:$0xff] %v7709_v33  ;;  %v7726_v4 = vmul.f32 0.06666667, %v10781_v16  ;;  %v7731_v23 = vmul.f32 0.06666667, %v10784_v20  ;;  %v10796_v16 = vld [vmem:[#allocation23_spill] sm:$0xff] }
 0x335   : > { %10777 = vst [vmem:[#allocation302_spill] sm:$0xff] %v7719_v22  ;;  %v7736_v49 = vmul.f32 0.06666667, %v10787_v50  ;;  %v10791_v22 = vld [vmem:[#allocation212_spill] sm:$0xff]  ;;  %v10797_v17 = vsub.f32 %v10795_v42, %v10796_v16  ;;  %v10799_v15 = vld [vmem:[#allocation217_spill] sm:$0xff]  ;;  %v10803_v54 = vld [vmem:[#allocation87_spill] sm:$0xff] }
 0x336   : > { %10782 = vst [vmem:[#allocation306_spill] sm:$0xff] %v7726_v4  ;;  %10785 = vst [vmem:[#allocation303_spill] sm:$0xff] %v7731_v23  ;;  %v10793_v13 = vsub.f32 %v10791_v22, %v10792_v46  ;;  %v10801_v20 = vsub.f32 %v10799_v15, %v10800_v32  ;;  %v10804_v53 = vld [vmem:[#allocation277_spill] sm:$0xff]  ;;  %v10810_v22 = vld [vmem:[#allocation26_spill] sm:$0xff] }
 0x337   : > { %10788 = vst [vmem:[#allocation307_spill] sm:$0xff] %v7736_v49  ;;  %v7748_v4 = vmul.f32 0.06666667, %v10797_v17  ;;  %v10805_v49 = vld [vmem:[#allocation214_spill] sm:$0xff]  ;;  %v10806_v27 = vld [vmem:[#allocation25_spill] sm:$0xff]  ;;  %v10813_v42 = vld [vmem:[#allocation215_spill] sm:$0xff] }
 0x338   : > { %v7743_v33 = vmul.f32 0.06666667, %v10793_v13  ;;  %v7753_v23 = vmul.f32 0.06666667, %v10801_v20  ;;  %v10807_v6 = vsub.f32 %v10805_v49, %v10806_v27  ;;  %v10809_v13 = vld [vmem:[#allocation218_spill] sm:$0xff]  ;;  %v10814_v16 = vld [vmem:[#allocation27_spill] sm:$0xff] }
 0x339   : > { %10798 = vst [vmem:[#allocation308_spill] sm:$0xff] %v7748_v4  ;;  %v10811_v46 = vsub.f32 %v10809_v13, %v10810_v22  ;;  %v10815_v17 = vsub.f32 %v10813_v42, %v10814_v16  ;;  %v10818_v32 = vld [vmem:[#allocation281_spill] sm:$0xff]  ;;  %v10820_v50 = vld [vmem:[#allocation28_spill] sm:$0xff]  ;;  %v10828_v22 = vld [vmem:[#allocation30_spill] sm:$0xff] }
 0x33a   : > { %10794 = vst [vmem:[#allocation304_spill] sm:$0xff] %v7743_v33  ;;  %10802 = vst [vmem:[#allocation309_spill] sm:$0xff] %v7753_v23  ;;  %v7760_v41 = vmul.f32 0.06666667, %v10807_v6  ;;  %v10819_v23 = vld [vmem:[#allocation219_spill] sm:$0xff]  ;;  %v10823_v6 = vld [vmem:[#allocation216_spill] sm:$0xff] }
 0x33b   : > { %v7765_v33 = vmul.f32 0.06666667, %v10811_v46  ;;  %v7770_v4 = vmul.f32 0.06666667, %v10815_v17  ;;  %v10821_v3 = vsub.f32 %v10819_v23, %v10820_v50  ;;  %v10824_v49 = vld [vmem:[#allocation29_spill] sm:$0xff]  ;;  %v10827_v13 = vld [vmem:[#allocation220_spill] sm:$0xff] }
 0x33c   : > { %10808 = vst [vmem:[#allocation313_spill] sm:$0xff] %v7760_v41  ;;  %v10825_v27 = vsub.f32 %v10823_v6, %v10824_v49  ;;  %v10829_v46 = vsub.f32 %v10827_v13, %v10828_v22  ;;  %v10834_v20 = vld [vmem:[#allocation31_spill] sm:$0xff]  ;;  %v10838_v23 = vld [vmem:[#allocation32_spill] sm:$0xff]  ;;  %v10841_v6 = vld [vmem:[#allocation222_spill] sm:$0xff] }
 0x33d   : > { %10812 = vst [vmem:[#allocation310_spill] sm:$0xff] %v7765_v33  ;;  %10816 = vst [vmem:[#allocation314_spill] sm:$0xff] %v7770_v4  ;;  %v7777_v34 = vmul.f32 0.06666667, %v10821_v3  ;;  %v10833_v4 = vld [vmem:[#allocation221_spill] sm:$0xff]  ;;  %v10848_v17 = vld [vmem:[#allocation34_spill] sm:$0xff] }
 0x33e   : > { %v7782_v41 = vmul.f32 0.06666667, %v10825_v27  ;;  %v7787_v33 = vmul.f32 0.06666667, %v10829_v46  ;;  %v10835_v63 = vsub.f32 %v10833_v4, %v10834_v20  ;;  %v10837_v3 = vld [vmem:[#allocation225_spill] sm:$0xff]  ;;  %v10852_v4 = vld [vmem:[#allocation35_spill] sm:$0xff] }
 0x33f   : > { %10822 = vst [vmem:[#allocation311_spill] sm:$0xff] %v7777_v34  ;;  %v10839_v50 = vsub.f32 %v10837_v3, %v10838_v23  ;;  %v10842_v49 = vld [vmem:[#allocation33_spill] sm:$0xff]  ;;  %v10855_v3 = vld [vmem:[#allocation227_spill] sm:$0xff]  ;;  %v10856_v23 = vld [vmem:[#allocation36_spill] sm:$0xff] }
 0x340   : > { %10826 = vst [vmem:[#allocation315_spill] sm:$0xff] %v7782_v41  ;;  %10830 = vst [vmem:[#allocation312_spill] sm:$0xff] %v7787_v33  ;;  %v7794_v51 = vmul.f32 0.06666667, %v10835_v63  ;;  %v10843_v27 = vsub.f32 %v10841_v6, %v10842_v49  ;;  %v10847_v33 = vld [vmem:[#allocation226_spill] sm:$0xff]  ;;  %v10851_v63 = vld [vmem:[#allocation223_spill] sm:$0xff] }
 0x341   : > { %v7799_v34 = vmul.f32 0.06666667, %v10839_v50  ;;  %v10849_v9 = vsub.f32 %v10847_v33, %v10848_v17  ;;  %v10853_v20 = vsub.f32 %v10851_v63, %v10852_v4  ;;  %v10857_v50 = vsub.f32 %v10855_v3, %v10856_v23  ;;  %v10862_v46 = vld [vmem:[#allocation37_spill] sm:$0xff]  ;;  %v10866_v33 = vld [vmem:[#allocation38_spill] sm:$0xff]  ;;  %v10870_v4 = vld [vmem:[#allocation39_spill] sm:$0xff] }
 0x342   : > { %10836 = vst [vmem:[#allocation316_spill] sm:$0xff] %v7794_v51  ;;  %v7804_v41 = vmul.f32 0.06666667, %v10843_v27  ;;  %v10869_v63 = vld [vmem:[#allocation229_spill] sm:$0xff]  ;;  %v10876_v27 = vld [vmem:[#allocation40_spill] sm:$0xff] }
 0x343   : > { %10840 = vst [vmem:[#allocation317_spill] sm:$0xff] %v7799_v34  ;;  %v7811_v45 = vmul.f32 0.06666667, %v10849_v9  ;;  %v7816_v51 = vmul.f32 0.06666667, %v10853_v20  ;;  %v10865_v9 = vld [vmem:[#allocation228_spill] sm:$0xff]  ;;  %v10871_v20 = vsub.f32 %v10869_v63, %v10870_v4 }
 0x344   : > { %10844 = vst [vmem:[#allocation321_spill] sm:$0xff] %v7804_v41  ;;  %v7821_v34 = vmul.f32 0.06666667, %v10857_v50  ;;  %v10861_v41 = vld [vmem:[#allocation224_spill] sm:$0xff]  ;;  %v10867_v17 = vsub.f32 %v10865_v9, %v10866_v33  ;;  %v10883_v9 = vld [vmem:[#allocation234_spill] sm:$0xff]  ;;  %v10890_v50 = vld [vmem:[#allocation43_spill] sm:$0xff] }
 0x345   : > { %10850 = vst [vmem:[#allocation318_spill] sm:$0xff] %v7811_v45  ;;  %10854 = vst [vmem:[#allocation322_spill] sm:$0xff] %v7816_v51  ;;  %v10863_v8 = vsub.f32 %v10861_v41, %v10862_v46  ;;  %v7838_v51 = vmul.f32 0.06666667, %v10871_v20  ;;  %v10880_v41 = vld [vmem:[#allocation41_spill] sm:$0xff]  ;;  %v10884_v33 = vld [vmem:[#allocation42_spill] sm:$0xff] }
 0x346   : > { %10858 = vst [vmem:[#allocation319_spill] sm:$0xff] %v7821_v34  ;;  %v7833_v45 = vmul.f32 0.06666667, %v10867_v17  ;;  %v10875_v34 = vld [vmem:[#allocation233_spill] sm:$0xff]  ;;  %v10885_v17 = vsub.f32 %v10883_v9, %v10884_v33  ;;  %v10904_v20 = vld [vmem:[#allocation46_spill] sm:$0xff] }
 0x347   : > { %v7828_v38 = vmul.f32 0.06666667, %v10863_v8  ;;  %10872 = vst [vmem:[#allocation324_spill] sm:$0xff] %v7838_v51  ;;  %v10877_v6 = vsub.f32 %v10875_v34, %v10876_v27  ;;  %v10879_v8 = vld [vmem:[#allocation230_spill] sm:$0xff]  ;;  %v10889_v51 = vld [vmem:[#allocation231_spill] sm:$0xff] }
 0x348   : > { %10868 = vst [vmem:[#allocation320_spill] sm:$0xff] %v7833_v45  ;;  %v10881_v46 = vsub.f32 %v10879_v8, %v10880_v41  ;;  %v7855_v45 = vmul.f32 0.06666667, %v10885_v17  ;;  %v10891_v3 = vsub.f32 %v10889_v51, %v10890_v50  ;;  %v10893_v34 = vld [vmem:[#allocation235_spill] sm:$0xff]  ;;  %v10897_v8 = vld [vmem:[#allocation232_spill] sm:$0xff]  ;;  %v10898_v41 = vld [vmem:[#allocation45_spill] sm:$0xff] }
 0x349   : > { %10864 = vst [vmem:[#allocation323_spill] sm:$0xff] %v7828_v38  ;;  %v7845_v49 = vmul.f32 0.06666667, %v10877_v6  ;;  %v10894_v6 = vld [vmem:[#allocation44_spill] sm:$0xff]  ;;  %v10907_v51 = vld [vmem:[#allocation237_spill] sm:$0xff] }
 0x34a   : > { %v7850_v38 = vmul.f32 0.06666667, %v10881_v46  ;;  %10886 = vst [vmem:[#allocation326_spill] sm:$0xff] %v7855_v45  ;;  %v7862_v23 = vmul.f32 0.06666667, %v10891_v3  ;;  %v10895_v27 = vsub.f32 %v10893_v34, %v10894_v6  ;;  %v10899_v46 = vsub.f32 %v10897_v8, %v10898_v41  ;;  %v10903_v45 = vld [vmem:[#allocation236_spill] sm:$0xff] }
 0x34b   : > { %10878 = vst [vmem:[#allocation325_spill] sm:$0xff] %v7845_v49  ;;  %v10905_v63 = vsub.f32 %v10903_v45, %v10904_v20  ;;  %v10908_v3 = vld [vmem:[#allocation47_spill] sm:$0xff]  ;;  %v10911_v34 = vld [vmem:[#allocation241_spill] sm:$0xff]  ;;  %v10912_v6 = vld [vmem:[#allocation48_spill] sm:$0xff] }
 0x34c   : > { %10882 = vst [vmem:[#allocation329_spill] sm:$0xff] %v7850_v38  ;;  %10892 = vst [vmem:[#allocation330_spill] sm:$0xff] %v7862_v23  ;;  %v7867_v49 = vmul.f32 0.06666667, %v10895_v27  ;;  %v7872_v38 = vmul.f32 0.06666667, %v10899_v46  ;;  %v10909_v50 = vsub.f32 %v10907_v51, %v10908_v3  ;;  %v10913_v27 = vsub.f32 %v10911_v34, %v10912_v6 }
 0x34d   : > { %v7879_v4 = vmul.f32 0.06666667, %v10905_v63  ;;  %v10915_v8 = vld [vmem:[#allocation95_spill] sm:$0xff]  ;;  %v10916_v41 = vld [vmem:[#allocation285_spill] sm:$0xff]  ;;  %v10921_v45 = vld [vmem:[#allocation242_spill] sm:$0xff] }
 0x34e   : > { %10896 = vst [vmem:[#allocation327_spill] sm:$0xff] %v7867_v49  ;;  %10900 = vst [vmem:[#allocation331_spill] sm:$0xff] %v7872_v38  ;;  %v7884_v23 = vmul.f32 0.06666667, %v10909_v50  ;;  %v7889_v49 = vmul.f32 0.06666667, %v10913_v27  ;;  %v2843_v46 = vsub.f32 %v10916_v41, %v10915_v8 }
 0x34f   : > { %10906 = vst [vmem:[#allocation328_spill] sm:$0xff] %v7879_v4  ;;  %v10917_v38 = vld [vmem:[#allocation238_spill] sm:$0xff]  ;;  %v10918_v17 = vld [vmem:[#allocation49_spill] sm:$0xff]  ;;  %v10925_v51 = vld [vmem:[#allocation239_spill] sm:$0xff] }
 0x350   : > { %10910 = vst [vmem:[#allocation332_spill] sm:$0xff] %v7884_v23  ;;  %10914 = vst [vmem:[#allocation333_spill] sm:$0xff] %v7889_v49  ;;  %v10919_v9 = vsub.f32 %v10917_v38, %v10918_v17  ;;  %v10922_v63 = vld [vmem:[#allocation50_spill] sm:$0xff]  ;;  %v10926_v3 = vld [vmem:[#allocation51_spill] sm:$0xff] }
 0x351   : > { %v10923_v20 = vsub.f32 %v10921_v45, %v10922_v63  ;;  %v10927_v50 = vsub.f32 %v10925_v51, %v10926_v3  ;;  %v10929_v34 = vld [vmem:[#allocation96_spill] sm:$0xff]  ;;  %v10930_v6 = vld [vmem:[#allocation289_spill] sm:$0xff]  ;;  %v10931_v49 = vld [vmem:[#allocation243_spill] sm:$0xff] }
 0x352   : > { %v7896_v33 = vmul.f32 0.06666667, %v10919_v9  ;;  %v2844_v27 = vsub.f32 %v10930_v6, %v10929_v34  ;;  %v10932_v8 = vld [vmem:[#allocation52_spill] sm:$0xff]  ;;  %v10936_v9 = vld [vmem:[#allocation53_spill] sm:$0xff]  ;;  %v10940_v63 = vld [vmem:[#allocation54_spill] sm:$0xff] }
 0x353   : > { %v7901_v4 = vmul.f32 0.06666667, %v10923_v20  ;;  %v7906_v23 = vmul.f32 0.06666667, %v10927_v50  ;;  %v10933_v41 = vsub.f32 %v10931_v49, %v10932_v8  ;;  %v10935_v38 = vld [vmem:[#allocation240_spill] sm:$0xff]  ;;  %v10943_v51 = vld [vmem:[#allocation97_spill] sm:$0xff] }
 0x354   : > { %10920 = vst [vmem:[#allocation337_spill] sm:$0xff] %v7896_v33  ;;  %v10937_v17 = vsub.f32 %v10935_v38, %v10936_v9  ;;  %v10939_v45 = vld [vmem:[#allocation244_spill] sm:$0xff]  ;;  %v10944_v3 = vld [vmem:[#allocation286_spill] sm:$0xff]  ;;  %v10946_v34 = vld [vmem:[#allocation55_spill] sm:$0xff] }
 0x355   : > { %10924 = vst [vmem:[#allocation334_spill] sm:$0xff] %v7901_v4  ;;  %10928 = vst [vmem:[#allocation338_spill] sm:$0xff] %v7906_v23  ;;  %v7913_v13 = vmul.f32 0.06666667, %v10933_v41  ;;  %v10941_v20 = vsub.f32 %v10939_v45, %v10940_v63  ;;  %v2845_v50 = vsub.f32 %v10944_v3, %v10943_v51  ;;  %v10945_v23 = vld [vmem:[#allocation245_spill] sm:$0xff]  ;;  %v10950_v8 = vld [vmem:[#allocation56_spill] sm:$0xff] }
 0x356   : > { %v7918_v33 = vmul.f32 0.06666667, %v10937_v17  ;;  %v10947_v6 = vsub.f32 %v10945_v23, %v10946_v34  ;;  %v10949_v49 = vld [vmem:[#allocation249_spill] sm:$0xff]  ;;  %v10953_v38 = vld [vmem:[#allocation246_spill] sm:$0xff]  ;;  %v10963_v23 = vld [vmem:[#allocation247_spill] sm:$0xff] }
 0x357   : > { %10934 = vst [vmem:[#allocation335_spill] sm:$0xff] %v7913_v13  ;;  %v7923_v4 = vmul.f32 0.06666667, %v10941_v20  ;;  %v10951_v41 = vsub.f32 %v10949_v49, %v10950_v8  ;;  %v10954_v9 = vld [vmem:[#allocation57_spill] sm:$0xff]  ;;  %v10957_v45 = vld [vmem:[#allocation98_spill] sm:$0xff]  ;;  %v10964_v34 = vld [vmem:[#allocation59_spill] sm:$0xff] }
 0x358   : > { %10938 = vst [vmem:[#allocation339_spill] sm:$0xff] %v7918_v33  ;;  %v7930_v22 = vmul.f32 0.06666667, %v10947_v6  ;;  %v10955_v17 = vsub.f32 %v10953_v38, %v10954_v9  ;;  %v10958_v63 = vld [vmem:[#allocation290_spill] sm:$0xff]  ;;  %v10965_v6 = vsub.f32 %v10963_v23, %v10964_v34  ;;  %v10967_v49 = vld [vmem:[#allocation251_spill] sm:$0xff]  ;;  %v10968_v8 = vld [vmem:[#allocation60_spill] sm:$0xff] }
 0x359   : > { %10942 = vst [vmem:[#allocation336_spill] sm:$0xff] %v7923_v4  ;;  %v7935_v13 = vmul.f32 0.06666667, %v10951_v41  ;;  %v2846_v20 = vsub.f32 %v10958_v63, %v10957_v45  ;;  %v10959_v4 = vld [vmem:[#allocation250_spill] sm:$0xff]  ;;  %v10969_v41 = vsub.f32 %v10967_v49, %v10968_v8  ;;  %v10971_v38 = vld [vmem:[#allocation99_spill] sm:$0xff]  ;;  %v10974_v45 = vld [vmem:[#allocation61_spill] sm:$0xff] }
 0x35a   : > { %10948 = vst [vmem:[#allocation340_spill] sm:$0xff] %v7930_v22  ;;  %v7940_v33 = vmul.f32 0.06666667, %v10955_v17  ;;  %v10960_v51 = vld [vmem:[#allocation58_spill] sm:$0xff]  ;;  %v7952_v22 = vmul.f32 0.06666667, %v10965_v6 }
 0x35b   : > { %10952 = vst [vmem:[#allocation341_spill] sm:$0xff] %v7935_v13  ;;  %v10961_v3 = vsub.f32 %v10959_v4, %v10960_v51  ;;  %v7957_v13 = vmul.f32 0.06666667, %v10969_v41  ;;  %v10972_v9 = vld [vmem:[#allocation287_spill] sm:$0xff]  ;;  %v10977_v4 = vld [vmem:[#allocation252_spill] sm:$0xff]  ;;  %v10978_v51 = vld [vmem:[#allocation62_spill] sm:$0xff] }
 0x35c   : > { %10956 = vst [vmem:[#allocation342_spill] sm:$0xff] %v7940_v33  ;;  %10966 = vst [vmem:[#allocation343_spill] sm:$0xff] %v7952_v22  ;;  %v2847_v17 = vsub.f32 %v10972_v9, %v10971_v38  ;;  %v10973_v33 = vld [vmem:[#allocation248_spill] sm:$0xff]  ;;  %v10980_v23 = vld [vmem:[#allocation253_spill] sm:$0xff] }
 0x35d   : > { %v7947_v42 = vmul.f32 0.06666667, %v10961_v3  ;;  %10970 = vst [vmem:[#allocation345_spill] sm:$0xff] %v7957_v13  ;;  %v10975_v63 = vsub.f32 %v10973_v33, %v10974_v45  ;;  %v10979_v3 = vsub.f32 %v10977_v4, %v10978_v51  ;;  %v10981_v34 = vld [vmem:[#allocation63_spill] sm:$0xff]  ;;  %v10984_v49 = vld [vmem:[#allocation100_spill] sm:$0xff]  ;;  %v10986_v13 = vld [vmem:[#allocation257_spill] sm:$0xff] }
 0x35e   : > { %v10982_v6 = vsub.f32 %v10980_v23, %v10981_v34  ;;  %v10985_v8 = vld [vmem:[#allocation291_spill] sm:$0xff]  ;;  %v10987_v38 = vld [vmem:[#allocation64_spill] sm:$0xff]  ;;  %v10989_v33 = vld [vmem:[#allocation254_spill] sm:$0xff] }
 0x35f   : > { %10962 = vst [vmem:[#allocation344_spill] sm:$0xff] %v7947_v42  ;;  %v7964_v16 = vmul.f32 0.06666667, %v10975_v63  ;;  %v7969_v42 = vmul.f32 0.06666667, %v10979_v3  ;;  %v2848_v41 = vsub.f32 %v10985_v8, %v10984_v49  ;;  %v10988_v9 = vsub.f32 %v10986_v13, %v10987_v38  ;;  %v10990_v45 = vld [vmem:[#allocation65_spill] sm:$0xff] }
 0x360   : > { %v7974_v22 = vmul.f32 0.06666667, %v10982_v6  ;;  %v10991_v63 = vsub.f32 %v10989_v33, %v10990_v45  ;;  %v10992_v4 = vld [vmem:[#allocation66_spill] sm:$0xff]  ;;  %v10994_v23 = vld [vmem:[#allocation101_spill] sm:$0xff]  ;;  %v10995_v34 = vld [vmem:[#allocation288_spill] sm:$0xff]  ;;  %v10998_v13 = vsub.f32 %v10644_v61, %v10643_v24  ;;  %v11005_v24 = vsub.f32 %v10652_v18, %v10651_v47 }
 0x361   : > { %10976 = vst [vmem:[#allocation346_spill] sm:$0xff] %v7964_v16  ;;  %v7981_v15 = vmul.f32 0.06666667, %v10988_v9  ;;  %v10993_v51 = vsub.f32 %v10640_v48, %v10992_v4  ;;  %v2849_v6 = vsub.f32 %v10995_v34, %v10994_v23  ;;  %v10996_v49 = vld [vmem:[#allocation67_spill] sm:$0xff]  ;;  %v10999_v9 = vsub.f32 %v10646_v60, %v10645_v37  ;;  %v11000_v48 = vld [vmem:[#allocation102_spill] sm:$0xff]  ;;  %v11001_v45 = vld [vmem:[#allocation292_spill] sm:$0xff] }
 0x362   : > { %10983 = vst [vmem:[#allocation350_spill] sm:$0xff] %v7974_v22  ;;  %v7986_v16 = vmul.f32 0.06666667, %v10991_v63  ;;  %v10997_v8 = vsub.f32 %v10642_v55, %v10996_v49  ;;  %v8003_v38 = vmul.f32 0.06666667, %v10998_v13  ;;  %v2850_v63 = vsub.f32 %v11001_v45, %v11000_v48  ;;  %v11003_v55 = vld [vmem:[#allocation71_spill] sm:$0xff] }
 0x363   : > { %v7991_v3 = vmul.f32 0.06666667, %v10993_v51  ;;  %v8008_v33 = vmul.f32 0.06666667, %v10999_v9  ;;  %v11002_v4 = vsub.f32 %v10648_v2, %v10647_v59  ;;  %v11004_v23 = vsub.f32 %v10650_v35, %v11003_v55  ;;  %v11006_v37 = vld [vmem:[#allocation103_spill] sm:$0xff]  ;;  %v11007_v60 = vld [vmem:[#allocation293_spill] sm:$0xff] }
 0x364   : > { %v7998_v22 = vmul.f32 0.06666667, %v10997_v8  ;;  %v8025_v61 = vmul.f32 0.06666667, %v11005_v24  ;;  %v2851_v49 = vsub.f32 %v11007_v60, %v11006_v37  ;;  %v11008_v8 = vsub.f32 %v10654_v56, %v10653_v39  ;;  %v11009_v59 = vld [vmem:[#allocation266_spill] sm:$0xff]  ;;  %v11013_v18 = vld [vmem:[#allocation104_spill] sm:$0xff] }
 0x365   : > { %v8015_v51 = vmul.f32 0.06666667, %v11002_v4  ;;  %v8020_v34 = vmul.f32 0.06666667, %v11004_v23  ;;  %v11010_v2 = vld [vmem:[#allocation74_spill] sm:$0xff]  ;;  %v11012_v35 = vsub.f32 %v10669_v31, %v10668_v40  ;;  %v11014_v47 = vld [vmem:[#allocation297_spill] sm:$0xff]  ;;  %v11015_v55 = vsub.f32 %v10680_v19, %v10679_v26 }
 0x366   : > { %v8032_v13 = vmul.f32 0.06666667, %v11008_v8  ;;  %v11011_v9 = vsub.f32 %v11009_v59, %v11010_v2  ;;  %v2852_v4 = vsub.f32 %v11014_v47, %v11013_v18  ;;  %v11016_v56 = vsub.f32 %v10691_v12, %v10690_v14  ;;  %v11018_v31 = vld [vmem:[#allocation105_spill] sm:$0xff]  ;;  %v11019_v40 = vld [vmem:[#allocation294_spill] sm:$0xff] }
 0x367   : > { %v8042_v45 = vmul.f32 0.06666667, %v11012_v35  ;;  %v8049_v23 = vmul.f32 0.06666667, %v11015_v55  ;;  %v11017_v24 = vsub.f32 %v10702_v58, %v10701_v44  ;;  %v2853_v60 = vsub.f32 %v11019_v40, %v11018_v31  ;;  %v11023_v44 = vld [vmem:[#allocation109_spill] sm:$0xff]  ;;  %v11024_v58 = vld [vmem:[#allocation298_spill] sm:$0xff] }
 0x368   : > { %v8037_v48 = vmul.f32 0.06666667, %v11011_v9  ;;  %v8054_v39 = vmul.f32 0.06666667, %v11016_v56  ;;  %v11020_v8 = vsub.f32 %v10713_v29, %v10712_v57  ;;  %v11021_v26 = vsub.f32 %v10724_v11, %v10723_v7 }
 0x369   : > { %v8059_v37 = vmul.f32 0.06666667, %v11017_v24  ;;  %v11022_v14 = vsub.f32 %v10735_v0, %v10734_v43  ;;  %v2854_v2 = vsub.f32 %v11024_v58, %v11023_v44  ;;  %v11025_v9 = vsub.f32 %v10746_v52, %v10745_v30  ;;  %v11028_v43 = vld [vmem:[#allocation110_spill] sm:$0xff]  ;;  %v11029_v0 = vld [vmem:[#allocation295_spill] sm:$0xff]  ;;  %v11036_v24 = vld [vmem:[#allocation88_spill] sm:$0xff] }
 0x36a   : > { %v8066_v59 = vmul.f32 0.06666667, %v11020_v8  ;;  %v8071_v19 = vmul.f32 0.06666667, %v11021_v26  ;;  %v11026_v57 = vsub.f32 %v10757_v21, %v10756_v62  ;;  %v11027_v7 = vsub.f32 %v10768_v5, %v10767_v1  ;;  %v11034_v1 = vld [vmem:[#allocation114_spill] sm:$0xff]  ;;  %v11035_v5 = vld [vmem:[#allocation299_spill] sm:$0xff] }
 0x36b   : > { %v8076_v12 = vmul.f32 0.06666667, %v11022_v14  ;;  %v8083_v35 = vmul.f32 0.06666667, %v11025_v9  ;;  %v2855_v18 = vsub.f32 %v11029_v0, %v11028_v43  ;;  %v11030_v47 = vsub.f32 %v10779_v36, %v10778_v28  ;;  %v11039_v28 = vld [vmem:[#allocation278_spill] sm:$0xff]  ;;  %v11040_v36 = vld [vmem:[#allocation89_spill] sm:$0xff] }
 0x36c   : > { %v8088_v29 = vmul.f32 0.06666667, %v11026_v57  ;;  %v8093_v11 = vmul.f32 0.06666667, %v11027_v7  ;;  %v11031_v30 = vsub.f32 %v10790_v10, %v10789_v25  ;;  %v11032_v62 = vsub.f32 %v10804_v53, %v10803_v54  ;;  %v11043_v25 = vld [vmem:[#allocation282_spill] sm:$0xff]  ;;  %v11047_v54 = vld [vmem:[#allocation279_spill] sm:$0xff] }
 0x36d   : > { %v8100_v55 = vmul.f32 0.06666667, %v11030_v47  ;;  %v2856_v56 = vsub.f32 %v11035_v5, %v11034_v1  ;;  %v11037_v31 = vsub.f32 %v10818_v32, %v11036_v24  ;;  %v11041_v8 = vsub.f32 %v11039_v28, %v11040_v36  ;;  %v11044_v10 = vld [vmem:[#allocation90_spill] sm:$0xff]  ;;  %v11048_v53 = vld [vmem:[#allocation91_spill] sm:$0xff]  ;;  %v11052_v32 = vld [vmem:[#allocation92_spill] sm:$0xff] }
 0x36e   : > { %v8105_v52 = vmul.f32 0.06666667, %v11031_v30  ;;  %v8110_v21 = vmul.f32 0.06666667, %v11032_v62  ;;  %v11045_v14 = vsub.f32 %v11043_v25, %v11044_v10  ;;  %v11049_v58 = vsub.f32 %v11047_v54, %v11048_v53  ;;  %v11051_v57 = vld [vmem:[#allocation283_spill] sm:$0xff]  ;;  %v11055_v0 = vld [vmem:[#allocation280_spill] sm:$0xff] }
 0x36f   : > { %v8117_v40 = vmul.f32 0.06666667, %v11037_v31  ;;  %v8122_v26 = vmul.f32 0.06666667, %v11041_v8  ;;  %v11053_v7 = vsub.f32 %v11051_v57, %v11052_v32  ;;  %v11056_v47 = vld [vmem:[#allocation93_spill] sm:$0xff]  ;;  %v2989_v1 = vlaneseq  ;;  %v11059_v5 = vld [vmem:[#allocation115_spill] sm:$0xff] }
 0x370   : > { %11033 = vst [vmem:[#allocation347_spill] sm:$0xff] %v8110_v21  ;;  %v8127_v44 = vmul.f32 0.06666667, %v11045_v14  ;;  %v8132_v9 = vmul.f32 0.06666667, %v11049_v58  ;;  %v11057_v30 = vsub.f32 %v11055_v0, %v11056_v47  ;;  %v11060_v24 = vld [vmem:[#allocation296_spill] sm:$0xff] }
 0x371   : > { %11038 = vst [vmem:[#allocation351_spill] sm:$0xff] %v8117_v40  ;;  %11042 = vst [vmem:[#allocation348_spill] sm:$0xff] %v8122_v26  ;;  %v8137_v43 = vmul.f32 0.06666667, %v11053_v7  ;;  %v2857_v31 = vsub.f32 %v11060_v24, %v11059_v5  ;;  %v11061_v28 = vld [vmem:[#allocation284_spill] sm:$0xff]  ;;  %v11062_v36 = vld [vmem:[#allocation94_spill] sm:$0xff] }
 0x372   : > { %11046 = vst [vmem:[#allocation352_spill] sm:$0xff] %v8127_v44  ;;  %11050 = vst [vmem:[#allocation349_spill] sm:$0xff] %v8132_v9  ;;  %v8142_v62 = vmul.f32 0.06666667, %v11057_v30  ;;  %v11063_v8 = vsub.f32 %v11061_v28, %v11062_v36  ;;  %v8151_v10 = vmul.f32 0.06666667, %v2843_v46  ;;  %v2994_v46 = vstv %s3714_s9 }
 0x373   : > { %11054 = vst [vmem:[#allocation353_spill] sm:$0xff] %v8137_v43  ;;  %v8153_v14 = vmul.f32 0.06666667, %v2844_v27  ;;  %v11067_v54 = vld [vmem:[#allocation119_spill] sm:$0xff]  ;;  %v11068_v53 = vld [vmem:[#allocation300_spill] sm:$0xff]  ;;  %v11076_v27 = vld [vmem:[#allocation301_spill] sm:$0xff] }
 0x374   : > { %11058 = vst [vmem:[#allocation354_spill] sm:$0xff] %v8142_v62  ;;  %v8149_v25 = vmul.f32 0.06666667, %v11063_v8  ;;  %11065 = vst [vmem:[#allocation355_spill] sm:$0xff] %v8151_v10  ;;  %v2858_v58 = vsub.f32 %v11068_v53, %v11067_v54  ;;  %v8157_v57 = vmul.f32 0.06666667, %v2845_v50 }
 0x375   : > { %11066 = vst [vmem:[#allocation111_spill] sm:$0xff] %v8153_v14  ;;  %v8159_v32 = vmul.f32 0.06666667, %v2846_v20  ;;  %v8161_v7 = vmul.f32 0.06666667, %v2847_v17  ;;  %v11075_v5 = vld [vmem:[#allocation120_spill] sm:$0xff] }
 0x376   : > { %11064 = vst [vmem:[#allocation108_spill] sm:$0xff] %v8149_v25  ;;  %11069 = vst [vmem:[#allocation106_spill] sm:$0xff] %v8157_v57  ;;  %v8163_v0 = vmul.f32 0.06666667, %v2848_v41  ;;  %v8165_v47 = vmul.f32 0.06666667, %v2849_v6  ;;  %v2859_v24 = vsub.f32 %v11076_v27, %v11075_v5  ;;  %v3000_v41 = vstv %s7532_s27 }
 0x377   : > { %11070 = vst [vmem:[#allocation112_spill] sm:$0xff] %v8159_v32  ;;  %11071 = vst [vmem:[#allocation107_spill] sm:$0xff] %v8161_v7  ;;  %v8167_v30 = vmul.f32 0.06666667, %v2850_v63  ;;  %v8173_v28 = vmul.f32 0.06666667, %v2851_v49 }
 0x378   : > { %11072 = vst [vmem:[#allocation113_spill] sm:$0xff] %v8163_v0  ;;  %11073 = vst [vmem:[#allocation116_spill] sm:$0xff] %v8165_v47  ;;  %v8175_v36 = vmul.f32 0.06666667, %v2852_v4  ;;  %v2990_v50 = vshrl.u32 %v2989_v1, 7  ;;  %v11092_v25 = vld [vmem:[#allocation124_spill] sm:$0xff] }
 0x379   : > { %11074 = vst [vmem:[#allocation118_spill] sm:$0xff] %v8167_v30  ;;  %11077 = vst [vmem:[#allocation117_spill] sm:$0xff] %v8173_v28  ;;  %v8177_v20 = vmul.f32 0.06666667, %v2853_v60  ;;  %v8179_v17 = vmul.f32 0.06666667, %v2854_v2 }
 0x37a   : > { %11078 = vst [vmem:[#allocation122_spill] sm:$0xff] %v8175_v36  ;;  %v2991_v8 = vadd.s32 8, %v2990_v50  ;;  %v2992_v6 = vadd.s32 16, %v2990_v50  ;;  %v2993_v54 = vadd.s32 24, %v2990_v50  ;;  %v2995_v63 = vadd.s32 %v2994_v46, %v2990_v50  ;;  %v11094_v43 = vld [vmem:[#allocation127_spill] sm:$0xff]  ;;  %v11096_v44 = vld [vmem:[#allocation136_spill] sm:$0xff] }
 0x37b   : > { %11079 = vst [vmem:[#allocation121_spill] sm:$0xff] %v8177_v20  ;;  %11080 = vst [vmem:[#allocation123_spill] sm:$0xff] %v8179_v17  ;;  %v8182_v53 = vmul.f32 0.06666667, %v2855_v18  ;;  %v8184_v30 = vmul.f32 0.06666667, %v2856_v56 }
 0x37c   : > { %v8186_v47 = vmul.f32 0.06666667, %v2857_v31  ;;  %v2996_v49 = vadd.s32 %v2994_v46, %v2991_v8  ;;  %v2997_v5 = vadd.s32 %v2994_v46, %v2992_v6  ;;  %v2998_v4 = vadd.s32 %v2994_v46, %v2993_v54  ;;  %v11098_v26 = vld [vmem:[#allocation137_spill] sm:$0xff] }
 0x37d   : > { %11081 = vst [vmem:[#allocation125_spill] sm:$0xff] %v8182_v53  ;;  %11082 = vst [vmem:[#allocation126_spill] sm:$0xff] %v8184_v30  ;;  %vm3001_vm0 = vcmp.lt.s32.totalorder %v2995_v63, %v3000_v41  ;;  %v8188_v1 = vmul.f32 0.06666667, %v2858_v58  ;;  %v8190_v60 = vmul.f32 0.06666667, %v2859_v24 }
 0x37e   : > { %11083 = vst [vmem:[#allocation128_spill] sm:$0xff] %v8186_v47  ;;  %v4209_v2 = vmov 0.0   ;;  %vm3002_vm1 = vcmp.lt.s32.totalorder %v2996_v49, %v3000_v41  ;;  %vm3003_vm2 = vcmp.lt.s32.totalorder %v2997_v5, %v3000_v41  ;;  %vm3004_vm3 = vcmp.lt.s32.totalorder %v2998_v4, %v3000_v41  ;;  %v11101_v40 = vld [vmem:[#allocation145_spill] sm:$0xff] }
 0x37f   : > { %11084 = vst [vmem:[#allocation129_spill] sm:$0xff] %v8188_v1  ;;  %11085 = vst [vmem:[#allocation356_spill] sm:$0xff] %v8190_v60  ;;  %v3715_v27 = vsel %vm3001_vm0, 1.0, %v4209_v2  ;;  %v8192_v18 = vsel %vm3002_vm1, 1.0, %v4209_v2  ;;  %v8194_v56 = vsel %vm3003_vm2, 1.0, %v4209_v2  ;;  %v8196_v31 = vsel %vm3004_vm3, 1.0, %v4209_v2 }
 0x380   : > { %v3017_v50 = vrot.slane %v3715_v27, 1  ;;  %v3018_v8 = vrot.slane %v3715_v27, 2  ;;  %v3019_v6 = vrot.slane %v3715_v27, 3  ;;  %v3020_v46 = vrot.slane %v3715_v27, 4  ;;  %v11103_v21 = vld [vmem:[#allocation149_spill] sm:$0xff] }
 0x381   : > { %v3021_v54 = vrot.slane %v3715_v27, 5  ;;  %v3022_v58 = vrot.slane %v3715_v27, 6  ;;  %v3023_v63 = vrot.slane %v3715_v27, 7  ;;  %v3024_v24 = vrot.slane %v8192_v18, 1 }
 0x382   : > { %v8200_v60 = vrot.slane %v8192_v18, 2  ;;  %v8203_v41 = vrot.slane %v8192_v18, 3  ;;  %v8206_v49 = vrot.slane %v8192_v18, 4  ;;  %v8209_v5 = vrot.slane %v8192_v18, 5 }
 0x383   : > { %v8212_v4 = vrot.slane %v8192_v18, 6  ;;  %v8215_v2 = vrot.slane %v8192_v18, 7  ;;  %v8218_v1 = vrot.slane %v8194_v56, 1  ;;  %v8221_v47 = vrot.slane %v8194_v56, 2 }
 0x384   : > { %v8224_v30 = vrot.slane %v8194_v56, 3  ;;  %v8227_v53 = vrot.slane %v8194_v56, 4  ;;  %v8230_v17 = vrot.slane %v8194_v56, 5  ;;  %v8233_v20 = vrot.slane %v8194_v56, 6 }
 0x385   : > { %v8236_v36 = vrot.slane %v8194_v56, 7  ;;  %v8239_v28 = vrot.slane %v8196_v31, 1  ;;  %v8242_v0 = vrot.slane %v8196_v31, 2  ;;  %v8245_v7 = vrot.slane %v8196_v31, 3 }
 0x386   : > { %v8248_v32 = vrot.slane %v8196_v31, 4  ;;  %v8251_v57 = vrot.slane %v8196_v31, 5  ;;  %v8254_v14 = vrot.slane %v8196_v31, 6  ;;  %v8257_v10 = vrot.slane %v8196_v31, 7 }
 0x387   : > { %11086 = vst [vmem:[#allocation357_spill] sm:$0xff] %v8242_v0  ;;  %11087 = vst [vmem:[#allocation358_spill] sm:$0xff] %v8245_v7  ;;  %v8260_v62 = vmul.f32 %v3715_v27, %v11092_v25  ;;  %v8263_v9 = vmul.f32 %v3715_v27, %v11094_v43  ;;  %v8266_v7 = vmul.f32 %v3715_v27, %v11096_v44  ;;  %v11100_v0 = vld [vmem:[#allocation144_spill] sm:$0xff]  ;;  %v11105_v25 = vld [vmem:[#allocation150_spill] sm:$0xff] }
 0x388   : > { %11088 = vst [vmem:[#allocation359_spill] sm:$0xff] %v8248_v32  ;;  %11089 = vst [vmem:[#allocation360_spill] sm:$0xff] %v8251_v57  ;;  %v8269_v32 = vmul.f32 %v3715_v27, %v11098_v26  ;;  %v8272_v57 = vmul.f32 %v3017_v50, %v11100_v0  ;;  %v11107_v43 = vld [vmem:[#allocation151_spill] sm:$0xff]  ;;  %v11108_v44 = vld [vmem:[#allocation152_spill] sm:$0xff] }
 0x389   : > { %11090 = vst [vmem:[#allocation361_spill] sm:$0xff] %v8254_v14  ;;  %11091 = vst [vmem:[#allocation362_spill] sm:$0xff] %v8257_v10  ;;  %v8275_v14 = vmul.f32 %v3017_v50, %v11101_v40  ;;  %v8278_v10 = vmul.f32 %v3017_v50, %v11103_v21  ;;  %v11110_v26 = vld [vmem:[#allocation156_spill] sm:$0xff]  ;;  %v11112_v0 = vld [vmem:[#allocation157_spill] sm:$0xff] }
 0x38a   : > { %11093 = vst [vmem:[#allocation363_spill] sm:$0xff] %v8260_v62  ;;  %11095 = vst [vmem:[#allocation364_spill] sm:$0xff] %v8263_v9  ;;  %v8281_v62 = vmul.f32 %v3017_v50, %v11105_v25  ;;  %v8284_v9 = vmul.f32 %v3018_v8, %v11107_v43  ;;  %v8290_v27 = vmul.f32 %v3018_v8, %v11110_v26  ;;  %v11114_v40 = vld [vmem:[#allocation161_spill] sm:$0xff]  ;;  %v11115_v21 = vld [vmem:[#allocation162_spill] sm:$0xff] }
 0x38b   : > { %11097 = vst [vmem:[#allocation365_spill] sm:$0xff] %v8266_v7  ;;  %11099 = vst [vmem:[#allocation366_spill] sm:$0xff] %v8269_v32  ;;  %v8287_v7 = vmul.f32 %v3018_v8, %v11108_v44  ;;  %v8293_v32 = vmul.f32 %v3018_v8, %v11112_v0  ;;  %v11117_v50 = vld [vmem:[#allocation166_spill] sm:$0xff]  ;;  %v11119_v43 = vld [vmem:[#allocation167_spill] sm:$0xff] }
 0x38c   : > { %11102 = vst [vmem:[#allocation367_spill] sm:$0xff] %v8275_v14  ;;  %11104 = vst [vmem:[#allocation368_spill] sm:$0xff] %v8278_v10  ;;  %v8296_v14 = vmul.f32 %v3019_v6, %v11114_v40  ;;  %v8299_v10 = vmul.f32 %v3019_v6, %v11115_v21  ;;  %v8302_v25 = vmul.f32 %v3019_v6, %v11117_v50  ;;  %v11121_v44 = vld [vmem:[#allocation173_spill] sm:$0xff]  ;;  %v11122_v26 = vld [vmem:[#allocation174_spill] sm:$0xff] }
 0x38d   : > { %11106 = vst [vmem:[#allocation369_spill] sm:$0xff] %v8281_v62  ;;  %11109 = vst [vmem:[#allocation370_spill] sm:$0xff] %v8287_v7  ;;  %v8305_v62 = vmul.f32 %v3019_v6, %v11119_v43  ;;  %v8308_v7 = vmul.f32 %v3020_v46, %v11121_v44  ;;  %v11124_v8 = vld [vmem:[#allocation175_spill] sm:$0xff]  ;;  %v11126_v40 = vld [vmem:[#allocation176_spill] sm:$0xff] }
 0x38e   : > { %11111 = vst [vmem:[#allocation371_spill] sm:$0xff] %v8290_v27  ;;  %11113 = vst [vmem:[#allocation372_spill] sm:$0xff] %v8293_v32  ;;  %v8311_v27 = vmul.f32 %v3020_v46, %v11122_v26  ;;  %v8314_v0 = vmul.f32 %v3020_v46, %v11124_v8  ;;  %v8317_v32 = vmul.f32 %v3020_v46, %v11126_v40  ;;  %v11128_v21 = vld [vmem:[#allocation177_spill] sm:$0xff]  ;;  %v11129_v50 = vld [vmem:[#allocation178_spill] sm:$0xff] }
 0x38f   : > { %11116 = vst [vmem:[#allocation193_spill] sm:$0xff] %v8299_v10  ;;  %11118 = vst [vmem:[#allocation190_spill] sm:$0xff] %v8302_v25  ;;  %v8320_v10 = vmul.f32 %v3021_v54, %v11128_v21  ;;  %v8323_v25 = vmul.f32 %v3021_v54, %v11129_v50  ;;  %v11131_v6 = vld [vmem:[#allocation179_spill] sm:$0xff]  ;;  %v11133_v44 = vld [vmem:[#allocation180_spill] sm:$0xff] }
 0x390   : > { %11120 = vst [vmem:[#allocation194_spill] sm:$0xff] %v8305_v62  ;;  %11123 = vst [vmem:[#allocation191_spill] sm:$0xff] %v8311_v27  ;;  %v8326_v43 = vmul.f32 %v3021_v54, %v11131_v6  ;;  %v8329_v62 = vmul.f32 %v3021_v54, %v11133_v44  ;;  %v11135_v26 = vld [vmem:[#allocation181_spill] sm:$0xff]  ;;  %v11136_v8 = vld [vmem:[#allocation182_spill] sm:$0xff] }
 0x391   : > { %11125 = vst [vmem:[#allocation195_spill] sm:$0xff] %v8314_v0  ;;  %11127 = vst [vmem:[#allocation192_spill] sm:$0xff] %v8317_v32  ;;  %v8332_v27 = vmul.f32 %v3022_v58, %v11135_v26  ;;  %v8335_v0 = vmul.f32 %v3022_v58, %v11136_v8  ;;  %v11138_v46 = vld [vmem:[#allocation183_spill] sm:$0xff]  ;;  %v11139_v21 = vld [vmem:[#allocation184_spill] sm:$0xff] }
 0x392   : > { %11130 = vst [vmem:[#allocation196_spill] sm:$0xff] %v8323_v25  ;;  %11132 = vst [vmem:[#allocation197_spill] sm:$0xff] %v8326_v43  ;;  %v8338_v40 = vmul.f32 %v3022_v58, %v11138_v46  ;;  %v8341_v32 = vmul.f32 %v3022_v58, %v11139_v21  ;;  %v11141_v50 = vld [vmem:[#allocation185_spill] sm:$0xff]  ;;  %v11142_v6 = vld [vmem:[#allocation186_spill] sm:$0xff] }
 0x393   : > { %11134 = vst [vmem:[#allocation201_spill] sm:$0xff] %v8329_v62  ;;  %11137 = vst [vmem:[#allocation198_spill] sm:$0xff] %v8335_v0  ;;  %v8344_v25 = vmul.f32 %v3023_v63, %v11141_v50  ;;  %v8347_v43 = vmul.f32 %v3023_v63, %v11142_v6  ;;  %v11143_v54 = vld [vmem:[#allocation187_spill] sm:$0xff]  ;;  %v11145_v26 = vld [vmem:[#allocation188_spill] sm:$0xff] }
 0x394   : > { %11140 = vst [vmem:[#allocation202_spill] sm:$0xff] %v8341_v32  ;;  %v8350_v44 = vmul.f32 %v3023_v63, %v11143_v54  ;;  %v8353_v62 = vmul.f32 %v3023_v63, %v11145_v26  ;;  %v11147_v8 = vld [vmem:[#allocation189_spill] sm:$0xff]  ;;  %v11151_v21 = vld [vmem:[#allocation302_spill] sm:$0xff]  ;;  %v11155_v54 = vld [vmem:[#allocation303_spill] sm:$0xff] }
 0x395   : > { %v8357_v0 = vmul.f32 %v8192_v18, %v11147_v8  ;;  %v11149_v46 = vld [vmem:[#allocation305_spill] sm:$0xff]  ;;  %v8365_v50 = vmul.f32 %v8192_v18, %v11151_v21  ;;  %v11153_v6 = vld [vmem:[#allocation306_spill] sm:$0xff]  ;;  %v11156_v63 = vld [vmem:[#allocation307_spill] sm:$0xff] }
 0x396   : > { %11144 = vst [vmem:[#allocation199_spill] sm:$0xff] %v8350_v44  ;;  %11146 = vst [vmem:[#allocation203_spill] sm:$0xff] %v8353_v62  ;;  %v8361_v58 = vmul.f32 %v8192_v18, %v11149_v46  ;;  %v8369_v32 = vmul.f32 %v8192_v18, %v11153_v6  ;;  %v8372_v44 = vmul.f32 %v3024_v24, %v11155_v54  ;;  %v11157_v8 = vld [vmem:[#allocation304_spill] sm:$0xff]  ;;  %v11163_v6 = vld [vmem:[#allocation310_spill] sm:$0xff] }
 0x397   : > { %11148 = vst [vmem:[#allocation200_spill] sm:$0xff] %v8357_v0  ;;  %11152 = vst [vmem:[#allocation205_spill] sm:$0xff] %v8365_v50  ;;  %v8375_v26 = vmul.f32 %v3024_v24, %v11156_v63  ;;  %v8378_v0 = vmul.f32 %v3024_v24, %v11157_v8  ;;  %v11159_v62 = vld [vmem:[#allocation308_spill] sm:$0xff]  ;;  %v11162_v50 = vld [vmem:[#allocation313_spill] sm:$0xff]  ;;  %v8393_v54 = vmul.f32 %v8200_v60, %v11163_v6 }
 0x398   : > { %11150 = vst [vmem:[#allocation204_spill] sm:$0xff] %v8361_v58  ;;  %11154 = vst [vmem:[#allocation209_spill] sm:$0xff] %v8369_v32  ;;  %v8381_v46 = vmul.f32 %v3024_v24, %v11159_v62  ;;  %v11161_v58 = vld [vmem:[#allocation309_spill] sm:$0xff]  ;;  %v8389_v18 = vmul.f32 %v8200_v60, %v11162_v50  ;;  %v11165_v63 = vld [vmem:[#allocation314_spill] sm:$0xff] }
 0x399   : > { %11158 = vst [vmem:[#allocation206_spill] sm:$0xff] %v8378_v0  ;;  %v8385_v21 = vmul.f32 %v8200_v60, %v11161_v58  ;;  %11164 = vst [vmem:[#allocation207_spill] sm:$0xff] %v8393_v54  ;;  %v8397_v32 = vmul.f32 %v8200_v60, %v11165_v63  ;;  %v11167_v8 = vld [vmem:[#allocation311_spill] sm:$0xff]  ;;  %v11172_v0 = vld [vmem:[#allocation316_spill] sm:$0xff] }
 0x39a   : > { %11160 = vst [vmem:[#allocation210_spill] sm:$0xff] %v8381_v46  ;;  %v8401_v62 = vmul.f32 %v8203_v41, %v11167_v8  ;;  %v11168_v24 = vld [vmem:[#allocation315_spill] sm:$0xff]  ;;  %v11170_v46 = vld [vmem:[#allocation312_spill] sm:$0xff]  ;;  %v8413_v6 = vmul.f32 %v8203_v41, %v11172_v0  ;;  %v11174_v54 = vld [vmem:[#allocation317_spill] sm:$0xff] }
 0x39b   : > { %11166 = vst [vmem:[#allocation211_spill] sm:$0xff] %v8397_v32  ;;  %v8405_v58 = vmul.f32 %v8203_v41, %v11168_v24  ;;  %v8409_v50 = vmul.f32 %v8203_v41, %v11170_v46  ;;  %v8417_v60 = vmul.f32 %v8206_v49, %v11174_v54  ;;  %v11175_v63 = vld [vmem:[#allocation321_spill] sm:$0xff]  ;;  %v11177_v32 = vld [vmem:[#allocation318_spill] sm:$0xff]  ;;  %v11182_v0 = vld [vmem:[#allocation323_spill] sm:$0xff] }
 0x39c   : > { %11173 = vst [vmem:[#allocation255_spill] sm:$0xff] %v8413_v6  ;;  %v8421_v8 = vmul.f32 %v8206_v49, %v11175_v63  ;;  %v8425_v24 = vmul.f32 %v8206_v49, %v11177_v32  ;;  %v8437_v54 = vmul.f32 %v8209_v5, %v11182_v0  ;;  %v11184_v6 = vld [vmem:[#allocation320_spill] sm:$0xff] }
 0x39d   : > { %11169 = vst [vmem:[#allocation208_spill] sm:$0xff] %v8405_v58  ;;  %11171 = vst [vmem:[#allocation258_spill] sm:$0xff] %v8409_v50  ;;  %v11179_v58 = vld [vmem:[#allocation322_spill] sm:$0xff]  ;;  %v11181_v50 = vld [vmem:[#allocation319_spill] sm:$0xff]  ;;  %v8441_v63 = vmul.f32 %v8209_v5, %v11184_v6 }
 0x39e   : > { %11176 = vst [vmem:[#allocation68_spill] sm:$0xff] %v8421_v8  ;;  %11178 = vst [vmem:[#allocation259_spill] sm:$0xff] %v8425_v24  ;;  %v8429_v46 = vmul.f32 %v8206_v49, %v11179_v58  ;;  %v8433_v41 = vmul.f32 %v8209_v5, %v11181_v50  ;;  %v11186_v8 = vld [vmem:[#allocation324_spill] sm:$0xff]  ;;  %v11188_v24 = vld [vmem:[#allocation325_spill] sm:$0xff] }
 0x39f   : > { %11183 = vst [vmem:[#allocation256_spill] sm:$0xff] %v8437_v54  ;;  %11185 = vst [vmem:[#allocation70_spill] sm:$0xff] %v8441_v63  ;;  %v8445_v32 = vmul.f32 %v8209_v5, %v11186_v8  ;;  %v8449_v49 = vmul.f32 %v8212_v4, %v11188_v24  ;;  %v11189_v58 = vld [vmem:[#allocation329_spill] sm:$0xff]  ;;  %v11193_v54 = vld [vmem:[#allocation330_spill] sm:$0xff] }
 0x3a0   : > { %11180 = vst [vmem:[#allocation69_spill] sm:$0xff] %v8429_v46  ;;  %v8453_v50 = vmul.f32 %v8212_v4, %v11189_v58  ;;  %v11191_v46 = vld [vmem:[#allocation326_spill] sm:$0xff]  ;;  %v8461_v6 = vmul.f32 %v8212_v4, %v11193_v54  ;;  %v11195_v63 = vld [vmem:[#allocation327_spill] sm:$0xff]  ;;  %v11203_v54 = vld [vmem:[#allocation337_spill] sm:$0xff] }
 0x3a1   : > { %11187 = vst [vmem:[#allocation260_spill] sm:$0xff] %v8445_v32  ;;  %v8457_v0 = vmul.f32 %v8212_v4, %v11191_v46  ;;  %v8465_v5 = vmul.f32 %v8215_v2, %v11195_v63  ;;  %v11196_v8 = vld [vmem:[#allocation331_spill] sm:$0xff]  ;;  %v11198_v32 = vld [vmem:[#allocation328_spill] sm:$0xff]  ;;  %v8485_v63 = vmul.f32 %v8194_v56, %v11203_v54 }
 0x3a2   : > { %11190 = vst [vmem:[#allocation261_spill] sm:$0xff] %v8453_v50  ;;  %11194 = vst [vmem:[#allocation265_spill] sm:$0xff] %v8461_v6  ;;  %v8469_v24 = vmul.f32 %v8215_v2, %v11196_v8  ;;  %v8473_v58 = vmul.f32 %v8215_v2, %v11198_v32  ;;  %v11200_v50 = vld [vmem:[#allocation332_spill] sm:$0xff]  ;;  %v11205_v6 = vld [vmem:[#allocation334_spill] sm:$0xff] }
 0x3a3   : > { %11192 = vst [vmem:[#allocation72_spill] sm:$0xff] %v8457_v0  ;;  %v8477_v46 = vmul.f32 %v8215_v2, %v11200_v50  ;;  %v11201_v0 = vld [vmem:[#allocation333_spill] sm:$0xff]  ;;  %11204 = vst [vmem:[#allocation75_spill] sm:$0xff] %v8485_v63  ;;  %v8489_v8 = vmul.f32 %v8194_v56, %v11205_v6  ;;  %v11210_v50 = vld [vmem:[#allocation339_spill] sm:$0xff] }
 0x3a4   : > { %11197 = vst [vmem:[#allocation73_spill] sm:$0xff] %v8469_v24  ;;  %11199 = vst [vmem:[#allocation262_spill] sm:$0xff] %v8473_v58  ;;  %v8481_v4 = vmul.f32 %v8194_v56, %v11201_v0  ;;  %v11207_v24 = vld [vmem:[#allocation338_spill] sm:$0xff]  ;;  %v11209_v58 = vld [vmem:[#allocation335_spill] sm:$0xff]  ;;  %v8501_v0 = vmul.f32 %v8218_v1, %v11210_v50 }
 0x3a5   : > { %11206 = vst [vmem:[#allocation263_spill] sm:$0xff] %v8489_v8  ;;  %v8493_v32 = vmul.f32 %v8194_v56, %v11207_v24  ;;  %v8497_v2 = vmul.f32 %v8218_v1, %v11209_v58  ;;  %v11214_v63 = vld [vmem:[#allocation340_spill] sm:$0xff]  ;;  %v11216_v8 = vld [vmem:[#allocation341_spill] sm:$0xff]  ;;  %v11217_v24 = vld [vmem:[#allocation342_spill] sm:$0xff] }
 0x3a6   : > { %11202 = vst [vmem:[#allocation131_spill] sm:$0xff] %v8481_v4  ;;  %11211 = vst [vmem:[#allocation133_spill] sm:$0xff] %v8501_v0  ;;  %v11212_v4 = vld [vmem:[#allocation336_spill] sm:$0xff]  ;;  %v8509_v6 = vmul.f32 %v8218_v1, %v11214_v63  ;;  %v8513_v56 = vmul.f32 %v8221_v47, %v11216_v8  ;;  %v8517_v58 = vmul.f32 %v8221_v47, %v11217_v24  ;;  %v11219_v0 = vld [vmem:[#allocation343_spill] sm:$0xff] }
 0x3a7   : > { %11208 = vst [vmem:[#allocation130_spill] sm:$0xff] %v8493_v32  ;;  %v8505_v54 = vmul.f32 %v8218_v1, %v11212_v4  ;;  %v11218_v32 = vld [vmem:[#allocation344_spill] sm:$0xff]  ;;  %v8525_v4 = vmul.f32 %v8221_v47, %v11219_v0  ;;  %v11221_v63 = vld [vmem:[#allocation346_spill] sm:$0xff]  ;;  %v8537_v24 = vmul.f32 %v8224_v30, %v7969_v42  ;;  %v8549_v0 = vmul.f32 %v8227_v53, %v7986_v16 }
 0x3a8   : > { %11215 = vst [vmem:[#allocation76_spill] sm:$0xff] %v8509_v6  ;;  %v8521_v50 = vmul.f32 %v8221_v47, %v11218_v32  ;;  %v8533_v8 = vmul.f32 %v8224_v30, %v11221_v63  ;;  %v11222_v6 = vld [vmem:[#allocation350_spill] sm:$0xff]  ;;  %v8545_v47 = vmul.f32 %v8227_v53, %v7981_v15  ;;  %v8557_v42 = vmul.f32 %v8227_v53, %v7998_v22  ;;  %v11240_v63 = vld [vmem:[#allocation353_spill] sm:$0xff] }
 0x3a9   : > { %11213 = vst [vmem:[#allocation132_spill] sm:$0xff] %v8505_v54  ;;  %v11220_v54 = vld [vmem:[#allocation345_spill] sm:$0xff]  ;;  %v8541_v32 = vmul.f32 %v8224_v30, %v11222_v6  ;;  %v8565_v15 = vmul.f32 %v8230_v17, %v8008_v33  ;;  %v8569_v16 = vmul.f32 %v8230_v17, %v8015_v51  ;;  %v8577_v22 = vmul.f32 %v8233_v20, %v8025_v61 }
 0x3aa   : > { %v8529_v1 = vmul.f32 %v8224_v30, %v11220_v54  ;;  %v8553_v54 = vmul.f32 %v8227_v53, %v7991_v3  ;;  %v8561_v30 = vmul.f32 %v8230_v17, %v8003_v38  ;;  %v8573_v3 = vmul.f32 %v8230_v17, %v8020_v34  ;;  %v11234_v53 = vld [vmem:[#allocation348_spill] sm:$0xff]  ;;  %v11238_v6 = vld [vmem:[#allocation349_spill] sm:$0xff] }
 0x3ab   : > { %v8581_v38 = vmul.f32 %v8233_v20, %v8032_v13  ;;  %v8585_v33 = vmul.f32 %v8233_v20, %v8037_v48  ;;  %v8589_v51 = vmul.f32 %v8233_v20, %v8042_v45  ;;  %v8593_v34 = vmul.f32 %v8236_v36, %v8049_v23  ;;  %v11231_v20 = vld [vmem:[#allocation351_spill] sm:$0xff] }
 0x3ac   : > { %v8597_v61 = vmul.f32 %v8236_v36, %v8054_v39  ;;  %v8601_v13 = vmul.f32 %v8236_v36, %v8059_v37  ;;  %v8605_v48 = vmul.f32 %v8236_v36, %v8066_v59  ;;  %v8609_v45 = vmul.f32 %v8196_v31, %v8071_v19  ;;  %v11229_v36 = vld [vmem:[#allocation347_spill] sm:$0xff] }
 0x3ad   : > { %v8613_v23 = vmul.f32 %v8196_v31, %v8076_v12  ;;  %v8617_v39 = vmul.f32 %v8196_v31, %v8083_v35  ;;  %v8621_v37 = vmul.f32 %v8196_v31, %v8088_v29  ;;  %v8625_v59 = vmul.f32 %v8239_v28, %v8093_v11  ;;  %v11232_v29 = vld [vmem:[#allocation357_spill] sm:$0xff] }
 0x3ae   : > { %11223 = vst [vmem:[#allocation267_spill] sm:$0xff] %v8609_v45  ;;  %v8629_v19 = vmul.f32 %v8239_v28, %v8100_v55  ;;  %v8633_v12 = vmul.f32 %v8239_v28, %v8105_v52  ;;  %v8637_v35 = vmul.f32 %v8239_v28, %v11229_v36  ;;  %v8641_v17 = vmul.f32 %v11232_v29, %v11231_v20  ;;  %v11236_v55 = vld [vmem:[#allocation352_spill] sm:$0xff]  ;;  %v11241_v28 = vld [vmem:[#allocation358_spill] sm:$0xff] }
 0x3af   : > { %11224 = vst [vmem:[#allocation134_spill] sm:$0xff] %v8613_v23  ;;  %11225 = vst [vmem:[#allocation135_spill] sm:$0xff] %v8617_v39  ;;  %v8645_v11 = vmul.f32 %v11232_v29, %v11234_v53  ;;  %v8649_v31 = vmul.f32 %v11232_v29, %v11236_v55  ;;  %v8653_v52 = vmul.f32 %v11232_v29, %v11238_v6  ;;  %v11245_v53 = vld [vmem:[#allocation108_spill] sm:$0xff]  ;;  %v11247_v39 = vld [vmem:[#allocation355_spill] sm:$0xff] }
 0x3b0   : > { %11226 = vst [vmem:[#allocation141_spill] sm:$0xff] %v8621_v37  ;;  %11227 = vst [vmem:[#allocation77_spill] sm:$0xff] %v8629_v19  ;;  %v8657_v36 = vmul.f32 %v11241_v28, %v11240_v63  ;;  %v11243_v37 = vld [vmem:[#allocation354_spill] sm:$0xff]  ;;  %v8669_v55 = vmul.f32 %v11241_v28, %v11247_v39  ;;  %v11250_v29 = vld [vmem:[#allocation359_spill] sm:$0xff] }
 0x3b1   : > { %11228 = vst [vmem:[#allocation264_spill] sm:$0xff] %v8633_v12  ;;  %11230 = vst [vmem:[#allocation138_spill] sm:$0xff] %v8637_v35  ;;  %v8661_v20 = vmul.f32 %v11241_v28, %v11243_v37  ;;  %v8665_v35 = vmul.f32 %v11241_v28, %v11245_v53  ;;  %v11254_v37 = vld [vmem:[#allocation112_spill] sm:$0xff]  ;;  %v11256_v53 = vld [vmem:[#allocation107_spill] sm:$0xff] }
 0x3b2   : > { %11233 = vst [vmem:[#allocation142_spill] sm:$0xff] %v8641_v17  ;;  %11235 = vst [vmem:[#allocation139_spill] sm:$0xff] %v8645_v11  ;;  %v8681_v12 = vmul.f32 %v11250_v29, %v11254_v37  ;;  %v11258_v39 = vld [vmem:[#allocation113_spill] sm:$0xff]  ;;  %v11259_v28 = vld [vmem:[#allocation360_spill] sm:$0xff] }
 0x3b3   : > { %11237 = vst [vmem:[#allocation78_spill] sm:$0xff] %v8649_v31  ;;  %11239 = vst [vmem:[#allocation268_spill] sm:$0xff] %v8653_v52  ;;  %v11249_v31 = vld [vmem:[#allocation111_spill] sm:$0xff]  ;;  %v11252_v52 = vld [vmem:[#allocation106_spill] sm:$0xff] }
 0x3b4   : > { %11242 = vst [vmem:[#allocation143_spill] sm:$0xff] %v8657_v36  ;;  %11244 = vst [vmem:[#allocation140_spill] sm:$0xff] %v8661_v20  ;;  %v8673_v6 = vmul.f32 %v11250_v29, %v11249_v31  ;;  %v8677_v63 = vmul.f32 %v11250_v29, %v11252_v52  ;;  %v11261_v31 = vld [vmem:[#allocation116_spill] sm:$0xff]  ;;  %v11263_v52 = vld [vmem:[#allocation118_spill] sm:$0xff] }
 0x3b5   : > { %11246 = vst [vmem:[#allocation146_spill] sm:$0xff] %v8665_v35  ;;  %11248 = vst [vmem:[#allocation79_spill] sm:$0xff] %v8669_v55  ;;  %v8685_v35 = vmul.f32 %v11250_v29, %v11256_v53  ;;  %v8689_v55 = vmul.f32 %v11259_v28, %v11258_v39  ;;  %v8693_v23 = vmul.f32 %v11259_v28, %v11261_v31  ;;  %v11265_v20 = vld [vmem:[#allocation117_spill] sm:$0xff]  ;;  %v11272_v11 = vld [vmem:[#allocation123_spill] sm:$0xff] }
 0x3b6   : > { %11251 = vst [vmem:[#allocation269_spill] sm:$0xff] %v8673_v6  ;;  %11253 = vst [vmem:[#allocation147_spill] sm:$0xff] %v8677_v63  ;;  %v8697_v63 = vmul.f32 %v11259_v28, %v11263_v52  ;;  %v8701_v37 = vmul.f32 %v11259_v28, %v11265_v20  ;;  %v11268_v29 = vld [vmem:[#allocation361_spill] sm:$0xff]  ;;  %v11277_v19 = vld [vmem:[#allocation362_spill] sm:$0xff] }
 0x3b7   : > { %11255 = vst [vmem:[#allocation155_spill] sm:$0xff] %v8681_v12  ;;  %11257 = vst [vmem:[#allocation148_spill] sm:$0xff] %v8685_v35  ;;  %v11267_v12 = vld [vmem:[#allocation122_spill] sm:$0xff]  ;;  %v11270_v35 = vld [vmem:[#allocation121_spill] sm:$0xff]  ;;  %v8713_v31 = vmul.f32 %v11268_v29, %v11272_v11 }
 0x3b8   : > { %11260 = vst [vmem:[#allocation80_spill] sm:$0xff] %v8689_v55  ;;  %11262 = vst [vmem:[#allocation273_spill] sm:$0xff] %v8693_v23  ;;  %v8705_v53 = vmul.f32 %v11268_v29, %v11267_v12  ;;  %v8709_v39 = vmul.f32 %v11268_v29, %v11270_v35  ;;  %v11274_v23 = vld [vmem:[#allocation125_spill] sm:$0xff]  ;;  %v11279_v28 = vld [vmem:[#allocation128_spill] sm:$0xff] }
 0x3b9   : > { %11264 = vst [vmem:[#allocation158_spill] sm:$0xff] %v8697_v63  ;;  %11266 = vst [vmem:[#allocation153_spill] sm:$0xff] %v8701_v37  ;;  %v8717_v52 = vmul.f32 %v11268_v29, %v11274_v23  ;;  %v11276_v63 = vld [vmem:[#allocation126_spill] sm:$0xff]  ;;  %v8725_v12 = vmul.f32 %v11277_v19, %v11279_v28  ;;  %v11281_v35 = vld [vmem:[#allocation129_spill] sm:$0xff]  ;;  %v3333_v23 = vrot.slane %v8272_v57, 7  ;;  %v3336_v29 = vrot.slane %v8284_v9, 6 }
 0x3ba   : > { %11269 = vst [vmem:[#allocation159_spill] sm:$0xff] %v8705_v53  ;;  %11271 = vst [vmem:[#allocation81_spill] sm:$0xff] %v8709_v39  ;;  %v8721_v20 = vmul.f32 %v11277_v19, %v11276_v63  ;;  %v8730_v37 = vmul.f32 %v11277_v19, %v11281_v35  ;;  %v11283_v11 = vld [vmem:[#allocation356_spill] sm:$0xff]  ;;  %v3339_v63 = vrot.slane %v8296_v14, 5  ;;  %v3345_v28 = vrot.slane %v8320_v10, 3  ;;  %v11285_v39 = vld [vmem:[#allocation363_spill] sm:$0xff] }
 0x3bb   : > { %11273 = vst [vmem:[#allocation270_spill] sm:$0xff] %v8713_v31  ;;  %11275 = vst [vmem:[#allocation154_spill] sm:$0xff] %v8717_v52  ;;  %v8734_v31 = vmul.f32 %v11277_v19, %v11283_v11  ;;  %v3342_v52 = vrot.slane %v8308_v7, 4  ;;  %v3335_v35 = vsel %vm3334_vm4, %v3333_v23, %v11285_v39  ;;  %v11287_v11 = vld [vmem:[#allocation370_spill] sm:$0xff]  ;;  %v11288_v14 = vld [vmem:[#allocation193_spill] sm:$0xff] }
 0x3bc   : > { %11278 = vst [vmem:[#allocation160_spill] sm:$0xff] %v8721_v20  ;;  %11280 = vst [vmem:[#allocation163_spill] sm:$0xff] %v8725_v12  ;;  %v3348_v12 = vrot.slane %v8332_v27, 2  ;;  %v11286_v20 = vld [vmem:[#allocation367_spill] sm:$0xff]  ;;  %v3338_v9 = vsel %vm3337_vm5, %v3336_v29, %v3335_v35  ;;  %v3358_v57 = vrot.slane %v11288_v14, 5  ;;  %v11290_v10 = vld [vmem:[#allocation196_spill] sm:$0xff] }
 0x3bd   : > { %11282 = vst [vmem:[#allocation82_spill] sm:$0xff] %v8730_v37  ;;  %11284 = vst [vmem:[#allocation274_spill] sm:$0xff] %v8734_v31  ;;  %v3351_v37 = vrot.slane %v8344_v25, 1  ;;  %v3354_v19 = vrot.slane %v11286_v20, 7  ;;  %v3356_v31 = vrot.slane %v11287_v11, 6  ;;  %v11289_v7 = vld [vmem:[#allocation191_spill] sm:$0xff]  ;;  %v3341_v27 = vsel %vm3340_vm6, %v3339_v63, %v3338_v9 }
 0x3be   : > { %v3360_v53 = vrot.slane %v11289_v7, 4  ;;  %v3362_v45 = vrot.slane %v11290_v10, 3  ;;  %v11291_v55 = vld [vmem:[#allocation364_spill] sm:$0xff]  ;;  %v11292_v25 = vld [vmem:[#allocation198_spill] sm:$0xff]  ;;  %v3366_v20 = vrot.slane %v8347_v43, 1  ;;  %v3344_v11 = vsel %vm3343_vm7, %v3342_v52, %v3341_v27  ;;  %v11294_v14 = vld [vmem:[#allocation371_spill] sm:$0xff] }
 0x3bf   : > { %v3355_v39 = vsel %vm3334_vm4, %v3354_v19, %v11291_v55  ;;  %v3364_v23 = vrot.slane %v11292_v25, 2  ;;  %v11293_v29 = vld [vmem:[#allocation368_spill] sm:$0xff]  ;;  %v3370_v36 = vrot.slane %v11294_v14, 6  ;;  %v3347_v7 = vsel %vm3346_vm8, %v3345_v28, %v3344_v11  ;;  %v11295_v63 = vld [vmem:[#allocation190_spill] sm:$0xff]  ;;  %v11296_v17 = vld [vmem:[#allocation195_spill] sm:$0xff] }
 0x3c0   : > { %v3357_v6 = vsel %vm3337_vm5, %v3356_v31, %v3355_v39  ;;  %v3368_v35 = vrot.slane %v11293_v29, 7  ;;  %v3372_v9 = vrot.slane %v11295_v63, 5  ;;  %v3374_v55 = vrot.slane %v11296_v17, 4  ;;  %v11297_v25 = vld [vmem:[#allocation365_spill] sm:$0xff] }
 0x3c1   : > { %v3359_v10 = vsel %vm3340_vm6, %v3358_v57, %v3357_v6  ;;  %v3350_v19 = vsel %vm3349_vm9, %v3348_v12, %v3347_v7  ;;  %v11298_v31 = vld [vmem:[#allocation197_spill] sm:$0xff]  ;;  %v3378_v6 = vrot.slane %v8338_v40, 2  ;;  %v11299_v12 = vld [vmem:[#allocation199_spill] sm:$0xff]  ;;  %v11302_v40 = vld [vmem:[#allocation194_spill] sm:$0xff] }
 0x3c2   : > { %v3361_v43 = vsel %vm3343_vm7, %v3360_v53, %v3359_v10  ;;  %v3369_v52 = vsel %vm3334_vm4, %v3368_v35, %v11297_v25  ;;  %v3376_v27 = vrot.slane %v11298_v31, 3  ;;  %v3353_v39 = vsel %vm3352_vm10, %v3351_v37, %v3350_v19  ;;  %v11300_v53 = vld [vmem:[#allocation369_spill] sm:$0xff]  ;;  %v11303_v10 = vld [vmem:[#allocation366_spill] sm:$0xff] }
 0x3c3   : > { %v3363_v29 = vsel %vm3346_vm8, %v3362_v45, %v3361_v43  ;;  %v3371_v28 = vsel %vm3337_vm5, %v3370_v36, %v3369_v52  ;;  %v3380_v11 = vrot.slane %v11299_v12, 1  ;;  %v3382_v14 = vrot.slane %v11300_v53, 7  ;;  %3580 = vst [vmem:[%s8779_s8] sm:$0xff] %v3353_v39  ;;  %v11301_v36 = vld [vmem:[#allocation372_spill] sm:$0xff]  ;;  %v11305_v43 = vld [vmem:[#allocation201_spill] sm:$0xff]  ;;  %v11307_v39 = vld [vmem:[#allocation203_spill] sm:$0xff] }
 0x3c4   : > { %v3365_v57 = vsel %vm3349_vm9, %v3364_v23, %v3363_v29  ;;  %v3373_v17 = vsel %vm3340_vm6, %v3372_v9, %v3371_v28  ;;  %v3384_v35 = vrot.slane %v11301_v36, 6  ;;  %v3386_v7 = vrot.slane %v11302_v40, 5  ;;  %v11304_v9 = vld [vmem:[#allocation192_spill] sm:$0xff] }
 0x3c5   : > { %v3367_v37 = vsel %vm3352_vm10, %v3366_v20, %v3365_v57  ;;  %v3375_v45 = vsel %vm3343_vm7, %v3374_v55, %v3373_v17  ;;  %v3383_v63 = vsel %vm3334_vm4, %v3382_v14, %v11303_v10  ;;  %v3388_v19 = vrot.slane %v11304_v9, 4  ;;  %v11306_v55 = vld [vmem:[#allocation202_spill] sm:$0xff]  ;;  %v11310_v10 = vld [vmem:[#allocation68_spill] sm:$0xff] }
 0x3c6   : > { %v3377_v23 = vsel %vm3346_vm8, %v3376_v27, %v3375_v45  ;;  %v3390_v25 = vrot.slane %v11305_v43, 3  ;;  %3581 = vst [vmem:[%s8779_s8 + $0x8] sm:$0xff] %v3367_v37  ;;  %v3385_v20 = vsel %vm3337_vm5, %v3384_v35, %v3383_v63  ;;  %v3392_v31 = vrot.slane %v11306_v55, 2  ;;  %v11308_v45 = vld [vmem:[#allocation200_spill] sm:$0xff] }
 0x3c7   : > { %v3379_v52 = vsel %vm3349_vm9, %v3378_v6, %v3377_v23  ;;  %v3394_v29 = vrot.slane %v11307_v39, 1  ;;  %v3387_v27 = vsel %vm3340_vm6, %v3386_v7, %v3385_v20  ;;  %v3396_v57 = vrot.slane %v8372_v44, 7  ;;  %v11309_v7 = vld [vmem:[#allocation208_spill] sm:$0xff]  ;;  %v11314_v20 = vld [vmem:[#allocation73_spill] sm:$0xff] }
 0x3c8   : > { %v3381_v28 = vsel %vm3352_vm10, %v3380_v11, %v3379_v52  ;;  %v3398_v17 = vrot.slane %v8385_v21, 6  ;;  %v3389_v12 = vsel %vm3343_vm7, %v3388_v19, %v3387_v27  ;;  %v3400_v53 = vrot.slane %v8401_v62, 5  ;;  %v11311_v9 = vld [vmem:[#allocation204_spill] sm:$0xff]  ;;  %v11316_v27 = vld [vmem:[#allocation207_spill] sm:$0xff] }
 0x3c9   : > { %v3402_v6 = vrot.slane %v8417_v60, 4  ;;  %v3404_v14 = vrot.slane %v8433_v41, 3  ;;  %3582 = vst [vmem:[%s8779_s8 + $0x10] sm:$0xff] %v3381_v28  ;;  %v3391_v37 = vsel %vm3346_vm8, %v3390_v25, %v3389_v12  ;;  %v3397_v11 = vsel %vm3334_vm4, %v3396_v57, %v11308_v45  ;;  %v11312_v19 = vld [vmem:[#allocation256_spill] sm:$0xff]  ;;  %v11313_v25 = vld [vmem:[#allocation261_spill] sm:$0xff]  ;;  %v11319_v45 = vld [vmem:[#allocation259_spill] sm:$0xff] }
 0x3ca   : > { %v3406_v36 = vrot.slane %v8449_v49, 2  ;;  %v3408_v44 = vrot.slane %v8465_v5, 1  ;;  %v3393_v21 = vsel %vm3349_vm9, %v3392_v31, %v3391_v37  ;;  %v3399_v35 = vsel %vm3337_vm5, %v3398_v17, %v3397_v11  ;;  %v11315_v31 = vld [vmem:[#allocation206_spill] sm:$0xff] }
 0x3cb   : > { %v3410_v62 = vrot.slane %v8375_v26, 7  ;;  %v3412_v60 = vrot.slane %v8389_v18, 6  ;;  %v3395_v41 = vsel %vm3352_vm10, %v3394_v29, %v3393_v21  ;;  %v3401_v40 = vsel %vm3340_vm6, %v3400_v53, %v3399_v35  ;;  %v11317_v17 = vld [vmem:[#allocation258_spill] sm:$0xff] }
 0x3cc   : > { %v3414_v23 = vrot.slane %v11309_v7, 5  ;;  %v3416_v63 = vrot.slane %v11310_v10, 4  ;;  %v3403_v49 = vsel %vm3343_vm7, %v3402_v6, %v3401_v40  ;;  %v3418_v43 = vrot.slane %v11312_v19, 3  ;;  %3583 = vst [vmem:[%s8779_s8 + $0x18] sm:$0xff] %v3395_v41  ;;  %v11322_v7 = vld [vmem:[#allocation262_spill] sm:$0xff] }
 0x3cd   : > { %v3411_v5 = vsel %vm3334_vm4, %v3410_v62, %v11311_v9  ;;  %v3420_v52 = vrot.slane %v11313_v25, 2  ;;  %v3405_v26 = vsel %vm3346_vm8, %v3404_v14, %v3403_v49  ;;  %v3422_v55 = vrot.slane %v11314_v20, 1  ;;  %v11318_v14 = vld [vmem:[#allocation205_spill] sm:$0xff]  ;;  %v11323_v10 = vld [vmem:[#allocation210_spill] sm:$0xff] }
 0x3ce   : > { %v3413_v18 = vsel %vm3337_vm5, %v3412_v60, %v3411_v5  ;;  %v3424_v39 = vrot.slane %v11315_v31, 7  ;;  %v3407_v29 = vsel %vm3349_vm9, %v3406_v36, %v3405_v26  ;;  %v3426_v57 = vrot.slane %v11316_v27, 6  ;;  %v11320_v36 = vld [vmem:[#allocation70_spill] sm:$0xff]  ;;  %v11321_v60 = vld [vmem:[#allocation72_spill] sm:$0xff]  ;;  %v11324_v5 = vld [vmem:[#allocation211_spill] sm:$0xff] }
 0x3cf   : > { %v3415_v28 = vsel %vm3340_vm6, %v3414_v23, %v3413_v18  ;;  %v3428_v12 = vrot.slane %v11317_v17, 5  ;;  %v3409_v53 = vsel %vm3352_vm10, %v3408_v44, %v3407_v29  ;;  %v3430_v11 = vrot.slane %v11319_v45, 4  ;;  %v11326_v18 = vld [vmem:[#allocation209_spill] sm:$0xff] }
 0x3d0   : > { %v3417_v6 = vsel %vm3343_vm7, %v3416_v63, %v3415_v28  ;;  %v3425_v37 = vsel %vm3334_vm4, %v3424_v39, %v11318_v14  ;;  %v3432_v62 = vrot.slane %v11320_v36, 3  ;;  %v3434_v41 = vrot.slane %v11321_v60, 2  ;;  %3584 = vst [vmem:[%s8779_s8 + $0x20] sm:$0xff] %v3409_v53  ;;  %v11328_v39 = vld [vmem:[#allocation260_spill] sm:$0xff]  ;;  %v11329_v27 = vld [vmem:[#allocation265_spill] sm:$0xff] }
 0x3d1   : > { %v3419_v21 = vsel %vm3346_vm8, %v3418_v43, %v3417_v6  ;;  %v3427_v35 = vsel %vm3337_vm5, %v3426_v57, %v3425_v37  ;;  %v3436_v23 = vrot.slane %v11322_v7, 1  ;;  %v3438_v63 = vrot.slane %v11323_v10, 7  ;;  %v11325_v43 = vld [vmem:[#allocation255_spill] sm:$0xff] }
 0x3d2   : > { %v3421_v40 = vsel %vm3349_vm9, %v3420_v52, %v3419_v21  ;;  %v3429_v44 = vsel %vm3340_vm6, %v3428_v12, %v3427_v35  ;;  %v3440_v19 = vrot.slane %v11324_v5, 6  ;;  %v3442_v25 = vrot.slane %v11325_v43, 5  ;;  %v11327_v52 = vld [vmem:[#allocation69_spill] sm:$0xff] }
 0x3d3   : > { %v3423_v49 = vsel %vm3352_vm10, %v3422_v55, %v3421_v40  ;;  %v3431_v9 = vsel %vm3343_vm7, %v3430_v11, %v3429_v44  ;;  %v3439_v20 = vsel %vm3334_vm4, %v3438_v63, %v11326_v18  ;;  %v3444_v31 = vrot.slane %v11327_v52, 4 }
 0x3d4   : > { %v3433_v26 = vsel %vm3346_vm8, %v3432_v62, %v3431_v9  ;;  %v3446_v29 = vrot.slane %v11328_v39, 3  ;;  %3585 = vst [vmem:[%s8779_s8 + $0x28] sm:$0xff] %v3423_v49  ;;  %v3441_v55 = vsel %vm3337_vm5, %v3440_v19, %v3439_v20  ;;  %v3448_v57 = vrot.slane %v11329_v27, 2 }
 0x3d5   : > { %v3435_v28 = vsel %vm3349_vm9, %v3434_v41, %v3433_v26  ;;  %v3450_v17 = vrot.slane %v8477_v46, 1  ;;  %v3443_v53 = vsel %vm3340_vm6, %v3442_v25, %v3441_v55  ;;  %v3452_v6 = vrot.slane %v8497_v2, 7  ;;  %v11330_v46 = vld [vmem:[#allocation131_spill] sm:$0xff] }
 0x3d6   : > { %v3437_v12 = vsel %vm3352_vm10, %v3436_v23, %v3435_v28  ;;  %v3454_v14 = vrot.slane %v8513_v56, 6  ;;  %v3445_v37 = vsel %vm3343_vm7, %v3444_v31, %v3443_v53  ;;  %v3456_v45 = vrot.slane %v8529_v1, 5  ;;  %v11331_v1 = vld [vmem:[#allocation133_spill] sm:$0xff]  ;;  %v11332_v23 = vld [vmem:[#allocation75_spill] sm:$0xff]  ;;  %v11335_v28 = vld [vmem:[#allocation76_spill] sm:$0xff] }
 0x3d7   : > { %v3458_v11 = vrot.slane %v8545_v47, 4  ;;  %v3460_v21 = vrot.slane %v8561_v30, 3  ;;  %3586 = vst [vmem:[%s8779_s8 + $0x30] sm:$0xff] %v3437_v12  ;;  %v3447_v35 = vsel %vm3346_vm8, %v3446_v29, %v3445_v37  ;;  %v3453_v36 = vsel %vm3334_vm4, %v3452_v6, %v11330_v46  ;;  %v11334_v26 = vld [vmem:[#allocation263_spill] sm:$0xff] }
 0x3d8   : > { %v3462_v62 = vrot.slane %v8577_v22, 2  ;;  %v3464_v2 = vrot.slane %v8593_v34, 1  ;;  %v3449_v56 = vsel %vm3349_vm9, %v3448_v57, %v3447_v35  ;;  %v3455_v60 = vsel %vm3337_vm5, %v3454_v14, %v3453_v36  ;;  %v11339_v36 = vld [vmem:[#allocation269_spill] sm:$0xff] }
 0x3d9   : > { %v3466_v41 = vrot.slane %v11331_v1, 7  ;;  %v3468_v47 = vrot.slane %v8517_v58, 6  ;;  %v3451_v30 = vsel %vm3352_vm10, %v3450_v17, %v3449_v56  ;;  %v3457_v40 = vsel %vm3340_vm6, %v3456_v45, %v3455_v60  ;;  %v11342_v1 = vld [vmem:[#allocation159_spill] sm:$0xff] }
 0x3da   : > { %v3470_v44 = vrot.slane %v8533_v8, 5  ;;  %v3472_v7 = vrot.slane %v8549_v0, 4  ;;  %v3459_v22 = vsel %vm3343_vm7, %v3458_v11, %v3457_v40  ;;  %v3474_v10 = vrot.slane %v8565_v15, 3  ;;  %3587 = vst [vmem:[%s8779_s8 + $0x38] sm:$0xff] %v3451_v30  ;;  %v11333_v8 = vld [vmem:[#allocation132_spill] sm:$0xff] }
 0x3db   : > { %v3467_v34 = vsel %vm3334_vm4, %v3466_v41, %v11332_v23  ;;  %v3476_v63 = vrot.slane %v8581_v38, 2  ;;  %v3461_v58 = vsel %vm3346_vm8, %v3460_v21, %v3459_v22  ;;  %v3478_v9 = vrot.slane %v8597_v61, 1  ;;  %v11337_v21 = vld [vmem:[#allocation142_spill] sm:$0xff]  ;;  %v11345_v22 = vld [vmem:[#allocation139_spill] sm:$0xff] }
 0x3dc   : > { %v3469_v49 = vsel %vm3337_vm5, %v3468_v47, %v3467_v34  ;;  %v3480_v5 = vrot.slane %v11333_v8, 7  ;;  %v3463_v0 = vsel %vm3349_vm9, %v3462_v62, %v3461_v58  ;;  %v3482_v43 = vrot.slane %v8521_v50, 6 }
 0x3dd   : > { %v3471_v19 = vsel %vm3340_vm6, %v3470_v44, %v3469_v49  ;;  %v3484_v15 = vrot.slane %v8537_v24, 5  ;;  %v3465_v38 = vsel %vm3352_vm10, %v3464_v2, %v3463_v0  ;;  %v3486_v20 = vrot.slane %v8553_v54, 4  ;;  %v11340_v2 = vld [vmem:[#allocation80_spill] sm:$0xff]  ;;  %v11344_v44 = vld [vmem:[#allocation77_spill] sm:$0xff]  ;;  %v11347_v49 = vld [vmem:[#allocation147_spill] sm:$0xff] }
 0x3de   : > { %v3473_v25 = vsel %vm3343_vm7, %v3472_v7, %v3471_v19  ;;  %v3481_v18 = vsel %vm3334_vm4, %v3480_v5, %v11334_v26  ;;  %v3488_v31 = vrot.slane %v8569_v16, 3  ;;  %v3490_v50 = vrot.slane %v8585_v33, 2  ;;  %3588 = vst [vmem:[%s8779_s8 + $0x40] sm:$0xff] %v3465_v38  ;;  %v11336_v33 = vld [vmem:[#allocation130_spill] sm:$0xff]  ;;  %v11349_v19 = vld [vmem:[#allocation273_spill] sm:$0xff] }
 0x3df   : > { %v3475_v61 = vsel %vm3346_vm8, %v3474_v10, %v3473_v25  ;;  %v3483_v52 = vsel %vm3337_vm5, %v3482_v43, %v3481_v18  ;;  %v3492_v29 = vrot.slane %v8601_v13, 1  ;;  %v3494_v55 = vrot.slane %v11335_v28, 7  ;;  %v11348_v5 = vld [vmem:[#allocation134_spill] sm:$0xff]  ;;  %v11351_v18 = vld [vmem:[#allocation163_spill] sm:$0xff] }
 0x3e0   : > { %v3477_v24 = vsel %vm3349_vm9, %v3476_v63, %v3475_v61  ;;  %v3485_v39 = vsel %vm3340_vm6, %v3484_v15, %v3483_v52  ;;  %v3496_v57 = vrot.slane %v8525_v4, 6  ;;  %v3498_v17 = vrot.slane %v8541_v32, 5  ;;  %v11346_v63 = vld [vmem:[#allocation140_spill] sm:$0xff]  ;;  %v11350_v15 = vld [vmem:[#allocation81_spill] sm:$0xff] }
 0x3e1   : > { %v3479_v54 = vsel %vm3352_vm10, %v3478_v9, %v3477_v24  ;;  %v3487_v27 = vsel %vm3343_vm7, %v3486_v20, %v3485_v39  ;;  %v3495_v12 = vsel %vm3334_vm4, %v3494_v55, %v11336_v33  ;;  %v3500_v53 = vrot.slane %v8557_v42, 4  ;;  %v11352_v61 = vld [vmem:[#allocation264_spill] sm:$0xff]  ;;  %v11353_v24 = vld [vmem:[#allocation78_spill] sm:$0xff] }
 0x3e2   : > { %v3489_v16 = vsel %vm3346_vm8, %v3488_v31, %v3487_v27  ;;  %v3502_v13 = vrot.slane %v8573_v3, 3  ;;  %3589 = vst [vmem:[%s8779_s8 + $0x48] sm:$0xff] %v3479_v54  ;;  %v3497_v14 = vsel %vm3337_vm5, %v3496_v57, %v3495_v12  ;;  %v3504_v37 = vrot.slane %v8589_v51, 2  ;;  %v11338_v3 = vld [vmem:[#allocation143_spill] sm:$0xff] }
 0x3e3   : > { %v3491_v6 = vsel %vm3349_vm9, %v3490_v50, %v3489_v16  ;;  %v3506_v4 = vrot.slane %v8605_v48, 1  ;;  %v3499_v45 = vsel %vm3340_vm6, %v3498_v17, %v3497_v14  ;;  %v3508_v11 = vrot.slane %v8625_v59, 7  ;;  %v11341_v48 = vld [vmem:[#allocation267_spill] sm:$0xff]  ;;  %v11343_v59 = vld [vmem:[#allocation160_spill] sm:$0xff] }
 0x3e4   : > { %v3493_v32 = vsel %vm3352_vm10, %v3492_v29, %v3491_v6  ;;  %v3510_v35 = vrot.slane %v11337_v21, 6  ;;  %v3501_v42 = vsel %vm3343_vm7, %v3500_v53, %v3499_v45  ;;  %v3512_v46 = vrot.slane %v11338_v3, 5  ;;  %v11354_v29 = vld [vmem:[#allocation146_spill] sm:$0xff]  ;;  %v11355_v27 = vld [vmem:[#allocation135_spill] sm:$0xff]  ;;  %v11361_v3 = vld [vmem:[#allocation268_spill] sm:$0xff] }
 0x3e5   : > { %v3514_v62 = vrot.slane %v11339_v36, 4  ;;  %v3516_v56 = vrot.slane %v11340_v2, 3  ;;  %3590 = vst [vmem:[%s8779_s8 + $0x50] sm:$0xff] %v3493_v32  ;;  %v3503_v51 = vsel %vm3346_vm8, %v3502_v13, %v3501_v42  ;;  %v3509_v60 = vsel %vm3334_vm4, %v3508_v11, %v11341_v48  ;;  %v11356_v17 = vld [vmem:[#allocation155_spill] sm:$0xff]  ;;  %v11357_v53 = vld [vmem:[#allocation158_spill] sm:$0xff]  ;;  %v11364_v48 = vld [vmem:[#allocation148_spill] sm:$0xff] }
 0x3e6   : > { %v3518_v41 = vrot.slane %v11342_v1, 2  ;;  %v3520_v47 = vrot.slane %v11343_v59, 1  ;;  %v3505_v30 = vsel %vm3349_vm9, %v3504_v37, %v3503_v51  ;;  %v3511_v40 = vsel %vm3337_vm5, %v3510_v35, %v3509_v60  ;;  %v11358_v6 = vld [vmem:[#allocation270_spill] sm:$0xff]  ;;  %v11362_v36 = vld [vmem:[#allocation79_spill] sm:$0xff]  ;;  %v11365_v1 = vld [vmem:[#allocation153_spill] sm:$0xff] }
 0x3e7   : > { %v3522_v7 = vrot.slane %v11344_v44, 7  ;;  %v3524_v23 = vrot.slane %v11345_v22, 6  ;;  %v3507_v34 = vsel %vm3352_vm10, %v3506_v4, %v3505_v30  ;;  %v3513_v10 = vsel %vm3340_vm6, %v3512_v46, %v3511_v40  ;;  %v11359_v32 = vld [vmem:[#allocation82_spill] sm:$0xff] }
 0x3e8   : > { %v3526_v58 = vrot.slane %v11346_v63, 5  ;;  %v3528_v9 = vrot.slane %v11347_v49, 4  ;;  %v3515_v8 = vsel %vm3343_vm7, %v3514_v62, %v3513_v10  ;;  %v3530_v43 = vrot.slane %v11349_v19, 3  ;;  %3591 = vst [vmem:[%s8779_s8 + $0x58] sm:$0xff] %v3507_v34  ;;  %v11360_v11 = vld [vmem:[#allocation138_spill] sm:$0xff] }
 0x3e9   : > { %v3523_v0 = vsel %vm3334_vm4, %v3522_v7, %v11348_v5  ;;  %v3532_v38 = vrot.slane %v11350_v15, 2  ;;  %v3517_v25 = vsel %vm3346_vm8, %v3516_v56, %v3515_v8  ;;  %v3534_v20 = vrot.slane %v11351_v18, 1  ;;  %v11363_v56 = vld [vmem:[#allocation141_spill] sm:$0xff]  ;;  %v11366_v30 = vld [vmem:[#allocation154_spill] sm:$0xff] }
 0x3ea   : > { %v3525_v26 = vsel %vm3337_vm5, %v3524_v23, %v3523_v0  ;;  %v3536_v52 = vrot.slane %v11352_v61, 7  ;;  %v3519_v31 = vsel %vm3349_vm9, %v3518_v41, %v3517_v25  ;;  %v3538_v39 = vrot.slane %v11353_v24, 6  ;;  %v11367_v22 = vld [vmem:[#allocation274_spill] sm:$0xff] }
 0x3eb   : > { %v3527_v50 = vsel %vm3340_vm6, %v3526_v58, %v3525_v26  ;;  %v3540_v28 = vrot.slane %v11354_v29, 5  ;;  %v3521_v55 = vsel %vm3352_vm10, %v3520_v47, %v3519_v31  ;;  %v3542_v16 = vrot.slane %v11356_v17, 4 }
 0x3ec   : > { %v3529_v54 = vsel %vm3343_vm7, %v3528_v9, %v3527_v50  ;;  %v3537_v57 = vsel %vm3334_vm4, %v3536_v52, %v11355_v27  ;;  %v3544_v13 = vrot.slane %v11357_v53, 3  ;;  %v3546_v14 = vrot.slane %v11358_v6, 2  ;;  %3592 = vst [vmem:[%s8779_s8 + $0x60] sm:$0xff] %v3521_v55 }
 0x3ed   : > { %v3531_v33 = vsel %vm3346_vm8, %v3530_v43, %v3529_v54  ;;  %v3539_v12 = vsel %vm3337_vm5, %v3538_v39, %v3537_v57  ;;  %v3548_v45 = vrot.slane %v11359_v32, 1  ;;  %v3550_v21 = vrot.slane %v11360_v11, 7 }
 0x3ee   : > { %v3533_v37 = vsel %vm3349_vm9, %v3532_v38, %v3531_v33  ;;  %v3541_v4 = vsel %vm3340_vm6, %v3540_v28, %v3539_v12  ;;  %v3552_v46 = vrot.slane %v11361_v3, 6  ;;  %v3554_v62 = vrot.slane %v11362_v36, 5 }
 0x3ef   : > { %v3535_v35 = vsel %vm3352_vm10, %v3534_v20, %v3533_v37  ;;  %v3543_v42 = vsel %vm3343_vm7, %v3542_v16, %v3541_v4  ;;  %v3551_v51 = vsel %vm3334_vm4, %v3550_v21, %v11363_v56  ;;  %v3556_v60 = vrot.slane %v11364_v48, 4 }
 0x3f0   : > { %v3545_v2 = vsel %vm3346_vm8, %v3544_v13, %v3543_v42  ;;  %v3558_v41 = vrot.slane %v11365_v1, 3  ;;  %3593 = vst [vmem:[%s8779_s8 + $0x68] sm:$0xff] %v3535_v35  ;;  %v3553_v47 = vsel %vm3337_vm5, %v3552_v46, %v3551_v51  ;;  %v3560_v40 = vrot.slane %v11366_v30, 2 }
 0x3f1   : > { %v3547_v59 = vsel %vm3349_vm9, %v3546_v14, %v3545_v2  ;;  %v3555_v7 = vsel %vm3340_vm6, %v3554_v62, %v3553_v47  ;;  %v3562_v23 = vrot.slane %v11367_v22, 1 }
 0x3f2   : > { %v3549_v44 = vsel %vm3352_vm10, %v3548_v45, %v3547_v59  ;;  %v3557_v34 = vsel %vm3343_vm7, %v3556_v60, %v3555_v7 }
 0x3f3   : > { %3594 = vst [vmem:[%s8779_s8 + $0x70] sm:$0xff] %v3549_v44  ;;  %v3559_v10 = vsel %vm3346_vm8, %v3558_v41, %v3557_v34 }
 0x3f4   : > { %v3561_v63 = vsel %vm3349_vm9, %v3560_v40, %v3559_v10 }
 0x3f5   : > { %v3563_v58 = vsel %vm3352_vm10, %v3562_v23, %v3561_v63 }
 0x3f6   : > { %3595 = vst [vmem:[%s8779_s8 + $0x78] sm:$0xff] %v3563_v58 }
 0x3f7   : > { %4093 = shalt.err (!%p4090_p1)
}
 0x3f8   : > { %s4094_s9 = scalar_lea.hbm %s9002_s25, 2048  ;;  %s4098_s16 = scalar_lea.hbm %s9070_s3, 8192 }
 0x3f9   : > { %p4095_p4 = scmp.ne.s32.totalorder %s9002_s25, %s4094_s9  ;;  %p4099_p10 = scmp.lt.s32.totalorder %s9002_s25, %s9070_s3 }
 0x3fa   : > { %p4100_p9 = scmp.lt.s32.totalorder %s4098_s16, %s4094_s9 }
 0x3fb   : > { %p4096_p5 = pnand %p4095_p4, %p11368_p2 }
 0x3fc   : > { %p4101_p7 = por %p4100_p9, %p4099_p10 }
 0x3fd   : > { %p4097_p6 = pneg %p4096_p5 }
 0x3ff   : > { %p4102_p11 = pnand %p4101_p7, %p4097_p6 }
 0x401   : > { %4105 = shalt.err (!%p4102_p11)
}
 0x402   : > { %s4211_s30 = smov 512   ;;  %s4212_s1 = smov 32  }
 0x403   : > { %3733 = dma.vmem_to_hbm [thread:$0]  (%p11368_p2), %s8996_s23, 2048, %s9002_s25, %s9008_s29, %s4211_s30, %s4211_s30, %s4212_s1  }
 0x404 PF: > { %p3746_p3 = scmp.ge.s32.totalorder %s4202_s26, 2  ;;  %s3628_s11 = sand.u32 1, %s4162_s18  }
 0x405   : > { %p11369_p8 = scmp.ne.s32.totalorder %s9352_s10, 0  ;;  %s3629_s6 = scalar_lea.sflag [#allocation7], %s3628_s11 }
 0x407   : > { %p3742_p12 = pnand %p3746_p3, %p11369_p8 }
 0x409   : > { %p3743_p13 = pneg %p3742_p12 }
 0x40b   : > { %4157 = dma.done.wait (%p3743_p13), %s3629_s6, 2048  }
 0x40c   : > { %4159 = vsyncadd (%p3743_p13), %s3629_s6, 4294965248  ;;  %s25_s26 = sadd.s32 1, %s4202_s26   ;;  %s11370_s23 = sld [smem:[#allocation14_spill]] }
 0x40d   : > { %p22_p0 = scmp.ge.s32.totalorder %s25_s26, 6   ;;  %s11371_s4 = sld [smem:[#allocation15_spill]] }
 0x40e   : > { %s11372_s25 = sld [smem:[#allocation16_spill]]  ;;  %s11373_s18 = smov %s4166_s19 }
 0x40f   : > { %s11374_s19 = smov %s4170_s20  ;;  %s11375_s20 = smov %s4329_s17 }
 0x410   : > { %s11376_s21 = smov %s4178_s0  ;;  %s11377_s0 = smov %s4182_s22 }
 0x411   : > { %s11378_s22 = smov %s4354_s12  ;;  %s11379_s1 = smov %s4194_s24 }
 0x412   :  { %24 = sbr.rel (!%p22_p0) target bundleno = 15 (0xf), region = 69 }
 0x413   : > { %s11380_s24 = smov %s11371_s4 }
 0x417   :  { %3634 = vsyncpa [#allocation6], 1 }
 0x418   :  { %3636 = vsyncpa [#allocation6 + $0x1], 1 }
 0x419   :  { %3637 = vsyncpa [#allocation7], 1 }
 0x41a   :  { %3639 = vsyncpa [#allocation7 + $0x1], 1 }

</bundles_post_ra>
